<compile_context>
chip_gen: v7x
topology: tpu7x:2x2x1
jax: 0.10.0
libtpu: 0.0.40
codegen_flags: <defaults>
</compile_context>

<pallas_src>
import functools

import jax
import jax.numpy as jnp
from jax.experimental import pallas as pl
from jax.experimental.pallas import tpu as pltpu


def _round_up(x, m):
    return ((x + m - 1) // m) * m


# ----------------------------------------------------------------------------
# Pallas kernels
# ----------------------------------------------------------------------------
def _conv_s2d_kernel(z_ref, w_ref, b_ref, o_ref, *, m, offsets, slope):
    """Fused 4x4/stride-2 conv (4 tap matmuls over a space-to-depth slab)
    + bias + LeakyReLU.

    z_ref: (nb*Rp, K)    s2d rows for `nb` images (bf16), Rp rows per image
    w_ref: (4, K, Cout)  per-tap weights, tap t = 2*ah + aw (bf16)
    b_ref: (1, Cout)     f32 bias
    o_ref: (nb*Rp, Cout) output rows (same row layout as z; rows >= m are
                         garbage and sliced away on the host)
    """
    acc = jnp.dot(z_ref[pl.ds(offsets[0], m), :], w_ref[0],
                  preferred_element_type=jnp.float32)
    for t in range(1, 4):
        acc = acc + jnp.dot(z_ref[pl.ds(offsets[t], m), :], w_ref[t],
                            preferred_element_type=jnp.float32)
    y = acc + b_ref[...]                               # f32 epilogue
    y = jnp.maximum(y, slope * y)                      # LeakyReLU(0.2): mul+max
    o_ref[pl.ds(0, m), :] = y.astype(o_ref.dtype)


def _heads_kernel(f_ref, w_ref, b_ref, feat_ref, out_ref):
    """AdaptiveAvgPool2d((1,1)) + fused (adv|aux) Linear heads (lane-dense)."""
    feats = jnp.mean(f_ref[...].astype(jnp.float32), axis=1)          # (N, C)
    y = jnp.dot(feats.astype(w_ref.dtype), w_ref[...],
                preferred_element_type=jnp.float32) + b_ref[...]      # (N, Ppad)
    feat_ref[...] = feats.astype(feat_ref.dtype)
    out_ref[...] = y.astype(out_ref.dtype)


# ----------------------------------------------------------------------------
# VMEM budgeting / block-size selection (generation aware)
# ----------------------------------------------------------------------------
def _vmem_limit_bytes():
    cap = 64 * 1024 * 1024            # conservative default (v7x: 64 MiB / TC)
    try:
        cap = int(pltpu.get_tpu_info().vmem_capacity_bytes)
    except Exception:
        pass
    # ~60% of physical VMEM, capped at 96 MiB (v5e/v6e: 128 MiB; v7x: 64 MiB)
    return max(32 * 1024 * 1024, min(int(cap * 0.6), 96 * 1024 * 1024))


def _pick_images_per_block(n, rp, k, cout, vmem_limit, row_target=1024):
    """Images per grid block.

    * keeps the grid >= 2 whenever batch >= 2 (two TensorCores on v7x),
    * grows the block until the matmul M dimension reaches `row_target` rows
      (amortizes the ~0.35 us per-grid-step overhead on v5e/v6e),
    * bounds per-block VMEM incl. double-buffered in/out blocks, the resident
      (double-buffered) tap weights, the f32 accumulator and one shifted tap
      operand.
    """
    k_pad = _round_up(k, 128)
    c_pad = _round_up(cout, 128)
    w_bytes = 2 * 4 * k * c_pad * 2                  # (4,K,Cout) bf16, 2 buffers

    def block_bytes(nb):
        m = nb * rp
        return (2 * m * k_pad * 2                    # z block, 2 buffers, bf16
                + 2 * m * c_pad * 2                  # out block, 2 buffers, bf16
                + m * c_pad * 4                      # f32 accumulator temp
                + m * k_pad * 2                      # shifted tap operand temp
                + w_bytes)

    budget = int(vmem_limit * 0.8)
    cands = [d for d in range(1, n + 1) if n % d == 0]
    if n >= 2:                                       # leave >= 2 blocks (megacore)
        cands = [d for d in cands if d <= n // 2]
    fits = [d for d in cands if block_bytes(d) <= budget]
    if not fits:
        fits = [cands[0]]
    for d in fits:                                   # smallest nb hitting target
        if d * rp >= row_target:
            return d
    return fits[-1]                                  # else biggest that fits


# ----------------------------------------------------------------------------
# Conv layer wrapper: Conv2d(4, 2, 1) + LeakyReLU(0.2), NHWC in / NHWC out
# ----------------------------------------------------------------------------
def conv4x4_s2_p1_lrelu_nhwc(x, w, b, *, slope=0.2, compute_dtype=jnp.bfloat16):
    """x: (N, H, W, C_in) NHWC; w: (C_out, C_in, 4, 4); b: (C_out,)."""
    N, H, W, C_in = x.shape
    C_out = w.shape[0]
    # TODO(synk): odd spatial dims (PyTorch floor-division output) unsupported.
    assert H % 2 == 0 and W % 2 == 0
    Ho, Wo = H // 2, W // 2
    Hs, Ws = Ho + 1, Wo + 1
    K = 4 * C_in
    R = Hs * Ws
    Rp = _round_up(R, 8)      # per-image row pad -> 8-aligned blocks for any nb

    # ---- host glue: pad + space-to-depth (single fused layout pass) --------
    xp = jnp.pad(x, ((0, 0), (1, 1), (1, 1), (0, 0))).astype(compute_dtype)
    s2d = xp.reshape(N, Hs, 2, Ws, 2, C_in)
    s2d = jnp.transpose(s2d, (0, 1, 3, 2, 4, 5)).reshape(N, R, K)
    z = jnp.pad(s2d, ((0, 0), (0, Rp - R), (0, 0))).reshape(N * Rp, K)

    # ---- weights: (Cout, Cin, 4, 4) -> (4, 4*Cin, Cout), tap t = 2*ah + aw --
    # TODO(synk): conv1 (Cin=3 -> K=12, Cout=64) underfills lanes / uses masked
    # stores; a dedicated first-layer path could fix it but it is the cheapest
    # layer, so it shares this kernel.
    w_r = jnp.transpose(w, (2, 3, 1, 0))                       # (kh, kw, cin, cout)
    w_taps = jnp.stack(
        [w_r[2 * ah:2 * ah + 2, 2 * aw:2 * aw + 2].reshape(K, C_out)
         for ah in range(2) for aw in range(2)],
        axis=0).astype(compute_dtype)                          # (4, K, Cout)
    bias = b.reshape(1, C_out).astype(jnp.float32)

    vmem_limit = _vmem_limit_bytes()
    nb = _pick_images_per_block(N, Rp, K, C_out, vmem_limit)
    grid = (N // nb,)
    m = nb * Rp - (Ws + 1)        # rows computed per block (covers all valid rows)
    offsets = (0, 1, Ws, Ws + 1)  # tap (ah, aw) -> row offset ah*Ws + aw

    kernel = functools.partial(_conv_s2d_kernel, m=m, offsets=offsets, slope=slope)

    itemsize = jnp.dtype(compute_dtype).itemsize
    flops = 2 * grid[0] * m * 16 * C_in * C_out
    bytes_accessed = int(z.size * itemsize + w_taps.size * itemsize
                         + bias.size * 4 + N * Rp * C_out * itemsize)

    out2 = pl.pallas_call(
        kernel,
        out_shape=jax.ShapeDtypeStruct((N * Rp, C_out), compute_dtype),
        grid_spec=pltpu.PrefetchScalarGridSpec(
            num_scalar_prefetch=0,
            grid=grid,
            in_specs=[
                pl.BlockSpec((nb * Rp, K), lambda i: (i, 0)),
                # weights / bias: constant index_map -> fetched once and kept
                # resident (their x2 buffering is included in the VMEM budget).
                pl.BlockSpec((4, K, C_out), lambda i: (0, 0, 0)),
                pl.BlockSpec((1, C_out), lambda i: (0, 0)),
            ],
            out_specs=pl.BlockSpec((nb * Rp, C_out), lambda i: (i, 0)),
        ),
        compiler_params=pltpu.CompilerParams(
            dimension_semantics=("parallel",),
            vmem_limit_bytes=vmem_limit),
        cost_estimate=pl.CostEstimate(flops=flops, transcendentals=0,
                                      bytes_accessed=bytes_accessed),
    )(z, w_taps, bias)

    # drop garbage rows (per-image pad + tap halo) and restore NHWC
    out = out2.reshape(N, Rp, C_out)[:, :R].reshape(N, Hs, Ws, C_out)
    return out[:, :Ho, :Wo, :]


# ----------------------------------------------------------------------------
# Full Discriminator forward
# ----------------------------------------------------------------------------
def discriminator_forward(x, params, return_features=False,
                          compute_dtype=jnp.bfloat16):
    # Single NCHW -> NHWC transpose at the input; NHWC everywhere after.
    h = jnp.transpose(x, (0, 2, 3, 1))
    for i in range(1, 5):
        h = conv4x4_s2_p1_lrelu_nhwc(h, params[f"conv{i}_w"], params[f"conv{i}_b"],
                                     compute_dtype=compute_dtype)

    N, Hh, Ww, C = h.shape
    feats_in = h.reshape(N, Hh * Ww, C)            # (N, S, C) slab for pooling

    # Merge adv (512->1) and aux (512->n_class) heads; pad out dim to 128 lanes.
    n_class = params["aux_w"].shape[0]
    P = 1 + n_class
    P_pad = _round_up(P, 128)
    w_heads = jnp.concatenate([params["adv_w"].T, params["aux_w"].T], axis=1)
    w_heads = jnp.pad(w_heads, ((0, 0), (0, P_pad - P))).astype(compute_dtype)
    b_heads = jnp.concatenate([params["adv_b"], params["aux_b"]]).reshape(1, P)
    b_heads = jnp.pad(b_heads, ((0, 0), (0, P_pad - P))).astype(jnp.float32)

    feats, heads = pl.pallas_call(
        _heads_kernel,
        out_shape=(
            jax.ShapeDtypeStruct((N, C), x.dtype),       # pooled features
            jax.ShapeDtypeStruct((N, P_pad), x.dtype),   # [adv | aux | pad]
        ),
    )(feats_in, w_heads, b_heads)

    if return_features:
        return feats
    adv = heads[:, 0:1]
    aux = heads[:, 1:1 + n_class]
    return adv, aux


# ----------------------------------------------------------------------------
# Deterministic parameter init (PyTorch module shapes; synthetic values)
# ----------------------------------------------------------------------------
def init_params(key, in_channels=3, n_class=5):
    chans = [(in_channels, 64), (64, 128), (128, 256), (256, 512)]
    keys = jax.random.split(key, 2 * len(chans) + 4)

    def init(k, shape, scale=0.05):
        return (scale * jax.random.normal(k, shape)).astype(jnp.float32)

    params = {}
    ki = 0
    for i, (cin, cout) in enumerate(chans, start=1):
        params[f"conv{i}_w"] = init(keys[ki], (cout, cin, 4, 4)); ki += 1
        params[f"conv{i}_b"] = init(keys[ki], (cout,)); ki += 1
    params["adv_w"] = init(keys[ki], (1, 512)); ki += 1            # Linear(512, 1)
    params["adv_b"] = init(keys[ki], (1,)); ki += 1
    params["aux_w"] = init(keys[ki], (n_class, 512)); ki += 1      # Linear(512, n_class)
    params["aux_b"] = init(keys[ki], (n_class,)); ki += 1
    return params


if __name__ == "__main__":
    key = jax.random.PRNGKey(0)
    k_param, k_x = jax.random.split(key)

    n_class = 5
    in_channels = 3
    img_size = 16          # 16 -> 8 -> 4 -> 2 -> 1 through the 4 stride-2 convs
    batch = 2              # NOTE: matmul M is tiny at batch=2; real throughput
                           # (and the full-M design) pays off at batch >= 64.

    params = init_params(k_param, in_channels=in_channels, n_class=n_class)
    x = jax.random.normal(k_x, (batch, in_channels, img_size, img_size),
                          dtype=jnp.float32)

    fwd = jax.jit(lambda inp: discriminator_forward(inp, params))
    adv, aux = fwd(x)
    jax.block_until_ready((adv, aux))

    assert adv.shape == (batch, 1), adv.shape
    assert aux.shape == (batch, n_class), aux.shape
    assert adv.dtype == jnp.float32 and aux.dtype == jnp.float32

    # return_features path (pooled + flattened 512-dim features)
    feats = jax.jit(lambda inp: discriminator_forward(inp, params,
                                                      return_features=True))(x)
    jax.block_until_ready(feats)
    assert feats.shape == (batch, 512), feats.shape

    print("KERNEL_OK")
</pallas_src>

<mosaic_0001>
module attributes {stable_mosaic.version = 11 : i64} {
  func.func @_conv_s2d_kernel(%arg0: i32, %arg1: memref<88x12xbf16, #tpu.memory_space<vmem>>, %arg2: memref<4x12x64xbf16, #tpu.memory_space<vmem>>, %arg3: memref<1x64xf32, #tpu.memory_space<vmem>>, %arg4: memref<88x64xbf16, #tpu.memory_space<vmem>>) attributes {dimension_semantics = [#tpu.dimension_semantics<parallel>], iteration_bounds = array<i64: 2>, scalar_prefetch = 0 : i64, scratch_operands = 0 : i64, tpu.core_type = #tpu.core_type<tc>, window_params = [{transform_indices = @transform_0, window_bounds = array<i64: 88, 12>}, {pipeline_mode = #tpu.pipeline_mode<synchronous>, transform_indices = @transform_1, window_bounds = array<i64: 4, 12, 64>}, {pipeline_mode = #tpu.pipeline_mode<synchronous>, transform_indices = @transform_2, window_bounds = array<i64: 1, 64>}, {transform_indices = @transform_3, window_bounds = array<i64: 88, 64>}]} {
    %c0 = arith.constant 0 : index
    %c0_0 = arith.constant 0 : index
    %0 = vector.load %arg1[%c0, %c0_0] : memref<88x12xbf16, #tpu.memory_space<vmem>>, vector<78x12xbf16>
    %c0_1 = arith.constant 0 : index
    %c0_2 = arith.constant 0 : index
    %c0_3 = arith.constant 0 : index
    %1 = vector.load %arg2[%c0_1, %c0_2, %c0_3] : memref<4x12x64xbf16, #tpu.memory_space<vmem>>, vector<1x12x64xbf16>
    %2 = vector.shape_cast %1 : vector<1x12x64xbf16> to vector<12x64xbf16>
    %cst = arith.constant dense<0.000000e+00> : vector<78x64xf32>
    %3 = tpu.matmul %0, %2, %cst {dimension_numbers = #tpu.dot_dimension_numbers<[1], [0], [0], [1], [0, 0, 1, 1], [], []>} : vector<78x12xbf16>, vector<12x64xbf16>, vector<78x64xf32> -> vector<78x64xf32>
    %c1 = arith.constant 1 : index
    %c0_4 = arith.constant 0 : index
    %4 = vector.load %arg1[%c1, %c0_4] : memref<88x12xbf16, #tpu.memory_space<vmem>>, vector<78x12xbf16>
    %c1_5 = arith.constant 1 : index
    %c0_6 = arith.constant 0 : index
    %c0_7 = arith.constant 0 : index
    %5 = vector.load %arg2[%c1_5, %c0_6, %c0_7] : memref<4x12x64xbf16, #tpu.memory_space<vmem>>, vector<1x12x64xbf16>
    %6 = vector.shape_cast %5 : vector<1x12x64xbf16> to vector<12x64xbf16>
    %cst_8 = arith.constant dense<0.000000e+00> : vector<78x64xf32>
    %7 = tpu.matmul %4, %6, %cst_8 {dimension_numbers = #tpu.dot_dimension_numbers<[1], [0], [0], [1], [0, 0, 1, 1], [], []>} : vector<78x12xbf16>, vector<12x64xbf16>, vector<78x64xf32> -> vector<78x64xf32>
    %8 = arith.addf %3, %7 : vector<78x64xf32>
    %c9 = arith.constant 9 : index
    %c0_9 = arith.constant 0 : index
    %9 = vector.load %arg1[%c9, %c0_9] : memref<88x12xbf16, #tpu.memory_space<vmem>>, vector<78x12xbf16>
    %c2 = arith.constant 2 : index
    %c0_10 = arith.constant 0 : index
    %c0_11 = arith.constant 0 : index
    %10 = vector.load %arg2[%c2, %c0_10, %c0_11] : memref<4x12x64xbf16, #tpu.memory_space<vmem>>, vector<1x12x64xbf16>
    %11 = vector.shape_cast %10 : vector<1x12x64xbf16> to vector<12x64xbf16>
    %cst_12 = arith.constant dense<0.000000e+00> : vector<78x64xf32>
    %12 = tpu.matmul %9, %11, %cst_12 {dimension_numbers = #tpu.dot_dimension_numbers<[1], [0], [0], [1], [0, 0, 1, 1], [], []>} : vector<78x12xbf16>, vector<12x64xbf16>, vector<78x64xf32> -> vector<78x64xf32>
    %13 = arith.addf %8, %12 : vector<78x64xf32>
    %c10 = arith.constant 10 : index
    %c0_13 = arith.constant 0 : index
    %14 = vector.load %arg1[%c10, %c0_13] : memref<88x12xbf16, #tpu.memory_space<vmem>>, vector<78x12xbf16>
    %c3 = arith.constant 3 : index
    %c0_14 = arith.constant 0 : index
    %c0_15 = arith.constant 0 : index
    %15 = vector.load %arg2[%c3, %c0_14, %c0_15] : memref<4x12x64xbf16, #tpu.memory_space<vmem>>, vector<1x12x64xbf16>
    %16 = vector.shape_cast %15 : vector<1x12x64xbf16> to vector<12x64xbf16>
    %cst_16 = arith.constant dense<0.000000e+00> : vector<78x64xf32>
    %17 = tpu.matmul %14, %16, %cst_16 {dimension_numbers = #tpu.dot_dimension_numbers<[1], [0], [0], [1], [0, 0, 1, 1], [], []>} : vector<78x12xbf16>, vector<12x64xbf16>, vector<78x64xf32> -> vector<78x64xf32>
    %18 = arith.addf %13, %17 : vector<78x64xf32>
    %c0_17 = arith.constant 0 : index
    %c0_18 = arith.constant 0 : index
    %19 = vector.load %arg3[%c0_17, %c0_18] : memref<1x64xf32, #tpu.memory_space<vmem>>, vector<1x64xf32>
    %20 = vector.broadcast %19 : vector<1x64xf32> to vector<78x64xf32>
    %21 = arith.addf %18, %20 : vector<78x64xf32>
    %cst_19 = arith.constant 2.000000e-01 : f32
    %22 = vector.broadcast %cst_19 : f32 to vector<78x64xf32>
    %23 = arith.mulf %22, %21 : vector<78x64xf32>
    %24 = arith.maximumf %21, %23 : vector<78x64xf32>
    %25 = arith.truncf %24 : vector<78x64xf32> to vector<78x64xbf16>
    %c0_20 = arith.constant 0 : index
    %c0_21 = arith.constant 0 : index
    %26 = vector.load %arg4[%c0_20, %c0_21] : memref<88x64xbf16, #tpu.memory_space<vmem>>, vector<78x64xbf16>
    tpu.vector_store %arg4[%c0_20, %c0_21], %25 {strides = array<i32>} : memref<88x64xbf16, #tpu.memory_space<vmem>>, vector<78x64xbf16>,
    return
  }
  func.func @transform_0(%arg0: i32) -> (i32, i32) {
    %c0_i32 = arith.constant 0 : i32
    %c0_i32_0 = arith.constant 0 : i32
    return %arg0, %c0_i32 : i32, i32
  }
  func.func @transform_1(%arg0: i32) -> (i32, i32, i32) {
    %c0_i32 = arith.constant 0 : i32
    %c0_i32_0 = arith.constant 0 : i32
    %c0_i32_1 = arith.constant 0 : i32
    %c0_i32_2 = arith.constant 0 : i32
    return %c0_i32, %c0_i32_0, %c0_i32_1 : i32, i32, i32
  }
  func.func @transform_2(%arg0: i32) -> (i32, i32) {
    %c0_i32 = arith.constant 0 : i32
    %c0_i32_0 = arith.constant 0 : i32
    %c0_i32_1 = arith.constant 0 : i32
    return %c0_i32, %c0_i32_0 : i32, i32
  }
  func.func @transform_3(%arg0: i32) -> (i32, i32) {
    %c0_i32 = arith.constant 0 : i32
    %c0_i32_0 = arith.constant 0 : i32
    return %arg0, %c0_i32 : i32, i32
  }
}

module attributes {stable_mosaic.version = 11 : i64} {
  func.func @_conv_s2d_kernel(%arg0: i32, %arg1: memref<32x256xbf16, #tpu.memory_space<vmem>>, %arg2: memref<4x256x128xbf16, #tpu.memory_space<vmem>>, %arg3: memref<1x128xf32, #tpu.memory_space<vmem>>, %arg4: memref<32x128xbf16, #tpu.memory_space<vmem>>) attributes {dimension_semantics = [#tpu.dimension_semantics<parallel>], iteration_bounds = array<i64: 2>, scalar_prefetch = 0 : i64, scratch_operands = 0 : i64, tpu.core_type = #tpu.core_type<tc>, window_params = [{transform_indices = @transform_0, window_bounds = array<i64: 32, 256>}, {pipeline_mode = #tpu.pipeline_mode<synchronous>, transform_indices = @transform_1, window_bounds = array<i64: 4, 256, 128>}, {pipeline_mode = #tpu.pipeline_mode<synchronous>, transform_indices = @transform_2, window_bounds = array<i64: 1, 128>}, {transform_indices = @transform_3, window_bounds = array<i64: 32, 128>}]} {
    %c0 = arith.constant 0 : index
    %c0_0 = arith.constant 0 : index
    %0 = vector.load %arg1[%c0, %c0_0] : memref<32x256xbf16, #tpu.memory_space<vmem>>, vector<26x256xbf16>
    %c0_1 = arith.constant 0 : index
    %c0_2 = arith.constant 0 : index
    %c0_3 = arith.constant 0 : index
    %1 = vector.load %arg2[%c0_1, %c0_2, %c0_3] : memref<4x256x128xbf16, #tpu.memory_space<vmem>>, vector<1x256x128xbf16>
    %2 = vector.shape_cast %1 : vector<1x256x128xbf16> to vector<256x128xbf16>
    %cst = arith.constant dense<0.000000e+00> : vector<26x128xf32>
    %3 = tpu.matmul %0, %2, %cst {dimension_numbers = #tpu.dot_dimension_numbers<[1], [0], [0], [1], [0, 0, 1, 1], [], []>} : vector<26x256xbf16>, vector<256x128xbf16>, vector<26x128xf32> -> vector<26x128xf32>
    %c1 = arith.constant 1 : index
    %c0_4 = arith.constant 0 : index
    %4 = vector.load %arg1[%c1, %c0_4] : memref<32x256xbf16, #tpu.memory_space<vmem>>, vector<26x256xbf16>
    %c1_5 = arith.constant 1 : index
    %c0_6 = arith.constant 0 : index
    %c0_7 = arith.constant 0 : index
    %5 = vector.load %arg2[%c1_5, %c0_6, %c0_7] : memref<4x256x128xbf16, #tpu.memory_space<vmem>>, vector<1x256x128xbf16>
    %6 = vector.shape_cast %5 : vector<1x256x128xbf16> to vector<256x128xbf16>
    %cst_8 = arith.constant dense<0.000000e+00> : vector<26x128xf32>
    %7 = tpu.matmul %4, %6, %cst_8 {dimension_numbers = #tpu.dot_dimension_numbers<[1], [0], [0], [1], [0, 0, 1, 1], [], []>} : vector<26x256xbf16>, vector<256x128xbf16>, vector<26x128xf32> -> vector<26x128xf32>
    %8 = arith.addf %3, %7 : vector<26x128xf32>
    %c5 = arith.constant 5 : index
    %c0_9 = arith.constant 0 : index
    %9 = vector.load %arg1[%c5, %c0_9] : memref<32x256xbf16, #tpu.memory_space<vmem>>, vector<26x256xbf16>
    %c2 = arith.constant 2 : index
    %c0_10 = arith.constant 0 : index
    %c0_11 = arith.constant 0 : index
    %10 = vector.load %arg2[%c2, %c0_10, %c0_11] : memref<4x256x128xbf16, #tpu.memory_space<vmem>>, vector<1x256x128xbf16>
    %11 = vector.shape_cast %10 : vector<1x256x128xbf16> to vector<256x128xbf16>
    %cst_12 = arith.constant dense<0.000000e+00> : vector<26x128xf32>
    %12 = tpu.matmul %9, %11, %cst_12 {dimension_numbers = #tpu.dot_dimension_numbers<[1], [0], [0], [1], [0, 0, 1, 1], [], []>} : vector<26x256xbf16>, vector<256x128xbf16>, vector<26x128xf32> -> vector<26x128xf32>
    %13 = arith.addf %8, %12 : vector<26x128xf32>
    %c6 = arith.constant 6 : index
    %c0_13 = arith.constant 0 : index
    %14 = vector.load %arg1[%c6, %c0_13] : memref<32x256xbf16, #tpu.memory_space<vmem>>, vector<26x256xbf16>
    %c3 = arith.constant 3 : index
    %c0_14 = arith.constant 0 : index
    %c0_15 = arith.constant 0 : index
    %15 = vector.load %arg2[%c3, %c0_14, %c0_15] : memref<4x256x128xbf16, #tpu.memory_space<vmem>>, vector<1x256x128xbf16>
    %16 = vector.shape_cast %15 : vector<1x256x128xbf16> to vector<256x128xbf16>
    %cst_16 = arith.constant dense<0.000000e+00> : vector<26x128xf32>
    %17 = tpu.matmul %14, %16, %cst_16 {dimension_numbers = #tpu.dot_dimension_numbers<[1], [0], [0], [1], [0, 0, 1, 1], [], []>} : vector<26x256xbf16>, vector<256x128xbf16>, vector<26x128xf32> -> vector<26x128xf32>
    %18 = arith.addf %13, %17 : vector<26x128xf32>
    %c0_17 = arith.constant 0 : index
    %c0_18 = arith.constant 0 : index
    %19 = vector.load %arg3[%c0_17, %c0_18] : memref<1x128xf32, #tpu.memory_space<vmem>>, vector<1x128xf32>
    %20 = vector.broadcast %19 : vector<1x128xf32> to vector<26x128xf32>
    %21 = arith.addf %18, %20 : vector<26x128xf32>
    %cst_19 = arith.constant 2.000000e-01 : f32
    %22 = vector.broadcast %cst_19 : f32 to vector<26x128xf32>
    %23 = arith.mulf %22, %21 : vector<26x128xf32>
    %24 = arith.maximumf %21, %23 : vector<26x128xf32>
    %25 = arith.truncf %24 : vector<26x128xf32> to vector<26x128xbf16>
    %c0_20 = arith.constant 0 : index
    %c0_21 = arith.constant 0 : index
    %26 = vector.load %arg4[%c0_20, %c0_21] : memref<32x128xbf16, #tpu.memory_space<vmem>>, vector<26x128xbf16>
    tpu.vector_store %arg4[%c0_20, %c0_21], %25 {strides = array<i32>} : memref<32x128xbf16, #tpu.memory_space<vmem>>, vector<26x128xbf16>,
    return
  }
  func.func @transform_0(%arg0: i32) -> (i32, i32) {
    %c0_i32 = arith.constant 0 : i32
    %c0_i32_0 = arith.constant 0 : i32
    return %arg0, %c0_i32 : i32, i32
  }
  func.func @transform_1(%arg0: i32) -> (i32, i32, i32) {
    %c0_i32 = arith.constant 0 : i32
    %c0_i32_0 = arith.constant 0 : i32
    %c0_i32_1 = arith.constant 0 : i32
    %c0_i32_2 = arith.constant 0 : i32
    return %c0_i32, %c0_i32_0, %c0_i32_1 : i32, i32, i32
  }
  func.func @transform_2(%arg0: i32) -> (i32, i32) {
    %c0_i32 = arith.constant 0 : i32
    %c0_i32_0 = arith.constant 0 : i32
    %c0_i32_1 = arith.constant 0 : i32
    return %c0_i32, %c0_i32_0 : i32, i32
  }
  func.func @transform_3(%arg0: i32) -> (i32, i32) {
    %c0_i32 = arith.constant 0 : i32
    %c0_i32_0 = arith.constant 0 : i32
    return %arg0, %c0_i32 : i32, i32
  }
}

module attributes {stable_mosaic.version = 11 : i64} {
  func.func @_conv_s2d_kernel(%arg0: i32, %arg1: memref<16x512xbf16, #tpu.memory_space<vmem>>, %arg2: memref<4x512x256xbf16, #tpu.memory_space<vmem>>, %arg3: memref<1x256xf32, #tpu.memory_space<vmem>>, %arg4: memref<16x256xbf16, #tpu.memory_space<vmem>>) attributes {dimension_semantics = [#tpu.dimension_semantics<parallel>], iteration_bounds = array<i64: 2>, scalar_prefetch = 0 : i64, scratch_operands = 0 : i64, tpu.core_type = #tpu.core_type<tc>, window_params = [{transform_indices = @transform_0, window_bounds = array<i64: 16, 512>}, {pipeline_mode = #tpu.pipeline_mode<synchronous>, transform_indices = @transform_1, window_bounds = array<i64: 4, 512, 256>}, {pipeline_mode = #tpu.pipeline_mode<synchronous>, transform_indices = @transform_2, window_bounds = array<i64: 1, 256>}, {transform_indices = @transform_3, window_bounds = array<i64: 16, 256>}]} {
    %c0 = arith.constant 0 : index
    %c0_0 = arith.constant 0 : index
    %0 = vector.load %arg1[%c0, %c0_0] : memref<16x512xbf16, #tpu.memory_space<vmem>>, vector<12x512xbf16>
    %c0_1 = arith.constant 0 : index
    %c0_2 = arith.constant 0 : index
    %c0_3 = arith.constant 0 : index
    %1 = vector.load %arg2[%c0_1, %c0_2, %c0_3] : memref<4x512x256xbf16, #tpu.memory_space<vmem>>, vector<1x512x256xbf16>
    %2 = vector.shape_cast %1 : vector<1x512x256xbf16> to vector<512x256xbf16>
    %cst = arith.constant dense<0.000000e+00> : vector<12x256xf32>
    %3 = tpu.matmul %0, %2, %cst {dimension_numbers = #tpu.dot_dimension_numbers<[1], [0], [0], [1], [0, 0, 1, 1], [], []>} : vector<12x512xbf16>, vector<512x256xbf16>, vector<12x256xf32> -> vector<12x256xf32>
    %c1 = arith.constant 1 : index
    %c0_4 = arith.constant 0 : index
    %4 = vector.load %arg1[%c1, %c0_4] : memref<16x512xbf16, #tpu.memory_space<vmem>>, vector<12x512xbf16>
    %c1_5 = arith.constant 1 : index
    %c0_6 = arith.constant 0 : index
    %c0_7 = arith.constant 0 : index
    %5 = vector.load %arg2[%c1_5, %c0_6, %c0_7] : memref<4x512x256xbf16, #tpu.memory_space<vmem>>, vector<1x512x256xbf16>
    %6 = vector.shape_cast %5 : vector<1x512x256xbf16> to vector<512x256xbf16>
    %cst_8 = arith.constant dense<0.000000e+00> : vector<12x256xf32>
    %7 = tpu.matmul %4, %6, %cst_8 {dimension_numbers = #tpu.dot_dimension_numbers<[1], [0], [0], [1], [0, 0, 1, 1], [], []>} : vector<12x512xbf16>, vector<512x256xbf16>, vector<12x256xf32> -> vector<12x256xf32>
    %8 = arith.addf %3, %7 : vector<12x256xf32>
    %c3 = arith.constant 3 : index
    %c0_9 = arith.constant 0 : index
    %9 = vector.load %arg1[%c3, %c0_9] : memref<16x512xbf16, #tpu.memory_space<vmem>>, vector<12x512xbf16>
    %c2 = arith.constant 2 : index
    %c0_10 = arith.constant 0 : index
    %c0_11 = arith.constant 0 : index
    %10 = vector.load %arg2[%c2, %c0_10, %c0_11] : memref<4x512x256xbf16, #tpu.memory_space<vmem>>, vector<1x512x256xbf16>
    %11 = vector.shape_cast %10 : vector<1x512x256xbf16> to vector<512x256xbf16>
    %cst_12 = arith.constant dense<0.000000e+00> : vector<12x256xf32>
    %12 = tpu.matmul %9, %11, %cst_12 {dimension_numbers = #tpu.dot_dimension_numbers<[1], [0], [0], [1], [0, 0, 1, 1], [], []>} : vector<12x512xbf16>, vector<512x256xbf16>, vector<12x256xf32> -> vector<12x256xf32>
    %13 = arith.addf %8, %12 : vector<12x256xf32>
    %c4 = arith.constant 4 : index
    %c0_13 = arith.constant 0 : index
    %14 = vector.load %arg1[%c4, %c0_13] : memref<16x512xbf16, #tpu.memory_space<vmem>>, vector<12x512xbf16>
    %c3_14 = arith.constant 3 : index
    %c0_15 = arith.constant 0 : index
    %c0_16 = arith.constant 0 : index
    %15 = vector.load %arg2[%c3_14, %c0_15, %c0_16] : memref<4x512x256xbf16, #tpu.memory_space<vmem>>, vector<1x512x256xbf16>
    %16 = vector.shape_cast %15 : vector<1x512x256xbf16> to vector<512x256xbf16>
    %cst_17 = arith.constant dense<0.000000e+00> : vector<12x256xf32>
    %17 = tpu.matmul %14, %16, %cst_17 {dimension_numbers = #tpu.dot_dimension_numbers<[1], [0], [0], [1], [0, 0, 1, 1], [], []>} : vector<12x512xbf16>, vector<512x256xbf16>, vector<12x256xf32> -> vector<12x256xf32>
    %18 = arith.addf %13, %17 : vector<12x256xf32>
    %c0_18 = arith.constant 0 : index
    %c0_19 = arith.constant 0 : index
    %19 = vector.load %arg3[%c0_18, %c0_19] : memref<1x256xf32, #tpu.memory_space<vmem>>, vector<1x256xf32>
    %20 = vector.broadcast %19 : vector<1x256xf32> to vector<12x256xf32>
    %21 = arith.addf %18, %20 : vector<12x256xf32>
    %cst_20 = arith.constant 2.000000e-01 : f32
    %22 = vector.broadcast %cst_20 : f32 to vector<12x256xf32>
    %23 = arith.mulf %22, %21 : vector<12x256xf32>
    %24 = arith.maximumf %21, %23 : vector<12x256xf32>
    %25 = arith.truncf %24 : vector<12x256xf32> to vector<12x256xbf16>
    %c0_21 = arith.constant 0 : index
    %c0_22 = arith.constant 0 : index
    %26 = vector.load %arg4[%c0_21, %c0_22] : memref<16x256xbf16, #tpu.memory_space<vmem>>, vector<12x256xbf16>
    tpu.vector_store %arg4[%c0_21, %c0_22], %25 {strides = array<i32>} : memref<16x256xbf16, #tpu.memory_space<vmem>>, vector<12x256xbf16>,
    return
  }
  func.func @transform_0(%arg0: i32) -> (i32, i32) {
    %c0_i32 = arith.constant 0 : i32
    %c0_i32_0 = arith.constant 0 : i32
    return %arg0, %c0_i32 : i32, i32
  }
  func.func @transform_1(%arg0: i32) -> (i32, i32, i32) {
    %c0_i32 = arith.constant 0 : i32
    %c0_i32_0 = arith.constant 0 : i32
    %c0_i32_1 = arith.constant 0 : i32
    %c0_i32_2 = arith.constant 0 : i32
    return %c0_i32, %c0_i32_0, %c0_i32_1 : i32, i32, i32
  }
  func.func @transform_2(%arg0: i32) -> (i32, i32) {
    %c0_i32 = arith.constant 0 : i32
    %c0_i32_0 = arith.constant 0 : i32
    %c0_i32_1 = arith.constant 0 : i32
    return %c0_i32, %c0_i32_0 : i32, i32
  }
  func.func @transform_3(%arg0: i32) -> (i32, i32) {
    %c0_i32 = arith.constant 0 : i32
    %c0_i32_0 = arith.constant 0 : i32
    return %arg0, %c0_i32 : i32, i32
  }
}

module attributes {stable_mosaic.version = 11 : i64} {
  func.func @_conv_s2d_kernel(%arg0: i32, %arg1: memref<8x1024xbf16, #tpu.memory_space<vmem>>, %arg2: memref<4x1024x512xbf16, #tpu.memory_space<vmem>>, %arg3: memref<1x512xf32, #tpu.memory_space<vmem>>, %arg4: memref<8x512xbf16, #tpu.memory_space<vmem>>) attributes {dimension_semantics = [#tpu.dimension_semantics<parallel>], iteration_bounds = array<i64: 2>, scalar_prefetch = 0 : i64, scratch_operands = 0 : i64, tpu.core_type = #tpu.core_type<tc>, window_params = [{transform_indices = @transform_0, window_bounds = array<i64: 8, 1024>}, {pipeline_mode = #tpu.pipeline_mode<synchronous>, transform_indices = @transform_1, window_bounds = array<i64: 4, 1024, 512>}, {pipeline_mode = #tpu.pipeline_mode<synchronous>, transform_indices = @transform_2, window_bounds = array<i64: 1, 512>}, {transform_indices = @transform_3, window_bounds = array<i64: 8, 512>}]} {
    %c0 = arith.constant 0 : index
    %c0_0 = arith.constant 0 : index
    %0 = vector.load %arg1[%c0, %c0_0] : memref<8x1024xbf16, #tpu.memory_space<vmem>>, vector<5x1024xbf16>
    %c0_1 = arith.constant 0 : index
    %c0_2 = arith.constant 0 : index
    %c0_3 = arith.constant 0 : index
    %1 = vector.load %arg2[%c0_1, %c0_2, %c0_3] : memref<4x1024x512xbf16, #tpu.memory_space<vmem>>, vector<1x1024x512xbf16>
    %2 = vector.shape_cast %1 : vector<1x1024x512xbf16> to vector<1024x512xbf16>
    %cst = arith.constant dense<0.000000e+00> : vector<5x512xf32>
    %3 = tpu.matmul %0, %2, %cst {dimension_numbers = #tpu.dot_dimension_numbers<[1], [0], [0], [1], [0, 0, 1, 1], [], []>} : vector<5x1024xbf16>, vector<1024x512xbf16>, vector<5x512xf32> -> vector<5x512xf32>
    %c1 = arith.constant 1 : index
    %c0_4 = arith.constant 0 : index
    %4 = vector.load %arg1[%c1, %c0_4] : memref<8x1024xbf16, #tpu.memory_space<vmem>>, vector<5x1024xbf16>
    %c1_5 = arith.constant 1 : index
    %c0_6 = arith.constant 0 : index
    %c0_7 = arith.constant 0 : index
    %5 = vector.load %arg2[%c1_5, %c0_6, %c0_7] : memref<4x1024x512xbf16, #tpu.memory_space<vmem>>, vector<1x1024x512xbf16>
    %6 = vector.shape_cast %5 : vector<1x1024x512xbf16> to vector<1024x512xbf16>
    %cst_8 = arith.constant dense<0.000000e+00> : vector<5x512xf32>
    %7 = tpu.matmul %4, %6, %cst_8 {dimension_numbers = #tpu.dot_dimension_numbers<[1], [0], [0], [1], [0, 0, 1, 1], [], []>} : vector<5x1024xbf16>, vector<1024x512xbf16>, vector<5x512xf32> -> vector<5x512xf32>
    %8 = arith.addf %3, %7 : vector<5x512xf32>
    %c2 = arith.constant 2 : index
    %c0_9 = arith.constant 0 : index
    %9 = vector.load %arg1[%c2, %c0_9] : memref<8x1024xbf16, #tpu.memory_space<vmem>>, vector<5x1024xbf16>
    %c2_10 = arith.constant 2 : index
    %c0_11 = arith.constant 0 : index
    %c0_12 = arith.constant 0 : index
    %10 = vector.load %arg2[%c2_10, %c0_11, %c0_12] : memref<4x1024x512xbf16, #tpu.memory_space<vmem>>, vector<1x1024x512xbf16>
    %11 = vector.shape_cast %10 : vector<1x1024x512xbf16> to vector<1024x512xbf16>
    %cst_13 = arith.constant dense<0.000000e+00> : vector<5x512xf32>
    %12 = tpu.matmul %9, %11, %cst_13 {dimension_numbers = #tpu.dot_dimension_numbers<[1], [0], [0], [1], [0, 0, 1, 1], [], []>} : vector<5x1024xbf16>, vector<1024x512xbf16>, vector<5x512xf32> -> vector<5x512xf32>
    %13 = arith.addf %8, %12 : vector<5x512xf32>
    %c3 = arith.constant 3 : index
    %c0_14 = arith.constant 0 : index
    %14 = vector.load %arg1[%c3, %c0_14] : memref<8x1024xbf16, #tpu.memory_space<vmem>>, vector<5x1024xbf16>
    %c3_15 = arith.constant 3 : index
    %c0_16 = arith.constant 0 : index
    %c0_17 = arith.constant 0 : index
    %15 = vector.load %arg2[%c3_15, %c0_16, %c0_17] : memref<4x1024x512xbf16, #tpu.memory_space<vmem>>, vector<1x1024x512xbf16>
    %16 = vector.shape_cast %15 : vector<1x1024x512xbf16> to vector<1024x512xbf16>
    %cst_18 = arith.constant dense<0.000000e+00> : vector<5x512xf32>
    %17 = tpu.matmul %14, %16, %cst_18 {dimension_numbers = #tpu.dot_dimension_numbers<[1], [0], [0], [1], [0, 0, 1, 1], [], []>} : vector<5x1024xbf16>, vector<1024x512xbf16>, vector<5x512xf32> -> vector<5x512xf32>
    %18 = arith.addf %13, %17 : vector<5x512xf32>
    %c0_19 = arith.constant 0 : index
    %c0_20 = arith.constant 0 : index
    %19 = vector.load %arg3[%c0_19, %c0_20] : memref<1x512xf32, #tpu.memory_space<vmem>>, vector<1x512xf32>
    %20 = vector.broadcast %19 : vector<1x512xf32> to vector<5x512xf32>
    %21 = arith.addf %18, %20 : vector<5x512xf32>
    %cst_21 = arith.constant 2.000000e-01 : f32
    %22 = vector.broadcast %cst_21 : f32 to vector<5x512xf32>
    %23 = arith.mulf %22, %21 : vector<5x512xf32>
    %24 = arith.maximumf %21, %23 : vector<5x512xf32>
    %25 = arith.truncf %24 : vector<5x512xf32> to vector<5x512xbf16>
    %c0_22 = arith.constant 0 : index
    %c0_23 = arith.constant 0 : index
    %26 = vector.load %arg4[%c0_22, %c0_23] : memref<8x512xbf16, #tpu.memory_space<vmem>>, vector<5x512xbf16>
    tpu.vector_store %arg4[%c0_22, %c0_23], %25 {strides = array<i32>} : memref<8x512xbf16, #tpu.memory_space<vmem>>, vector<5x512xbf16>,
    return
  }
  func.func @transform_0(%arg0: i32) -> (i32, i32) {
    %c0_i32 = arith.constant 0 : i32
    %c0_i32_0 = arith.constant 0 : i32
    return %arg0, %c0_i32 : i32, i32
  }
  func.func @transform_1(%arg0: i32) -> (i32, i32, i32) {
    %c0_i32 = arith.constant 0 : i32
    %c0_i32_0 = arith.constant 0 : i32
    %c0_i32_1 = arith.constant 0 : i32
    %c0_i32_2 = arith.constant 0 : i32
    return %c0_i32, %c0_i32_0, %c0_i32_1 : i32, i32, i32
  }
  func.func @transform_2(%arg0: i32) -> (i32, i32) {
    %c0_i32 = arith.constant 0 : i32
    %c0_i32_0 = arith.constant 0 : i32
    %c0_i32_1 = arith.constant 0 : i32
    return %c0_i32, %c0_i32_0 : i32, i32
  }
  func.func @transform_3(%arg0: i32) -> (i32, i32) {
    %c0_i32 = arith.constant 0 : i32
    %c0_i32_0 = arith.constant 0 : i32
    return %arg0, %c0_i32 : i32, i32
  }
}

module attributes {stable_mosaic.version = 11 : i64} {
  func.func @_heads_kernel(%arg0: memref<2x1x512xbf16, #tpu.memory_space<vmem>>, %arg1: memref<512x128xbf16, #tpu.memory_space<vmem>>, %arg2: memref<1x128xf32, #tpu.memory_space<vmem>>, %arg3: memref<2x512xf32, #tpu.memory_space<vmem>>, %arg4: memref<2x128xf32, #tpu.memory_space<vmem>>) attributes {dimension_semantics = [], scalar_prefetch = 0 : i64, scratch_operands = 0 : i64, tpu.core_type = #tpu.core_type<tc>} {
    %c0 = arith.constant 0 : index
    %c0_0 = arith.constant 0 : index
    %c0_1 = arith.constant 0 : index
    %0 = vector.load %arg0[%c0, %c0_0, %c0_1] : memref<2x1x512xbf16, #tpu.memory_space<vmem>>, vector<2x1x512xbf16>
    %1 = arith.extf %0 : vector<2x1x512xbf16> to vector<2x1x512xf32>
    %cst = arith.constant dense<0.000000e+00> : vector<2x512xf32>
    %2 = vector.multi_reduction <add>, %1, %cst [1] : vector<2x1x512xf32> to vector<2x512xf32>
    %cst_2 = arith.constant 1.000000e+00 : f32
    %3 = vector.broadcast %cst_2 : f32 to vector<2x512xf32>
    %4 = arith.divf %2, %3 : vector<2x512xf32>
    %5 = arith.truncf %4 : vector<2x512xf32> to vector<2x512xbf16>
    %c0_3 = arith.constant 0 : index
    %c0_4 = arith.constant 0 : index
    %6 = vector.load %arg1[%c0_3, %c0_4] : memref<512x128xbf16, #tpu.memory_space<vmem>>, vector<512x128xbf16>
    %cst_5 = arith.constant dense<0.000000e+00> : vector<2x128xf32>
    %7 = tpu.matmul %5, %6, %cst_5 {dimension_numbers = #tpu.dot_dimension_numbers<[1], [0], [0], [1], [0, 0, 1, 1], [], []>} : vector<2x512xbf16>, vector<512x128xbf16>, vector<2x128xf32> -> vector<2x128xf32>
    %c0_6 = arith.constant 0 : index
    %c0_7 = arith.constant 0 : index
    %8 = vector.load %arg2[%c0_6, %c0_7] : memref<1x128xf32, #tpu.memory_space<vmem>>, vector<1x128xf32>
    %9 = vector.broadcast %8 : vector<1x128xf32> to vector<2x128xf32>
    %10 = arith.addf %7, %9 : vector<2x128xf32>
    %c0_8 = arith.constant 0 : index
    %c0_9 = arith.constant 0 : index
    %11 = vector.load %arg3[%c0_8, %c0_9] : memref<2x512xf32, #tpu.memory_space<vmem>>, vector<2x512xf32>
    tpu.vector_store %arg3[%c0_8, %c0_9], %4 {strides = array<i32>} : memref<2x512xf32, #tpu.memory_space<vmem>>, vector<2x512xf32>,
    %c0_10 = arith.constant 0 : index
    %c0_11 = arith.constant 0 : index
    %12 = vector.load %arg4[%c0_10, %c0_11] : memref<2x128xf32, #tpu.memory_space<vmem>>, vector<2x128xf32>
    tpu.vector_store %arg4[%c0_10, %c0_11], %10 {strides = array<i32>} : memref<2x128xf32, #tpu.memory_space<vmem>>, vector<2x128xf32>,
    return
  }
}

</mosaic_0001>

<bundles_post_ra>
// kernel: _lambda_.5
= control target key start
LH: loop header
LB: loop body
LE: loop exit
PB: predicated region body
PF: predicated region fallthrough
CT: control target
= control target key end

     0   :  { %8 = vsyncpa [#allocation3], 0  ;;  %s1554_s0 = inlined_call_operand.vmem [shape: bf16[176,12], index: 0, kind: input, shape index: {}]   ;;  %s1555_s1 = inlined_call_operand.hbm [shape: bf16[4,12,64], index: 1, kind: input, shape index: {}]   ;;  %s1556_s2 = inlined_call_operand.hbm [shape: f32[1,64], index: 2, kind: input, shape index: {}]   ;;  %s1557_s3 = inlined_call_operand.vmem [shape: bf16[176,64], index: 3, kind: output, shape index: {}]  }
   0x1   :  { %9 = vsyncpa [#allocation5], 0  ;;  %s1279_s12 = smov 0  }
   0x2 LB: > { %s950_s13 = sadd.s32 4294967295, %s1251_s12   ;;  %p952_p0 = scmp.ge.s32.totalorder %s1251_s12, 1  ;;  %s1251_s12 = sphi %s1279_s12, %s15_s12  }
   0x3   : > { %p114_p1 = scmp.lt.s32.totalorder %s1251_s12, 3  ;;  %s1253_s14 = smov [#allocation2]  }
   0x4   : > { %s126_s15 = sshll.u32 %s1253_s14, 4  ;;  %p1293_p3 = scmp.eq.s32.totalorder %s950_s13, 0  ;;  %s127_s15 = int_to_ptr.vmem [resolvable:$true] %s126_s15 }
   0x5   : > { %p1287_p2 = pnand %p952_p0, %p114_p1  ;;  %s1254_s18 = smov [#allocation4]  }
   0x6   : > { %s1562_s17 = scalar_select %p1293_p3, 1, 0 }
   0x7   : > { %s1561_s16 = scalar_select %p1287_p2, 1, 0 }
   0x8   : > { %p1140_p4 = pneg %p1287_p2  ;;  %s140_s19 = sshll.u32 %s1254_s18, 4  ;;  %s1305_s19 = int_to_ptr.vmem [resolvable:$true] %s140_s19 }
   0x9   : > { %s1181_s23 = scalar_lea.hbm %s1555_s1, 512 }
   0xa   : > { %p1301_p5 = pnand %p1293_p3, %p1140_p4  ;;  %p1182_p6 = scmp.ne.s32.totalorder %s1555_s1, %s1181_s23 }
   0xb   : > { %p1188_p10 = scmp.lt.u32.totalorder %s1181_s23, %s1555_s1 }
   0xc   : > { %p1183_p7 = pneg %p1301_p5 }
   0xe   : > { %p1184_p8 = pnand %p1183_p7, %p1182_p6 }
  0x10   : > { %p1185_p9 = pneg %p1184_p8 }
  0x12   : > { %p1190_p11 = pnand %p1188_p10, %p1185_p9 }
  0x14   : > { %1193 = shalt.err (!%p1190_p11)
}
  0x15   : > { %s1194_s28 = scalar_lea.vmem %s127_s15, 512  ;;  %p1202_p1 = scmp.lt.s32.totalorder %s127_s15, %s127_s15 }
  0x16   : > { %p1195_p12 = scmp.ne.s32.totalorder %s127_s15, %s1194_s28  ;;  %p1203_p4 = scmp.lt.s32.totalorder %s1194_s28, %s1194_s28 }
  0x18   : > { %p1197_p13 = pnand %p1195_p12, %p1183_p7  ;;  %p1204_p3 = por %p1203_p4, %p1202_p1 }
  0x1a   : > { %p1198_p0 = pneg %p1197_p13 }
  0x1c   : > { %p1205_p2 = pnand %p1204_p3, %p1198_p0 }
  0x1e   : > { %1208 = shalt.err (!%p1205_p2)
}
  0x1f   : > { %s1255_s29 = smov 64   ;;  %s1256_s30 = smov 4  }
  0x20   : > { %1143 = dma.hbm_to_vmem [thread:$0]  (!%p1301_p5), %s1555_s1, 512, %s127_s15, [#allocation3], %s1255_s29, %s1255_s29, %s1256_s30  }
  0x21   : > { %s1209_s8 = scalar_lea.hbm %s1556_s2, 16 }
  0x22   : > { %p1210_p6 = scmp.ne.s32.totalorder %s1556_s2, %s1209_s8  ;;  %p1216_p8 = scmp.lt.u32.totalorder %s1209_s8, %s1556_s2 }
  0x24   : > { %p1212_p2 = pnand %p1210_p6, %p1183_p7 }
  0x26   : > { %p1213_p3 = pneg %p1212_p2 }
  0x28   : > { %p1218_p9 = pnand %p1216_p8, %p1213_p3 }
  0x2a   : > { %1221 = shalt.err (!%p1218_p9)
}
  0x2b   : > { %s1222_s15 = scalar_lea.vmem %s1305_s19, 16  ;;  %s1229_s18 = scalar_lea.vmem %s1305_s19, 32 }
  0x2c   : > { %p1223_p10 = scmp.ne.s32.totalorder %s1305_s19, %s1222_s15  ;;  %p1230_p13 = scmp.lt.s32.totalorder %s1305_s19, %s1305_s19 }
  0x2d   : > { %p1231_p0 = scmp.lt.s32.totalorder %s1229_s18, %s1222_s15 }
  0x2e   : > { %p1225_p11 = pnand %p1223_p10, %p1183_p7 }
  0x2f   : > { %p1232_p1 = por %p1231_p0, %p1230_p13 }
  0x30   : > { %p1226_p12 = pneg %p1225_p11 }
  0x32   : > { %p1233_p4 = pnand %p1232_p1, %p1226_p12 }
  0x34   : > { %1236 = shalt.err (!%p1233_p4)
}
  0x35   : > { %1146 = dma.hbm_to_vmem [thread:$0]  (!%p1301_p5), %s1556_s2, 16, %s1305_s19, [#allocation5]  }
  0x36   : > { %p1564_p6 = scmp.ne.s32.totalorder %s1561_s16, 0 }
  0x37   : > { %p1565_p7 = scmp.ne.s32.totalorder (!%p1564_p6), %s1562_s17, 0 }
  0x38   : > { %162 = sbr.rel (%p1564_p6) target bundleno = 380 (0x17c), region = 32 }
  0x3f   : > { %1242 = dma.done.wait (%p1565_p7), [#allocation3], 512  }
  0x40   : > { %1244 = vsyncadd (%p1565_p7), [#allocation3], 4294966784 }
  0x41   : > { %1246 = dma.done.wait (%p1565_p7), [#allocation5], 16  }
  0x42   : > { %1248 = vsyncadd (%p1565_p7), [#allocation5], 4294967280  ;;  %s190_s20 = smul.u32 11, %s950_s13  ;;  %v1257_v0 = vmov 0.0   ;;  %vm1258_vm0 = vmmov 0   ;;  %vm305_vm1 = vcmask 1045504  }
  0x43   : > { %1044 = vmatprep.subr.bf16.mxu0 %v1257_v0  ;;  %1066 = vmatprep.subr.bf16.mxu1 %v1257_v0  ;;  %vm289_vm2 = vcmask 97280   ;;  %vm244_vm3 = vsmask.f32 7424  ;;  %v1165_v1 = vld [vmem:[#allocation2 + $0x8] sm:$0x3f]   ;;  %vm667_vm4 = vcmask 1046528  }
  0x44   : > { %1068 = vmatprep.mubr.msk.bf16.mxu1 %vm1258_vm0, %v1257_v0  ;;  %1046 = vmatprep.mubr.msk.bf16.mxu0 %vm1258_vm0, %v1257_v0  ;;  %p191_p5 = scmp.lt.s32.totalorder %s190_s20, 21  ;;  %v1166_v2 = vld [vmem:[#allocation2] sm:$0x3f]   ;;  %v307_v3 = vsel %vm305_vm1, %v1165_v1, 0  ;;  %v1169_v10 = vld [vmem:[#allocation2 + $0x10] sm:$0x3f]  }
  0x45   : > { %1045 = vmatpush3.bf16.msra.mxu0 %v307_v3  ;;  %v402_v5 = vsel %vm305_vm1, %v1166_v2, 0  ;;  %v1170_v13 = vld [vmem:[#allocation2 + $0x18] sm:$0x3f]   ;;  %v575_v19 = vsel %vm305_vm1, %v1169_v10, 0  ;;  %vm860_vm5 = vcmask 519168   ;;  %vm870_vm6 = vcmask 518144  }
  0x46   : > { %s1567_s20 = smov (!%p191_p5, %s190_s20), 21  ;;  %1067 = vmatpush3.bf16.msra.mxu1 %v402_v5  ;;  %1088 = vmatprep.subr.bf16.mxu0 %v1257_v0  ;;  %v698_v17 = vsel %vm305_vm1, %v1170_v13, 0 }
  0x47   : > { %s959_s16 = sshll.u32 %s1567_s20, 2  ;;  %1110 = vmatprep.subr.bf16.mxu1 %v1257_v0 }
  0x48   : > { %s1381_s19 = scalar_lea.vmem %s1554_s0, %s959_s16  ;;  %s1515_s25 = scalar_lea.vmem %s1557_s3, %s959_s16 }
  0x49   : > { %v1167_v4 = vld [vmem:[%s1381_s19] sm:$0xff]   ;;  %v1168_v6 = vld [vmem:[%s1381_s19 + $0x8] sm:$0xff]   ;;  %v1171_v11 = vld [vmem:[%s1381_s19 + $0x10] sm:$0xff]  }
  0x4a   : > { %v246_v7 = vshrl.u32 %v1167_v4, 16  ;;  %v248_v8 = vshll.u32 %v1167_v4, 16  ;;  %v253_v9 = vshll.u32 %v1168_v6, 16  ;;  %1069 = vmatmul.mubr.msk.bf16.vlgmr.msra.gmra.mrb[0].mxu1 %vm289_vm2, %v1167_v4  ;;  %v257_v15 = vshrl.u32 %v1168_v6, 16  ;;  %v1172_v23 = vld [vmem:[%s1381_s19 + $0x18] sm:$0xff]   ;;  %v1410_v30 = vld [vmem:[%s1381_s19 + $0x24] sm:$0xff]  }
  0x4b   : > { %1072 = vmatprep.mubr.msk.bf16.mxu1 %vm1258_vm0, %v1257_v0  ;;  %v261_v18 = vshll.u32 %v1171_v11, 16  ;;  %1111 = vmatpush3.bf16.msra.mxu1 %v698_v17  ;;  %v265_v24 = vshrl.u32 %v1171_v11, 16  ;;  %v211_v25 = vld [vmem:[%s1381_s19 + $0x20] sm:$0xf]  ;;  %v269_v28 = vshll.u32 %v1172_v23, 16  ;;  %v547_v36 = vshll.u32 %v1410_v30, 16 }
  0x4c   : > { %v250_v12 = vrot.slane %v248_v8, 1  ;;  %v255_v14 = vrot.slane %v253_v9, 1  ;;  %v1403_v26 = vld [vmem:[%s1381_s19 + $0x1c] sm:$0xff]   ;;  %v215_v29 = vld [vmem:[%s1381_s19 + $0x24] sm:$0xf]  ;;  %v273_v41 = vshrl.u32 %v1172_v23, 16 }
  0x4d   : > { %v263_v22 = vrot.slane %v261_v18, 1  ;;  %v965_v31 = vcombine.low %v211_v25, %v215_v29  ;;  %v539_v32 = vshll.u32 %v1403_v26, 16  ;;  %v271_v34 = vrot.slane %v269_v28, 1  ;;  %v477_v46 = vld [vmem:[%s1381_s19 + $0x4] sm:$0xf]  ;;  %v1176_v54 = vld [vmem:[%s1381_s19 + $0xc] sm:$0xff]  }
  0x4e   : > { %v251_v16 = vor.u32 %v250_v12, %v246_v7  ;;  %v259_v21 = vor.u32 %v257_v15, %v255_v14  ;;  %v543_v35 = vshrl.u32 %v1403_v26, 16  ;;  %v1420_v38 = vrot.slane %v547_v36, 1  ;;  %v478_v47 = vld [vmem:[%s1381_s19 + $0x8] sm:$0xf]  ;;  %v212_v49 = vld [vmem:[%s1381_s19 + $0x24] sm:$0x7] }
  0x4f   : > { %v267_v33 = vor.u32 %v265_v24, %v263_v22  ;;  %v1418_v37 = vrot.slane %v539_v32, 1  ;;  %v277_v42 = vshll.u32 %v965_v31, 16  ;;  %v275_v44 = vor.u32 %v273_v41, %v271_v34  ;;  %v660_v51 = vld [vmem:[%s1381_s19 + $0x4] sm:$0xe]  ;;  %v1178_v3 = vld [vmem:[%s1381_s19 + $0x14] sm:$0xff]  }
  0x50   : > { %v256_v20 = vsel %vm244_vm3, %v251_v16, %v255_v14  ;;  %v264_v27 = vsel %vm244_vm3, %v259_v21, %v263_v22  ;;  %v979_v50 = vcombine.low %v477_v46, %v478_v47  ;;  %v972_v52 = vcombine.low %v211_v25, %v212_v49 }
  0x51   : > { %1047 = vmatmul.mubr.msk.bf16.vlgmr.msra.gmra.mrb[0].mxu0 %vm289_vm2, %v256_v20  ;;  %v545_v39 = vor.u32 %v543_v35, %v1418_v37  ;;  %v272_v40 = vsel %vm244_vm3, %v267_v33, %v271_v34  ;;  %v279_v45 = vrot.slane %v277_v42, 1  ;;  %v281_v53 = vshrl.u32 %v965_v31, 16 }
  0x52   : > { %1089 = vmatpush3.bf16.msra.mxu0 %v575_v19  ;;  %1050 = vmatprep.mubr.msk.bf16.mxu0 %vm1258_vm0, %v1257_v0  ;;  %v990_v55 = vcombine.low %v660_v51, %v478_v47  ;;  %v518_v56 = vshll.u32 %v979_v50, 16  ;;  %v669_v58 = vrot.slane %v1176_v54, 1  ;;  %v516_v60 = vshrl.u32 %v979_v50, 16 }
  0x53   : > { %1073 = vmatmul.mubr.msk.bf16.gmra.mrb[4].mxu1 %vm289_vm2, %v1168_v6  ;;  %v1429_v43 = vsel %vm244_vm3, %v545_v39, %v1420_v38  ;;  %v280_v48 = vsel %vm244_vm3, %v275_v44, %v279_v45  ;;  %v283_v57 = vor.u32 %v281_v53, %v279_v45  ;;  %v523_v62 = vshll.u32 %v1176_v54, 16 }
  0x54   : > { %1076 = vmatprep.mubr.msk.bf16.mxu1 %vm1258_vm0, %v1257_v0  ;;  %v668_v59 = vrot.slane %v990_v55, 1  ;;  %v520_v61 = vrot.slane %v518_v56, 1  ;;  %v671_v5 = vrot.slane %v1178_v3, 1  ;;  %v527_v6 = vshrl.u32 %v1176_v54, 16 }
  0x55   : > { %v525_v2 = vrot.slane %v523_v62, 1  ;;  %v531_v7 = vshll.u32 %v1178_v3, 16  ;;  %v673_v12 = vrot.slane %v1403_v26, 1  ;;  %v535_v13 = vshrl.u32 %v1178_v3, 16 }
  0x56   : > { %v670_v63 = vsel %vm667_vm4, %v668_v59, %v669_v58  ;;  %v521_v1 = vor.u32 %v520_v61, %v516_v60  ;;  %v672_v8 = vsel %vm667_vm4, %v669_v58, %v671_v5  ;;  %v675_v17 = vrot.slane %v1410_v30, 1 }
  0x57   : > { %v529_v9 = vor.u32 %v527_v6, %v525_v2  ;;  %v533_v10 = vrot.slane %v531_v7, 1  ;;  %v674_v14 = vsel %vm667_vm4, %v671_v5, %v673_v12  ;;  %v551_v19 = vshrl.u32 %v1410_v30, 16 }
  0x58   : > { %v526_v4 = vsel %vm244_vm3, %v521_v1, %v525_v2  ;;  %v676_v18 = vsel %vm667_vm4, %v673_v12, %v675_v17 }
  0x59   : > { %1051 = vmatmul.mubr.msk.bf16.gmra.mrb[4].mxu0 %vm289_vm2, %v264_v27  ;;  %v537_v15 = vor.u32 %v535_v13, %v533_v10  ;;  %v553_v20 = vor.u32 %v551_v19, %v1420_v38 }
  0x5a   : > { %1054 = vmatprep.mubr.msk.bf16.mxu0 %vm1258_vm0, %v1257_v0 }
  0x5b   : > { %1077 = vmatmul.mubr.msk.bf16.gmra.mrb[8].mxu1 %vm289_vm2, %v1171_v11  ;;  %v534_v11 = vsel %vm244_vm3, %v529_v9, %v533_v10  ;;  %v542_v16 = vsel %vm244_vm3, %v537_v15, %v1418_v37 }
  0x5c   : > { %1080 = vmatprep.mubr.msk.bf16.mxu1 %vm1258_vm0, %v1257_v0 }
  0x61   : > { %1055 = vmatmul.mubr.msk.bf16.gmra.mrb[8].mxu0 %vm289_vm2, %v272_v40 }
  0x62   : > { %1058 = vmatprep.mubr.msk.bf16.mxu0 %vm1258_vm0, %v1257_v0 }
  0x63   : > { %1081 = vmatmul.mubr.msk.bf16.gmra.mrb[12].mxu1 %vm289_vm2, %v1172_v23 }
  0x64   : > { %1084 = vmatprep.mubr.msk.bf16.mxu1 %vm1258_vm0, %v1257_v0 }
  0x69   : > { %1059 = vmatmul.mubr.msk.bf16.gmra.mrb[12].mxu0 %vm289_vm2, %v280_v48 }
  0x6a   : > { %1062 = vmatprep.mubr.msk.bf16.mxu0 %vm1258_vm0, %v1257_v0 }
  0x6b   : > { %1085 = vmatmul.mubr.msk.bf16.gmra.mrb[16].mxu1 %vm289_vm2, %v972_v52 }
  0x6c   : > { %1112 = vmatprep.mubr.msk.bf16.mxu1 %vm1258_vm0, %v1257_v0 }
  0x71   : > { %1063 = vmatmul.mubr.msk.bf16.gmra.mrb[16].mxu0 %vm289_vm2, %v283_v57 }
  0x72   : > { %1090 = vmatprep.mubr.msk.bf16.mxu0 %vm1258_vm0, %v1257_v0 }
  0x73   : > { %1113 = vmatmul.mubr.msk.bf16.vlgmr.msra.gmra.mrb[20].mxu1 %vm289_vm2, %v670_v63 }
  0x74   : > { %1116 = vmatprep.mubr.msk.bf16.mxu1 %vm1258_vm0, %v1257_v0 }
  0x79   : > { %1091 = vmatmul.mubr.msk.bf16.vlgmr.msra.gmra.mrb[20].mxu0 %vm289_vm2, %v526_v4 }
  0x7a   : > { %1094 = vmatprep.mubr.msk.bf16.mxu0 %vm1258_vm0, %v1257_v0 }
  0x7b   : > { %1117 = vmatmul.mubr.msk.bf16.gmra.mrb[24].mxu1 %vm289_vm2, %v672_v8 }
  0x7c   : > { %1120 = vmatprep.mubr.msk.bf16.mxu1 %vm1258_vm0, %v1257_v0 }
  0x81   : > { %1095 = vmatmul.mubr.msk.bf16.gmra.mrb[24].mxu0 %vm289_vm2, %v534_v11 }
  0x82   : > { %1098 = vmatprep.mubr.msk.bf16.mxu0 %vm1258_vm0, %v1257_v0 }
  0x83   : > { %1121 = vmatmul.mubr.msk.bf16.gmra.mrb[28].mxu1 %vm289_vm2, %v674_v14  ;;  %v1506_v14 = vld [vmem:[#allocation4] ss:$0 sm:$0xff] }
  0x84   : > { %1124 = vmatprep.mubr.msk.bf16.mxu1 %vm1258_vm0, %v1257_v0 }
  0x89   : > { %1099 = vmatmul.mubr.msk.bf16.gmra.mrb[28].mxu0 %vm289_vm2, %v542_v16 }
  0x8a   : > { %1102 = vmatprep.mubr.msk.bf16.mxu0 %vm1258_vm0, %v1257_v0 }
  0x8b   : > { %1125 = vmatmul.mubr.msk.bf16.gmra.mrb[32].mxu1 %vm289_vm2, %v676_v18 }
  0x8c   : > { %1128 = vmatprep.mubr.msk.bf16.mxu1 %vm1258_vm0, %v1257_v0 }
  0x91   : > { %1103 = vmatmul.mubr.msk.bf16.gmra.mrb[32].mxu0 %vm289_vm2, %v1429_v43 }
  0x92   : > { %1106 = vmatprep.mubr.msk.bf16.mxu0 %vm1258_vm0, %v1257_v0 }
  0x93   : > { %1129 = vmatmul.mubr.msk.bf16.gmra.mrb[36].mxu1 %vm289_vm2, %v675_v17 }
  0x99   : > { %1107 = vmatmul.mubr.msk.bf16.gmra.mrb[36].mxu0 %vm289_vm2, %v553_v20 }
 0x11d   : > { %v438_v21 = vpop.f32.mrb[0].mxu1 }
 0x11e   : > { %v1070_v22 = vpop.f32.mrb[1].mxu1 }
 0x11f   : > { %v441_v23 = vpop.f32.mrb[2].mxu1 }
 0x120   : > { %v1071_v24 = vpop.f32.mrb[3].mxu1 }
 0x124   : > { %v343_v25 = vpop.f32.mrb[0].mxu0 }
 0x125   : > { %v439_v26 = vadd.f32 %v438_v21, %v343_v25  ;;  %v1048_v27 = vpop.f32.mrb[1].mxu0 }
 0x126   : > { %v346_v28 = vpop.f32.mrb[2].mxu0  ;;  %v446_v30 = vpop.f32.mrb[4].mxu1 }
 0x127   : > { %v442_v29 = vadd.f32 %v441_v23, %v346_v28  ;;  %v1049_v31 = vpop.f32.mrb[3].mxu0  ;;  %v1074_v32 = vpop.f32.mrb[5].mxu1 }
 0x128   : > { %v449_v33 = vpop.f32.mrb[6].mxu1 }
 0x129   : > { %v1075_v0 = vpop.f32.mrb[7].mxu1 }
 0x12c   : > { %v351_v34 = vpop.f32.mrb[4].mxu0 }
 0x12d   : > { %v447_v35 = vadd.f32 %v446_v30, %v351_v34  ;;  %v1052_v36 = vpop.f32.mrb[5].mxu0 }
 0x12e   : > { %v354_v37 = vpop.f32.mrb[6].mxu0  ;;  %v454_v40 = vpop.f32.mrb[8].mxu1 }
 0x12f   : > { %v1492_v38 = vadd.f32 %v449_v33, %v354_v37  ;;  %v1053_v39 = vpop.f32.mrb[7].mxu0  ;;  %v1078_v41 = vpop.f32.mrb[9].mxu1 }
 0x130   : > { %v457_v42 = vpop.f32.mrb[10].mxu1 }
 0x131   : > { %v1079_v43 = vpop.f32.mrb[11].mxu1 }
 0x134   : > { %v359_v44 = vpop.f32.mrb[8].mxu0 }
 0x135   : > { %v1494_v45 = vadd.f32 %v454_v40, %v359_v44  ;;  %v1056_v46 = vpop.f32.mrb[9].mxu0 }
 0x136   : > { %v362_v47 = vpop.f32.mrb[10].mxu0  ;;  %v462_v50 = vpop.f32.mrb[12].mxu1 }
 0x137   : > { %v1496_v48 = vadd.f32 %v457_v42, %v362_v47  ;;  %v1057_v49 = vpop.f32.mrb[11].mxu0  ;;  %v1082_v51 = vpop.f32.mrb[13].mxu1 }
 0x138   : > { %v465_v52 = vpop.f32.mrb[14].mxu1 }
 0x139   : > { %v1083_v53 = vpop.f32.mrb[15].mxu1 }
 0x13c   : > { %v367_v54 = vpop.f32.mrb[12].mxu0 }
 0x13d   : > { %v1498_v55 = vadd.f32 %v462_v50, %v367_v54  ;;  %v1060_v56 = vpop.f32.mrb[13].mxu0 }
 0x13e   : > { %v370_v57 = vpop.f32.mrb[14].mxu0  ;;  %v470_v60 = vpop.f32.mrb[16].mxu1 }
 0x13f   : > { %v1500_v58 = vadd.f32 %v465_v52, %v370_v57  ;;  %v1061_v59 = vpop.f32.mrb[15].mxu0  ;;  %v1086_v61 = vpop.f32.mrb[17].mxu1 }
 0x140   : > { %v473_v62 = vpop.f32.mrb[18].mxu1 }
 0x141   : > { %v1087_v63 = vpop.f32.mrb[19].mxu1 }
 0x144   : > { %v375_v1 = vpop.f32.mrb[16].mxu0 }
 0x145   : > { %v1502_v2 = vadd.f32 %v470_v60, %v375_v1  ;;  %v1064_v3 = vpop.f32.mrb[17].mxu0 }
 0x146   : > { %v378_v4 = vpop.f32.mrb[18].mxu0  ;;  %v734_v7 = vpop.f32.mrb[20].mxu1 }
 0x147   : > { %v1504_v5 = vadd.f32 %v473_v62, %v378_v4  ;;  %v1065_v6 = vpop.f32.mrb[19].mxu0  ;;  %v1114_v8 = vpop.f32.mrb[21].mxu1 }
 0x148   : > { %v737_v9 = vpop.f32.mrb[22].mxu1 }
 0x149   : > { %v1115_v10 = vpop.f32.mrb[23].mxu1 }
 0x14c   : > { %v611_v11 = vpop.f32.mrb[20].mxu0 }
 0x14d   : > { %v650_v12 = vadd.f32 %v611_v11, %v439_v26  ;;  %v1092_v13 = vpop.f32.mrb[21].mxu0 }
 0x14e   : > { %v614_v15 = vpop.f32.mrb[22].mxu0  ;;  %v742_v19 = vpop.f32.mrb[24].mxu1 }
 0x14f   : > { %v773_v16 = vadd.f32 %v734_v7, %v650_v12  ;;  %v651_v17 = vadd.f32 %v614_v15, %v442_v29  ;;  %v1093_v18 = vpop.f32.mrb[23].mxu0  ;;  %v1118_v22 = vpop.f32.mrb[25].mxu1 }
 0x150   : > { %v745_v23 = vpop.f32.mrb[26].mxu1 }
 0x151   : > { %v790_v20 = vadd.f32 %v1506_v14, %v773_v16  ;;  %v774_v21 = vadd.f32 %v737_v9, %v651_v17  ;;  %v1119_v27 = vpop.f32.mrb[27].mxu1 }
 0x153   : > { %v800_v24 = vmul.f32 0.2, %v790_v20  ;;  %v791_v25 = vadd.f32 %v1506_v14, %v774_v21 }
 0x154   : > { %v619_v28 = vpop.f32.mrb[24].mxu0 }
 0x155   : > { %v810_v26 = vmax.f32 %v790_v20, %v800_v24  ;;  %v801_v31 = vmul.f32 0.2, %v791_v25  ;;  %v652_v30 = vadd.f32 %v619_v28, %v447_v35  ;;  %v1096_v32 = vpop.f32.mrb[25].mxu0 }
 0x156   : > { %v622_v29 = vpop.f32.mrb[26].mxu0  ;;  %v750_v39 = vpop.f32.mrb[28].mxu1 }
 0x157   : > { %v1010_v33 = vpack.c.bf16 %v810_v26, %v810_v26  ;;  %v811_v0 = vmax.f32 %v791_v25, %v801_v31  ;;  %v775_v34 = vadd.f32 %v742_v19, %v652_v30  ;;  %v653_v36 = vadd.f32 %v622_v29, %v1492_v38  ;;  %v1097_v37 = vpop.f32.mrb[27].mxu0  ;;  %v1122_v42 = vpop.f32.mrb[29].mxu1 }
 0x158   : > { %v753_v43 = vpop.f32.mrb[30].mxu1 }
 0x159   : > { %861 = vst.msk [vmem:[%s1515_s25] sm:$0xf] %vm860_vm5, %v1010_v33  ;;  %v1011_v35 = vpack.c.bf16 %v811_v0, %v811_v0  ;;  %v792_v40 = vadd.f32 %v1506_v14, %v775_v34  ;;  %v776_v41 = vadd.f32 %v745_v23, %v653_v36  ;;  %v1123_v47 = vpop.f32.mrb[31].mxu1 }
 0x15b   : > { %862 = vst.msk [vmem:[%s1515_s25 + $0x4] sm:$0xf] %vm860_vm5, %v1011_v35  ;;  %v802_v44 = vmul.f32 0.2, %v792_v40  ;;  %v793_v46 = vadd.f32 %v1506_v14, %v776_v41 }
 0x15c   : > { %v627_v49 = vpop.f32.mrb[28].mxu0 }
 0x15d   : > { %v812_v50 = vmax.f32 %v792_v40, %v802_v44  ;;  %v803_v38 = vmul.f32 0.2, %v793_v46  ;;  %v654_v51 = vadd.f32 %v627_v49, %v1494_v45  ;;  %v1100_v52 = vpop.f32.mrb[29].mxu0 }
 0x15e   : > { %v630_v53 = vpop.f32.mrb[30].mxu0  ;;  %v758_v61 = vpop.f32.mrb[32].mxu1 }
 0x15f   : > { %v1012_v54 = vpack.c.bf16 %v812_v50, %v812_v50  ;;  %v813_v56 = vmax.f32 %v793_v46, %v803_v38  ;;  %v777_v57 = vadd.f32 %v750_v39, %v654_v51  ;;  %v655_v59 = vadd.f32 %v630_v53, %v1496_v48  ;;  %v1101_v60 = vpop.f32.mrb[31].mxu0  ;;  %v1126_v3 = vpop.f32.mrb[33].mxu1 }
 0x160   : > { %v761_v4 = vpop.f32.mrb[34].mxu1 }
 0x161   : > { %863 = vst.msk [vmem:[%s1515_s25 + $0x8] sm:$0xf] %vm860_vm5, %v1012_v54  ;;  %v1013_v62 = vpack.c.bf16 %v813_v56, %v813_v56  ;;  %v794_v63 = vadd.f32 %v1506_v14, %v777_v57  ;;  %v778_v1 = vadd.f32 %v753_v43, %v655_v59  ;;  %v1127_v7 = vpop.f32.mrb[35].mxu1 }
 0x163   : > { %864 = vst.msk [vmem:[%s1515_s25 + $0xc] sm:$0xf] %vm860_vm5, %v1013_v62  ;;  %v804_v45 = vmul.f32 0.2, %v794_v63  ;;  %v795_v6 = vadd.f32 %v1506_v14, %v778_v1 }
 0x164   : > { %v635_v8 = vpop.f32.mrb[32].mxu0 }
 0x165   : > { %v814_v9 = vmax.f32 %v794_v63, %v804_v45  ;;  %v805_v48 = vmul.f32 0.2, %v795_v6  ;;  %v656_v10 = vadd.f32 %v635_v8, %v1498_v55  ;;  %v1104_v11 = vpop.f32.mrb[33].mxu0 }
 0x166   : > { %v638_v12 = vpop.f32.mrb[34].mxu0  ;;  %v766_v19 = vpop.f32.mrb[36].mxu1 }
 0x167   : > { %v1014_v13 = vpack.c.bf16 %v814_v9, %v814_v9  ;;  %v815_v15 = vmax.f32 %v795_v6, %v805_v48  ;;  %v779_v16 = vadd.f32 %v758_v61, %v656_v10  ;;  %v657_v17 = vadd.f32 %v638_v12, %v1500_v58  ;;  %v1105_v18 = vpop.f32.mrb[35].mxu0  ;;  %v1130_v23 = vpop.f32.mrb[37].mxu1 }
 0x168   : > { %v769_v24 = vpop.f32.mrb[38].mxu1 }
 0x169   : > { %865 = vst.msk [vmem:[%s1515_s25 + $0x10] sm:$0xf] %vm860_vm5, %v1014_v13  ;;  %v1015_v20 = vpack.c.bf16 %v815_v15, %v815_v15  ;;  %v796_v21 = vadd.f32 %v1506_v14, %v779_v16  ;;  %v780_v22 = vadd.f32 %v761_v4, %v657_v17  ;;  %v1131_v27 = vpop.f32.mrb[39].mxu1 }
 0x16b   : > { %866 = vst.msk [vmem:[%s1515_s25 + $0x14] sm:$0xf] %vm860_vm5, %v1015_v20  ;;  %v806_v55 = vmul.f32 0.2, %v796_v21  ;;  %v797_v25 = vadd.f32 %v1506_v14, %v780_v22 }
 0x16c   : > { %v643_v28 = vpop.f32.mrb[36].mxu0 }
 0x16d   : > { %v816_v58 = vmax.f32 %v796_v21, %v806_v55  ;;  %v807_v26 = vmul.f32 0.2, %v797_v25  ;;  %v658_v31 = vadd.f32 %v643_v28, %v1502_v2  ;;  %v1108_v30 = vpop.f32.mrb[37].mxu0 }
 0x16e   : > { %v646_v32 = vpop.f32.mrb[38].mxu0 }
 0x16f   : > { %v1016_v29 = vpack.c.bf16 %v816_v58, %v816_v58  ;;  %v817_v33 = vmax.f32 %v797_v25, %v807_v26  ;;  %v781_v0 = vadd.f32 %v766_v19, %v658_v31  ;;  %v659_v34 = vadd.f32 %v646_v32, %v1504_v5  ;;  %v1109_v36 = vpop.f32.mrb[39].mxu0 }
 0x171   : > { %867 = vst.msk [vmem:[%s1515_s25 + $0x18] sm:$0xf] %vm860_vm5, %v1016_v29  ;;  %v1017_v37 = vpack.c.bf16 %v817_v33, %v817_v33  ;;  %v798_v39 = vadd.f32 %v1506_v14, %v781_v0  ;;  %v782_v35 = vadd.f32 %v769_v24, %v659_v34 }
 0x173   : > { %868 = vst.msk [vmem:[%s1515_s25 + $0x1c] sm:$0xf] %vm860_vm5, %v1017_v37  ;;  %v808_v40 = vmul.f32 0.2, %v798_v39  ;;  %v799_v2 = vadd.f32 %v1506_v14, %v782_v35 }
 0x175   : > { %v818_v41 = vmax.f32 %v798_v39, %v808_v40  ;;  %v809_v42 = vmul.f32 0.2, %v799_v2 }
 0x177   : > { %v1018_v43 = vpack.c.bf16 %v818_v41, %v818_v41  ;;  %v819_v44 = vmax.f32 %v799_v2, %v809_v42 }
 0x179   : > { %869 = vst.msk [vmem:[%s1515_s25 + $0x20] sm:$0xf] %vm860_vm5, %v1018_v43  ;;  %v1019_v5 = vpack.c.bf16 %v819_v44, %v819_v44 }
 0x17b   : > { %871 = vst.msk [vmem:[%s1515_s25 + $0x24] sm:$0x7] %vm870_vm6, %v1019_v5 }
 0x17c PF: > { %s15_s12 = sadd.s32 1, %s1251_s12  }
 0x17d   : > { %p12_p2 = scmp.ge.s32.totalorder %s15_s12, 4  }
 0x17f   :  { %14 = sbr.rel (!%p12_p2) target bundleno = 2 (0x2), region = 74 }
 0x186   :  { %894 = vsyncpa [#allocation3], 1 }
 0x187   :  { %896 = vsyncpa [#allocation3 + $0x1], 1 }
 0x188   :  { %897 = vsyncpa [#allocation5], 1 }

// kernel: _lambda_.6
= control target key start
LH: loop header
LB: loop body
LE: loop exit
PB: predicated region body
PF: predicated region fallthrough
CT: control target
= control target key end

     0   :  { %8 = vsyncpa [#allocation3], 0  ;;  %s1730_s0 = inlined_call_operand.vmem [shape: bf16[64,256], index: 0, kind: input, shape index: {}]   ;;  %s1731_s1 = inlined_call_operand.hbm [shape: bf16[4,256,128], index: 1, kind: input, shape index: {}]   ;;  %s1732_s2 = inlined_call_operand.hbm [shape: f32[1,128], index: 2, kind: input, shape index: {}]   ;;  %s1733_s3 = inlined_call_operand.vmem [shape: bf16[64,128], index: 3, kind: output, shape index: {}]  }
   0x1   :  { %9 = vsyncpa [#allocation5], 0  ;;  %s1597_s12 = smov 0  }
   0x2 LB: > { %s1175_s13 = sadd.s32 4294967295, %s1571_s12   ;;  %p1177_p0 = scmp.ge.s32.totalorder %s1571_s12, 1  ;;  %s1571_s12 = sphi %s1597_s12, %s15_s12  }
   0x3   : > { %p114_p1 = scmp.lt.s32.totalorder %s1571_s12, 3  ;;  %s1573_s14 = smov [#allocation2]  }
   0x4   : > { %s126_s15 = sshll.u32 %s1573_s14, 4  ;;  %p1611_p3 = scmp.eq.s32.totalorder %s1175_s13, 0  ;;  %s127_s15 = int_to_ptr.vmem [resolvable:$true] %s126_s15 }
   0x5   : > { %p1605_p2 = pnand %p1177_p0, %p114_p1  ;;  %s1574_s18 = smov [#allocation4]  }
   0x6   : > { %s1738_s17 = scalar_select %p1611_p3, 1, 0 }
   0x7   : > { %s1737_s16 = scalar_select %p1605_p2, 1, 0 }
   0x8   : > { %p1402_p4 = pneg %p1605_p2  ;;  %s140_s19 = sshll.u32 %s1574_s18, 4  ;;  %s1623_s19 = int_to_ptr.vmem [resolvable:$true] %s140_s19 }
   0x9   : > { %s1501_s23 = scalar_lea.hbm %s1731_s1, 8192 }
   0xa   : > { %p1619_p5 = pnand %p1611_p3, %p1402_p4  ;;  %p1502_p6 = scmp.ne.s32.totalorder %s1731_s1, %s1501_s23 }
   0xb   : > { %p1508_p10 = scmp.lt.u32.totalorder %s1501_s23, %s1731_s1 }
   0xc   : > { %p1503_p7 = pneg %p1619_p5 }
   0xe   : > { %p1504_p8 = pnand %p1503_p7, %p1502_p6 }
  0x10   : > { %p1505_p9 = pneg %p1504_p8 }
  0x12   : > { %p1510_p11 = pnand %p1508_p10, %p1505_p9 }
  0x14   : > { %1513 = shalt.err (!%p1510_p11)
}
  0x15   : > { %s1514_s28 = scalar_lea.vmem %s127_s15, 8192  ;;  %p1522_p1 = scmp.lt.s32.totalorder %s127_s15, %s127_s15 }
  0x16   : > { %p1515_p12 = scmp.ne.s32.totalorder %s127_s15, %s1514_s28  ;;  %p1523_p4 = scmp.lt.s32.totalorder %s1514_s28, %s1514_s28 }
  0x18   : > { %p1517_p13 = pnand %p1515_p12, %p1503_p7  ;;  %p1524_p3 = por %p1523_p4, %p1522_p1 }
  0x1a   : > { %p1518_p0 = pneg %p1517_p13 }
  0x1c   : > { %p1525_p2 = pnand %p1524_p3, %p1518_p0 }
  0x1e   : > { %1528 = shalt.err (!%p1525_p2)
}
  0x1f   : > { %s1575_s29 = smov 64   ;;  %s1576_s30 = smov 4  }
  0x20   : > { %1405 = dma.hbm_to_vmem [thread:$0]  (!%p1619_p5), %s1731_s1, 8192, %s127_s15, [#allocation3], %s1575_s29, %s1575_s29, %s1576_s30  }
  0x21   : > { %s1529_s8 = scalar_lea.hbm %s1732_s2, 16 }
  0x22   : > { %p1530_p6 = scmp.ne.s32.totalorder %s1732_s2, %s1529_s8  ;;  %p1536_p8 = scmp.lt.u32.totalorder %s1529_s8, %s1732_s2 }
  0x24   : > { %p1532_p2 = pnand %p1530_p6, %p1503_p7 }
  0x26   : > { %p1533_p3 = pneg %p1532_p2 }
  0x28   : > { %p1538_p9 = pnand %p1536_p8, %p1533_p3 }
  0x2a   : > { %1541 = shalt.err (!%p1538_p9)
}
  0x2b   : > { %s1542_s15 = scalar_lea.vmem %s1623_s19, 16  ;;  %s1549_s18 = scalar_lea.vmem %s1623_s19, 32 }
  0x2c   : > { %p1543_p10 = scmp.ne.s32.totalorder %s1623_s19, %s1542_s15  ;;  %p1550_p13 = scmp.lt.s32.totalorder %s1623_s19, %s1623_s19 }
  0x2d   : > { %p1551_p0 = scmp.lt.s32.totalorder %s1549_s18, %s1542_s15 }
  0x2e   : > { %p1545_p11 = pnand %p1543_p10, %p1503_p7 }
  0x2f   : > { %p1552_p1 = por %p1551_p0, %p1550_p13 }
  0x30   : > { %p1546_p12 = pneg %p1545_p11 }
  0x32   : > { %p1553_p4 = pnand %p1552_p1, %p1546_p12 }
  0x34   : > { %1556 = shalt.err (!%p1553_p4)
}
  0x35   : > { %1408 = dma.hbm_to_vmem [thread:$0]  (!%p1619_p5), %s1732_s2, 16, %s1623_s19, [#allocation5]  }
  0x36   : > { %p1740_p6 = scmp.ne.s32.totalorder %s1737_s16, 0 }
  0x37   : > { %p1741_p7 = scmp.ne.s32.totalorder (!%p1740_p6), %s1738_s17, 0 }
  0x38   : > { %163 = sbr.rel (%p1740_p6) target bundleno = 370 (0x172), region = 32 }
  0x3f   : > { %1562 = dma.done.wait (%p1741_p7), [#allocation3], 8192  }
  0x40   : > { %1564 = vsyncadd (%p1741_p7), [#allocation3], 4294959104 }
  0x41   : > { %1566 = dma.done.wait (%p1741_p7), [#allocation5], 16  }
  0x42   : > { %1568 = vsyncadd (%p1741_p7), [#allocation5], 4294967280  ;;  %v1425_v0 = vld [vmem:[#allocation2 + $0xc0] sm:$0xff]   ;;  %v1429_v4 = vld [vmem:[#allocation2 + $0xc8] sm:$0xff]   ;;  %s1184_s16 = sshll.u32 %s1175_s13, 2  ;;  %vm898_vm1 = vcmask 1044480  }
  0x43   : > { %v1426_v1 = vld [vmem:[#allocation2 + $0x40] sm:$0xff]   ;;  %1282 = vmatprep.subr.bf16.mxu0 %v1425_v0  ;;  %v1430_v5 = vld [vmem:[#allocation2 + $0x48] sm:$0xff]   ;;  %v1433_v8 = vld [vmem:[#allocation2 + $0xd0] sm:$0xff]   ;;  %p193_p5 = scmp.lt.s32.totalorder %s1184_s16, 7  ;;  %vm292_vm0 = vsmask.f32 7424 }
  0x44   : > { %v1427_v2 = vld [vmem:[#allocation2 + $0x80] sm:$0xff]   ;;  %1310 = vmatprep.subr.bf16.mxu1 %v1426_v1  ;;  %v1431_v6 = vld [vmem:[#allocation2 + $0x88] sm:$0xff]   ;;  %v1434_v9 = vld [vmem:[#allocation2 + $0x50] sm:$0xff]   ;;  %vm671_vm2 = vsmask.f32 5376 }
  0x45   : > { %v1428_v3 = vld [vmem:[#allocation2] sm:$0xff]   ;;  %1283 = vmatpush3.bf16.msra.mxu0 %v1427_v2  ;;  %v1432_v7 = vld [vmem:[#allocation2 + $0x8] sm:$0xff]   ;;  %v1435_v10 = vld [vmem:[#allocation2 + $0x90] sm:$0xff]   ;;  %s1743_s16 = smov (!%p193_p5, %s1184_s16), 7 }
  0x46   : > { %1311 = vmatpush3.bf16.msra.mxu1 %v1428_v3  ;;  %1284 = vmatprep.subr.bf16.mxu0 %v1429_v4  ;;  %v1436_v11 = vld [vmem:[#allocation2 + $0x10] sm:$0xff]   ;;  %v1437_v12 = vld [vmem:[#allocation2 + $0xd8] sm:$0xff]   ;;  %v1441_v16 = vld [vmem:[#allocation2 + $0xe0] sm:$0xff]   ;;  %s1272_s13 = sshll.u32 %s1743_s16, 3  ;;  %s1188_s23 = sshll.u32 %s1743_s16, 2 }
  0x47   : > { %1312 = vmatprep.subr.bf16.mxu1 %v1430_v5  ;;  %v1438_v13 = vld [vmem:[#allocation2 + $0x58] sm:$0xff]   ;;  %v1442_v17 = vld [vmem:[#allocation2 + $0x60] sm:$0xff]   ;;  %v1445_v20 = vld [vmem:[#allocation2 + $0xe8] sm:$0xff]   ;;  %s1691_s20 = scalar_lea.vmem %s1730_s0, %s1272_s13  ;;  %s203_s26 = scalar_lea.vmem %s1733_s3, %s1188_s23 }
  0x48   : > { %v1439_v14 = vld [vmem:[#allocation2 + $0x98] sm:$0xff]   ;;  %v1443_v18 = vld [vmem:[#allocation2 + $0xa0] sm:$0xff]   ;;  %v1446_v21 = vld [vmem:[#allocation2 + $0x68] sm:$0xff]  }
  0x49   : > { %1285 = vmatpush3.bf16.msra.mxu0 %v1431_v6  ;;  %v1440_v15 = vld [vmem:[#allocation2 + $0x18] sm:$0xff]   ;;  %v1444_v19 = vld [vmem:[#allocation2 + $0x20] sm:$0xff]   ;;  %v1447_v22 = vld [vmem:[#allocation2 + $0xa8] sm:$0xff]  }
  0x4a   : > { %1313 = vmatpush3.bf16.msra.mxu1 %v1432_v7  ;;  %1286 = vmatprep.subr.bf16.mxu0 %v1433_v8  ;;  %v1448_v23 = vld [vmem:[#allocation2 + $0x28] sm:$0xff]   ;;  %v1449_v24 = vld [vmem:[#allocation2 + $0xf0] sm:$0xff]   ;;  %v1453_v28 = vld [vmem:[#allocation2 + $0xf8] sm:$0xff]  }
  0x4b   : > { %1314 = vmatprep.subr.bf16.mxu1 %v1434_v9  ;;  %v1450_v25 = vld [vmem:[#allocation2 + $0x70] sm:$0xff]   ;;  %v1454_v29 = vld [vmem:[#allocation2 + $0x78] sm:$0xff]   ;;  %v206_v32 = vld [vmem:[%s1691_s20] sm:$0xff] }
  0x4c   : > { %v1451_v26 = vld [vmem:[#allocation2 + $0xb0] sm:$0xff]   ;;  %v1455_v30 = vld [vmem:[#allocation2 + $0xb8] sm:$0xff]   ;;  %v1695_v33 = vld [vmem:[%s1691_s20 + $0x8] sm:$0xff] }
  0x4d   : > { %1287 = vmatpush3.bf16.msra.mxu0 %v1435_v10  ;;  %v1452_v27 = vld [vmem:[#allocation2 + $0x30] sm:$0xff]   ;;  %v1456_v31 = vld [vmem:[#allocation2 + $0x38] sm:$0xff]   ;;  %v1190_v36 = vcombine.high %v206_v32, %v1695_v33  ;;  %v1189_v37 = vcombine.low %v206_v32, %v1695_v33  ;;  %v1461_v40 = vld [vmem:[#allocation2 + $0x140] sm:$0xff]  }
  0x4e   : > { %1315 = vmatpush3.bf16.msra.mxu1 %v1436_v11  ;;  %1288 = vmatprep.subr.bf16.mxu0 %v1437_v12  ;;  %v1698_v34 = vld [vmem:[%s1691_s20 + $0x10] sm:$0xff]  ;;  %v242_v35 = vld [vmem:[%s1691_s20 + $0x18] sm:$0x33]  ;;  %v1462_v45 = vld [vmem:[#allocation2 + $0x1c0] sm:$0xff]  }
  0x4f   : > { %1316 = vmatprep.subr.bf16.mxu1 %v1438_v13  ;;  %v1192_v38 = vcombine.high %v1698_v34, %v242_v35  ;;  %v1191_v39 = vcombine.low %v1698_v34, %v242_v35  ;;  %v306_v41 = vshrl.u32 %v1190_v36, 16  ;;  %v308_v42 = vshll.u32 %v1190_v36, 16  ;;  %609 = vmatprep.mubr.bf16.mxu1 %v1190_v36  ;;  %v1463_v52 = vld [vmem:[#allocation2 + $0x100] sm:$0xff]   ;;  %v1466_v56 = vld [vmem:[#allocation2 + $0x1c8] sm:$0xff]   ;;  %v1470_v1 = vld [vmem:[#allocation2 + $0x1d0] sm:$0xff]  }
  0x50   : > { %v294_v43 = vshrl.u32 %v1189_v37, 16  ;;  %v296_v44 = vshll.u32 %v1189_v37, 16  ;;  %v1464_v53 = vld [vmem:[#allocation2 + $0x180] sm:$0xff]   ;;  %v1465_v60 = vld [vmem:[#allocation2 + $0x148] sm:$0xff]   ;;  %v1469_v2 = vld [vmem:[#allocation2 + $0x150] sm:$0xff]  }
  0x51   : > { %1289 = vmatpush3.bf16.msra.mxu0 %v1439_v14  ;;  %v313_v46 = vshll.u32 %v1192_v38, 16  ;;  %v301_v47 = vshll.u32 %v1191_v39, 16  ;;  %v310_v48 = vrot.slane %v308_v42, 1  ;;  %v320_v57 = vshrl.u32 %v1192_v38, 16  ;;  %v1468_v61 = vld [vmem:[#allocation2 + $0x188] sm:$0xff]   ;;  %v1472_v3 = vld [vmem:[#allocation2 + $0x190] sm:$0xff]  }
  0x52   : > { %1317 = vmatpush3.bf16.msra.mxu1 %v1440_v15  ;;  %1290 = vmatprep.subr.bf16.mxu0 %v1441_v16  ;;  %v298_v49 = vrot.slane %v296_v44, 1  ;;  %v1467_v63 = vld [vmem:[#allocation2 + $0x108] sm:$0xff]   ;;  %v317_v0 = vshrl.u32 %v1191_v39, 16  ;;  %v1471_v4 = vld [vmem:[#allocation2 + $0x110] sm:$0xff]   ;;  %v1474_v6 = vld [vmem:[#allocation2 + $0x1d8] sm:$0xff]  }
  0x53   : > { %1318 = vmatprep.subr.bf16.mxu1 %v1442_v17  ;;  %v315_v50 = vrot.slane %v313_v46, 1  ;;  %v303_v51 = vrot.slane %v301_v47, 1  ;;  %v311_v54 = vor.u32 %v310_v48, %v306_v41  ;;  %v1473_v7 = vld [vmem:[#allocation2 + $0x158] sm:$0xff]   ;;  %v1478_v10 = vld [vmem:[#allocation2 + $0x1e0] sm:$0xff]   ;;  %v1483_v17 = vld [vmem:[#allocation2 + $0x1e8] sm:$0xff]  }
  0x54   : > { %v299_v55 = vor.u32 %v298_v49, %v294_v43  ;;  %v1476_v8 = vld [vmem:[#allocation2 + $0x198] sm:$0xff]   ;;  %v1477_v11 = vld [vmem:[#allocation2 + $0x160] sm:$0xff]  }
  0x55   : > { %1291 = vmatpush3.bf16.msra.mxu0 %v1443_v18  ;;  %v316_v58 = vsel %vm292_vm0, %v311_v54, %v315_v50  ;;  %v322_v62 = vor.u32 %v320_v57, %v315_v50  ;;  %v319_v5 = vor.u32 %v317_v0, %v303_v51  ;;  %v1475_v9 = vld [vmem:[#allocation2 + $0x118] sm:$0xff]   ;;  %v1480_v12 = vld [vmem:[#allocation2 + $0x1a0] sm:$0xff]   ;;  %v1482_v18 = vld [vmem:[#allocation2 + $0x168] sm:$0xff]  }
  0x56   : > { %1319 = vmatpush3.bf16.msra.mxu1 %v1444_v19  ;;  %1292 = vmatprep.subr.bf16.mxu0 %v1445_v20  ;;  %v304_v59 = vsel %vm292_vm0, %v299_v55, %v303_v51  ;;  %v209_v13 = vld [vmem:[%s1691_s20 + $0x18] sm:$0x11]  ;;  %v1479_v14 = vld [vmem:[#allocation2 + $0x120] sm:$0xff]   ;;  %v1486_v19 = vld [vmem:[#allocation2 + $0x1a8] sm:$0xff]  }
  0x57   : > { %1320 = vmatprep.subr.bf16.mxu1 %v1446_v21  ;;  %455 = vmatprep.mubr.bf16.mxu0 %v316_v58  ;;  %v1210_v15 = vcombine.high %v1698_v34, %v209_v13  ;;  %v1209_v16 = vcombine.low %v1698_v34, %v209_v13  ;;  %v1485_v20 = vld [vmem:[#allocation2 + $0x128] sm:$0xff]   ;;  %v1488_v21 = vld [vmem:[#allocation2 + $0x1f0] sm:$0xff]   ;;  %v859_v32 = vld [vmem:[%s1691_s20] sm:$0x88] }
  0x58   : > { %v1493_v35 = vld [vmem:[#allocation2 + $0x138] sm:$0xff]   ;;  %v1247_v38 = vcombine.low %v859_v32, %v1695_v33  ;;  %v1248_v41 = vcombine.high %v859_v32, %v1695_v33 }
  0x59   : > { %1293 = vmatpush3.bf16.msra.mxu0 %v1447_v22  ;;  %v1487_v22 = vld [vmem:[#allocation2 + $0x170] sm:$0xff]  }
  0x5a   : > { %1321 = vmatpush3.bf16.msra.mxu1 %v1448_v23  ;;  %1294 = vmatprep.subr.bf16.mxu0 %v1449_v24  ;;  %v1490_v23 = vld [vmem:[#allocation2 + $0x1b0] sm:$0xff]   ;;  %v902_v49 = vrot.slane %v1248_v41, 3 }
  0x5b   : > { %1322 = vmatprep.subr.bf16.mxu1 %v1450_v25  ;;  %v1489_v24 = vld [vmem:[#allocation2 + $0x130] sm:$0xff]   ;;  %v1492_v25 = vld [vmem:[#allocation2 + $0x1f8] sm:$0xff]  }
  0x5d   : > { %1295 = vmatpush3.bf16.msra.mxu0 %v1451_v26  ;;  %v1491_v26 = vld [vmem:[#allocation2 + $0x178] sm:$0xff]  }
  0x5e   : > { %1323 = vmatpush3.bf16.msra.mxu1 %v1452_v27  ;;  %1296 = vmatprep.subr.bf16.mxu0 %v1453_v28  ;;  %v1494_v27 = vld [vmem:[#allocation2 + $0x1b8] sm:$0xff]   ;;  %v626_v28 = vld [vmem:[%s1691_s20] sm:$0xcc] }
  0x5f   : > { %1324 = vmatprep.subr.bf16.mxu1 %v1454_v29  ;;  %v627_v29 = vld [vmem:[%s1691_s20 + $0x18] sm:$0xff] }
  0x60   : > { %v1229_v36 = vcombine.low %v1698_v34, %v627_v29 }
  0x61   : > { %1297 = vmatpush3.bf16.msra.mxu0 %v1455_v30  ;;  %v1227_v30 = vcombine.low %v626_v28, %v1695_v33 }
  0x62   : > { %1325 = vmatpush3.bf16.msra.mxu1 %v1456_v31  ;;  %1338 = vmatprep.subr.bf16.mxu0 %v1461_v40  ;;  %v1228_v31 = vcombine.high %v626_v28, %v1695_v33  ;;  %v900_v57 = vrot.slane %v1229_v36, 3 }
  0x63   : > { %1366 = vmatprep.subr.bf16.mxu1 %v1462_v45  ;;  %v673_v42 = vshrl.u32 %v1227_v30, 16  ;;  %v899_v45 = vrot.slane %v1247_v38, 3 }
  0x64   : > { %456 = vmatmul.mubr.bf16.vlgmr.msra.gmra.mrb[0].mxu0 %v304_v59  ;;  %v690_v39 = vshrl.u32 %v1228_v31, 16  ;;  %v693_v40 = vshll.u32 %v1228_v31, 16 }
  0x65   : > { %610 = vmatmul.mubr.bf16.vlgmr.msra.gmra.mrb[0].mxu1 %v1189_v37  ;;  %1339 = vmatpush3.bf16.msra.mxu0 %v1463_v52  ;;  %v1230_v37 = vcombine.high %v1698_v34, %v627_v29  ;;  %v675_v50 = vrot.slane %v673_v42, 2  ;;  %v676_v52 = vshll.u32 %v1227_v30, 16 }
  0x66   : > { %1367 = vmatpush3.bf16.msra.mxu1 %v1464_v53  ;;  %1340 = vmatprep.subr.bf16.mxu0 %v1465_v60  ;;  %v692_v47 = vrot.slane %v690_v39, 2  ;;  %v695_v48 = vrot.slane %v693_v40, 3  ;;  %v681_v53 = vshrl.u32 %v1229_v36, 16 }
  0x67   : > { %1368 = vmatprep.subr.bf16.mxu1 %v1466_v56  ;;  %463 = vmatprep.mubr.bf16.mxu0 %v322_v62  ;;  %v698_v43 = vshrl.u32 %v1230_v37, 16  ;;  %v701_v44 = vshll.u32 %v1230_v37, 16  ;;  %v903_v46 = vrot.slane %v1230_v37, 3  ;;  %v684_v56 = vshll.u32 %v1229_v36, 16 }
  0x68   : > { %617 = vmatprep.mubr.bf16.mxu1 %v1210_v15  ;;  %v696_v54 = vor.u32 %v695_v48, %v692_v47  ;;  %v678_v58 = vrot.slane %v676_v52, 3  ;;  %v683_v59 = vrot.slane %v681_v53, 2 }
  0x69   : > { %1341 = vmatpush3.bf16.msra.mxu0 %v1467_v63  ;;  %v700_v51 = vrot.slane %v698_v43, 2  ;;  %v703_v34 = vrot.slane %v701_v44, 3  ;;  %v904_v55 = vsel %vm898_vm1, %v902_v49, %v903_v46  ;;  %v686_v60 = vrot.slane %v684_v56, 3 }
  0x6a   : > { %1369 = vmatpush3.bf16.msra.mxu1 %v1468_v61  ;;  %1342 = vmatprep.subr.bf16.mxu0 %v1469_v2  ;;  %v901_v61 = vsel %vm898_vm1, %v899_v45, %v900_v57  ;;  %v679_v63 = vor.u32 %v678_v58, %v675_v50 }
  0x6b   : > { %1370 = vmatprep.subr.bf16.mxu1 %v1470_v1  ;;  %v704_v33 = vor.u32 %v703_v34, %v700_v51  ;;  %v687_v0 = vor.u32 %v686_v60, %v683_v59 }
  0x6c   : > { %464 = vmatmul.mubr.bf16.gmra.mrb[4].mxu0 %v319_v5 }
  0x6d   : > { %1343 = vmatpush3.bf16.msra.mxu0 %v1471_v4  ;;  %618 = vmatmul.mubr.bf16.gmra.mrb[4].mxu1 %v1209_v16  ;;  %v705_v62 = vsel %vm671_vm2, %v696_v54, %v704_v33  ;;  %v688_v1 = vsel %vm671_vm2, %v679_v63, %v687_v0 }
  0x6e   : > { %1371 = vmatpush3.bf16.msra.mxu1 %v1472_v3  ;;  %1344 = vmatprep.subr.bf16.mxu0 %v1473_v7 }
  0x6f   : > { %1372 = vmatprep.subr.bf16.mxu1 %v1474_v6  ;;  %1037 = vmatprep.mubr.bf16.mxu1 %v904_v55 }
  0x70   : > { %838 = vmatprep.mubr.bf16.mxu0 %v705_v62 }
  0x71   : > { %1345 = vmatpush3.bf16.msra.mxu0 %v1475_v9 }
  0x72   : > { %1373 = vmatpush3.bf16.msra.mxu1 %v1476_v8  ;;  %1346 = vmatprep.subr.bf16.mxu0 %v1477_v11 }
  0x73   : > { %1374 = vmatprep.subr.bf16.mxu1 %v1478_v10 }
  0x75   : > { %1347 = vmatpush3.bf16.msra.mxu0 %v1479_v14 }
  0x76   : > { %1375 = vmatpush3.bf16.msra.mxu1 %v1480_v12  ;;  %1348 = vmatprep.subr.bf16.mxu0 %v1482_v18 }
  0x77   : > { %1376 = vmatprep.subr.bf16.mxu1 %v1483_v17 }
  0x79   : > { %1349 = vmatpush3.bf16.msra.mxu0 %v1485_v20 }
  0x7a   : > { %1377 = vmatpush3.bf16.msra.mxu1 %v1486_v19  ;;  %1350 = vmatprep.subr.bf16.mxu0 %v1487_v22 }
  0x7b   : > { %1378 = vmatprep.subr.bf16.mxu1 %v1488_v21 }
  0x7d   : > { %1351 = vmatpush3.bf16.msra.mxu0 %v1489_v24 }
  0x7e   : > { %1379 = vmatpush3.bf16.msra.mxu1 %v1490_v23  ;;  %1352 = vmatprep.subr.bf16.mxu0 %v1491_v26 }
  0x7f   : > { %1380 = vmatprep.subr.bf16.mxu1 %v1492_v25 }
  0x81   : > { %1353 = vmatpush3.bf16.msra.mxu0 %v1493_v35 }
  0x82   : > { %1381 = vmatpush3.bf16.msra.mxu1 %v1494_v27 }
  0x84   : > { %839 = vmatmul.mubr.bf16.vlgmr.msra.gmra.mrb[8].mxu0 %v688_v1 }
  0x85   : > { %1038 = vmatmul.mubr.bf16.vlgmr.msra.gmra.mrb[8].mxu1 %v901_v61  ;;  %846 = vmatprep.mubr.bf16.mxu0 %v704_v33 }
  0x86   : > { %1045 = vmatprep.mubr.bf16.mxu1 %v903_v46  ;;  %v1265_v46 = vld [vmem:[#allocation4] ss:$0 sm:$0xff] }
  0x8c   : > { %847 = vmatmul.mubr.bf16.gmra.mrb[12].mxu0 %v687_v0 }
  0x8d   : > { %1046 = vmatmul.mubr.bf16.gmra.mrb[12].mxu1 %v900_v57 }
 0x137   : > { %v1298_v8 = vpop.f32.mrb[0].mxu0 }
 0x138   : > { %v1326_v2 = vpop.f32.mrb[0].mxu1  ;;  %v1299_v9 = vpop.f32.mrb[1].mxu0 }
 0x139   : > { %v1327_v3 = vpop.f32.mrb[1].mxu1  ;;  %v1300_v10 = vadd.f32 %v1299_v9, %v1298_v8  ;;  %v1301_v11 = vpop.f32.mrb[2].mxu0 }
 0x13a   : > { %v1328_v4 = vadd.f32 %v1327_v3, %v1326_v2  ;;  %v1329_v5 = vpop.f32.mrb[2].mxu1  ;;  %v1302_v12 = vpop.f32.mrb[3].mxu0 }
 0x13b   : > { %v1330_v6 = vpop.f32.mrb[3].mxu1  ;;  %v1303_v14 = vadd.f32 %v1302_v12, %v1301_v11 }
 0x13c   : > { %v1331_v7 = vadd.f32 %v1330_v6, %v1329_v5  ;;  %v612_v13 = vadd.f32 %v1328_v4, %v1300_v10 }
 0x13e   : > { %v615_v15 = vadd.f32 %v1331_v7, %v1303_v14 }
 0x13f   : > { %v1304_v16 = vpop.f32.mrb[4].mxu0 }
 0x140   : > { %v1305_v17 = vpop.f32.mrb[5].mxu0  ;;  %v1332_v22 = vpop.f32.mrb[4].mxu1 }
 0x141   : > { %v1306_v18 = vadd.f32 %v1305_v17, %v1304_v16  ;;  %v1307_v19 = vpop.f32.mrb[6].mxu0  ;;  %v1333_v23 = vpop.f32.mrb[5].mxu1 }
 0x142   : > { %v1308_v20 = vpop.f32.mrb[7].mxu0  ;;  %v1334_v24 = vadd.f32 %v1333_v23, %v1332_v22  ;;  %v1335_v25 = vpop.f32.mrb[6].mxu1 }
 0x143   : > { %v1309_v21 = vadd.f32 %v1308_v20, %v1307_v19  ;;  %v1336_v26 = vpop.f32.mrb[7].mxu1 }
 0x144   : > { %v620_v27 = vadd.f32 %v1334_v24, %v1306_v18  ;;  %v1337_v28 = vadd.f32 %v1336_v26, %v1335_v25 }
 0x146   : > { %v623_v29 = vadd.f32 %v1337_v28, %v1309_v21 }
 0x157   : > { %v1354_v37 = vpop.f32.mrb[8].mxu0 }
 0x158   : > { %v1382_v30 = vpop.f32.mrb[8].mxu1  ;;  %v1355_v39 = vpop.f32.mrb[9].mxu0 }
 0x159   : > { %v1383_v31 = vpop.f32.mrb[9].mxu1  ;;  %v1356_v40 = vadd.f32 %v1355_v39, %v1354_v37  ;;  %v1357_v41 = vpop.f32.mrb[10].mxu0 }
 0x15a   : > { %v1384_v32 = vadd.f32 %v1383_v31, %v1382_v30  ;;  %v1385_v35 = vpop.f32.mrb[10].mxu1  ;;  %v1358_v42 = vpop.f32.mrb[11].mxu0 }
 0x15b   : > { %v1386_v36 = vpop.f32.mrb[11].mxu1  ;;  %v855_v43 = vadd.f32 %v1356_v40, %v612_v13  ;;  %v1359_v44 = vadd.f32 %v1358_v42, %v1357_v41 }
 0x15c   : > { %v1387_v38 = vadd.f32 %v1386_v36, %v1385_v35 }
 0x15d   : > { %v1054_v48 = vadd.f32 %v1384_v32, %v855_v43  ;;  %v856_v49 = vadd.f32 %v1359_v44, %v615_v15 }
 0x15f   : > { %v1065_v52 = vadd.f32 %v1265_v46, %v1054_v48  ;;  %v1055_v53 = vadd.f32 %v1387_v38, %v856_v49  ;;  %v1360_v54 = vpop.f32.mrb[12].mxu0 }
 0x160   : > { %v1388_v45 = vpop.f32.mrb[12].mxu1  ;;  %v1361_v56 = vpop.f32.mrb[13].mxu0 }
 0x161   : > { %v1389_v47 = vpop.f32.mrb[13].mxu1  ;;  %v1069_v57 = vmul.f32 0.2, %v1065_v52  ;;  %v1066_v33 = vadd.f32 %v1265_v46, %v1055_v53  ;;  %v1362_v58 = vadd.f32 %v1361_v56, %v1360_v54  ;;  %v1363_v59 = vpop.f32.mrb[14].mxu0 }
 0x162   : > { %v1390_v50 = vadd.f32 %v1389_v47, %v1388_v45  ;;  %v1391_v51 = vpop.f32.mrb[14].mxu1  ;;  %v1364_v60 = vpop.f32.mrb[15].mxu0 }
 0x163   : > { %v1392_v34 = vpop.f32.mrb[15].mxu1  ;;  %v1070_v61 = vmul.f32 0.2, %v1066_v33  ;;  %v857_v62 = vadd.f32 %v1362_v58, %v620_v27  ;;  %v1365_v63 = vadd.f32 %v1364_v60, %v1363_v59  ;;  %v1073_v0 = vmax.f32 %v1065_v52, %v1069_v57 }
 0x164   : > { %v1393_v55 = vadd.f32 %v1392_v34, %v1391_v51 }
 0x165   : > { %v1074_v1 = vmax.f32 %v1066_v33, %v1070_v61  ;;  %v1056_v2 = vadd.f32 %v1390_v50, %v857_v62  ;;  %v858_v3 = vadd.f32 %v1365_v63, %v623_v29 }
 0x167   : > { %v1280_v4 = vpack.c.bf16 %v1074_v1, %v1073_v0  ;;  %v1067_v5 = vadd.f32 %v1265_v46, %v1056_v2  ;;  %v1057_v6 = vadd.f32 %v1393_v55, %v858_v3 }
 0x169   : > { %1281 = vst [vmem:[%s203_s26] sm:$0xff] %v1280_v4   ;;  %v1071_v7 = vmul.f32 0.2, %v1067_v5  ;;  %v1068_v8 = vadd.f32 %v1265_v46, %v1057_v6 }
 0x16b   : > { %v1075_v9 = vmax.f32 %v1067_v5, %v1071_v7  ;;  %v1072_v10 = vmul.f32 0.2, %v1068_v8 }
 0x16d   : > { %v1275_v11 = vpack.c.bf16 %v1075_v9, %v1075_v9  ;;  %v1076_v12 = vmax.f32 %v1068_v8, %v1072_v10 }
 0x16f   : > { %1095 = vst [vmem:[%s203_s26 + $0x8] sm:$0xf] %v1275_v11  ;;  %v1276_v13 = vpack.c.bf16 %v1076_v12, %v1076_v12 }
 0x171   : > { %1096 = vst [vmem:[%s203_s26 + $0xc] sm:$0x1] %v1276_v13 }
 0x172 PF: > { %s15_s12 = sadd.s32 1, %s1571_s12  }
 0x173   : > { %p12_p2 = scmp.ge.s32.totalorder %s15_s12, 4  }
 0x175   :  { %14 = sbr.rel (!%p12_p2) target bundleno = 2 (0x2), region = 74 }
 0x17c   :  { %1119 = vsyncpa [#allocation3], 1 }
 0x17d   :  { %1121 = vsyncpa [#allocation3 + $0x1], 1 }
 0x17e   :  { %1122 = vsyncpa [#allocation5], 1 }

// kernel: _lambda_.7
= control target key start
LH: loop header
LB: loop body
LE: loop exit
PB: predicated region body
PF: predicated region fallthrough
CT: control target
= control target key end

     0   :  { %s3259_s12 = smov 0   ;;  %s4115_s0 = inlined_call_operand.vmem [shape: bf16[32,512], index: 0, kind: input, shape index: {}]   ;;  %s4116_s1 = inlined_call_operand.vmem [shape: bf16[4,512,256], index: 1, kind: input, shape index: {}]   ;;  %s4117_s2 = inlined_call_operand.vmem [shape: f32[1,256], index: 2, kind: input, shape index: {}]   ;;  %s4118_s3 = inlined_call_operand.vmem [shape: bf16[32,256], index: 3, kind: output, shape index: {}]  }
   0x1 LB: > { %s2310_s13 = sadd.s32 4294967295, %s3237_s12   ;;  %p2314_p0 = scmp.ge.s32.totalorder %s3237_s12, 1  ;;  %s3237_s12 = sphi %s3259_s12, %s13_s12  }
   0x2   : > { %p139_p1 = scmp.lt.s32.totalorder %s3237_s12, 3 }
   0x4   : > { %p140_p2 = pnand %p2314_p0, %p139_p1 }
   0x5   : > { %v2829_v0 = vld [vmem:[%s4116_s1 + $0x204] ss:$8 sps:$4 sm:$0xff] (!%p140_p2)   ;;  %v2833_v2 = vld [vmem:[%s4116_s1 + $0x200] ss:$8 sps:$4 sm:$0xff] (!%p140_p2)   ;;  %v2835_v4 = vld [vmem:[%s4116_s1 + $0x214] ss:$8 sps:$4 sm:$0xff] (!%p140_p2)  }
   0x6   : > { %143 = sbr.rel (%p140_p2) target bundleno = 489 (0x1e9), region = 32  ;;  %v2831_v1 = vld [vmem:[%s4116_s1 + $0x404] ss:$8 sps:$4 sm:$0xff] (!%p140_p2)   ;;  %682 = vmatprep.subr.bf16.mxu1 (!%p140_p2), %v2829_v0  ;;  %v2834_v3 = vld [vmem:[%s4116_s1 + $0x400] ss:$8 sps:$4 sm:$0xff] (!%p140_p2)   ;;  %s2315_s24 = sshll.u32 (!%p140_p2), %s2310_s13, 1 }
   0x7   : > { %1629 = vmatprep.subr.bf16.mxu0 (!%p140_p2), %v2831_v1  ;;  %683 = vmatpush1.bf16.msra.mxu1 (!%p140_p2), %v2833_v2  ;;  %v2837_v5 = vld [vmem:[%s4116_s1 + $0x414] ss:$8 sps:$4 sm:$0xff] (!%p140_p2)   ;;  %v2839_v6 = vld [vmem:[%s4116_s1 + $0x210] ss:$8 sps:$4 sm:$0xff] (!%p140_p2)   ;;  %v2841_v8 = vld [vmem:[%s4116_s1 + $0x224] ss:$8 sps:$4 sm:$0xff] (!%p140_p2)  }
   0x8   : > { %1630 = vmatpush1.bf16.msra.mxu0 (!%p140_p2), %v2834_v3  ;;  %684 = vmatprep.subr.bf16.mxu1 (!%p140_p2), %v2835_v4  ;;  %v2840_v7 = vld [vmem:[%s4116_s1 + $0x410] ss:$8 sps:$4 sm:$0xff] (!%p140_p2)   ;;  %v2843_v9 = vld [vmem:[%s4116_s1 + $0x424] ss:$8 sps:$4 sm:$0xff] (!%p140_p2)   ;;  %v2845_v10 = vld [vmem:[%s4116_s1 + $0x220] ss:$8 sps:$4 sm:$0xff] (!%p140_p2)  }
   0x9   : > { %1631 = vmatprep.subr.bf16.mxu0 (!%p140_p2), %v2837_v5  ;;  %v2846_v11 = vld [vmem:[%s4116_s1 + $0x420] ss:$8 sps:$4 sm:$0xff] (!%p140_p2)   ;;  %v2847_v12 = vld [vmem:[%s4116_s1 + $0x234] ss:$8 sps:$4 sm:$0xff] (!%p140_p2)   ;;  %v2851_v14 = vld [vmem:[%s4116_s1 + $0x230] ss:$8 sps:$4 sm:$0xff] (!%p140_p2)  }
   0xa   : > { %v2849_v13 = vld [vmem:[%s4116_s1 + $0x434] ss:$8 sps:$4 sm:$0xff] (!%p140_p2)   ;;  %v2852_v15 = vld [vmem:[%s4116_s1 + $0x430] ss:$8 sps:$4 sm:$0xff] (!%p140_p2)   ;;  %v2853_v16 = vld [vmem:[%s4116_s1 + $0x244] ss:$8 sps:$4 sm:$0xff] (!%p140_p2)  }
   0xb   : > { %685 = vmatpush1.bf16.msra.mxu1 (!%p140_p2), %v2839_v6  ;;  %v2855_v17 = vld [vmem:[%s4116_s1 + $0x444] ss:$8 sps:$4 sm:$0xff] (!%p140_p2)   ;;  %v2857_v18 = vld [vmem:[%s4116_s1 + $0x240] ss:$8 sps:$4 sm:$0xff] (!%p140_p2)   ;;  %v2859_v20 = vld [vmem:[%s4116_s1 + $0x254] ss:$8 sps:$4 sm:$0xff] (!%p140_p2)  }
   0xc   : > { %1632 = vmatpush1.bf16.msra.mxu0 (!%p140_p2), %v2840_v7  ;;  %686 = vmatprep.subr.bf16.mxu1 (!%p140_p2), %v2841_v8  ;;  %v2858_v19 = vld [vmem:[%s4116_s1 + $0x440] ss:$8 sps:$4 sm:$0xff] (!%p140_p2)   ;;  %v2861_v21 = vld [vmem:[%s4116_s1 + $0x454] ss:$8 sps:$4 sm:$0xff] (!%p140_p2)   ;;  %v2863_v22 = vld [vmem:[%s4116_s1 + $0x250] ss:$8 sps:$4 sm:$0xff] (!%p140_p2)  }
   0xd   : > { %1633 = vmatprep.subr.bf16.mxu0 %v2843_v9  ;;  %v2864_v23 = vld [vmem:[%s4116_s1 + $0x450] ss:$8 sps:$4 sm:$0xff]   ;;  %v2865_v24 = vld [vmem:[%s4116_s1 + $0x264] ss:$8 sps:$4 sm:$0xff]   ;;  %v2869_v26 = vld [vmem:[%s4116_s1 + $0x260] ss:$8 sps:$4 sm:$0xff]  }
   0xe   : > { %v2867_v25 = vld [vmem:[%s4116_s1 + $0x464] ss:$8 sps:$4 sm:$0xff]   ;;  %v2870_v27 = vld [vmem:[%s4116_s1 + $0x460] ss:$8 sps:$4 sm:$0xff]   ;;  %v2871_v28 = vld [vmem:[%s4116_s1 + $0x274] ss:$8 sps:$4 sm:$0xff]  }
   0xf   : > { %687 = vmatpush1.bf16.msra.mxu1 %v2845_v10  ;;  %v2873_v29 = vld [vmem:[%s4116_s1 + $0x474] ss:$8 sps:$4 sm:$0xff]   ;;  %v2875_v30 = vld [vmem:[%s4116_s1 + $0x270] ss:$8 sps:$4 sm:$0xff]   ;;  %v2877_v32 = vld [vmem:[%s4116_s1 + $0x284] ss:$8 sps:$4 sm:$0xff]  }
  0x10   : > { %1634 = vmatpush1.bf16.msra.mxu0 %v2846_v11  ;;  %688 = vmatprep.subr.bf16.mxu1 %v2847_v12  ;;  %v2876_v31 = vld [vmem:[%s4116_s1 + $0x470] ss:$8 sps:$4 sm:$0xff]   ;;  %p166_p3 = scmp.lt.s32.totalorder %s2315_s24, 3  ;;  %v2879_v33 = vld [vmem:[%s4116_s1 + $0x484] ss:$8 sps:$4 sm:$0xff]  }
  0x11   : > { %1635 = vmatprep.subr.bf16.mxu0 %v2849_v13  ;;  %v2881_v34 = vld [vmem:[%s4116_s1 + $0x280] ss:$8 sps:$4 sm:$0xff]   ;;  %v2883_v36 = vld [vmem:[%s4116_s1 + $0x294] ss:$8 sps:$4 sm:$0xff]   ;;  %v2887_v38 = vld [vmem:[%s4116_s1 + $0x290] ss:$8 sps:$4 sm:$0xff]  }
  0x12   : > { %v2882_v35 = vld [vmem:[%s4116_s1 + $0x480] ss:$8 sps:$4 sm:$0xff]   ;;  %s4120_s24 = smov (!%p166_p3, %s2315_s24), 3  ;;  %v2885_v37 = vld [vmem:[%s4116_s1 + $0x494] ss:$8 sps:$4 sm:$0xff]  }
  0x13   : > { %689 = vmatpush1.bf16.msra.mxu1 %v2851_v14  ;;  %v2888_v39 = vld [vmem:[%s4116_s1 + $0x490] ss:$8 sps:$4 sm:$0xff]   ;;  %v2889_v40 = vld [vmem:[%s4116_s1 + $0x2a4] ss:$8 sps:$4 sm:$0xff]   ;;  %s2789_s21 = sshll.u32 %s4120_s24, 4  ;;  %s2790_s19 = sshll.u32 %s4120_s24, 3 }
  0x14   : > { %1636 = vmatpush1.bf16.msra.mxu0 %v2852_v15  ;;  %690 = vmatprep.subr.bf16.mxu1 %v2853_v16  ;;  %v2891_v41 = vld [vmem:[%s4116_s1 + $0x4a4] ss:$8 sps:$4 sm:$0xff]   ;;  %v2893_v42 = vld [vmem:[%s4116_s1 + $0x2a0] ss:$8 sps:$4 sm:$0xff]   ;;  %s3407_s4 = scalar_lea.vmem %s4115_s0, %s2789_s21  ;;  %v2895_v44 = vld [vmem:[%s4116_s1 + $0x2b4] ss:$8 sps:$4 sm:$0xff]   ;;  %s177_s22 = scalar_lea.vmem %s4118_s3, %s2790_s19 }
  0x15   : > { %1637 = vmatprep.subr.bf16.mxu0 %v2855_v17  ;;  %v2894_v43 = vld [vmem:[%s4116_s1 + $0x4a0] ss:$8 sps:$4 sm:$0xff]   ;;  %v2897_v45 = vld [vmem:[%s4116_s1 + $0x4b4] ss:$8 sps:$4 sm:$0xff]   ;;  %v2899_v46 = vld [vmem:[%s4116_s1 + $0x2b0] ss:$8 sps:$4 sm:$0xff]  }
  0x16   : > { %v2900_v47 = vld [vmem:[%s4116_s1 + $0x4b0] ss:$8 sps:$4 sm:$0xff]   ;;  %v3422_v48 = vld [vmem:[%s3407_s4] sm:$0xff]  ;;  %v2907_v60 = vld [vmem:[%s4116_s1 + $0x2d4] ss:$8 sps:$4 sm:$0xff]  }
  0x17   : > { %691 = vmatpush1.bf16.msra.mxu1 %v2857_v18  ;;  %v247_v49 = vld [vmem:[%s3407_s4 + $0x10] sm:$0x77]  ;;  %v2901_v50 = vld [vmem:[%s4116_s1 + $0x2c4] ss:$8 sps:$4 sm:$0xff]   ;;  %v2905_v55 = vld [vmem:[%s4116_s1 + $0x2c0] ss:$8 sps:$4 sm:$0xff]  }
  0x18   : > { %1638 = vmatpush1.bf16.msra.mxu0 %v2858_v19  ;;  %692 = vmatprep.subr.bf16.mxu1 %v2859_v20  ;;  %v2903_v51 = vld [vmem:[%s4116_s1 + $0x4c4] ss:$8 sps:$4 sm:$0xff]   ;;  %v2386_v52 = vcombine.high %v3422_v48, %v247_v49  ;;  %v3434_v54 = vld [vmem:[%s3407_s4 + $0x10] sm:$0xff]  ;;  %v2906_v59 = vld [vmem:[%s4116_s1 + $0x4c0] ss:$8 sps:$4 sm:$0xff]   ;;  %v2385_v6 = vcombine.low %v3422_v48, %v247_v49 }
  0x19   : > { %1639 = vmatprep.subr.bf16.mxu0 %v2861_v21  ;;  %v1188_v53 = vld [vmem:[%s3407_s4] sm:$0xee]  ;;  %v2909_v0 = vld [vmem:[%s4116_s1 + $0x4d4] ss:$8 sps:$4 sm:$0xff]   ;;  %v2911_v4 = vld [vmem:[%s4116_s1 + $0x2d0] ss:$8 sps:$4 sm:$0xff]  }
  0x1a   : > { %v338_v56 = vshrl.u32 %v2386_v52, 16  ;;  %v340_v57 = vshll.u32 %v2386_v52, 16  ;;  %v2586_v58 = vcombine.high %v1188_v53, %v3434_v54  ;;  %v2912_v5 = vld [vmem:[%s4116_s1 + $0x4d0] ss:$8 sps:$4 sm:$0xff]   ;;  %v2585_v7 = vcombine.low %v1188_v53, %v3434_v54  ;;  %v2913_v8 = vld [vmem:[%s4116_s1 + $0x2e4] ss:$8 sps:$4 sm:$0xff]  }
  0x1b   : > { %693 = vmatpush1.bf16.msra.mxu1 %v2863_v22  ;;  %v2915_v10 = vld [vmem:[%s4116_s1 + $0x4e4] ss:$8 sps:$4 sm:$0xff]   ;;  %v2917_v11 = vld [vmem:[%s4116_s1 + $0x2e0] ss:$8 sps:$4 sm:$0xff]   ;;  %v333_v13 = vshll.u32 %v2385_v6, 16  ;;  %v331_v20 = vshrl.u32 %v2385_v6, 16 }
  0x1c   : > { %1640 = vmatpush1.bf16.msra.mxu0 %v2864_v23  ;;  %694 = vmatprep.subr.bf16.mxu1 %v2865_v24  ;;  %v342_v61 = vrot.slane %v340_v57, 1  ;;  %v1282_v62 = vshrl.u32 %v2586_v58, 16  ;;  %v1285_v63 = vshll.u32 %v2586_v58, 16  ;;  %v2918_v12 = vld [vmem:[%s4116_s1 + $0x4e0] ss:$8 sps:$4 sm:$0xff]   ;;  %v1274_v14 = vshrl.u32 %v2585_v7, 16 }
  0x1d   : > { %1641 = vmatprep.subr.bf16.mxu0 %v2867_v25  ;;  %v1277_v15 = vshll.u32 %v2585_v7, 16  ;;  %v2919_v16 = vld [vmem:[%s4116_s1 + $0x2f4] ss:$8 sps:$4 sm:$0xff]   ;;  %v2923_v18 = vld [vmem:[%s4116_s1 + $0x2f0] ss:$8 sps:$4 sm:$0xff]   ;;  %v335_v21 = vrot.slane %v333_v13, 1 }
  0x1e   : > { %v343_v1 = vor.u32 %v342_v61, %v338_v56  ;;  %v1284_v2 = vrot.slane %v1282_v62, 1  ;;  %v1287_v3 = vrot.slane %v1285_v63, 2  ;;  %v2921_v17 = vld [vmem:[%s4116_s1 + $0x4f4] ss:$8 sps:$4 sm:$0xff]   ;;  %v2924_v19 = vld [vmem:[%s4116_s1 + $0x4f0] ss:$8 sps:$4 sm:$0xff]  }
  0x1f   : > { %695 = vmatpush1.bf16.msra.mxu1 %v2869_v26  ;;  %v1276_v22 = vrot.slane %v1274_v14, 1  ;;  %v1279_v23 = vrot.slane %v1277_v15, 2  ;;  %v2929_v24 = vld [vmem:[%s4116_s1 + $0x304] ss:$8 sps:$4 sm:$0xff]   ;;  %v2927_v26 = vld [vmem:[%s4116_s1 + $0x300] ss:$8 sps:$4 sm:$0xff]  }
  0x20   : > { %1642 = vmatpush1.bf16.msra.mxu0 %v2870_v27  ;;  %696 = vmatprep.subr.bf16.mxu1 %v2871_v28  ;;  %v1288_v9 = vor.u32 %v1287_v3, %v1284_v2  ;;  %v2934_v25 = vld [vmem:[%s4116_s1 + $0x504] ss:$8 sps:$4 sm:$0xff]   ;;  %v2932_v27 = vld [vmem:[%s4116_s1 + $0x500] ss:$8 sps:$4 sm:$0xff]   ;;  %v336_v28 = vor.u32 %v335_v21, %v331_v20  ;;  %v2959_v49 = vld [vmem:[%s4116_s1 + $0x350] ss:$8 sps:$4 sm:$0xff]  }
  0x21   : > { %1643 = vmatprep.subr.bf16.mxu0 %v2873_v29  ;;  %714 = vmatprep.mubr.bf16.mxu1 %v343_v1  ;;  %v1280_v29 = vor.u32 %v1279_v23, %v1276_v22  ;;  %v2970_v52 = vld [vmem:[%s4116_s1 + $0x564] ss:$8 sps:$4 sm:$0xff]   ;;  %v2965_v53 = vld [vmem:[%s4116_s1 + $0x360] ss:$8 sps:$4 sm:$0xff]   ;;  %v3569_v57 = vld [vmem:[%s3407_s4 + $0x18] sm:$0x77] }
  0x22   : > { %1661 = vmatprep.mubr.bf16.mxu0 %v1288_v9  ;;  %v3566_v56 = vld [vmem:[%s3407_s4 + $0x8] sm:$0xff]  ;;  %v2973_v58 = vld [vmem:[%s4116_s1 + $0x374] ss:$8 sps:$4 sm:$0xff]   ;;  %v2971_v61 = vld [vmem:[%s4116_s1 + $0x370] ss:$8 sps:$4 sm:$0xff]  }
  0x23   : > { %697 = vmatpush1.bf16.msra.mxu1 %v2875_v30  ;;  %v2937_v30 = vld [vmem:[%s4116_s1 + $0x314] ss:$8 sps:$4 sm:$0xff]   ;;  %v3583_v62 = vld [vmem:[%s3407_s4 + $0x8] sm:$0xee] }
  0x24   : > { %1644 = vmatpush1.bf16.msra.mxu0 %v2876_v31  ;;  %698 = vmatprep.subr.bf16.mxu1 %v2877_v32  ;;  %v2940_v31 = vld [vmem:[%s4116_s1 + $0x514] ss:$8 sps:$4 sm:$0xff]   ;;  %v2935_v32 = vld [vmem:[%s4116_s1 + $0x310] ss:$8 sps:$4 sm:$0xff]   ;;  %v2980_v13 = vld [vmem:[%s4116_s1 + $0x580] ss:$8 sps:$4 sm:$0xff]  }
  0x25   : > { %1645 = vmatprep.subr.bf16.mxu0 %v2879_v33  ;;  %v2938_v33 = vld [vmem:[%s4116_s1 + $0x510] ss:$8 sps:$4 sm:$0xff]   ;;  %v2985_v14 = vld [vmem:[%s4116_s1 + $0x394] ss:$8 sps:$4 sm:$0xff]   ;;  %v2994_v20 = vld [vmem:[%s4116_s1 + $0x5a4] ss:$8 sps:$4 sm:$0xff]  }
  0x26   : > { %v3586_v63 = vld [vmem:[%s3407_s4 + $0x18] sm:$0xff]  ;;  %v2989_v21 = vld [vmem:[%s4116_s1 + $0x3a0] ss:$8 sps:$4 sm:$0xff]  }
  0x27   : > { %699 = vmatpush1.bf16.msra.mxu1 %v2881_v34  ;;  %v2943_v34 = vld [vmem:[%s4116_s1 + $0x324] ss:$8 sps:$4 sm:$0xff]   ;;  %v2588_v3 = vcombine.high %v3583_v62, %v3586_v63  ;;  %v2988_v15 = vld [vmem:[%s4116_s1 + $0x594] ss:$8 sps:$4 sm:$0xff]   ;;  %v2992_v22 = vld [vmem:[%s4116_s1 + $0x5a0] ss:$8 sps:$4 sm:$0xff]  }
  0x28   : > { %1646 = vmatpush1.bf16.msra.mxu0 %v2882_v35  ;;  %700 = vmatprep.subr.bf16.mxu1 %v2883_v36  ;;  %v2946_v35 = vld [vmem:[%s4116_s1 + $0x524] ss:$8 sps:$4 sm:$0xff]   ;;  %v2941_v36 = vld [vmem:[%s4116_s1 + $0x320] ss:$8 sps:$4 sm:$0xff]   ;;  %v2997_v23 = vld [vmem:[%s4116_s1 + $0x3b4] ss:$8 sps:$4 sm:$0xff]  }
  0x29   : > { %1647 = vmatprep.subr.bf16.mxu0 %v2885_v37  ;;  %v2944_v37 = vld [vmem:[%s4116_s1 + $0x520] ss:$8 sps:$4 sm:$0xff]   ;;  %v1298_v7 = vshrl.u32 %v2588_v3, 16 }
  0x2b   : > { %701 = vmatpush1.bf16.msra.mxu1 %v2887_v38  ;;  %v2949_v38 = vld [vmem:[%s4116_s1 + $0x334] ss:$8 sps:$4 sm:$0xff]  }
  0x2c   : > { %1648 = vmatpush1.bf16.msra.mxu0 %v2888_v39  ;;  %702 = vmatprep.subr.bf16.mxu1 %v2889_v40  ;;  %v2952_v39 = vld [vmem:[%s4116_s1 + $0x534] ss:$8 sps:$4 sm:$0xff]   ;;  %v2947_v40 = vld [vmem:[%s4116_s1 + $0x330] ss:$8 sps:$4 sm:$0xff]  }
  0x2d   : > { %1649 = vmatprep.subr.bf16.mxu0 %v2891_v41  ;;  %v2950_v41 = vld [vmem:[%s4116_s1 + $0x530] ss:$8 sps:$4 sm:$0xff]  }
  0x2f   : > { %703 = vmatpush1.bf16.msra.mxu1 %v2893_v42  ;;  %v2955_v42 = vld [vmem:[%s4116_s1 + $0x344] ss:$8 sps:$4 sm:$0xff]  }
  0x30   : > { %1650 = vmatpush1.bf16.msra.mxu0 %v2894_v43  ;;  %704 = vmatprep.subr.bf16.mxu1 %v2895_v44  ;;  %v2958_v43 = vld [vmem:[%s4116_s1 + $0x544] ss:$8 sps:$4 sm:$0xff]   ;;  %v2953_v44 = vld [vmem:[%s4116_s1 + $0x340] ss:$8 sps:$4 sm:$0xff]  }
  0x31   : > { %1651 = vmatprep.subr.bf16.mxu0 %v2897_v45  ;;  %v2956_v45 = vld [vmem:[%s4116_s1 + $0x540] ss:$8 sps:$4 sm:$0xff]  }
  0x33   : > { %705 = vmatpush1.bf16.msra.mxu1 %v2899_v46  ;;  %v2961_v46 = vld [vmem:[%s4116_s1 + $0x354] ss:$8 sps:$4 sm:$0xff]  }
  0x34   : > { %1652 = vmatpush1.bf16.msra.mxu0 %v2900_v47  ;;  %706 = vmatprep.subr.bf16.mxu1 %v2901_v50  ;;  %v2964_v47 = vld [vmem:[%s4116_s1 + $0x554] ss:$8 sps:$4 sm:$0xff]   ;;  %v2962_v50 = vld [vmem:[%s4116_s1 + $0x550] ss:$8 sps:$4 sm:$0xff]  }
  0x35   : > { %1653 = vmatprep.subr.bf16.mxu0 %v2903_v51  ;;  %v2967_v51 = vld [vmem:[%s4116_s1 + $0x364] ss:$8 sps:$4 sm:$0xff]  }
  0x37   : > { %707 = vmatpush1.bf16.msra.mxu1 %v2905_v55  ;;  %v2968_v55 = vld [vmem:[%s4116_s1 + $0x560] ss:$8 sps:$4 sm:$0xff]  }
  0x38   : > { %1654 = vmatpush1.bf16.msra.mxu0 %v2906_v59  ;;  %708 = vmatprep.subr.bf16.mxu1 %v2907_v60  ;;  %v2976_v59 = vld [vmem:[%s4116_s1 + $0x574] ss:$8 sps:$4 sm:$0xff]   ;;  %v2388_v60 = vcombine.high %v3566_v56, %v3569_v57 }
  0x39   : > { %1655 = vmatprep.subr.bf16.mxu0 %v2909_v0  ;;  %v2974_v0 = vld [vmem:[%s4116_s1 + $0x570] ss:$8 sps:$4 sm:$0xff]  }
  0x3a   : > { %v352_v1 = vshrl.u32 %v2388_v60, 16  ;;  %v354_v2 = vshll.u32 %v2388_v60, 16  ;;  %v3032_v60 = vld [vmem:[%s4116_s1 + $0x600] ss:$8 sps:$4 sm:$0xff]  }
  0x3b   : > { %709 = vmatpush1.bf16.msra.mxu1 %v2911_v4  ;;  %v2979_v4 = vld [vmem:[%s4116_s1 + $0x384] ss:$8 sps:$4 sm:$0xff]  }
  0x3c   : > { %1656 = vmatpush1.bf16.msra.mxu0 %v2912_v5  ;;  %710 = vmatprep.subr.bf16.mxu1 %v2913_v8  ;;  %v2982_v5 = vld [vmem:[%s4116_s1 + $0x584] ss:$8 sps:$4 sm:$0xff]   ;;  %v356_v6 = vrot.slane %v354_v2, 1  ;;  %v1301_v8 = vshll.u32 %v2588_v3, 16 }
  0x3d   : > { %1657 = vmatprep.subr.bf16.mxu0 %v2915_v10  ;;  %v1300_v10 = vrot.slane %v1298_v7, 1  ;;  %v3043_v2 = vld [vmem:[%s4116_s1 + $0x24] ss:$8 sps:$4 sm:$0xff]   ;;  %v3041_v7 = vld [vmem:[%s4116_s1 + $0x20] ss:$8 sps:$4 sm:$0xff]  }
  0x3e   : > { %v357_v9 = vor.u32 %v356_v6, %v352_v1  ;;  %v3038_v1 = vld [vmem:[%s4116_s1 + $0x610] ss:$8 sps:$4 sm:$0xff]   ;;  %v3046_v3 = vld [vmem:[%s4116_s1 + $0x624] ss:$8 sps:$4 sm:$0xff]  }
  0x3f   : > { %711 = vmatpush1.bf16.msra.mxu1 %v2917_v11  ;;  %v1303_v11 = vrot.slane %v1301_v8, 2  ;;  %v3729_v6 = vld [vmem:[%s3407_s4] sm:$0xcc] }
  0x40   : > { %1658 = vmatpush1.bf16.msra.mxu0 %v2918_v12  ;;  %712 = vmatprep.subr.bf16.mxu1 %v2919_v16  ;;  %v2977_v12 = vld [vmem:[%s4116_s1 + $0x380] ss:$8 sps:$4 sm:$0xff]   ;;  %v2718_v8 = vcombine.high %v3729_v6, %v3434_v54  ;;  %v3047_v54 = vld [vmem:[%s4116_s1 + $0x30] ss:$8 sps:$4 sm:$0xff]  }
  0x41   : > { %1659 = vmatprep.subr.bf16.mxu0 %v2921_v17  ;;  %v1304_v16 = vor.u32 %v1303_v11, %v1300_v10  ;;  %v2983_v17 = vld [vmem:[%s4116_s1 + $0x390] ss:$8 sps:$4 sm:$0xff]   ;;  %v3052_v10 = vld [vmem:[%s4116_s1 + $0x634] ss:$8 sps:$4 sm:$0xff]  }
  0x42   : > { %v1797_v11 = vrot.slane %v2718_v8, 2  ;;  %v3230_v8 = vld [vmem:[%s3407_s4] sm:$0xff] }
  0x43   : > { %713 = vmatpush1.bf16.msra.mxu1 %v2923_v18  ;;  %v2986_v18 = vld [vmem:[%s4116_s1 + $0x590] ss:$8 sps:$4 sm:$0xff]  }
  0x44   : > { %1660 = vmatpush1.bf16.msra.mxu0 %v2924_v19  ;;  %725 = vmatprep.subr.bf16.mxu1 %v2929_v24  ;;  %v2991_v19 = vld [vmem:[%s4116_s1 + $0x3a4] ss:$8 sps:$4 sm:$0xff]   ;;  %v3000_v24 = vld [vmem:[%s4116_s1 + $0x5b4] ss:$8 sps:$4 sm:$0xff]  }
  0x45   : > { %1672 = vmatprep.subr.bf16.mxu0 %v2934_v25  ;;  %v2995_v25 = vld [vmem:[%s4116_s1 + $0x3b0] ss:$8 sps:$4 sm:$0xff]  }
  0x46   : > { %715 = vmatmul.mubr.bf16.vlgmr.msra.gmra.mrb[0].mxu1 %v336_v28  ;;  %v3006_v28 = vld [vmem:[%s4116_s1 + $0x5c4] ss:$8 sps:$4 sm:$0xff]  }
  0x47   : > { %1662 = vmatmul.mubr.bf16.vlgmr.msra.gmra.mrb[0].mxu0 %v1280_v29  ;;  %726 = vmatpush1.bf16.msra.mxu1 %v2927_v26  ;;  %v2998_v26 = vld [vmem:[%s4116_s1 + $0x5b0] ss:$8 sps:$4 sm:$0xff]   ;;  %v3001_v29 = vld [vmem:[%s4116_s1 + $0x3c0] ss:$8 sps:$4 sm:$0xff]  }
  0x48   : > { %1673 = vmatpush1.bf16.msra.mxu0 %v2932_v27  ;;  %727 = vmatprep.subr.bf16.mxu1 %v2937_v30  ;;  %v3003_v27 = vld [vmem:[%s4116_s1 + $0x3c4] ss:$8 sps:$4 sm:$0xff]   ;;  %v3004_v30 = vld [vmem:[%s4116_s1 + $0x5c0] ss:$8 sps:$4 sm:$0xff]  }
  0x49   : > { %1674 = vmatprep.subr.bf16.mxu0 %v2940_v31  ;;  %757 = vmatprep.mubr.bf16.mxu1 %v357_v9  ;;  %v3009_v31 = vld [vmem:[%s4116_s1 + $0x3d4] ss:$8 sps:$4 sm:$0xff]   ;;  %v3044_v9 = vld [vmem:[%s4116_s1 + $0x620] ss:$8 sps:$4 sm:$0xff]  }
  0x4a   : > { %1704 = vmatprep.mubr.bf16.mxu0 %v1304_v16  ;;  %v3056_v16 = vld [vmem:[%s4116_s1 + $0x640] ss:$8 sps:$4 sm:$0xff]  }
  0x4b   : > { %728 = vmatpush1.bf16.msra.mxu1 %v2935_v32  ;;  %v3012_v32 = vld [vmem:[%s4116_s1 + $0x5d4] ss:$8 sps:$4 sm:$0xff]  }
  0x4c   : > { %1675 = vmatpush1.bf16.msra.mxu0 %v2938_v33  ;;  %729 = vmatprep.subr.bf16.mxu1 %v2943_v34  ;;  %v3007_v33 = vld [vmem:[%s4116_s1 + $0x3d0] ss:$8 sps:$4 sm:$0xff]   ;;  %v2387_v34 = vcombine.low %v3566_v56, %v3569_v57  ;;  %v3027_v57 = vld [vmem:[%s4116_s1] ss:$8 sps:$4 sm:$0xff]  }
  0x4d   : > { %1676 = vmatprep.subr.bf16.mxu0 %v2946_v35  ;;  %v2587_v35 = vcombine.low %v3583_v62, %v3586_v63  ;;  %v3040_v62 = vld [vmem:[%s4116_s1 + $0x614] ss:$8 sps:$4 sm:$0xff]  }
  0x4f   : > { %730 = vmatpush1.bf16.msra.mxu1 %v2941_v36  ;;  %v3010_v36 = vld [vmem:[%s4116_s1 + $0x5d0] ss:$8 sps:$4 sm:$0xff]  }
  0x50   : > { %1677 = vmatpush1.bf16.msra.mxu0 %v2944_v37  ;;  %731 = vmatprep.subr.bf16.mxu1 %v2949_v38  ;;  %v3015_v37 = vld [vmem:[%s4116_s1 + $0x3e4] ss:$8 sps:$4 sm:$0xff]  }
  0x51   : > { %1678 = vmatprep.subr.bf16.mxu0 %v2952_v39  ;;  %v3018_v38 = vld [vmem:[%s4116_s1 + $0x5e4] ss:$8 sps:$4 sm:$0xff]   ;;  %v3013_v39 = vld [vmem:[%s4116_s1 + $0x3e0] ss:$8 sps:$4 sm:$0xff]  }
  0x53   : > { %732 = vmatpush1.bf16.msra.mxu1 %v2947_v40  ;;  %v347_v40 = vshll.u32 %v2387_v34, 16 }
  0x54   : > { %1679 = vmatpush1.bf16.msra.mxu0 %v2950_v41  ;;  %733 = vmatprep.subr.bf16.mxu1 %v2955_v42  ;;  %v1290_v41 = vshrl.u32 %v2587_v35, 16  ;;  %v1293_v42 = vshll.u32 %v2587_v35, 16  ;;  %v3083_v35 = vld [vmem:[%s4116_s1 + $0x90] ss:$8 sps:$4 sm:$0xff]  }
  0x55   : > { %1680 = vmatprep.subr.bf16.mxu0 %v2958_v43  ;;  %v3016_v43 = vld [vmem:[%s4116_s1 + $0x5e0] ss:$8 sps:$4 sm:$0xff]  }
  0x57   : > { %734 = vmatpush1.bf16.msra.mxu1 %v2953_v44  ;;  %v3021_v44 = vld [vmem:[%s4116_s1 + $0x3f4] ss:$8 sps:$4 sm:$0xff]  }
  0x58   : > { %1681 = vmatpush1.bf16.msra.mxu0 %v2956_v45  ;;  %735 = vmatprep.subr.bf16.mxu1 %v2961_v46  ;;  %v3024_v45 = vld [vmem:[%s4116_s1 + $0x5f4] ss:$8 sps:$4 sm:$0xff]   ;;  %v3019_v46 = vld [vmem:[%s4116_s1 + $0x3f0] ss:$8 sps:$4 sm:$0xff]  }
  0x59   : > { %1682 = vmatprep.subr.bf16.mxu0 %v2964_v47  ;;  %v345_v47 = vshrl.u32 %v2387_v34, 16  ;;  %v3088_v34 = vld [vmem:[%s4116_s1 + $0x694] ss:$8 sps:$4 sm:$0xff]  }
  0x5b   : > { %736 = vmatpush1.bf16.msra.mxu1 %v2959_v49  ;;  %v349_v49 = vrot.slane %v347_v40, 1  ;;  %v3092_v40 = vld [vmem:[%s4116_s1 + $0x6a0] ss:$8 sps:$4 sm:$0xff]  }
  0x5c   : > { %1683 = vmatpush1.bf16.msra.mxu0 %v2962_v50  ;;  %737 = vmatprep.subr.bf16.mxu1 %v2967_v51  ;;  %v1292_v50 = vrot.slane %v1290_v41, 1  ;;  %v1295_v51 = vrot.slane %v1293_v42, 2  ;;  %v3097_v41 = vld [vmem:[%s4116_s1 + $0xb4] ss:$8 sps:$4 sm:$0xff]  }
  0x5d   : > { %1684 = vmatprep.subr.bf16.mxu0 %v2970_v52  ;;  %v3022_v52 = vld [vmem:[%s4116_s1 + $0x5f0] ss:$8 sps:$4 sm:$0xff]   ;;  %v3100_v42 = vld [vmem:[%s4116_s1 + $0x6b4] ss:$8 sps:$4 sm:$0xff]  }
  0x5f   : > { %738 = vmatpush1.bf16.msra.mxu1 %v2965_v53  ;;  %v3029_v53 = vld [vmem:[%s4116_s1 + $0x4] ss:$8 sps:$4 sm:$0xff]  }
  0x60   : > { %1685 = vmatpush1.bf16.msra.mxu0 %v2968_v55  ;;  %739 = vmatprep.subr.bf16.mxu1 %v2973_v58  ;;  %v3034_v55 = vld [vmem:[%s4116_s1 + $0x604] ss:$8 sps:$4 sm:$0xff]   ;;  %v350_v58 = vor.u32 %v349_v49, %v345_v47  ;;  %v3101_v47 = vld [vmem:[%s4116_s1 + $0xc0] ss:$8 sps:$4 sm:$0xff]  }
  0x61   : > { %1686 = vmatprep.subr.bf16.mxu0 %v2976_v59  ;;  %v1296_v59 = vor.u32 %v1295_v51, %v1292_v50  ;;  %v3104_v49 = vld [vmem:[%s4116_s1 + $0x6c0] ss:$8 sps:$4 sm:$0xff]   ;;  %v3109_v50 = vld [vmem:[%s4116_s1 + $0xd4] ss:$8 sps:$4 sm:$0xff]  }
  0x62   : > { %v3112_v51 = vld [vmem:[%s4116_s1 + $0x6d4] ss:$8 sps:$4 sm:$0xff]  }
  0x63   : > { %740 = vmatpush1.bf16.msra.mxu1 %v2971_v61  ;;  %v3037_v61 = vld [vmem:[%s4116_s1 + $0x14] ss:$8 sps:$4 sm:$0xff]  }
  0x64   : > { %1687 = vmatpush1.bf16.msra.mxu0 %v2974_v0  ;;  %741 = vmatprep.subr.bf16.mxu1 %v2979_v4  ;;  %v3035_v0 = vld [vmem:[%s4116_s1 + $0x10] ss:$8 sps:$4 sm:$0xff]  }
  0x65   : > { %1688 = vmatprep.subr.bf16.mxu0 %v2982_v5  ;;  %v3724_v4 = vld [vmem:[%s3407_s4 + $0x10] sm:$0x33] }
  0x66   : > { %v2454_v5 = vcombine.high %v3422_v48, %v3724_v4  ;;  %v3049_v48 = vld [vmem:[%s4116_s1 + $0x34] ss:$8 sps:$4 sm:$0xff]  }
  0x67   : > { %742 = vmatpush1.bf16.msra.mxu1 %v2977_v12  ;;  %v3050_v12 = vld [vmem:[%s4116_s1 + $0x630] ss:$8 sps:$4 sm:$0xff]  }
  0x68   : > { %1689 = vmatpush1.bf16.msra.mxu0 %v2980_v13  ;;  %743 = vmatprep.subr.bf16.mxu1 %v2985_v14  ;;  %v3055_v13 = vld [vmem:[%s4116_s1 + $0x44] ss:$8 sps:$4 sm:$0xff]  }
  0x69   : > { %1690 = vmatprep.subr.bf16.mxu0 %v2988_v15  ;;  %v3058_v14 = vld [vmem:[%s4116_s1 + $0x644] ss:$8 sps:$4 sm:$0xff]   ;;  %v3053_v15 = vld [vmem:[%s4116_s1 + $0x40] ss:$8 sps:$4 sm:$0xff]  }
  0x6b   : > { %744 = vmatpush1.bf16.msra.mxu1 %v2983_v17  ;;  %v3061_v17 = vld [vmem:[%s4116_s1 + $0x54] ss:$8 sps:$4 sm:$0xff]  }
  0x6c   : > { %1691 = vmatpush1.bf16.msra.mxu0 %v2986_v18  ;;  %745 = vmatprep.subr.bf16.mxu1 %v2991_v19  ;;  %v3064_v18 = vld [vmem:[%s4116_s1 + $0x654] ss:$8 sps:$4 sm:$0xff]   ;;  %v3059_v19 = vld [vmem:[%s4116_s1 + $0x50] ss:$8 sps:$4 sm:$0xff]  }
  0x6d   : > { %1692 = vmatprep.subr.bf16.mxu0 %v2994_v20  ;;  %v3062_v20 = vld [vmem:[%s4116_s1 + $0x650] ss:$8 sps:$4 sm:$0xff]  }
  0x6f   : > { %746 = vmatpush1.bf16.msra.mxu1 %v2989_v21  ;;  %v3067_v21 = vld [vmem:[%s4116_s1 + $0x64] ss:$8 sps:$4 sm:$0xff]  }
  0x70   : > { %1693 = vmatpush1.bf16.msra.mxu0 %v2992_v22  ;;  %747 = vmatprep.subr.bf16.mxu1 %v2997_v23  ;;  %v3070_v22 = vld [vmem:[%s4116_s1 + $0x664] ss:$8 sps:$4 sm:$0xff]   ;;  %v3065_v23 = vld [vmem:[%s4116_s1 + $0x60] ss:$8 sps:$4 sm:$0xff]  }
  0x71   : > { %1694 = vmatprep.subr.bf16.mxu0 %v3000_v24  ;;  %v3068_v24 = vld [vmem:[%s4116_s1 + $0x660] ss:$8 sps:$4 sm:$0xff]  }
  0x73   : > { %748 = vmatpush1.bf16.msra.mxu1 %v2995_v25  ;;  %v3073_v25 = vld [vmem:[%s4116_s1 + $0x74] ss:$8 sps:$4 sm:$0xff]  }
  0x74   : > { %1695 = vmatpush1.bf16.msra.mxu0 %v2998_v26  ;;  %749 = vmatprep.subr.bf16.mxu1 %v3003_v27  ;;  %v3076_v26 = vld [vmem:[%s4116_s1 + $0x674] ss:$8 sps:$4 sm:$0xff]   ;;  %v3071_v27 = vld [vmem:[%s4116_s1 + $0x70] ss:$8 sps:$4 sm:$0xff]  }
  0x75   : > { %1696 = vmatprep.subr.bf16.mxu0 %v3006_v28  ;;  %v3074_v28 = vld [vmem:[%s4116_s1 + $0x670] ss:$8 sps:$4 sm:$0xff]  }
  0x77   : > { %750 = vmatpush1.bf16.msra.mxu1 %v3001_v29  ;;  %v3079_v29 = vld [vmem:[%s4116_s1 + $0x84] ss:$8 sps:$4 sm:$0xff]  }
  0x78   : > { %1697 = vmatpush1.bf16.msra.mxu0 %v3004_v30  ;;  %751 = vmatprep.subr.bf16.mxu1 %v3009_v31  ;;  %v3082_v30 = vld [vmem:[%s4116_s1 + $0x684] ss:$8 sps:$4 sm:$0xff]   ;;  %v3077_v31 = vld [vmem:[%s4116_s1 + $0x80] ss:$8 sps:$4 sm:$0xff]  }
  0x79   : > { %1698 = vmatprep.subr.bf16.mxu0 %v3012_v32  ;;  %v3080_v32 = vld [vmem:[%s4116_s1 + $0x680] ss:$8 sps:$4 sm:$0xff]  }
  0x7b   : > { %752 = vmatpush1.bf16.msra.mxu1 %v3007_v33  ;;  %v3085_v33 = vld [vmem:[%s4116_s1 + $0x94] ss:$8 sps:$4 sm:$0xff]  }
  0x7c   : > { %1699 = vmatpush1.bf16.msra.mxu0 %v3010_v36  ;;  %753 = vmatprep.subr.bf16.mxu1 %v3015_v37  ;;  %v3086_v36 = vld [vmem:[%s4116_s1 + $0x690] ss:$8 sps:$4 sm:$0xff]   ;;  %v3091_v37 = vld [vmem:[%s4116_s1 + $0xa4] ss:$8 sps:$4 sm:$0xff]  }
  0x7d   : > { %1700 = vmatprep.subr.bf16.mxu0 %v3018_v38  ;;  %v3094_v38 = vld [vmem:[%s4116_s1 + $0x6a4] ss:$8 sps:$4 sm:$0xff]  }
  0x7f   : > { %754 = vmatpush1.bf16.msra.mxu1 %v3013_v39  ;;  %v3089_v39 = vld [vmem:[%s4116_s1 + $0xa0] ss:$8 sps:$4 sm:$0xff]  }
  0x80   : > { %1701 = vmatpush1.bf16.msra.mxu0 %v3016_v43  ;;  %755 = vmatprep.subr.bf16.mxu1 %v3021_v44  ;;  %v3095_v43 = vld [vmem:[%s4116_s1 + $0xb0] ss:$8 sps:$4 sm:$0xff]  }
  0x81   : > { %1702 = vmatprep.subr.bf16.mxu0 %v3024_v45  ;;  %v3098_v44 = vld [vmem:[%s4116_s1 + $0x6b0] ss:$8 sps:$4 sm:$0xff]   ;;  %v3103_v45 = vld [vmem:[%s4116_s1 + $0xc4] ss:$8 sps:$4 sm:$0xff]  }
  0x83   : > { %756 = vmatpush1.bf16.msra.mxu1 %v3019_v46  ;;  %v3106_v46 = vld [vmem:[%s4116_s1 + $0x6c4] ss:$8 sps:$4 sm:$0xff]  }
  0x84   : > { %1703 = vmatpush1.bf16.msra.mxu0 %v3022_v52  ;;  %1102 = vmatprep.subr.bf16.mxu1 %v3029_v53  ;;  %v3107_v52 = vld [vmem:[%s4116_s1 + $0xd0] ss:$8 sps:$4 sm:$0xff]  }
  0x85   : > { %2124 = vmatprep.subr.bf16.mxu0 %v3034_v55  ;;  %v3110_v53 = vld [vmem:[%s4116_s1 + $0x6d0] ss:$8 sps:$4 sm:$0xff]   ;;  %v3115_v55 = vld [vmem:[%s4116_s1 + $0xe4] ss:$8 sps:$4 sm:$0xff]  }
  0x86   : > { %758 = vmatmul.mubr.bf16.vlgmr.msra.gmra.mrb[0].mxu1 %v350_v58  ;;  %v3113_v58 = vld [vmem:[%s4116_s1 + $0xe0] ss:$8 sps:$4 sm:$0xff]  }
  0x87   : > { %1705 = vmatmul.mubr.bf16.vlgmr.msra.gmra.mrb[0].mxu0 %v1296_v59  ;;  %1103 = vmatpush1.bf16.msra.mxu1 %v3027_v57  ;;  %v3118_v57 = vld [vmem:[%s4116_s1 + $0x6e4] ss:$8 sps:$4 sm:$0xff]   ;;  %v3116_v59 = vld [vmem:[%s4116_s1 + $0x6e0] ss:$8 sps:$4 sm:$0xff]  }
  0x88   : > { %2125 = vmatpush1.bf16.msra.mxu0 %v3032_v60  ;;  %1104 = vmatprep.subr.bf16.mxu1 %v3037_v61  ;;  %v3121_v60 = vld [vmem:[%s4116_s1 + $0xf4] ss:$8 sps:$4 sm:$0xff]  }
  0x89   : > { %2126 = vmatprep.subr.bf16.mxu0 %v3040_v62  ;;  %1134 = vmatprep.mubr.bf16.mxu1 %v2454_v5  ;;  %v3124_v61 = vld [vmem:[%s4116_s1 + $0x6f4] ss:$8 sps:$4 sm:$0xff]   ;;  %v3129_v5 = vld [vmem:[%s4116_s1 + $0x104] ss:$8 sps:$4 sm:$0xff]  }
  0x8a   : > { %2156 = vmatprep.mubr.bf16.mxu0 %v1797_v11  ;;  %v3229_v62 = vld [vmem:[%s3407_s4 + $0x10] sm:$0xff]  ;;  %v3127_v11 = vld [vmem:[%s4116_s1 + $0x100] ss:$8 sps:$4 sm:$0xff]  }
  0x8b   : > { %1105 = vmatpush1.bf16.msra.mxu1 %v3035_v0  ;;  %v2717_v0 = vcombine.low %v3729_v6, %v3229_v62  ;;  %v3134_v6 = vld [vmem:[%s4116_s1 + $0x704] ss:$8 sps:$4 sm:$0xff]   ;;  %v3201_v62 = vld [vmem:[%s4116_s1 + $0x1c0] ss:$8 sps:$4 sm:$0xff]  }
  0x8c   : > { %2127 = vmatpush1.bf16.msra.mxu0 %v3038_v1  ;;  %1106 = vmatprep.subr.bf16.mxu1 %v3043_v2  ;;  %v3892_v1 = vld [vmem:[%s3407_s4 + $0x8] sm:$0xcc]  ;;  %v3119_v2 = vld [vmem:[%s4116_s1 + $0xf0] ss:$8 sps:$4 sm:$0xff]  }
  0x8d   : > { %2128 = vmatprep.subr.bf16.mxu0 %v3046_v3  ;;  %v3122_v3 = vld [vmem:[%s4116_s1 + $0x6f0] ss:$8 sps:$4 sm:$0xff]  }
  0x8f   : > { %1107 = vmatpush1.bf16.msra.mxu1 %v3041_v7  ;;  %v2720_v7 = vcombine.high %v3892_v1, %v3586_v63 }
  0x90   : > { %2129 = vmatpush1.bf16.msra.mxu0 %v3044_v9  ;;  %1108 = vmatprep.subr.bf16.mxu1 %v3049_v48  ;;  %v2453_v9 = vcombine.low %v3230_v8, %v3724_v4  ;;  %v1796_v48 = vrot.slane %v2717_v0, 2  ;;  %v3140_v4 = vld [vmem:[%s4116_s1 + $0x714] ss:$8 sps:$4 sm:$0xff]   ;;  %v3204_v0 = vld [vmem:[%s4116_s1 + $0x7c0] ss:$8 sps:$4 sm:$0xff]  }
  0x91   : > { %2130 = vmatprep.subr.bf16.mxu0 %v3052_v10  ;;  %v3911_v10 = vld [vmem:[%s3407_s4 + $0x18] sm:$0x33]  ;;  %v3218_v8 = vld [vmem:[%s4116_s1 + $0x7e4] ss:$8 sps:$4 sm:$0xff]  }
  0x93   : > { %1109 = vmatpush1.bf16.msra.mxu1 %v3047_v54  ;;  %v3132_v54 = vld [vmem:[%s4116_s1 + $0x700] ss:$8 sps:$4 sm:$0xff]  }
  0x94   : > { %2131 = vmatpush1.bf16.msra.mxu0 %v3050_v12  ;;  %1110 = vmatprep.subr.bf16.mxu1 %v3055_v13  ;;  %v3137_v12 = vld [vmem:[%s4116_s1 + $0x114] ss:$8 sps:$4 sm:$0xff]   ;;  %v2456_v13 = vcombine.high %v3566_v56, %v3911_v10 }
  0x95   : > { %2132 = vmatprep.subr.bf16.mxu0 %v3058_v14  ;;  %v1799_v14 = vrot.slane %v2720_v7, 2  ;;  %v3215_v7 = vld [vmem:[%s4116_s1 + $0x1e4] ss:$8 sps:$4 sm:$0xff]  }
  0x97   : > { %1111 = vmatpush1.bf16.msra.mxu1 %v3053_v15  ;;  %v3135_v15 = vld [vmem:[%s4116_s1 + $0x110] ss:$8 sps:$4 sm:$0xff]  }
  0x98   : > { %2133 = vmatpush1.bf16.msra.mxu0 %v3056_v16  ;;  %1112 = vmatprep.subr.bf16.mxu1 %v3061_v17  ;;  %v3138_v16 = vld [vmem:[%s4116_s1 + $0x710] ss:$8 sps:$4 sm:$0xff]   ;;  %v3143_v17 = vld [vmem:[%s4116_s1 + $0x124] ss:$8 sps:$4 sm:$0xff]  }
  0x99   : > { %2134 = vmatprep.subr.bf16.mxu0 %v3064_v18  ;;  %v3146_v18 = vld [vmem:[%s4116_s1 + $0x724] ss:$8 sps:$4 sm:$0xff]  }
  0x9b   : > { %1113 = vmatpush1.bf16.msra.mxu1 %v3059_v19  ;;  %v3141_v19 = vld [vmem:[%s4116_s1 + $0x120] ss:$8 sps:$4 sm:$0xff]  }
  0x9c   : > { %2135 = vmatpush1.bf16.msra.mxu0 %v3062_v20  ;;  %1114 = vmatprep.subr.bf16.mxu1 %v3067_v21  ;;  %v3144_v20 = vld [vmem:[%s4116_s1 + $0x720] ss:$8 sps:$4 sm:$0xff]   ;;  %v3149_v21 = vld [vmem:[%s4116_s1 + $0x134] ss:$8 sps:$4 sm:$0xff]  }
  0x9d   : > { %2136 = vmatprep.subr.bf16.mxu0 %v3070_v22  ;;  %v3152_v22 = vld [vmem:[%s4116_s1 + $0x734] ss:$8 sps:$4 sm:$0xff]  }
  0x9f   : > { %1115 = vmatpush1.bf16.msra.mxu1 %v3065_v23  ;;  %v3147_v23 = vld [vmem:[%s4116_s1 + $0x130] ss:$8 sps:$4 sm:$0xff]  }
  0xa0   : > { %2137 = vmatpush1.bf16.msra.mxu0 %v3068_v24  ;;  %1116 = vmatprep.subr.bf16.mxu1 %v3073_v25  ;;  %v3150_v24 = vld [vmem:[%s4116_s1 + $0x730] ss:$8 sps:$4 sm:$0xff]   ;;  %v3155_v25 = vld [vmem:[%s4116_s1 + $0x144] ss:$8 sps:$4 sm:$0xff]  }
  0xa1   : > { %2138 = vmatprep.subr.bf16.mxu0 %v3076_v26  ;;  %v3158_v26 = vld [vmem:[%s4116_s1 + $0x744] ss:$8 sps:$4 sm:$0xff]  }
  0xa3   : > { %1117 = vmatpush1.bf16.msra.mxu1 %v3071_v27  ;;  %v3153_v27 = vld [vmem:[%s4116_s1 + $0x140] ss:$8 sps:$4 sm:$0xff]  }
  0xa4   : > { %2139 = vmatpush1.bf16.msra.mxu0 %v3074_v28  ;;  %1118 = vmatprep.subr.bf16.mxu1 %v3079_v29  ;;  %v3156_v28 = vld [vmem:[%s4116_s1 + $0x740] ss:$8 sps:$4 sm:$0xff]   ;;  %v3161_v29 = vld [vmem:[%s4116_s1 + $0x154] ss:$8 sps:$4 sm:$0xff]  }
  0xa5   : > { %2140 = vmatprep.subr.bf16.mxu0 %v3082_v30  ;;  %v3164_v30 = vld [vmem:[%s4116_s1 + $0x754] ss:$8 sps:$4 sm:$0xff]  }
  0xa7   : > { %1119 = vmatpush1.bf16.msra.mxu1 %v3077_v31  ;;  %v3159_v31 = vld [vmem:[%s4116_s1 + $0x150] ss:$8 sps:$4 sm:$0xff]  }
  0xa8   : > { %2141 = vmatpush1.bf16.msra.mxu0 %v3080_v32  ;;  %1120 = vmatprep.subr.bf16.mxu1 %v3085_v33  ;;  %v3162_v32 = vld [vmem:[%s4116_s1 + $0x750] ss:$8 sps:$4 sm:$0xff]   ;;  %v3167_v33 = vld [vmem:[%s4116_s1 + $0x164] ss:$8 sps:$4 sm:$0xff]  }
  0xa9   : > { %2142 = vmatprep.subr.bf16.mxu0 %v3088_v34  ;;  %v3170_v34 = vld [vmem:[%s4116_s1 + $0x764] ss:$8 sps:$4 sm:$0xff]  }
  0xab   : > { %1121 = vmatpush1.bf16.msra.mxu1 %v3083_v35  ;;  %v3165_v35 = vld [vmem:[%s4116_s1 + $0x160] ss:$8 sps:$4 sm:$0xff]  }
  0xac   : > { %2143 = vmatpush1.bf16.msra.mxu0 %v3086_v36  ;;  %1122 = vmatprep.subr.bf16.mxu1 %v3091_v37  ;;  %v3168_v36 = vld [vmem:[%s4116_s1 + $0x760] ss:$8 sps:$4 sm:$0xff]   ;;  %v3173_v37 = vld [vmem:[%s4116_s1 + $0x174] ss:$8 sps:$4 sm:$0xff]  }
  0xad   : > { %2144 = vmatprep.subr.bf16.mxu0 %v3094_v38  ;;  %v3176_v38 = vld [vmem:[%s4116_s1 + $0x774] ss:$8 sps:$4 sm:$0xff]  }
  0xaf   : > { %1123 = vmatpush1.bf16.msra.mxu1 %v3089_v39  ;;  %v3171_v39 = vld [vmem:[%s4116_s1 + $0x170] ss:$8 sps:$4 sm:$0xff]  }
  0xb0   : > { %2145 = vmatpush1.bf16.msra.mxu0 %v3092_v40  ;;  %1124 = vmatprep.subr.bf16.mxu1 %v3097_v41  ;;  %v3174_v40 = vld [vmem:[%s4116_s1 + $0x770] ss:$8 sps:$4 sm:$0xff]   ;;  %v3179_v41 = vld [vmem:[%s4116_s1 + $0x184] ss:$8 sps:$4 sm:$0xff]  }
  0xb1   : > { %2146 = vmatprep.subr.bf16.mxu0 %v3100_v42  ;;  %v3182_v42 = vld [vmem:[%s4116_s1 + $0x784] ss:$8 sps:$4 sm:$0xff]  }
  0xb3   : > { %1125 = vmatpush1.bf16.msra.mxu1 %v3095_v43  ;;  %v3177_v43 = vld [vmem:[%s4116_s1 + $0x180] ss:$8 sps:$4 sm:$0xff]  }
  0xb4   : > { %2147 = vmatpush1.bf16.msra.mxu0 %v3098_v44  ;;  %1126 = vmatprep.subr.bf16.mxu1 %v3103_v45  ;;  %v3180_v44 = vld [vmem:[%s4116_s1 + $0x780] ss:$8 sps:$4 sm:$0xff]   ;;  %v3185_v45 = vld [vmem:[%s4116_s1 + $0x194] ss:$8 sps:$4 sm:$0xff]  }
  0xb5   : > { %2148 = vmatprep.subr.bf16.mxu0 %v3106_v46  ;;  %v3188_v46 = vld [vmem:[%s4116_s1 + $0x794] ss:$8 sps:$4 sm:$0xff]  }
  0xb7   : > { %1127 = vmatpush1.bf16.msra.mxu1 %v3101_v47  ;;  %v3183_v47 = vld [vmem:[%s4116_s1 + $0x190] ss:$8 sps:$4 sm:$0xff]  }
  0xb8   : > { %2149 = vmatpush1.bf16.msra.mxu0 %v3104_v49  ;;  %1128 = vmatprep.subr.bf16.mxu1 %v3109_v50  ;;  %v3186_v49 = vld [vmem:[%s4116_s1 + $0x790] ss:$8 sps:$4 sm:$0xff]   ;;  %v3191_v50 = vld [vmem:[%s4116_s1 + $0x1a4] ss:$8 sps:$4 sm:$0xff]  }
  0xb9   : > { %2150 = vmatprep.subr.bf16.mxu0 %v3112_v51  ;;  %v3194_v51 = vld [vmem:[%s4116_s1 + $0x7a4] ss:$8 sps:$4 sm:$0xff]  }
  0xbb   : > { %1129 = vmatpush1.bf16.msra.mxu1 %v3107_v52  ;;  %v3189_v52 = vld [vmem:[%s4116_s1 + $0x1a0] ss:$8 sps:$4 sm:$0xff]  }
  0xbc   : > { %2151 = vmatpush1.bf16.msra.mxu0 %v3110_v53  ;;  %1130 = vmatprep.subr.bf16.mxu1 %v3115_v55  ;;  %v3192_v53 = vld [vmem:[%s4116_s1 + $0x7a0] ss:$8 sps:$4 sm:$0xff]   ;;  %v3197_v55 = vld [vmem:[%s4116_s1 + $0x1b4] ss:$8 sps:$4 sm:$0xff]  }
  0xbd   : > { %2152 = vmatprep.subr.bf16.mxu0 %v3118_v57  ;;  %v3200_v57 = vld [vmem:[%s4116_s1 + $0x7b4] ss:$8 sps:$4 sm:$0xff]  }
  0xbf   : > { %1131 = vmatpush1.bf16.msra.mxu1 %v3113_v58  ;;  %v3195_v58 = vld [vmem:[%s4116_s1 + $0x1b0] ss:$8 sps:$4 sm:$0xff]  }
  0xc0   : > { %2153 = vmatpush1.bf16.msra.mxu0 %v3116_v59  ;;  %1132 = vmatprep.subr.bf16.mxu1 %v3121_v60  ;;  %v3198_v59 = vld [vmem:[%s4116_s1 + $0x7b0] ss:$8 sps:$4 sm:$0xff]   ;;  %v3203_v60 = vld [vmem:[%s4116_s1 + $0x1c4] ss:$8 sps:$4 sm:$0xff]  }
  0xc1   : > { %2154 = vmatprep.subr.bf16.mxu0 %v3124_v61  ;;  %v3206_v61 = vld [vmem:[%s4116_s1 + $0x7c4] ss:$8 sps:$4 sm:$0xff]  }
  0xc3   : > { %1133 = vmatpush1.bf16.msra.mxu1 %v3119_v2  ;;  %v3209_v2 = vld [vmem:[%s4116_s1 + $0x1d4] ss:$8 sps:$4 sm:$0xff]  }
  0xc4   : > { %2155 = vmatpush1.bf16.msra.mxu0 %v3122_v3  ;;  %1145 = vmatprep.subr.bf16.mxu1 %v3129_v5  ;;  %v3212_v3 = vld [vmem:[%s4116_s1 + $0x7d4] ss:$8 sps:$4 sm:$0xff]   ;;  %v3207_v5 = vld [vmem:[%s4116_s1 + $0x1d0] ss:$8 sps:$4 sm:$0xff]  }
  0xc5   : > { %2167 = vmatprep.subr.bf16.mxu0 %v3134_v6  ;;  %v3210_v6 = vld [vmem:[%s4116_s1 + $0x7d0] ss:$8 sps:$4 sm:$0xff]  }
  0xc6   : > { %1135 = vmatmul.mubr.bf16.vlgmr.msra.gmra.mrb[0].mxu1 %v2453_v9  ;;  %v3213_v9 = vld [vmem:[%s4116_s1 + $0x1e0] ss:$8 sps:$4 sm:$0xff]  }
  0xc7   : > { %2157 = vmatmul.mubr.bf16.vlgmr.msra.gmra.mrb[0].mxu0 %v1796_v48  ;;  %1146 = vmatpush1.bf16.msra.mxu1 %v3127_v11  ;;  %v3216_v48 = vld [vmem:[%s4116_s1 + $0x7e0] ss:$8 sps:$4 sm:$0xff]   ;;  %v3221_v11 = vld [vmem:[%s4116_s1 + $0x1f4] ss:$8 sps:$4 sm:$0xff]  }
  0xc8   : > { %2168 = vmatpush1.bf16.msra.mxu0 %v3132_v54  ;;  %1147 = vmatprep.subr.bf16.mxu1 %v3137_v12  ;;  %v3224_v54 = vld [vmem:[%s4116_s1 + $0x7f4] ss:$8 sps:$4 sm:$0xff]   ;;  %v2719_v12 = vcombine.low %v3892_v1, %v3586_v63  ;;  %v2216_v63 = vlaneseq }
  0xc9   : > { %2169 = vmatprep.subr.bf16.mxu0 %v3140_v4  ;;  %1177 = vmatprep.mubr.bf16.mxu1 %v2456_v13  ;;  %v3219_v4 = vld [vmem:[%s4116_s1 + $0x1f0] ss:$8 sps:$4 sm:$0xff]  }
  0xca   : > { %2199 = vmatprep.mubr.bf16.mxu0 %v1799_v14  ;;  %v3222_v13 = vld [vmem:[%s4116_s1 + $0x7f0] ss:$8 sps:$4 sm:$0xff]   ;;  %v2455_v14 = vcombine.low %v3566_v56, %v3911_v10  ;;  %v2217_v1 = vshrl.u32 %v2216_v63, 7 }
  0xcb   : > { %1148 = vmatpush1.bf16.msra.mxu1 %v3135_v15  ;;  %v1798_v15 = vrot.slane %v2719_v12, 2 }
  0xcc   : > { %2170 = vmatpush1.bf16.msra.mxu0 %v3138_v16  ;;  %1149 = vmatprep.subr.bf16.mxu1 %v3143_v17  ;;  %v2218_v16 = vsub.s32 0, %v2217_v1  ;;  %v2214_v17 = vld [vmem:[%s4117_s2] sm:$0x3] }
  0xcd   : > { %2171 = vmatprep.subr.bf16.mxu0 %v3146_v18  ;;  %v2222_v18 = vsub.s32 1, %v2217_v1 }
  0xcf   : > { %1150 = vmatpush1.bf16.msra.mxu1 %v3141_v19  ;;  %v2219_v19 = vrot.slane %v2214_v17, %v2218_v16 }
  0xd0   : > { %2172 = vmatpush1.bf16.msra.mxu0 %v3144_v20  ;;  %1151 = vmatprep.subr.bf16.mxu1 %v3149_v21 }
  0xd1   : > { %2173 = vmatprep.subr.bf16.mxu0 %v3152_v22  ;;  %v2223_v22 = vrot.slane %v2214_v17, %v2222_v18 }
  0xd3   : > { %1152 = vmatpush1.bf16.msra.mxu1 %v3147_v23 }
  0xd4   : > { %2174 = vmatpush1.bf16.msra.mxu0 %v3150_v24  ;;  %1153 = vmatprep.subr.bf16.mxu1 %v3155_v25 }
  0xd5   : > { %2175 = vmatprep.subr.bf16.mxu0 %v3158_v26 }
  0xd7   : > { %1154 = vmatpush1.bf16.msra.mxu1 %v3153_v27 }
  0xd8   : > { %2176 = vmatpush1.bf16.msra.mxu0 %v3156_v28  ;;  %1155 = vmatprep.subr.bf16.mxu1 %v3161_v29 }
  0xd9   : > { %2177 = vmatprep.subr.bf16.mxu0 %v3164_v30 }
  0xdb   : > { %1156 = vmatpush1.bf16.msra.mxu1 %v3159_v31 }
  0xdc   : > { %2178 = vmatpush1.bf16.msra.mxu0 %v3162_v32  ;;  %1157 = vmatprep.subr.bf16.mxu1 %v3167_v33 }
  0xdd   : > { %2179 = vmatprep.subr.bf16.mxu0 %v3170_v34 }
  0xdf   : > { %1158 = vmatpush1.bf16.msra.mxu1 %v3165_v35 }
  0xe0   : > { %2180 = vmatpush1.bf16.msra.mxu0 %v3168_v36  ;;  %1159 = vmatprep.subr.bf16.mxu1 %v3173_v37 }
  0xe1   : > { %2181 = vmatprep.subr.bf16.mxu0 %v3176_v38 }
  0xe3   : > { %1160 = vmatpush1.bf16.msra.mxu1 %v3171_v39 }
  0xe4   : > { %2182 = vmatpush1.bf16.msra.mxu0 %v3174_v40  ;;  %1161 = vmatprep.subr.bf16.mxu1 %v3179_v41 }
  0xe5   : > { %2183 = vmatprep.subr.bf16.mxu0 %v3182_v42 }
  0xe7   : > { %1162 = vmatpush1.bf16.msra.mxu1 %v3177_v43 }
  0xe8   : > { %2184 = vmatpush1.bf16.msra.mxu0 %v3180_v44  ;;  %1163 = vmatprep.subr.bf16.mxu1 %v3185_v45 }
  0xe9   : > { %2185 = vmatprep.subr.bf16.mxu0 %v3188_v46 }
  0xeb   : > { %1164 = vmatpush1.bf16.msra.mxu1 %v3183_v47 }
  0xec   : > { %2186 = vmatpush1.bf16.msra.mxu0 %v3186_v49  ;;  %1165 = vmatprep.subr.bf16.mxu1 %v3191_v50 }
  0xed   : > { %2187 = vmatprep.subr.bf16.mxu0 %v3194_v51 }
  0xef   : > { %1166 = vmatpush1.bf16.msra.mxu1 %v3189_v52 }
  0xf0   : > { %2188 = vmatpush1.bf16.msra.mxu0 %v3192_v53  ;;  %1167 = vmatprep.subr.bf16.mxu1 %v3197_v55 }
  0xf1   : > { %2189 = vmatprep.subr.bf16.mxu0 %v3200_v57 }
  0xf3   : > { %1168 = vmatpush1.bf16.msra.mxu1 %v3195_v58 }
  0xf4   : > { %2190 = vmatpush1.bf16.msra.mxu0 %v3198_v59  ;;  %1169 = vmatprep.subr.bf16.mxu1 %v3203_v60 }
  0xf5   : > { %2191 = vmatprep.subr.bf16.mxu0 %v3206_v61 }
  0xf7   : > { %1170 = vmatpush1.bf16.msra.mxu1 %v3201_v62 }
  0xf8   : > { %2192 = vmatpush1.bf16.msra.mxu0 %v3204_v0  ;;  %1171 = vmatprep.subr.bf16.mxu1 %v3209_v2 }
  0xf9   : > { %2193 = vmatprep.subr.bf16.mxu0 %v3212_v3 }
  0xfb   : > { %1172 = vmatpush1.bf16.msra.mxu1 %v3207_v5 }
  0xfc   : > { %2194 = vmatpush1.bf16.msra.mxu0 %v3210_v6  ;;  %1173 = vmatprep.subr.bf16.mxu1 %v3215_v7 }
  0xfd   : > { %2195 = vmatprep.subr.bf16.mxu0 %v3218_v8 }
  0xff   : > { %1174 = vmatpush1.bf16.msra.mxu1 %v3213_v9 }
 0x100   : > { %2196 = vmatpush1.bf16.msra.mxu0 %v3216_v48  ;;  %1175 = vmatprep.subr.bf16.mxu1 %v3221_v11 }
 0x101   : > { %2197 = vmatprep.subr.bf16.mxu0 %v3224_v54 }
 0x103   : > { %1176 = vmatpush1.bf16.msra.mxu1 %v3219_v4 }
 0x104   : > { %2198 = vmatpush1.bf16.msra.mxu0 %v3222_v13 }
 0x106   : > { %1178 = vmatmul.mubr.bf16.vlgmr.msra.gmra.mrb[0].mxu1 %v2455_v14 }
 0x107   : > { %2200 = vmatmul.mubr.bf16.vlgmr.msra.gmra.mrb[0].mxu0 %v1798_v15 }
 0x1d9   : > { %v1179_v20 = vpop.f32.mrb[0].mxu1 }
 0x1da   : > { %v2201_v21 = vpop.f32.mrb[0].mxu0  ;;  %v1181_v56 = vpop.f32.mrb[1].mxu1 }
 0x1db   : > { %v2793_v23 = vadd.f32 %v2201_v21, %v1179_v20  ;;  %v2203_v10 = vpop.f32.mrb[1].mxu0  ;;  %v1183_v25 = vpop.f32.mrb[2].mxu1 }
 0x1dc   : > { %v2794_v24 = vadd.f32 %v2203_v10, %v1181_v56  ;;  %v2205_v26 = vpop.f32.mrb[2].mxu0  ;;  %v1185_v29 = vpop.f32.mrb[3].mxu1 }
 0x1dd   : > { %v2226_v27 = vadd.f32 %v2793_v23, %v2219_v19  ;;  %v2795_v28 = vadd.f32 %v2205_v26, %v1183_v25  ;;  %v2207_v30 = vpop.f32.mrb[3].mxu0 }
 0x1de   : > { %v2227_v31 = vadd.f32 %v2794_v24, %v2223_v22  ;;  %v2796_v32 = vadd.f32 %v2207_v30, %v1185_v29 }
 0x1df   : > { %v2230_v33 = vmul.f32 0.2, %v2226_v27  ;;  %v2228_v34 = vadd.f32 %v2795_v28, %v2219_v19 }
 0x1e0   : > { %v2231_v35 = vmul.f32 0.2, %v2227_v31  ;;  %v2229_v36 = vadd.f32 %v2796_v32, %v2223_v22 }
 0x1e1   : > { %v2234_v37 = vmax.f32 %v2226_v27, %v2230_v33  ;;  %v2232_v38 = vmul.f32 0.2, %v2228_v34 }
 0x1e2   : > { %v2235_v39 = vmax.f32 %v2227_v31, %v2231_v35  ;;  %v2233_v40 = vmul.f32 0.2, %v2229_v36 }
 0x1e3   : > { %v2236_v41 = vmax.f32 %v2228_v34, %v2232_v38 }
 0x1e4   : > { %v2791_v42 = vpack.c.bf16 %v2235_v39, %v2234_v37  ;;  %v2237_v43 = vmax.f32 %v2229_v36, %v2233_v40 }
 0x1e6   : > { %2250 = vst [vmem:[%s177_s22] sm:$0xff] %v2791_v42  ;;  %v2792_v44 = vpack.c.bf16 %v2237_v43, %v2236_v41 }
 0x1e8   : > { %2251 = vst [vmem:[%s177_s22 + $0x8] sm:$0x33] %v2792_v44 }
 0x1e9 PF: > { %s13_s12 = sadd.s32 1, %s3237_s12  }
 0x1ea   : > { %p10_p4 = scmp.ge.s32.totalorder %s13_s12, 4  }
 0x1ec   :  { %12 = sbr.rel (!%p10_p4) target bundleno = 1 (0x1), region = 65 }

// kernel: _lambda_.9
= control target key start
LH: loop header
LB: loop body
LE: loop exit
PB: predicated region body
PF: predicated region fallthrough
CT: control target
= control target key end

     0   :  { %v26_v23 = vlaneseq  ;;  %s769_s0 = inlined_call_operand.vmem [shape: bf16[2,1,512], index: 0, kind: input, shape index: {}]   ;;  %s770_s1 = inlined_call_operand.vmem [shape: bf16[512,128], index: 1, kind: input, shape index: {}]   ;;  %s771_s2 = inlined_call_operand.vmem [shape: f32[1,128], index: 2, kind: input, shape index: {}]   ;;  %s772_s3 = inlined_call_operand.hbm [shape: f32[2,512], index: 3, kind: output, shape index: {0}]   ;;  %s773_s4 = inlined_call_operand.vmem [shape: f32[2,128], index: 4, kind: output, shape index: {1}]  }
   0x1   :  { %v565_v0 = vld [vmem:[%s770_s1 + $0x40] sm:$0xff]   ;;  %v569_v4 = vld [vmem:[%s770_s1 + $0x48] sm:$0xff]   ;;  %v573_v8 = vld [vmem:[%s770_s1 + $0x50] sm:$0xff]  }
   0x2   :  { %v566_v1 = vld [vmem:[%s770_s1 + $0xc0] sm:$0xff]   ;;  %520 = vmatprep.subr.bf16.mxu0 %v565_v0  ;;  %v570_v5 = vld [vmem:[%s770_s1 + $0xc8] sm:$0xff]   ;;  %v574_v9 = vld [vmem:[%s770_s1 + $0xd0] sm:$0xff]   ;;  %v27_v28 = vshrl.u32 %v26_v23, 7 }
   0x3   :  { %v567_v2 = vld [vmem:[%s770_s1] sm:$0xff]   ;;  %542 = vmatprep.subr.bf16.mxu1 %v566_v1  ;;  %v571_v6 = vld [vmem:[%s770_s1 + $0x8] sm:$0xff]   ;;  %v575_v10 = vld [vmem:[%s770_s1 + $0x10] sm:$0xff]  }
   0x4   :  { %v568_v3 = vld [vmem:[%s770_s1 + $0x80] sm:$0xff]   ;;  %521 = vmatpush3.bf16.msra.mxu0 %v567_v2  ;;  %v572_v7 = vld [vmem:[%s770_s1 + $0x88] sm:$0xff]   ;;  %v576_v11 = vld [vmem:[%s770_s1 + $0x90] sm:$0xff]   ;;  %v32_v33 = vsub.s32 2, %v27_v28  ;;  %v40_v35 = vsub.s32 6, %v27_v28  ;;  %v28_v37 = vsub.s32 0, %v27_v28 }
   0x5   :  { %543 = vmatpush3.bf16.msra.mxu1 %v568_v3  ;;  %522 = vmatprep.subr.bf16.mxu0 %v569_v4  ;;  %v577_v12 = vld [vmem:[%s770_s1 + $0x58] sm:$0xff]   ;;  %v581_v16 = vld [vmem:[%s770_s1 + $0x60] sm:$0xff]   ;;  %v585_v20 = vld [vmem:[%s770_s1 + $0x68] sm:$0xff]   ;;  %v36_v38 = vsub.s32 4, %v27_v28 }
   0x6   :  { %544 = vmatprep.subr.bf16.mxu1 %v570_v5  ;;  %v578_v13 = vld [vmem:[%s770_s1 + $0xd8] sm:$0xff]   ;;  %v582_v17 = vld [vmem:[%s770_s1 + $0xe0] sm:$0xff]   ;;  %v586_v21 = vld [vmem:[%s770_s1 + $0xe8] sm:$0xff]  }
   0x7   :  { %v579_v14 = vld [vmem:[%s770_s1 + $0x18] sm:$0xff]   ;;  %v583_v18 = vld [vmem:[%s770_s1 + $0x20] sm:$0xff]   ;;  %v587_v22 = vld [vmem:[%s770_s1 + $0x28] sm:$0xff]  }
   0x8   :  { %523 = vmatpush3.bf16.msra.mxu0 %v571_v6  ;;  %v580_v15 = vld [vmem:[%s770_s1 + $0x98] sm:$0xff]   ;;  %v584_v19 = vld [vmem:[%s770_s1 + $0xa0] sm:$0xff]   ;;  %v588_v24 = vld [vmem:[%s770_s1 + $0xa8] sm:$0xff]  }
   0x9   :  { %545 = vmatpush3.bf16.msra.mxu1 %v572_v7  ;;  %524 = vmatprep.subr.bf16.mxu0 %v573_v8  ;;  %v589_v25 = vld [vmem:[%s770_s1 + $0x70] sm:$0xff]   ;;  %v593_v30 = vld [vmem:[%s770_s1 + $0x78] sm:$0xff]   ;;  %v517_v36 = vld [vmem:[%s769_s0] sm:$0xff]  }
   0xa   :  { %546 = vmatprep.subr.bf16.mxu1 %v574_v9  ;;  %v590_v26 = vld [vmem:[%s770_s1 + $0xf0] sm:$0xff]   ;;  %v594_v31 = vld [vmem:[%s770_s1 + $0xf8] sm:$0xff]  }
   0xb   :  { %v591_v27 = vld [vmem:[%s770_s1 + $0x30] sm:$0xff]   ;;  %v595_v32 = vld [vmem:[%s770_s1 + $0x38] sm:$0xff]  }
   0xc   :  { %525 = vmatpush3.bf16.msra.mxu0 %v575_v10  ;;  %v592_v29 = vld [vmem:[%s770_s1 + $0xb0] sm:$0xff]   ;;  %v596_v34 = vld [vmem:[%s770_s1 + $0xb8] sm:$0xff]  }
   0xd   :  { %547 = vmatpush3.bf16.msra.mxu1 %v576_v11  ;;  %526 = vmatprep.subr.bf16.mxu0 %v577_v12 }
   0xe   :  { %548 = vmatprep.subr.bf16.mxu1 %v578_v13 }
  0x10   :  { %527 = vmatpush3.bf16.msra.mxu0 %v579_v14 }
  0x11   :  { %549 = vmatpush3.bf16.msra.mxu1 %v580_v15  ;;  %528 = vmatprep.subr.bf16.mxu0 %v581_v16 }
  0x12   :  { %550 = vmatprep.subr.bf16.mxu1 %v582_v17 }
  0x14   :  { %529 = vmatpush3.bf16.msra.mxu0 %v583_v18 }
  0x15   :  { %551 = vmatpush3.bf16.msra.mxu1 %v584_v19  ;;  %530 = vmatprep.subr.bf16.mxu0 %v585_v20 }
  0x16   :  { %552 = vmatprep.subr.bf16.mxu1 %v586_v21 }
  0x18   :  { %531 = vmatpush3.bf16.msra.mxu0 %v587_v22 }
  0x19   :  { %553 = vmatpush3.bf16.msra.mxu1 %v588_v24  ;;  %532 = vmatprep.subr.bf16.mxu0 %v589_v25 }
  0x1a   :  { %554 = vmatprep.subr.bf16.mxu1 %v590_v26 }
  0x1c   :  { %533 = vmatpush3.bf16.msra.mxu0 %v591_v27 }
  0x1d   :  { %555 = vmatpush3.bf16.msra.mxu1 %v592_v29  ;;  %534 = vmatprep.subr.bf16.mxu0 %v593_v30 }
  0x1e   :  { %556 = vmatprep.subr.bf16.mxu1 %v594_v31 }
  0x20   :  { %535 = vmatpush3.bf16.msra.mxu0 %v595_v32 }
  0x21   :  { %10 = vsyncpa [#allocation3], 0  ;;  %557 = vmatpush3.bf16.msra.mxu1 %v596_v34  ;;  %v518_v39 = vunpack.c.l.bf16 %v517_v36  ;;  %v519_v40 = vunpack.c.h.bf16 %v517_v36  ;;  %vm162_vm0 = vcmask 1041409   ;;  %vm456_vm1 = vcmask 1043459   ;;  %s621_s0 = smov [#allocation2]  }
  0x22   :  { %vm458_vm2 = vcmask 1045509   ;;  %vm460_vm3 = vcmask 1047559   ;;  %s471_s1 = sshll.u32 %s621_s0, 4  ;;  %s472_s1 = int_to_ptr.vmem [resolvable:$true] %s471_s1 }
  0x23   :  { %v33_v41 = vrot.slane %v518_v39, %v32_v33  ;;  %v49_v42 = vrot.slane %v519_v40, %v32_v33  ;;  %v41_v43 = vrot.slane %v518_v39, %v40_v35  ;;  %v57_v44 = vrot.slane %v519_v40, %v40_v35  ;;  %s597_s29 = scalar_lea.vmem %s472_s1, 128  ;;  %p602_p1 = scmp.lt.s32.totalorder %s472_s1, %s472_s1 }
  0x24   :  { %v29_v45 = vrot.slane %v518_v39, %v28_v37  ;;  %v45_v46 = vrot.slane %v519_v40, %v28_v37  ;;  %v37_v47 = vrot.slane %v518_v39, %v36_v38  ;;  %v53_v48 = vrot.slane %v519_v40, %v36_v38  ;;  %p598_p0 = scmp.ne.s32.totalorder %s472_s1, %s597_s29  ;;  %p603_p2 = scmp.lt.s32.totalorder %s597_s29, %s597_s29 }
  0x25   :  { %v67_v49 = vpack.c.bf16 %v33_v41, %v33_v41  ;;  %v71_v50 = vpack.c.bf16 %v49_v42, %v49_v42  ;;  %v69_v51 = vpack.c.bf16 %v41_v43, %v41_v43  ;;  %v73_v52 = vpack.c.bf16 %v57_v44, %v57_v44 }
  0x26   :  { %v66_v53 = vpack.c.bf16 %v29_v45, %v29_v45  ;;  %v70_v54 = vpack.c.bf16 %v45_v46, %v45_v46  ;;  %v68_v55 = vpack.c.bf16 %v37_v47, %v37_v47  ;;  %v72_v56 = vpack.c.bf16 %v53_v48, %v53_v48  ;;  %p604_p3 = por %p603_p2, %p602_p1 }
  0x27   :  { %v154_v57 = vunpack.c.l.b16 %v67_v49  ;;  %v158_v58 = vunpack.c.l.b16 %v71_v50  ;;  %v156_v59 = vunpack.c.l.b16 %v69_v51  ;;  %v160_v60 = vunpack.c.l.b16 %v73_v52 }
  0x28   :  { %v153_v61 = vunpack.c.l.b16 %v66_v53  ;;  %v157_v62 = vunpack.c.l.b16 %v70_v54  ;;  %v155_v63 = vunpack.c.l.b16 %v68_v55  ;;  %v159_v0 = vunpack.c.l.b16 %v72_v56  ;;  %p605_p4 = pnand %p604_p3, %p598_p0 }
  0x29   :  { %v164_v1 = vrot.slane %v158_v58, 7  ;;  %v168_v2 = vrot.slane %v160_v60, 7  ;;  %v454_v13 = vrot.slane %v519_v40, 7 }
  0x2a   :  { %v161_v3 = vrot.slane %v157_v62, 7  ;;  %v166_v4 = vrot.slane %v159_v0, 7 }
  0x2b   :  { %v165_v5 = vsel %vm162_vm0, %v164_v1, %v154_v57  ;;  %v169_v6 = vsel %vm162_vm0, %v168_v2, %v156_v59  ;;  %v455_v14 = vsel %vm162_vm0, %v454_v13, %v518_v39 }
  0x2c   :  { %v171_v7 = vpack.c.b16 %v165_v5, %v165_v5  ;;  %v173_v8 = vpack.c.b16 %v169_v6, %v169_v6  ;;  %v163_v9 = vsel %vm162_vm0, %v161_v3, %v153_v61  ;;  %v167_v10 = vsel %vm162_vm0, %v166_v4, %v155_v63 }
  0x2d   :  { %v170_v11 = vpack.c.b16 %v163_v9, %v163_v9  ;;  %v172_v12 = vpack.c.b16 %v167_v10, %v167_v10  ;;  %v457_v15 = vsel %vm456_vm1, %v454_v13, %v455_v14 }
  0x2e   :  { %402 = vmatprep.mubr.bf16.mxu0 %v171_v7  ;;  %442 = vmatprep.mubr.bf16.mxu1 %v173_v8  ;;  %v459_v16 = vsel %vm458_vm2, %v454_v13, %v457_v15 }
  0x2f   :  { %403 = vmatmul.mubr.bf16.vlgmr.msra.gmra.mrb[0].mxu0 %v170_v11  ;;  %443 = vmatmul.mubr.bf16.vlgmr.msra.gmra.mrb[0].mxu1 %v172_v12  ;;  %v461_v17 = vsel %vm460_vm3, %v454_v13, %v459_v16 }
  0x30   :  { %463 = vst [vmem:[#allocation2] sm:$0xff] %v461_v17 }
  0x31   :  { %608 = shalt.err (!%p605_p4)
}
  0x32   :  { %s609_s6 = scalar_lea.hbm %s772_s3, 128 }
  0x33   :  { %p610_p5 = scmp.ne.s32.totalorder %s772_s3, %s609_s6  ;;  %p613_p6 = scmp.lt.u32.totalorder %s609_s6, %s772_s3 }
  0x35   :  { %p615_p7 = pnand %p613_p6, %p610_p5 }
  0x37   :  { %618 = shalt.err (!%p615_p7)
}
  0x38   :  { %474 = dma.vmem_to_hbm [thread:$0]  %s472_s1, 128, %s772_s3, [#allocation3]   ;;  %v483_v20 = vld [vmem:[%s771_s2] ss:$0 sm:$0xff] }
 0x102   :  { %v536_v18 = vpop.f32.mrb[0].mxu0  ;;  %v558_v19 = vpop.f32.mrb[0].mxu1 }
 0x103   :  { %v537_v21 = vpop.f32.mrb[1].mxu0  ;;  %v559_v22 = vpop.f32.mrb[1].mxu1 }
 0x104   :  { %v538_v23 = vadd.f32 %v537_v21, %v536_v18  ;;  %v560_v24 = vadd.f32 %v559_v22, %v558_v19  ;;  %v539_v25 = vpop.f32.mrb[2].mxu0  ;;  %v561_v26 = vpop.f32.mrb[2].mxu1 }
 0x105   :  { %v540_v27 = vpop.f32.mrb[3].mxu0  ;;  %v562_v28 = vpop.f32.mrb[3].mxu1 }
 0x106   :  { %v405_v29 = vadd.f32 %v538_v23, %v483_v20 }
 0x108   :  { %v445_v30 = vadd.f32 %v560_v24, %v405_v29 }
 0x10a   :  { %464 = vst [vmem:[%s773_s4] sm:$0x3] %v445_v30 }
 0x10b   :  { %619 = dma.done.wait [#allocation3], 128  }
 0x10c   :  { %620 = vsyncadd [#allocation3], 4294967168 }
 0x10d   :  { %482 = vsyncpa [#allocation3], 1 }

// kernel: _lambda_.8
= control target key start
LH: loop header
LB: loop body
LE: loop exit
PB: predicated region body
PF: predicated region fallthrough
CT: control target
= control target key end

     0   :  { %s11377_s12 = smov 0   ;;  %s14813_s0 = inlined_call_operand.vmem [shape: bf16[16,1024], index: 0, kind: input, shape index: {}]   ;;  %s14814_s1 = inlined_call_operand.vmem [shape: bf16[4,1024,512], index: 1, kind: input, shape index: {}]   ;;  %s14815_s2 = inlined_call_operand.vmem [shape: f32[1,512], index: 2, kind: input, shape index: {}]   ;;  %s14816_s3 = inlined_call_operand.vmem [shape: bf16[16,512], index: 3, kind: output, shape index: {}]  }
   0x1 LB: > { %s7964_s13 = sadd.s32 4294967295, %s11355_s12   ;;  %p7968_p0 = scmp.ge.s32.totalorder %s11355_s12, 1  ;;  %s11355_s12 = sphi %s11377_s12, %s13_s12  }
   0x2   : > { %p137_p1 = scmp.lt.s32.totalorder %s11355_s12, 3 }
   0x4   : > { %p138_p2 = pnand %p7968_p0, %p137_p1 }
   0x5   : > { %v9797_v0 = vld [vmem:[%s14814_s1 + $0x804] ss:$16 sps:$4 sm:$0xff] (!%p138_p2)   ;;  %v9801_v2 = vld [vmem:[%s14814_s1 + $0x800] ss:$16 sps:$4 sm:$0xff] (!%p138_p2)   ;;  %p161_p3 = scmp.lt.s32.totalorder (!%p138_p2), %s7964_s13, 1  ;;  %vm7896_vm0 = vcmask (!%p138_p2), 1042432  }
   0x6   : > { %141 = sbr.rel (%p138_p2) target bundleno = 1259 (0x4eb), region = 32  ;;  %v9799_v1 = vld [vmem:[%s14814_s1 + $0xa04] ss:$16 sps:$4 sm:$0xff] (!%p138_p2)   ;;  %2052 = vmatprep.subr.bf16.mxu0 (!%p138_p2), %v9797_v0  ;;  %v9802_v3 = vld [vmem:[%s14814_s1 + $0xa00] ss:$16 sps:$4 sm:$0xff] (!%p138_p2)   ;;  %vm7899_vm2 = vcmask (!%p138_p2), 1046532  }
   0x7   : > { %2093 = vmatprep.subr.bf16.mxu1 (!%p138_p2), %v9799_v1  ;;  %v9803_v4 = vld [vmem:[%s14814_s1 + $0x824] ss:$16 sps:$4 sm:$0xff] (!%p138_p2)   ;;  %2053 = vmatpush1.bf16.msra.mxu0 (!%p138_p2), %v9801_v2  ;;  %v9807_v6 = vld [vmem:[%s14814_s1 + $0x820] ss:$16 sps:$4 sm:$0xff] (!%p138_p2)   ;;  %vm7897_vm1 = vsmask.f32 (!%p138_p2), 2304 }
   0x8   : > { %2094 = vmatpush1.bf16.msra.mxu1 (!%p138_p2), %v9802_v3  ;;  %v9805_v5 = vld [vmem:[%s14814_s1 + $0xa24] ss:$16 sps:$4 sm:$0xff] (!%p138_p2)   ;;  %2054 = vmatprep.subr.bf16.mxu0 (!%p138_p2), %v9803_v4  ;;  %v9808_v7 = vld [vmem:[%s14814_s1 + $0xa20] ss:$16 sps:$4 sm:$0xff] (!%p138_p2)   ;;  %vm7900_vm3 = vsmask.f32 (!%p138_p2), 6400  ;;  %vm14775_vm4 = vmand (!%p138_p2), %vm7896_vm0, %vm7897_vm1 }
   0x9   : > { %2095 = vmatprep.subr.bf16.mxu1 (!%p138_p2), %v9805_v5  ;;  %v9809_v8 = vld [vmem:[%s14814_s1 + $0x844] ss:$16 sps:$4 sm:$0xff] (!%p138_p2)   ;;  %v9813_v10 = vld [vmem:[%s14814_s1 + $0x840] ss:$16 sps:$4 sm:$0xff] (!%p138_p2)   ;;  %vm14784_vm5 = vmand (!%p138_p2), %vm7899_vm2, %vm7900_vm3 }
   0xa   : > { %v9811_v9 = vld [vmem:[%s14814_s1 + $0xa44] ss:$16 sps:$4 sm:$0xff] (!%p138_p2)   ;;  %v9814_v11 = vld [vmem:[%s14814_s1 + $0xa40] ss:$16 sps:$4 sm:$0xff] (!%p138_p2)   ;;  %vm7902_vm6 = vmor (!%p138_p2), %vm14784_vm5, %vm14775_vm4 }
   0xb   : > { %2055 = vmatpush1.bf16.msra.mxu0 (!%p138_p2), %v9807_v6  ;;  %v9815_v12 = vld [vmem:[%s14814_s1 + $0x864] ss:$16 sps:$4 sm:$0xff] (!%p138_p2)   ;;  %v9819_v14 = vld [vmem:[%s14814_s1 + $0x860] ss:$16 sps:$4 sm:$0xff] (!%p138_p2)  }
   0xc   : > { %2096 = vmatpush1.bf16.msra.mxu1 (!%p138_p2), %v9808_v7  ;;  %2056 = vmatprep.subr.bf16.mxu0 (!%p138_p2), %v9809_v8  ;;  %v9817_v13 = vld [vmem:[%s14814_s1 + $0xa64] ss:$16 sps:$4 sm:$0xff] (!%p138_p2)   ;;  %v9820_v15 = vld [vmem:[%s14814_s1 + $0xa60] ss:$16 sps:$4 sm:$0xff] (!%p138_p2)  }
   0xd   : > { %2097 = vmatprep.subr.bf16.mxu1 %v9811_v9  ;;  %v9821_v16 = vld [vmem:[%s14814_s1 + $0x884] ss:$16 sps:$4 sm:$0xff]   ;;  %v9825_v18 = vld [vmem:[%s14814_s1 + $0x880] ss:$16 sps:$4 sm:$0xff]   ;;  %s14822_s13 = smov (!%p161_p3, %s7964_s13), 1 }
   0xe   : > { %v9823_v17 = vld [vmem:[%s14814_s1 + $0xa84] ss:$16 sps:$4 sm:$0xff]   ;;  %v9826_v19 = vld [vmem:[%s14814_s1 + $0xa80] ss:$16 sps:$4 sm:$0xff]   ;;  %s9785_s21 = sshll.u32 %s14822_s13, 5  ;;  %s9786_s10 = sshll.u32 %s14822_s13, 4 }
   0xf   : > { %2057 = vmatpush1.bf16.msra.mxu0 %v9813_v10  ;;  %v9827_v20 = vld [vmem:[%s14814_s1 + $0x8a4] ss:$16 sps:$4 sm:$0xff]   ;;  %v9831_v22 = vld [vmem:[%s14814_s1 + $0x8a0] ss:$16 sps:$4 sm:$0xff]   ;;  %s11527_s30 = scalar_lea.vmem %s14813_s0, %s9785_s21  ;;  %s14782_s14 = scalar_lea.vmem %s14816_s3, %s9786_s10 }
  0x10   : > { %2098 = vmatpush1.bf16.msra.mxu1 %v9814_v11  ;;  %2058 = vmatprep.subr.bf16.mxu0 %v9815_v12  ;;  %v9829_v21 = vld [vmem:[%s14814_s1 + $0xaa4] ss:$16 sps:$4 sm:$0xff]   ;;  %v9832_v23 = vld [vmem:[%s14814_s1 + $0xaa0] ss:$16 sps:$4 sm:$0xff]   ;;  %v172_v49 = vld [vmem:[%s11527_s30 + $0x8] sm:$0x77] }
  0x11   : > { %2099 = vmatprep.subr.bf16.mxu1 %v9817_v13  ;;  %v9833_v24 = vld [vmem:[%s14814_s1 + $0x8c4] ss:$16 sps:$4 sm:$0xff]   ;;  %v9837_v26 = vld [vmem:[%s14814_s1 + $0x8c0] ss:$16 sps:$4 sm:$0xff]   ;;  %v11548_v52 = vcombine.high %v172_v49, %v172_v49  ;;  %v11576_v3 = vcombine.low %v172_v49, %v172_v49 }
  0x12   : > { %v9835_v25 = vld [vmem:[%s14814_s1 + $0xac4] ss:$16 sps:$4 sm:$0xff]   ;;  %v9838_v27 = vld [vmem:[%s14814_s1 + $0xac0] ss:$16 sps:$4 sm:$0xff]  }
  0x13   : > { %2059 = vmatpush1.bf16.msra.mxu0 %v9819_v14  ;;  %v9839_v28 = vld [vmem:[%s14814_s1 + $0x8e4] ss:$16 sps:$4 sm:$0xff]   ;;  %v9843_v30 = vld [vmem:[%s14814_s1 + $0x8e0] ss:$16 sps:$4 sm:$0xff]   ;;  %v730_v56 = vshrl.u32 %v11548_v52, 16  ;;  %v732_v57 = vshll.u32 %v11548_v52, 16 }
  0x14   : > { %2100 = vmatpush1.bf16.msra.mxu1 %v9820_v15  ;;  %2060 = vmatprep.subr.bf16.mxu0 %v9821_v16  ;;  %v9841_v29 = vld [vmem:[%s14814_s1 + $0xae4] ss:$16 sps:$4 sm:$0xff]   ;;  %v9844_v31 = vld [vmem:[%s14814_s1 + $0xae0] ss:$16 sps:$4 sm:$0xff]   ;;  %v725_v9 = vshll.u32 %v11576_v3, 16  ;;  %v723_v16 = vshrl.u32 %v11576_v3, 16 }
  0x15   : > { %2101 = vmatprep.subr.bf16.mxu1 %v9823_v17  ;;  %v9845_v32 = vld [vmem:[%s14814_s1 + $0x904] ss:$16 sps:$4 sm:$0xff]   ;;  %v9849_v34 = vld [vmem:[%s14814_s1 + $0x900] ss:$16 sps:$4 sm:$0xff]   ;;  %v734_v61 = vrot.slane %v732_v57, 1 }
  0x16   : > { %v9847_v33 = vld [vmem:[%s14814_s1 + $0xb04] ss:$16 sps:$4 sm:$0xff]   ;;  %v9850_v35 = vld [vmem:[%s14814_s1 + $0xb00] ss:$16 sps:$4 sm:$0xff]   ;;  %v727_v17 = vrot.slane %v725_v9, 1 }
  0x17   : > { %2061 = vmatpush1.bf16.msra.mxu0 %v9825_v18  ;;  %v9851_v36 = vld [vmem:[%s14814_s1 + $0x924] ss:$16 sps:$4 sm:$0xff]   ;;  %v9855_v38 = vld [vmem:[%s14814_s1 + $0x920] ss:$16 sps:$4 sm:$0xff]   ;;  %v11571_v1 = vor.u32 %v734_v61, %v730_v56 }
  0x18   : > { %2102 = vmatpush1.bf16.msra.mxu1 %v9826_v19  ;;  %2062 = vmatprep.subr.bf16.mxu0 %v9827_v20  ;;  %v9853_v37 = vld [vmem:[%s14814_s1 + $0xb24] ss:$16 sps:$4 sm:$0xff]   ;;  %v9856_v39 = vld [vmem:[%s14814_s1 + $0xb20] ss:$16 sps:$4 sm:$0xff]  }
  0x19   : > { %2103 = vmatprep.subr.bf16.mxu1 %v9829_v21  ;;  %v9857_v40 = vld [vmem:[%s14814_s1 + $0x944] ss:$16 sps:$4 sm:$0xff]   ;;  %v9861_v42 = vld [vmem:[%s14814_s1 + $0x940] ss:$16 sps:$4 sm:$0xff]   ;;  %2125 = vmatprep.mubr.bf16.mxu1 %v11571_v1 }
  0x1a   : > { %v9859_v41 = vld [vmem:[%s14814_s1 + $0xb44] ss:$16 sps:$4 sm:$0xff]   ;;  %v9862_v43 = vld [vmem:[%s14814_s1 + $0xb40] ss:$16 sps:$4 sm:$0xff]  }
  0x1b   : > { %2063 = vmatpush1.bf16.msra.mxu0 %v9831_v22  ;;  %v9863_v44 = vld [vmem:[%s14814_s1 + $0x964] ss:$16 sps:$4 sm:$0xff]   ;;  %v9867_v46 = vld [vmem:[%s14814_s1 + $0x960] ss:$16 sps:$4 sm:$0xff]  }
  0x1c   : > { %2104 = vmatpush1.bf16.msra.mxu1 %v9832_v23  ;;  %2064 = vmatprep.subr.bf16.mxu0 %v9833_v24  ;;  %v9865_v45 = vld [vmem:[%s14814_s1 + $0xb64] ss:$16 sps:$4 sm:$0xff]   ;;  %v9868_v50 = vld [vmem:[%s14814_s1 + $0xb60] ss:$16 sps:$4 sm:$0xff]   ;;  %v11621_v23 = vor.u32 %v727_v17, %v723_v16 }
  0x1d   : > { %2105 = vmatprep.subr.bf16.mxu1 %v9835_v25  ;;  %v171_v47 = vld [vmem:[%s11527_s30] sm:$0x77] }
  0x1e   : > { %v11539_v48 = vcombine.high %v171_v47, %v171_v47  ;;  %v9869_v51 = vld [vmem:[%s14814_s1 + $0x984] ss:$16 sps:$4 sm:$0xff]   ;;  %v9873_v59 = vld [vmem:[%s14814_s1 + $0x980] ss:$16 sps:$4 sm:$0xff]   ;;  %v11573_v2 = vcombine.low %v171_v47, %v171_v47 }
  0x1f   : > { %2065 = vmatpush1.bf16.msra.mxu0 %v9837_v26  ;;  %v9871_v53 = vld [vmem:[%s14814_s1 + $0xb84] ss:$16 sps:$4 sm:$0xff]   ;;  %v9874_v60 = vld [vmem:[%s14814_s1 + $0xb80] ss:$16 sps:$4 sm:$0xff]  }
  0x20   : > { %2106 = vmatpush1.bf16.msra.mxu1 %v9838_v27  ;;  %2066 = vmatprep.subr.bf16.mxu0 %v9839_v28  ;;  %v716_v54 = vshrl.u32 %v11539_v48, 16  ;;  %v718_v55 = vshll.u32 %v11539_v48, 16  ;;  %v9875_v62 = vld [vmem:[%s14814_s1 + $0x9a4] ss:$16 sps:$4 sm:$0xff]   ;;  %v9879_v4 = vld [vmem:[%s14814_s1 + $0x9a0] ss:$16 sps:$4 sm:$0xff]  }
  0x21   : > { %2107 = vmatprep.subr.bf16.mxu1 %v9841_v29  ;;  %v9877_v63 = vld [vmem:[%s14814_s1 + $0xba4] ss:$16 sps:$4 sm:$0xff]   ;;  %v9880_v5 = vld [vmem:[%s14814_s1 + $0xba0] ss:$16 sps:$4 sm:$0xff]   ;;  %v711_v8 = vshll.u32 %v11573_v2, 16  ;;  %v709_v14 = vshrl.u32 %v11573_v2, 16 }
  0x22   : > { %v720_v58 = vrot.slane %v718_v55, 1  ;;  %v9881_v6 = vld [vmem:[%s14814_s1 + $0x9c4] ss:$16 sps:$4 sm:$0xff]   ;;  %v9885_v10 = vld [vmem:[%s14814_s1 + $0x9c0] ss:$16 sps:$4 sm:$0xff]  }
  0x23   : > { %2067 = vmatpush1.bf16.msra.mxu0 %v9843_v30  ;;  %v9883_v7 = vld [vmem:[%s14814_s1 + $0xbc4] ss:$16 sps:$4 sm:$0xff]   ;;  %v9886_v11 = vld [vmem:[%s14814_s1 + $0xbc0] ss:$16 sps:$4 sm:$0xff]   ;;  %v713_v15 = vrot.slane %v711_v8, 1 }
  0x24   : > { %2108 = vmatpush1.bf16.msra.mxu1 %v9844_v31  ;;  %2068 = vmatprep.subr.bf16.mxu0 %v9845_v32  ;;  %v11569_v0 = vor.u32 %v720_v58, %v716_v54  ;;  %v9887_v12 = vld [vmem:[%s14814_s1 + $0x9e4] ss:$16 sps:$4 sm:$0xff]   ;;  %v9891_v18 = vld [vmem:[%s14814_s1 + $0x9e0] ss:$16 sps:$4 sm:$0xff]  }
  0x25   : > { %2109 = vmatprep.subr.bf16.mxu1 %v9847_v33  ;;  %v9889_v13 = vld [vmem:[%s14814_s1 + $0xbe4] ss:$16 sps:$4 sm:$0xff]   ;;  %v9892_v19 = vld [vmem:[%s14814_s1 + $0xbe0] ss:$16 sps:$4 sm:$0xff]   ;;  %v11619_v22 = vor.u32 %v713_v15, %v709_v14 }
  0x26   : > { %2084 = vmatprep.mubr.bf16.mxu0 %v11569_v0  ;;  %v9899_v20 = vld [vmem:[%s14814_s1 + $0xc04] ss:$16 sps:$4 sm:$0xff]   ;;  %v9897_v24 = vld [vmem:[%s14814_s1 + $0xc00] ss:$16 sps:$4 sm:$0xff]  }
  0x27   : > { %2069 = vmatpush1.bf16.msra.mxu0 %v9849_v34  ;;  %v9902_v21 = vld [vmem:[%s14814_s1 + $0xe04] ss:$16 sps:$4 sm:$0xff]   ;;  %v9900_v25 = vld [vmem:[%s14814_s1 + $0xe00] ss:$16 sps:$4 sm:$0xff]  }
  0x28   : > { %2110 = vmatpush1.bf16.msra.mxu1 %v9850_v35  ;;  %2070 = vmatprep.subr.bf16.mxu0 %v9851_v36  ;;  %v9905_v26 = vld [vmem:[%s14814_s1 + $0xc24] ss:$16 sps:$4 sm:$0xff]   ;;  %v9903_v28 = vld [vmem:[%s14814_s1 + $0xc20] ss:$16 sps:$4 sm:$0xff]  }
  0x29   : > { %2111 = vmatprep.subr.bf16.mxu1 %v9853_v37  ;;  %v9908_v27 = vld [vmem:[%s14814_s1 + $0xe24] ss:$16 sps:$4 sm:$0xff]   ;;  %v9906_v29 = vld [vmem:[%s14814_s1 + $0xe20] ss:$16 sps:$4 sm:$0xff]  }
  0x2a   : > { %v9911_v30 = vld [vmem:[%s14814_s1 + $0xc44] ss:$16 sps:$4 sm:$0xff]   ;;  %v9909_v32 = vld [vmem:[%s14814_s1 + $0xc40] ss:$16 sps:$4 sm:$0xff]  }
  0x2b   : > { %2071 = vmatpush1.bf16.msra.mxu0 %v9855_v38  ;;  %v9914_v31 = vld [vmem:[%s14814_s1 + $0xe44] ss:$16 sps:$4 sm:$0xff]   ;;  %v9912_v33 = vld [vmem:[%s14814_s1 + $0xe40] ss:$16 sps:$4 sm:$0xff]  }
  0x2c   : > { %2112 = vmatpush1.bf16.msra.mxu1 %v9856_v39  ;;  %2072 = vmatprep.subr.bf16.mxu0 %v9857_v40  ;;  %v9917_v34 = vld [vmem:[%s14814_s1 + $0xc64] ss:$16 sps:$4 sm:$0xff]   ;;  %v9915_v36 = vld [vmem:[%s14814_s1 + $0xc60] ss:$16 sps:$4 sm:$0xff]  }
  0x2d   : > { %2113 = vmatprep.subr.bf16.mxu1 %v9859_v41  ;;  %v9920_v35 = vld [vmem:[%s14814_s1 + $0xe64] ss:$16 sps:$4 sm:$0xff]   ;;  %v9918_v37 = vld [vmem:[%s14814_s1 + $0xe60] ss:$16 sps:$4 sm:$0xff]  }
  0x2e   : > { %v9923_v38 = vld [vmem:[%s14814_s1 + $0xc84] ss:$16 sps:$4 sm:$0xff]   ;;  %v9921_v40 = vld [vmem:[%s14814_s1 + $0xc80] ss:$16 sps:$4 sm:$0xff]  }
  0x2f   : > { %2073 = vmatpush1.bf16.msra.mxu0 %v9861_v42  ;;  %v9926_v39 = vld [vmem:[%s14814_s1 + $0xe84] ss:$16 sps:$4 sm:$0xff]   ;;  %v9924_v41 = vld [vmem:[%s14814_s1 + $0xe80] ss:$16 sps:$4 sm:$0xff]  }
  0x30   : > { %2114 = vmatpush1.bf16.msra.mxu1 %v9862_v43  ;;  %2074 = vmatprep.subr.bf16.mxu0 %v9863_v44  ;;  %v9929_v42 = vld [vmem:[%s14814_s1 + $0xca4] ss:$16 sps:$4 sm:$0xff]   ;;  %v9927_v44 = vld [vmem:[%s14814_s1 + $0xca0] ss:$16 sps:$4 sm:$0xff]  }
  0x31   : > { %2115 = vmatprep.subr.bf16.mxu1 %v9865_v45  ;;  %v9932_v43 = vld [vmem:[%s14814_s1 + $0xea4] ss:$16 sps:$4 sm:$0xff]   ;;  %v9930_v45 = vld [vmem:[%s14814_s1 + $0xea0] ss:$16 sps:$4 sm:$0xff]  }
  0x32   : > { %v9938_v47 = vld [vmem:[%s14814_s1 + $0xec4] ss:$16 sps:$4 sm:$0xff]   ;;  %v9933_v49 = vld [vmem:[%s14814_s1 + $0xcc0] ss:$16 sps:$4 sm:$0xff]  }
  0x33   : > { %2075 = vmatpush1.bf16.msra.mxu0 %v9867_v46  ;;  %v9935_v46 = vld [vmem:[%s14814_s1 + $0xcc4] ss:$16 sps:$4 sm:$0xff]   ;;  %v9942_v61 = vld [vmem:[%s14814_s1 + $0xee0] ss:$16 sps:$4 sm:$0xff]  }
  0x34   : > { %2116 = vmatpush1.bf16.msra.mxu1 %v9868_v50  ;;  %2076 = vmatprep.subr.bf16.mxu0 %v9869_v51  ;;  %v9936_v50 = vld [vmem:[%s14814_s1 + $0xec0] ss:$16 sps:$4 sm:$0xff]   ;;  %v9941_v54 = vld [vmem:[%s14814_s1 + $0xce4] ss:$16 sps:$4 sm:$0xff]  }
  0x35   : > { %2117 = vmatprep.subr.bf16.mxu1 %v9871_v53  ;;  %v11704_v51 = vld [vmem:[%s11527_s30 + $0x10] sm:$0x77]  ;;  %v11707_v53 = vld [vmem:[%s11527_s30 + $0x18] sm:$0x77] }
  0x36   : > { %v11714_v55 = vcombine.high %v11704_v51, %v11704_v51  ;;  %v9944_v56 = vld [vmem:[%s14814_s1 + $0xee4] ss:$16 sps:$4 sm:$0xff]   ;;  %v11721_v57 = vcombine.high %v11707_v53, %v11707_v53  ;;  %v9945_v9 = vld [vmem:[%s14814_s1 + $0xd00] ss:$16 sps:$4 sm:$0xff]  }
  0x37   : > { %2077 = vmatpush1.bf16.msra.mxu0 %v9873_v59  ;;  %v9951_v14 = vld [vmem:[%s14814_s1 + $0xd20] ss:$16 sps:$4 sm:$0xff]   ;;  %v9959_v16 = vld [vmem:[%s14814_s1 + $0xd44] ss:$16 sps:$4 sm:$0xff]  }
  0x38   : > { %2118 = vmatpush1.bf16.msra.mxu1 %v9874_v60  ;;  %2078 = vmatprep.subr.bf16.mxu0 %v9875_v62  ;;  %v744_v58 = vshrl.u32 %v11714_v55, 16  ;;  %v746_v59 = vshll.u32 %v11714_v55, 16  ;;  %v9939_v60 = vld [vmem:[%s14814_s1 + $0xce0] ss:$16 sps:$4 sm:$0xff]   ;;  %v758_v62 = vshrl.u32 %v11721_v57, 16 }
  0x39   : > { %2119 = vmatprep.subr.bf16.mxu1 %v9877_v63  ;;  %v760_v63 = vshll.u32 %v11721_v57, 16  ;;  %v9954_v15 = vld [vmem:[%s14814_s1 + $0xf20] ss:$16 sps:$4 sm:$0xff]   ;;  %v9962_v17 = vld [vmem:[%s14814_s1 + $0xf44] ss:$16 sps:$4 sm:$0xff]  }
  0x3b   : > { %2079 = vmatpush1.bf16.msra.mxu0 %v9879_v4  ;;  %v9947_v4 = vld [vmem:[%s14814_s1 + $0xd04] ss:$16 sps:$4 sm:$0xff]  }
  0x3c   : > { %2120 = vmatpush1.bf16.msra.mxu1 %v9880_v5  ;;  %2080 = vmatprep.subr.bf16.mxu0 %v9881_v6  ;;  %v748_v5 = vrot.slane %v746_v59, 1  ;;  %v9950_v6 = vld [vmem:[%s14814_s1 + $0xf04] ss:$16 sps:$4 sm:$0xff]   ;;  %v10000_v59 = vld [vmem:[%s14814_s1 + $0xa08] ss:$16 sps:$4 sm:$0xff]  }
  0x3d   : > { %2121 = vmatprep.subr.bf16.mxu1 %v9883_v7  ;;  %v762_v7 = vrot.slane %v760_v63, 1  ;;  %v10006_v63 = vld [vmem:[%s14814_s1 + $0xa28] ss:$16 sps:$4 sm:$0xff]  }
  0x3e   : > { %v11739_v8 = vor.u32 %v748_v5, %v744_v58  ;;  %v9997_v58 = vld [vmem:[%s14814_s1 + $0x808] ss:$16 sps:$4 sm:$0xff]   ;;  %v10014_v5 = vld [vmem:[%s14814_s1 + $0xa4c] ss:$16 sps:$4 sm:$0xff]  }
  0x3f   : > { %2081 = vmatpush1.bf16.msra.mxu0 %v9885_v10  ;;  %v9948_v10 = vld [vmem:[%s14814_s1 + $0xf00] ss:$16 sps:$4 sm:$0xff]  }
  0x40   : > { %2122 = vmatpush1.bf16.msra.mxu1 %v9886_v11  ;;  %2082 = vmatprep.subr.bf16.mxu0 %v9887_v12  ;;  %v11747_v11 = vor.u32 %v762_v7, %v758_v62  ;;  %v9953_v12 = vld [vmem:[%s14814_s1 + $0xd24] ss:$16 sps:$4 sm:$0xff]   ;;  %v10003_v62 = vld [vmem:[%s14814_s1 + $0x828] ss:$16 sps:$4 sm:$0xff]  }
  0x41   : > { %2123 = vmatprep.subr.bf16.mxu1 %v9889_v13  ;;  %v9956_v13 = vld [vmem:[%s14814_s1 + $0xf24] ss:$16 sps:$4 sm:$0xff]   ;;  %v10012_v7 = vld [vmem:[%s14814_s1 + $0xa48] ss:$16 sps:$4 sm:$0xff]  }
  0x43   : > { %2083 = vmatpush1.bf16.msra.mxu0 %v9891_v18  ;;  %v9957_v18 = vld [vmem:[%s14814_s1 + $0xd40] ss:$16 sps:$4 sm:$0xff]  }
  0x44   : > { %2124 = vmatpush1.bf16.msra.mxu1 %v9892_v19  ;;  %2134 = vmatprep.subr.bf16.mxu0 %v9899_v20  ;;  %v9960_v19 = vld [vmem:[%s14814_s1 + $0xf40] ss:$16 sps:$4 sm:$0xff]   ;;  %v9965_v20 = vld [vmem:[%s14814_s1 + $0xd64] ss:$16 sps:$4 sm:$0xff]  }
  0x45   : > { %2175 = vmatprep.subr.bf16.mxu1 %v9902_v21  ;;  %v9968_v21 = vld [vmem:[%s14814_s1 + $0xf64] ss:$16 sps:$4 sm:$0xff]  }
  0x46   : > { %2085 = vmatmul.mubr.bf16.vlgmr.msra.gmra.mrb[0].mxu0 %v11619_v22 }
  0x47   : > { %2126 = vmatmul.mubr.bf16.vlgmr.msra.gmra.mrb[0].mxu1 %v11621_v23  ;;  %2135 = vmatpush1.bf16.msra.mxu0 %v9897_v24  ;;  %v9963_v24 = vld [vmem:[%s14814_s1 + $0xd60] ss:$16 sps:$4 sm:$0xff]  }
  0x48   : > { %2176 = vmatpush1.bf16.msra.mxu1 %v9900_v25  ;;  %2136 = vmatprep.subr.bf16.mxu0 %v9905_v26  ;;  %v9966_v25 = vld [vmem:[%s14814_s1 + $0xf60] ss:$16 sps:$4 sm:$0xff]   ;;  %v9971_v26 = vld [vmem:[%s14814_s1 + $0xd84] ss:$16 sps:$4 sm:$0xff]  }
  0x49   : > { %2177 = vmatprep.subr.bf16.mxu1 %v9908_v27  ;;  %2166 = vmatprep.mubr.bf16.mxu0 %v11739_v8  ;;  %v9974_v27 = vld [vmem:[%s14814_s1 + $0xf84] ss:$16 sps:$4 sm:$0xff]  }
  0x4a   : > { %2207 = vmatprep.mubr.bf16.mxu1 %v11747_v11 }
  0x4b   : > { %2137 = vmatpush1.bf16.msra.mxu0 %v9903_v28  ;;  %v9969_v28 = vld [vmem:[%s14814_s1 + $0xd80] ss:$16 sps:$4 sm:$0xff]  }
  0x4c   : > { %2178 = vmatpush1.bf16.msra.mxu1 %v9906_v29  ;;  %2138 = vmatprep.subr.bf16.mxu0 %v9911_v30  ;;  %v9972_v29 = vld [vmem:[%s14814_s1 + $0xf80] ss:$16 sps:$4 sm:$0xff]   ;;  %v9977_v30 = vld [vmem:[%s14814_s1 + $0xda4] ss:$16 sps:$4 sm:$0xff]  }
  0x4d   : > { %2179 = vmatprep.subr.bf16.mxu1 %v9914_v31  ;;  %v9980_v31 = vld [vmem:[%s14814_s1 + $0xfa4] ss:$16 sps:$4 sm:$0xff]  }
  0x4f   : > { %2139 = vmatpush1.bf16.msra.mxu0 %v9909_v32  ;;  %v9975_v32 = vld [vmem:[%s14814_s1 + $0xda0] ss:$16 sps:$4 sm:$0xff]  }
  0x50   : > { %2180 = vmatpush1.bf16.msra.mxu1 %v9912_v33  ;;  %2140 = vmatprep.subr.bf16.mxu0 %v9917_v34  ;;  %v9978_v33 = vld [vmem:[%s14814_s1 + $0xfa0] ss:$16 sps:$4 sm:$0xff]   ;;  %v11813_v34 = vcombine.low %v11704_v51, %v11704_v51  ;;  %v9999_v51 = vld [vmem:[%s14814_s1 + $0x80c] ss:$16 sps:$4 sm:$0xff]  }
  0x51   : > { %2181 = vmatprep.subr.bf16.mxu1 %v9920_v35  ;;  %v11817_v35 = vcombine.low %v11707_v53, %v11707_v53  ;;  %v10002_v53 = vld [vmem:[%s14814_s1 + $0xa0c] ss:$16 sps:$4 sm:$0xff]  }
  0x53   : > { %2141 = vmatpush1.bf16.msra.mxu0 %v9915_v36  ;;  %v9983_v36 = vld [vmem:[%s14814_s1 + $0xdc4] ss:$16 sps:$4 sm:$0xff]  }
  0x54   : > { %2182 = vmatpush1.bf16.msra.mxu1 %v9918_v37  ;;  %2142 = vmatprep.subr.bf16.mxu0 %v9923_v38  ;;  %v9986_v37 = vld [vmem:[%s14814_s1 + $0xfc4] ss:$16 sps:$4 sm:$0xff]   ;;  %v9981_v38 = vld [vmem:[%s14814_s1 + $0xdc0] ss:$16 sps:$4 sm:$0xff]  }
  0x55   : > { %2183 = vmatprep.subr.bf16.mxu1 %v9926_v39  ;;  %v9984_v39 = vld [vmem:[%s14814_s1 + $0xfc0] ss:$16 sps:$4 sm:$0xff]  }
  0x57   : > { %2143 = vmatpush1.bf16.msra.mxu0 %v9921_v40  ;;  %v739_v40 = vshll.u32 %v11813_v34, 16 }
  0x58   : > { %2184 = vmatpush1.bf16.msra.mxu1 %v9924_v41  ;;  %2144 = vmatprep.subr.bf16.mxu0 %v9929_v42  ;;  %v753_v41 = vshll.u32 %v11817_v35, 16  ;;  %v9989_v42 = vld [vmem:[%s14814_s1 + $0xde4] ss:$16 sps:$4 sm:$0xff]  }
  0x59   : > { %2185 = vmatprep.subr.bf16.mxu1 %v9932_v43  ;;  %v9992_v43 = vld [vmem:[%s14814_s1 + $0xfe4] ss:$16 sps:$4 sm:$0xff]  }
  0x5b   : > { %2145 = vmatpush1.bf16.msra.mxu0 %v9927_v44  ;;  %v9987_v44 = vld [vmem:[%s14814_s1 + $0xde0] ss:$16 sps:$4 sm:$0xff]  }
  0x5c   : > { %2186 = vmatpush1.bf16.msra.mxu1 %v9930_v45  ;;  %2146 = vmatprep.subr.bf16.mxu0 %v9935_v46  ;;  %v9990_v45 = vld [vmem:[%s14814_s1 + $0xfe0] ss:$16 sps:$4 sm:$0xff]   ;;  %v737_v46 = vshrl.u32 %v11813_v34, 16 }
  0x5d   : > { %2187 = vmatprep.subr.bf16.mxu1 %v9938_v47  ;;  %v741_v47 = vrot.slane %v739_v40, 1  ;;  %v10059_v40 = vld [vmem:[%s14814_s1 + $0x94c] ss:$16 sps:$4 sm:$0xff]  }
  0x5f   : > { %2147 = vmatpush1.bf16.msra.mxu0 %v9933_v49  ;;  %v751_v49 = vshrl.u32 %v11817_v35, 16 }
  0x60   : > { %2188 = vmatpush1.bf16.msra.mxu1 %v9936_v50  ;;  %2148 = vmatprep.subr.bf16.mxu0 %v9941_v54  ;;  %v755_v50 = vrot.slane %v753_v41, 1  ;;  %v11853_v54 = vor.u32 %v741_v47, %v737_v46  ;;  %v10062_v41 = vld [vmem:[%s14814_s1 + $0xb4c] ss:$16 sps:$4 sm:$0xff]   ;;  %v10063_v46 = vld [vmem:[%s14814_s1 + $0x968] ss:$16 sps:$4 sm:$0xff]  }
  0x61   : > { %2189 = vmatprep.subr.bf16.mxu1 %v9944_v56  ;;  %v10066_v47 = vld [vmem:[%s14814_s1 + $0xb68] ss:$16 sps:$4 sm:$0xff]  }
  0x62   : > { %v11855_v56 = vor.u32 %v755_v50, %v751_v49  ;;  %v10071_v49 = vld [vmem:[%s14814_s1 + $0x98c] ss:$16 sps:$4 sm:$0xff]  }
  0x63   : > { %2149 = vmatpush1.bf16.msra.mxu0 %v9939_v60  ;;  %v10005_v60 = vld [vmem:[%s14814_s1 + $0x82c] ss:$16 sps:$4 sm:$0xff]  }
  0x64   : > { %2190 = vmatpush1.bf16.msra.mxu1 %v9942_v61  ;;  %2150 = vmatprep.subr.bf16.mxu0 %v9947_v4  ;;  %v10008_v61 = vld [vmem:[%s14814_s1 + $0xa2c] ss:$16 sps:$4 sm:$0xff]  }
  0x65   : > { %2191 = vmatprep.subr.bf16.mxu1 %v9950_v6  ;;  %v10011_v4 = vld [vmem:[%s14814_s1 + $0x84c] ss:$16 sps:$4 sm:$0xff]   ;;  %v10009_v6 = vld [vmem:[%s14814_s1 + $0x848] ss:$16 sps:$4 sm:$0xff]  }
  0x66   : > { %v10074_v50 = vld [vmem:[%s14814_s1 + $0xb8c] ss:$16 sps:$4 sm:$0xff]  }
  0x67   : > { %2151 = vmatpush1.bf16.msra.mxu0 %v9945_v9  ;;  %v10017_v9 = vld [vmem:[%s14814_s1 + $0x86c] ss:$16 sps:$4 sm:$0xff]  }
  0x68   : > { %2192 = vmatpush1.bf16.msra.mxu1 %v9948_v10  ;;  %2152 = vmatprep.subr.bf16.mxu0 %v9953_v12  ;;  %v10018_v10 = vld [vmem:[%s14814_s1 + $0xa68] ss:$16 sps:$4 sm:$0xff]   ;;  %v10023_v12 = vld [vmem:[%s14814_s1 + $0x88c] ss:$16 sps:$4 sm:$0xff]  }
  0x69   : > { %2193 = vmatprep.subr.bf16.mxu1 %v9956_v13  ;;  %v10026_v13 = vld [vmem:[%s14814_s1 + $0xa8c] ss:$16 sps:$4 sm:$0xff]  }
  0x6b   : > { %2153 = vmatpush1.bf16.msra.mxu0 %v9951_v14  ;;  %v10021_v14 = vld [vmem:[%s14814_s1 + $0x888] ss:$16 sps:$4 sm:$0xff]  }
  0x6c   : > { %2194 = vmatpush1.bf16.msra.mxu1 %v9954_v15  ;;  %2154 = vmatprep.subr.bf16.mxu0 %v9959_v16  ;;  %v10024_v15 = vld [vmem:[%s14814_s1 + $0xa88] ss:$16 sps:$4 sm:$0xff]   ;;  %v10029_v16 = vld [vmem:[%s14814_s1 + $0x8ac] ss:$16 sps:$4 sm:$0xff]  }
  0x6d   : > { %2195 = vmatprep.subr.bf16.mxu1 %v9962_v17  ;;  %v10032_v17 = vld [vmem:[%s14814_s1 + $0xaac] ss:$16 sps:$4 sm:$0xff]  }
  0x6f   : > { %2155 = vmatpush1.bf16.msra.mxu0 %v9957_v18  ;;  %v10027_v18 = vld [vmem:[%s14814_s1 + $0x8a8] ss:$16 sps:$4 sm:$0xff]  }
  0x70   : > { %2196 = vmatpush1.bf16.msra.mxu1 %v9960_v19  ;;  %2156 = vmatprep.subr.bf16.mxu0 %v9965_v20  ;;  %v10030_v19 = vld [vmem:[%s14814_s1 + $0xaa8] ss:$16 sps:$4 sm:$0xff]   ;;  %v10035_v20 = vld [vmem:[%s14814_s1 + $0x8cc] ss:$16 sps:$4 sm:$0xff]  }
  0x71   : > { %2197 = vmatprep.subr.bf16.mxu1 %v9968_v21  ;;  %v10038_v21 = vld [vmem:[%s14814_s1 + $0xacc] ss:$16 sps:$4 sm:$0xff]  }
  0x73   : > { %2157 = vmatpush1.bf16.msra.mxu0 %v9963_v24  ;;  %v10033_v24 = vld [vmem:[%s14814_s1 + $0x8c8] ss:$16 sps:$4 sm:$0xff]  }
  0x74   : > { %2198 = vmatpush1.bf16.msra.mxu1 %v9966_v25  ;;  %2158 = vmatprep.subr.bf16.mxu0 %v9971_v26  ;;  %v10036_v25 = vld [vmem:[%s14814_s1 + $0xac8] ss:$16 sps:$4 sm:$0xff]   ;;  %v10041_v26 = vld [vmem:[%s14814_s1 + $0x8ec] ss:$16 sps:$4 sm:$0xff]  }
  0x75   : > { %2199 = vmatprep.subr.bf16.mxu1 %v9974_v27  ;;  %v10044_v27 = vld [vmem:[%s14814_s1 + $0xaec] ss:$16 sps:$4 sm:$0xff]  }
  0x77   : > { %2159 = vmatpush1.bf16.msra.mxu0 %v9969_v28  ;;  %v10039_v28 = vld [vmem:[%s14814_s1 + $0x8e8] ss:$16 sps:$4 sm:$0xff]  }
  0x78   : > { %2200 = vmatpush1.bf16.msra.mxu1 %v9972_v29  ;;  %2160 = vmatprep.subr.bf16.mxu0 %v9977_v30  ;;  %v10042_v29 = vld [vmem:[%s14814_s1 + $0xae8] ss:$16 sps:$4 sm:$0xff]   ;;  %v10047_v30 = vld [vmem:[%s14814_s1 + $0x90c] ss:$16 sps:$4 sm:$0xff]  }
  0x79   : > { %2201 = vmatprep.subr.bf16.mxu1 %v9980_v31  ;;  %v10050_v31 = vld [vmem:[%s14814_s1 + $0xb0c] ss:$16 sps:$4 sm:$0xff]  }
  0x7b   : > { %2161 = vmatpush1.bf16.msra.mxu0 %v9975_v32  ;;  %v10045_v32 = vld [vmem:[%s14814_s1 + $0x908] ss:$16 sps:$4 sm:$0xff]  }
  0x7c   : > { %2202 = vmatpush1.bf16.msra.mxu1 %v9978_v33  ;;  %2162 = vmatprep.subr.bf16.mxu0 %v9983_v36  ;;  %v10048_v33 = vld [vmem:[%s14814_s1 + $0xb08] ss:$16 sps:$4 sm:$0xff]   ;;  %v10053_v36 = vld [vmem:[%s14814_s1 + $0x92c] ss:$16 sps:$4 sm:$0xff]  }
  0x7d   : > { %2203 = vmatprep.subr.bf16.mxu1 %v9986_v37  ;;  %v10056_v37 = vld [vmem:[%s14814_s1 + $0xb2c] ss:$16 sps:$4 sm:$0xff]  }
  0x7f   : > { %2163 = vmatpush1.bf16.msra.mxu0 %v9981_v38  ;;  %v10051_v38 = vld [vmem:[%s14814_s1 + $0x928] ss:$16 sps:$4 sm:$0xff]  }
  0x80   : > { %2204 = vmatpush1.bf16.msra.mxu1 %v9984_v39  ;;  %2164 = vmatprep.subr.bf16.mxu0 %v9989_v42  ;;  %v10054_v39 = vld [vmem:[%s14814_s1 + $0xb28] ss:$16 sps:$4 sm:$0xff]  }
  0x81   : > { %2205 = vmatprep.subr.bf16.mxu1 %v9992_v43  ;;  %v10057_v42 = vld [vmem:[%s14814_s1 + $0x948] ss:$16 sps:$4 sm:$0xff]  }
  0x82   : > { %v10060_v43 = vld [vmem:[%s14814_s1 + $0xb48] ss:$16 sps:$4 sm:$0xff]  }
  0x83   : > { %2165 = vmatpush1.bf16.msra.mxu0 %v9987_v44  ;;  %v10065_v44 = vld [vmem:[%s14814_s1 + $0x96c] ss:$16 sps:$4 sm:$0xff]  }
  0x84   : > { %2206 = vmatpush1.bf16.msra.mxu1 %v9990_v45  ;;  %2216 = vmatprep.subr.bf16.mxu0 %v9999_v51  ;;  %v10068_v45 = vld [vmem:[%s14814_s1 + $0xb6c] ss:$16 sps:$4 sm:$0xff]   ;;  %v10069_v51 = vld [vmem:[%s14814_s1 + $0x988] ss:$16 sps:$4 sm:$0xff]  }
  0x85   : > { %2257 = vmatprep.subr.bf16.mxu1 %v10002_v53  ;;  %v10072_v53 = vld [vmem:[%s14814_s1 + $0xb88] ss:$16 sps:$4 sm:$0xff]  }
  0x86   : > { %2167 = vmatmul.mubr.bf16.vlgmr.msra.gmra.mrb[4].mxu0 %v11853_v54 }
  0x87   : > { %2208 = vmatmul.mubr.bf16.vlgmr.msra.gmra.mrb[4].mxu1 %v11855_v56  ;;  %2217 = vmatpush1.bf16.msra.mxu0 %v9997_v58  ;;  %v10077_v58 = vld [vmem:[%s14814_s1 + $0x9ac] ss:$16 sps:$4 sm:$0xff]  }
  0x88   : > { %2258 = vmatpush1.bf16.msra.mxu1 %v10000_v59  ;;  %2218 = vmatprep.subr.bf16.mxu0 %v10005_v60  ;;  %v10080_v59 = vld [vmem:[%s14814_s1 + $0xbac] ss:$16 sps:$4 sm:$0xff]   ;;  %v10075_v60 = vld [vmem:[%s14814_s1 + $0x9a8] ss:$16 sps:$4 sm:$0xff]  }
  0x89   : > { %2259 = vmatprep.subr.bf16.mxu1 %v10008_v61  ;;  %2248 = vmatprep.mubr.bf16.mxu0 %v11569_v0  ;;  %v10020_v0 = vld [vmem:[%s14814_s1 + $0xa6c] ss:$16 sps:$4 sm:$0xff]   ;;  %v10078_v61 = vld [vmem:[%s14814_s1 + $0xba8] ss:$16 sps:$4 sm:$0xff]  }
  0x8a   : > { %2289 = vmatprep.mubr.bf16.mxu1 %v11571_v1  ;;  %v10015_v1 = vld [vmem:[%s14814_s1 + $0x868] ss:$16 sps:$4 sm:$0xff]  }
  0x8b   : > { %2219 = vmatpush1.bf16.msra.mxu0 %v10003_v62  ;;  %v10083_v62 = vld [vmem:[%s14814_s1 + $0x9cc] ss:$16 sps:$4 sm:$0xff]  }
  0x8c   : > { %2260 = vmatpush1.bf16.msra.mxu1 %v10006_v63  ;;  %2220 = vmatprep.subr.bf16.mxu0 %v10011_v4  ;;  %v10086_v63 = vld [vmem:[%s14814_s1 + $0xbcc] ss:$16 sps:$4 sm:$0xff]   ;;  %v10081_v4 = vld [vmem:[%s14814_s1 + $0x9c8] ss:$16 sps:$4 sm:$0xff]  }
  0x8d   : > { %2261 = vmatprep.subr.bf16.mxu1 %v10014_v5  ;;  %v10084_v5 = vld [vmem:[%s14814_s1 + $0xbc8] ss:$16 sps:$4 sm:$0xff]  }
  0x8f   : > { %2221 = vmatpush1.bf16.msra.mxu0 %v10009_v6  ;;  %v10089_v6 = vld [vmem:[%s14814_s1 + $0x9ec] ss:$16 sps:$4 sm:$0xff]  }
  0x90   : > { %2262 = vmatpush1.bf16.msra.mxu1 %v10012_v7  ;;  %2222 = vmatprep.subr.bf16.mxu0 %v10017_v9  ;;  %v10092_v7 = vld [vmem:[%s14814_s1 + $0xbec] ss:$16 sps:$4 sm:$0xff]   ;;  %v10087_v9 = vld [vmem:[%s14814_s1 + $0x9e8] ss:$16 sps:$4 sm:$0xff]  }
  0x91   : > { %2263 = vmatprep.subr.bf16.mxu1 %v10020_v0  ;;  %v10090_v0 = vld [vmem:[%s14814_s1 + $0xbe8] ss:$16 sps:$4 sm:$0xff]  }
  0x93   : > { %2223 = vmatpush1.bf16.msra.mxu0 %v10015_v1  ;;  %v10095_v1 = vld [vmem:[%s14814_s1 + $0xc0c] ss:$16 sps:$4 sm:$0xff]  }
  0x94   : > { %2264 = vmatpush1.bf16.msra.mxu1 %v10018_v10  ;;  %2224 = vmatprep.subr.bf16.mxu0 %v10023_v12  ;;  %v10098_v10 = vld [vmem:[%s14814_s1 + $0xe0c] ss:$16 sps:$4 sm:$0xff]   ;;  %v10093_v12 = vld [vmem:[%s14814_s1 + $0xc08] ss:$16 sps:$4 sm:$0xff]  }
  0x95   : > { %2265 = vmatprep.subr.bf16.mxu1 %v10026_v13  ;;  %v10096_v13 = vld [vmem:[%s14814_s1 + $0xe08] ss:$16 sps:$4 sm:$0xff]  }
  0x97   : > { %2225 = vmatpush1.bf16.msra.mxu0 %v10021_v14  ;;  %v10101_v14 = vld [vmem:[%s14814_s1 + $0xc2c] ss:$16 sps:$4 sm:$0xff]  }
  0x98   : > { %2266 = vmatpush1.bf16.msra.mxu1 %v10024_v15  ;;  %2226 = vmatprep.subr.bf16.mxu0 %v10029_v16  ;;  %v10104_v15 = vld [vmem:[%s14814_s1 + $0xe2c] ss:$16 sps:$4 sm:$0xff]   ;;  %v10099_v16 = vld [vmem:[%s14814_s1 + $0xc28] ss:$16 sps:$4 sm:$0xff]  }
  0x99   : > { %2267 = vmatprep.subr.bf16.mxu1 %v10032_v17  ;;  %v10102_v17 = vld [vmem:[%s14814_s1 + $0xe28] ss:$16 sps:$4 sm:$0xff]  }
  0x9b   : > { %2227 = vmatpush1.bf16.msra.mxu0 %v10027_v18  ;;  %v10107_v18 = vld [vmem:[%s14814_s1 + $0xc4c] ss:$16 sps:$4 sm:$0xff]  }
  0x9c   : > { %2268 = vmatpush1.bf16.msra.mxu1 %v10030_v19  ;;  %2228 = vmatprep.subr.bf16.mxu0 %v10035_v20  ;;  %v10108_v19 = vld [vmem:[%s14814_s1 + $0xe48] ss:$16 sps:$4 sm:$0xff]   ;;  %v10113_v20 = vld [vmem:[%s14814_s1 + $0xc6c] ss:$16 sps:$4 sm:$0xff]  }
  0x9d   : > { %2269 = vmatprep.subr.bf16.mxu1 %v10038_v21  ;;  %v10114_v21 = vld [vmem:[%s14814_s1 + $0xe68] ss:$16 sps:$4 sm:$0xff]  }
  0x9f   : > { %2229 = vmatpush1.bf16.msra.mxu0 %v10033_v24  ;;  %v10119_v24 = vld [vmem:[%s14814_s1 + $0xc8c] ss:$16 sps:$4 sm:$0xff]  }
  0xa0   : > { %2270 = vmatpush1.bf16.msra.mxu1 %v10036_v25  ;;  %2230 = vmatprep.subr.bf16.mxu0 %v10041_v26  ;;  %v10122_v25 = vld [vmem:[%s14814_s1 + $0xe8c] ss:$16 sps:$4 sm:$0xff]   ;;  %v10117_v26 = vld [vmem:[%s14814_s1 + $0xc88] ss:$16 sps:$4 sm:$0xff]  }
  0xa1   : > { %2271 = vmatprep.subr.bf16.mxu1 %v10044_v27  ;;  %v10120_v27 = vld [vmem:[%s14814_s1 + $0xe88] ss:$16 sps:$4 sm:$0xff]  }
  0xa3   : > { %2231 = vmatpush1.bf16.msra.mxu0 %v10039_v28  ;;  %v10125_v28 = vld [vmem:[%s14814_s1 + $0xcac] ss:$16 sps:$4 sm:$0xff]  }
  0xa4   : > { %2272 = vmatpush1.bf16.msra.mxu1 %v10042_v29  ;;  %2232 = vmatprep.subr.bf16.mxu0 %v10047_v30  ;;  %v10128_v29 = vld [vmem:[%s14814_s1 + $0xeac] ss:$16 sps:$4 sm:$0xff]   ;;  %v10123_v30 = vld [vmem:[%s14814_s1 + $0xca8] ss:$16 sps:$4 sm:$0xff]  }
  0xa5   : > { %2273 = vmatprep.subr.bf16.mxu1 %v10050_v31  ;;  %v10126_v31 = vld [vmem:[%s14814_s1 + $0xea8] ss:$16 sps:$4 sm:$0xff]  }
  0xa7   : > { %2233 = vmatpush1.bf16.msra.mxu0 %v10045_v32  ;;  %v10131_v32 = vld [vmem:[%s14814_s1 + $0xccc] ss:$16 sps:$4 sm:$0xff]  }
  0xa8   : > { %2274 = vmatpush1.bf16.msra.mxu1 %v10048_v33  ;;  %2234 = vmatprep.subr.bf16.mxu0 %v10053_v36  ;;  %v10134_v33 = vld [vmem:[%s14814_s1 + $0xecc] ss:$16 sps:$4 sm:$0xff]   ;;  %v10129_v36 = vld [vmem:[%s14814_s1 + $0xcc8] ss:$16 sps:$4 sm:$0xff]  }
  0xa9   : > { %2275 = vmatprep.subr.bf16.mxu1 %v10056_v37  ;;  %v10132_v37 = vld [vmem:[%s14814_s1 + $0xec8] ss:$16 sps:$4 sm:$0xff]  }
  0xab   : > { %2235 = vmatpush1.bf16.msra.mxu0 %v10051_v38  ;;  %v10137_v38 = vld [vmem:[%s14814_s1 + $0xcec] ss:$16 sps:$4 sm:$0xff]  }
  0xac   : > { %2276 = vmatpush1.bf16.msra.mxu1 %v10054_v39  ;;  %2236 = vmatprep.subr.bf16.mxu0 %v10059_v40  ;;  %v10140_v39 = vld [vmem:[%s14814_s1 + $0xeec] ss:$16 sps:$4 sm:$0xff]   ;;  %v10135_v40 = vld [vmem:[%s14814_s1 + $0xce8] ss:$16 sps:$4 sm:$0xff]  }
  0xad   : > { %2277 = vmatprep.subr.bf16.mxu1 %v10062_v41  ;;  %v10138_v41 = vld [vmem:[%s14814_s1 + $0xee8] ss:$16 sps:$4 sm:$0xff]  }
  0xaf   : > { %2237 = vmatpush1.bf16.msra.mxu0 %v10057_v42  ;;  %v10143_v42 = vld [vmem:[%s14814_s1 + $0xd0c] ss:$16 sps:$4 sm:$0xff]  }
  0xb0   : > { %2278 = vmatpush1.bf16.msra.mxu1 %v10060_v43  ;;  %2238 = vmatprep.subr.bf16.mxu0 %v10065_v44  ;;  %v10146_v43 = vld [vmem:[%s14814_s1 + $0xf0c] ss:$16 sps:$4 sm:$0xff]   ;;  %v10141_v44 = vld [vmem:[%s14814_s1 + $0xd08] ss:$16 sps:$4 sm:$0xff]  }
  0xb1   : > { %2279 = vmatprep.subr.bf16.mxu1 %v10068_v45  ;;  %v10144_v45 = vld [vmem:[%s14814_s1 + $0xf08] ss:$16 sps:$4 sm:$0xff]  }
  0xb3   : > { %2239 = vmatpush1.bf16.msra.mxu0 %v10063_v46  ;;  %v10149_v46 = vld [vmem:[%s14814_s1 + $0xd2c] ss:$16 sps:$4 sm:$0xff]  }
  0xb4   : > { %2280 = vmatpush1.bf16.msra.mxu1 %v10066_v47  ;;  %2240 = vmatprep.subr.bf16.mxu0 %v10071_v49  ;;  %v10152_v47 = vld [vmem:[%s14814_s1 + $0xf2c] ss:$16 sps:$4 sm:$0xff]   ;;  %v10147_v49 = vld [vmem:[%s14814_s1 + $0xd28] ss:$16 sps:$4 sm:$0xff]  }
  0xb5   : > { %2281 = vmatprep.subr.bf16.mxu1 %v10074_v50  ;;  %v10150_v50 = vld [vmem:[%s14814_s1 + $0xf28] ss:$16 sps:$4 sm:$0xff]  }
  0xb7   : > { %2241 = vmatpush1.bf16.msra.mxu0 %v10069_v51  ;;  %v10155_v51 = vld [vmem:[%s14814_s1 + $0xd4c] ss:$16 sps:$4 sm:$0xff]  }
  0xb8   : > { %2282 = vmatpush1.bf16.msra.mxu1 %v10072_v53  ;;  %2242 = vmatprep.subr.bf16.mxu0 %v10077_v58  ;;  %v10158_v53 = vld [vmem:[%s14814_s1 + $0xf4c] ss:$16 sps:$4 sm:$0xff]   ;;  %v10153_v58 = vld [vmem:[%s14814_s1 + $0xd48] ss:$16 sps:$4 sm:$0xff]  }
  0xb9   : > { %2283 = vmatprep.subr.bf16.mxu1 %v10080_v59  ;;  %v10156_v59 = vld [vmem:[%s14814_s1 + $0xf48] ss:$16 sps:$4 sm:$0xff]  }
  0xbb   : > { %2243 = vmatpush1.bf16.msra.mxu0 %v10075_v60  ;;  %v10161_v60 = vld [vmem:[%s14814_s1 + $0xd6c] ss:$16 sps:$4 sm:$0xff]  }
  0xbc   : > { %2284 = vmatpush1.bf16.msra.mxu1 %v10078_v61  ;;  %2244 = vmatprep.subr.bf16.mxu0 %v10083_v62  ;;  %v10164_v61 = vld [vmem:[%s14814_s1 + $0xf6c] ss:$16 sps:$4 sm:$0xff]   ;;  %v10159_v62 = vld [vmem:[%s14814_s1 + $0xd68] ss:$16 sps:$4 sm:$0xff]  }
  0xbd   : > { %2285 = vmatprep.subr.bf16.mxu1 %v10086_v63  ;;  %v10162_v63 = vld [vmem:[%s14814_s1 + $0xf68] ss:$16 sps:$4 sm:$0xff]  }
  0xbf   : > { %2245 = vmatpush1.bf16.msra.mxu0 %v10081_v4  ;;  %v10167_v4 = vld [vmem:[%s14814_s1 + $0xd8c] ss:$16 sps:$4 sm:$0xff]  }
  0xc0   : > { %2286 = vmatpush1.bf16.msra.mxu1 %v10084_v5  ;;  %2246 = vmatprep.subr.bf16.mxu0 %v10089_v6  ;;  %v10170_v5 = vld [vmem:[%s14814_s1 + $0xf8c] ss:$16 sps:$4 sm:$0xff]   ;;  %v10165_v6 = vld [vmem:[%s14814_s1 + $0xd88] ss:$16 sps:$4 sm:$0xff]  }
  0xc1   : > { %2287 = vmatprep.subr.bf16.mxu1 %v10092_v7  ;;  %v10168_v7 = vld [vmem:[%s14814_s1 + $0xf88] ss:$16 sps:$4 sm:$0xff]  }
  0xc3   : > { %2247 = vmatpush1.bf16.msra.mxu0 %v10087_v9  ;;  %v10173_v9 = vld [vmem:[%s14814_s1 + $0xdac] ss:$16 sps:$4 sm:$0xff]  }
  0xc4   : > { %2288 = vmatpush1.bf16.msra.mxu1 %v10090_v0  ;;  %2298 = vmatprep.subr.bf16.mxu0 %v10095_v1  ;;  %v10176_v0 = vld [vmem:[%s14814_s1 + $0xfac] ss:$16 sps:$4 sm:$0xff]   ;;  %v10171_v1 = vld [vmem:[%s14814_s1 + $0xda8] ss:$16 sps:$4 sm:$0xff]  }
  0xc5   : > { %2339 = vmatprep.subr.bf16.mxu1 %v10098_v10  ;;  %v10174_v10 = vld [vmem:[%s14814_s1 + $0xfa8] ss:$16 sps:$4 sm:$0xff]  }
  0xc6   : > { %2249 = vmatmul.mubr.bf16.vlgmr.msra.gmra.mrb[8].mxu0 %v11619_v22  ;;  %v10110_v22 = vld [vmem:[%s14814_s1 + $0xe4c] ss:$16 sps:$4 sm:$0xff]  }
  0xc7   : > { %2290 = vmatmul.mubr.bf16.vlgmr.msra.gmra.mrb[8].mxu1 %v11621_v23  ;;  %2299 = vmatpush1.bf16.msra.mxu0 %v10093_v12  ;;  %v10105_v23 = vld [vmem:[%s14814_s1 + $0xc48] ss:$16 sps:$4 sm:$0xff]   ;;  %v10179_v12 = vld [vmem:[%s14814_s1 + $0xdcc] ss:$16 sps:$4 sm:$0xff]  }
  0xc8   : > { %2340 = vmatpush1.bf16.msra.mxu1 %v10096_v13  ;;  %2300 = vmatprep.subr.bf16.mxu0 %v10101_v14  ;;  %v10182_v13 = vld [vmem:[%s14814_s1 + $0xfcc] ss:$16 sps:$4 sm:$0xff]   ;;  %v10177_v14 = vld [vmem:[%s14814_s1 + $0xdc8] ss:$16 sps:$4 sm:$0xff]  }
  0xc9   : > { %2341 = vmatprep.subr.bf16.mxu1 %v10104_v15  ;;  %2330 = vmatprep.mubr.bf16.mxu0 %v11739_v8  ;;  %v10116_v8 = vld [vmem:[%s14814_s1 + $0xe6c] ss:$16 sps:$4 sm:$0xff]   ;;  %v10180_v15 = vld [vmem:[%s14814_s1 + $0xfc8] ss:$16 sps:$4 sm:$0xff]  }
  0xca   : > { %2371 = vmatprep.mubr.bf16.mxu1 %v11747_v11  ;;  %v10111_v11 = vld [vmem:[%s14814_s1 + $0xc68] ss:$16 sps:$4 sm:$0xff]  }
  0xcb   : > { %2301 = vmatpush1.bf16.msra.mxu0 %v10099_v16  ;;  %v10185_v16 = vld [vmem:[%s14814_s1 + $0xdec] ss:$16 sps:$4 sm:$0xff]  }
  0xcc   : > { %2342 = vmatpush1.bf16.msra.mxu1 %v10102_v17  ;;  %2302 = vmatprep.subr.bf16.mxu0 %v10107_v18  ;;  %v10188_v17 = vld [vmem:[%s14814_s1 + $0xfec] ss:$16 sps:$4 sm:$0xff]   ;;  %v10183_v18 = vld [vmem:[%s14814_s1 + $0xde8] ss:$16 sps:$4 sm:$0xff]  }
  0xcd   : > { %2343 = vmatprep.subr.bf16.mxu1 %v10110_v22  ;;  %v10186_v22 = vld [vmem:[%s14814_s1 + $0xfe8] ss:$16 sps:$4 sm:$0xff]  }
  0xcf   : > { %2303 = vmatpush1.bf16.msra.mxu0 %v10105_v23  ;;  %v10191_v23 = vld [vmem:[%s14814_s1 + $0x4] ss:$16 sps:$4 sm:$0xff]  }
  0xd0   : > { %2344 = vmatpush1.bf16.msra.mxu1 %v10108_v19  ;;  %2304 = vmatprep.subr.bf16.mxu0 %v10113_v20  ;;  %v10194_v19 = vld [vmem:[%s14814_s1 + $0x204] ss:$16 sps:$4 sm:$0xff]   ;;  %v10189_v20 = vld [vmem:[%s14814_s1] ss:$16 sps:$4 sm:$0xff]  }
  0xd1   : > { %2345 = vmatprep.subr.bf16.mxu1 %v10116_v8  ;;  %v10192_v8 = vld [vmem:[%s14814_s1 + $0x200] ss:$16 sps:$4 sm:$0xff]  }
  0xd3   : > { %2305 = vmatpush1.bf16.msra.mxu0 %v10111_v11  ;;  %v10197_v11 = vld [vmem:[%s14814_s1 + $0x24] ss:$16 sps:$4 sm:$0xff]  }
  0xd4   : > { %2346 = vmatpush1.bf16.msra.mxu1 %v10114_v21  ;;  %2306 = vmatprep.subr.bf16.mxu0 %v10119_v24  ;;  %v10200_v21 = vld [vmem:[%s14814_s1 + $0x224] ss:$16 sps:$4 sm:$0xff]   ;;  %v10195_v24 = vld [vmem:[%s14814_s1 + $0x20] ss:$16 sps:$4 sm:$0xff]  }
  0xd5   : > { %2347 = vmatprep.subr.bf16.mxu1 %v10122_v25  ;;  %v10198_v25 = vld [vmem:[%s14814_s1 + $0x220] ss:$16 sps:$4 sm:$0xff]  }
  0xd7   : > { %2307 = vmatpush1.bf16.msra.mxu0 %v10117_v26  ;;  %v10203_v26 = vld [vmem:[%s14814_s1 + $0x44] ss:$16 sps:$4 sm:$0xff]  }
  0xd8   : > { %2348 = vmatpush1.bf16.msra.mxu1 %v10120_v27  ;;  %2308 = vmatprep.subr.bf16.mxu0 %v10125_v28  ;;  %v10204_v27 = vld [vmem:[%s14814_s1 + $0x240] ss:$16 sps:$4 sm:$0xff]   ;;  %v10209_v28 = vld [vmem:[%s14814_s1 + $0x64] ss:$16 sps:$4 sm:$0xff]  }
  0xd9   : > { %2349 = vmatprep.subr.bf16.mxu1 %v10128_v29  ;;  %v10212_v29 = vld [vmem:[%s14814_s1 + $0x264] ss:$16 sps:$4 sm:$0xff]  }
  0xdb   : > { %2309 = vmatpush1.bf16.msra.mxu0 %v10123_v30  ;;  %v10207_v30 = vld [vmem:[%s14814_s1 + $0x60] ss:$16 sps:$4 sm:$0xff]  }
  0xdc   : > { %2350 = vmatpush1.bf16.msra.mxu1 %v10126_v31  ;;  %2310 = vmatprep.subr.bf16.mxu0 %v10131_v32  ;;  %v10210_v31 = vld [vmem:[%s14814_s1 + $0x260] ss:$16 sps:$4 sm:$0xff]   ;;  %v10215_v32 = vld [vmem:[%s14814_s1 + $0x84] ss:$16 sps:$4 sm:$0xff]  }
  0xdd   : > { %2351 = vmatprep.subr.bf16.mxu1 %v10134_v33  ;;  %v10218_v33 = vld [vmem:[%s14814_s1 + $0x284] ss:$16 sps:$4 sm:$0xff]  }
  0xdf   : > { %2311 = vmatpush1.bf16.msra.mxu0 %v10129_v36  ;;  %v10213_v36 = vld [vmem:[%s14814_s1 + $0x80] ss:$16 sps:$4 sm:$0xff]  }
  0xe0   : > { %2352 = vmatpush1.bf16.msra.mxu1 %v10132_v37  ;;  %2312 = vmatprep.subr.bf16.mxu0 %v10137_v38  ;;  %v10216_v37 = vld [vmem:[%s14814_s1 + $0x280] ss:$16 sps:$4 sm:$0xff]   ;;  %v10221_v38 = vld [vmem:[%s14814_s1 + $0xa4] ss:$16 sps:$4 sm:$0xff]  }
  0xe1   : > { %2353 = vmatprep.subr.bf16.mxu1 %v10140_v39  ;;  %v10224_v39 = vld [vmem:[%s14814_s1 + $0x2a4] ss:$16 sps:$4 sm:$0xff]  }
  0xe3   : > { %2313 = vmatpush1.bf16.msra.mxu0 %v10135_v40  ;;  %v10219_v40 = vld [vmem:[%s14814_s1 + $0xa0] ss:$16 sps:$4 sm:$0xff]  }
  0xe4   : > { %2354 = vmatpush1.bf16.msra.mxu1 %v10138_v41  ;;  %2314 = vmatprep.subr.bf16.mxu0 %v10143_v42  ;;  %v10222_v41 = vld [vmem:[%s14814_s1 + $0x2a0] ss:$16 sps:$4 sm:$0xff]   ;;  %v10227_v42 = vld [vmem:[%s14814_s1 + $0xc4] ss:$16 sps:$4 sm:$0xff]  }
  0xe5   : > { %2355 = vmatprep.subr.bf16.mxu1 %v10146_v43  ;;  %v10230_v43 = vld [vmem:[%s14814_s1 + $0x2c4] ss:$16 sps:$4 sm:$0xff]  }
  0xe7   : > { %2315 = vmatpush1.bf16.msra.mxu0 %v10141_v44 }
  0xe8   : > { %2356 = vmatpush1.bf16.msra.mxu1 %v10144_v45  ;;  %2316 = vmatprep.subr.bf16.mxu0 %v10149_v46  ;;  %v10225_v46 = vld [vmem:[%s14814_s1 + $0xc0] ss:$16 sps:$4 sm:$0xff]  }
  0xe9   : > { %2357 = vmatprep.subr.bf16.mxu1 %v10152_v47  ;;  %v10228_v47 = vld [vmem:[%s14814_s1 + $0x2c0] ss:$16 sps:$4 sm:$0xff]  }
  0xeb   : > { %2317 = vmatpush1.bf16.msra.mxu0 %v10147_v49 }
  0xec   : > { %2358 = vmatpush1.bf16.msra.mxu1 %v10150_v50  ;;  %2318 = vmatprep.subr.bf16.mxu0 %v10155_v51 }
  0xed   : > { %2359 = vmatprep.subr.bf16.mxu1 %v10158_v53 }
  0xef   : > { %2319 = vmatpush1.bf16.msra.mxu0 %v10153_v58 }
  0xf0   : > { %2360 = vmatpush1.bf16.msra.mxu1 %v10156_v59  ;;  %2320 = vmatprep.subr.bf16.mxu0 %v10161_v60 }
  0xf1   : > { %2361 = vmatprep.subr.bf16.mxu1 %v10164_v61 }
  0xf3   : > { %2321 = vmatpush1.bf16.msra.mxu0 %v10159_v62  ;;  %v10233_v62 = vld [vmem:[%s14814_s1 + $0xe4] ss:$16 sps:$4 sm:$0xff]  }
  0xf4   : > { %2362 = vmatpush1.bf16.msra.mxu1 %v10162_v63  ;;  %2322 = vmatprep.subr.bf16.mxu0 %v10167_v4  ;;  %v10236_v63 = vld [vmem:[%s14814_s1 + $0x2e4] ss:$16 sps:$4 sm:$0xff]   ;;  %v10231_v4 = vld [vmem:[%s14814_s1 + $0xe0] ss:$16 sps:$4 sm:$0xff]  }
  0xf5   : > { %2363 = vmatprep.subr.bf16.mxu1 %v10170_v5  ;;  %v10234_v5 = vld [vmem:[%s14814_s1 + $0x2e0] ss:$16 sps:$4 sm:$0xff]  }
  0xf7   : > { %2323 = vmatpush1.bf16.msra.mxu0 %v10165_v6  ;;  %v10239_v6 = vld [vmem:[%s14814_s1 + $0x104] ss:$16 sps:$4 sm:$0xff]  }
  0xf8   : > { %2364 = vmatpush1.bf16.msra.mxu1 %v10168_v7  ;;  %2324 = vmatprep.subr.bf16.mxu0 %v10173_v9  ;;  %v10242_v7 = vld [vmem:[%s14814_s1 + $0x304] ss:$16 sps:$4 sm:$0xff]   ;;  %v10237_v9 = vld [vmem:[%s14814_s1 + $0x100] ss:$16 sps:$4 sm:$0xff]  }
  0xf9   : > { %2365 = vmatprep.subr.bf16.mxu1 %v10176_v0  ;;  %v10240_v0 = vld [vmem:[%s14814_s1 + $0x300] ss:$16 sps:$4 sm:$0xff]  }
  0xfb   : > { %2325 = vmatpush1.bf16.msra.mxu0 %v10171_v1  ;;  %v10245_v1 = vld [vmem:[%s14814_s1 + $0x124] ss:$16 sps:$4 sm:$0xff]  }
  0xfc   : > { %2366 = vmatpush1.bf16.msra.mxu1 %v10174_v10  ;;  %2326 = vmatprep.subr.bf16.mxu0 %v10179_v12  ;;  %v10248_v10 = vld [vmem:[%s14814_s1 + $0x324] ss:$16 sps:$4 sm:$0xff]   ;;  %v10243_v12 = vld [vmem:[%s14814_s1 + $0x120] ss:$16 sps:$4 sm:$0xff]  }
  0xfd   : > { %2367 = vmatprep.subr.bf16.mxu1 %v10182_v13  ;;  %v10246_v13 = vld [vmem:[%s14814_s1 + $0x320] ss:$16 sps:$4 sm:$0xff]  }
  0xff   : > { %2327 = vmatpush1.bf16.msra.mxu0 %v10177_v14  ;;  %v10251_v14 = vld [vmem:[%s14814_s1 + $0x144] ss:$16 sps:$4 sm:$0xff]  }
 0x100   : > { %2368 = vmatpush1.bf16.msra.mxu1 %v10180_v15  ;;  %2328 = vmatprep.subr.bf16.mxu0 %v10185_v16  ;;  %v10254_v15 = vld [vmem:[%s14814_s1 + $0x344] ss:$16 sps:$4 sm:$0xff]   ;;  %v10249_v16 = vld [vmem:[%s14814_s1 + $0x140] ss:$16 sps:$4 sm:$0xff]  }
 0x101   : > { %2369 = vmatprep.subr.bf16.mxu1 %v10188_v17  ;;  %v10252_v17 = vld [vmem:[%s14814_s1 + $0x340] ss:$16 sps:$4 sm:$0xff]  }
 0x103   : > { %2329 = vmatpush1.bf16.msra.mxu0 %v10183_v18  ;;  %v10257_v18 = vld [vmem:[%s14814_s1 + $0x164] ss:$16 sps:$4 sm:$0xff]  }
 0x104   : > { %2370 = vmatpush1.bf16.msra.mxu1 %v10186_v22  ;;  %3668 = vmatprep.subr.bf16.mxu0 %v10191_v23  ;;  %v10260_v22 = vld [vmem:[%s14814_s1 + $0x364] ss:$16 sps:$4 sm:$0xff]   ;;  %v10255_v23 = vld [vmem:[%s14814_s1 + $0x160] ss:$16 sps:$4 sm:$0xff]  }
 0x105   : > { %3709 = vmatprep.subr.bf16.mxu1 %v10194_v19  ;;  %v10258_v19 = vld [vmem:[%s14814_s1 + $0x360] ss:$16 sps:$4 sm:$0xff]  }
 0x106   : > { %2331 = vmatmul.mubr.bf16.vlgmr.msra.gmra.mrb[12].mxu0 %v11853_v54  ;;  %v10206_v54 = vld [vmem:[%s14814_s1 + $0x244] ss:$16 sps:$4 sm:$0xff]  }
 0x107   : > { %2372 = vmatmul.mubr.bf16.vlgmr.msra.gmra.mrb[12].mxu1 %v11855_v56  ;;  %3669 = vmatpush1.bf16.msra.mxu0 %v10189_v20  ;;  %v10201_v56 = vld [vmem:[%s14814_s1 + $0x40] ss:$16 sps:$4 sm:$0xff]   ;;  %v10263_v20 = vld [vmem:[%s14814_s1 + $0x184] ss:$16 sps:$4 sm:$0xff]  }
 0x108   : > { %3710 = vmatpush1.bf16.msra.mxu1 %v10192_v8  ;;  %3670 = vmatprep.subr.bf16.mxu0 %v10197_v11  ;;  %v10266_v8 = vld [vmem:[%s14814_s1 + $0x384] ss:$16 sps:$4 sm:$0xff]   ;;  %v10261_v11 = vld [vmem:[%s14814_s1 + $0x180] ss:$16 sps:$4 sm:$0xff]  }
 0x109   : > { %3711 = vmatprep.subr.bf16.mxu1 %v10200_v21  ;;  %3700 = vmatprep.mubr.bf16.mxu0 %v11539_v48  ;;  %v10264_v21 = vld [vmem:[%s14814_s1 + $0x380] ss:$16 sps:$4 sm:$0xff]  }
 0x10a   : > { %3741 = vmatprep.mubr.bf16.mxu1 %v11548_v52 }
 0x10b   : > { %3671 = vmatpush1.bf16.msra.mxu0 %v10195_v24  ;;  %v10269_v24 = vld [vmem:[%s14814_s1 + $0x1a4] ss:$16 sps:$4 sm:$0xff]  }
 0x10c   : > { %3712 = vmatpush1.bf16.msra.mxu1 %v10198_v25  ;;  %3672 = vmatprep.subr.bf16.mxu0 %v10203_v26  ;;  %v10272_v25 = vld [vmem:[%s14814_s1 + $0x3a4] ss:$16 sps:$4 sm:$0xff]   ;;  %v10267_v26 = vld [vmem:[%s14814_s1 + $0x1a0] ss:$16 sps:$4 sm:$0xff]  }
 0x10d   : > { %3713 = vmatprep.subr.bf16.mxu1 %v10206_v54  ;;  %v10270_v54 = vld [vmem:[%s14814_s1 + $0x3a0] ss:$16 sps:$4 sm:$0xff]  }
 0x10f   : > { %3673 = vmatpush1.bf16.msra.mxu0 %v10201_v56  ;;  %v10275_v56 = vld [vmem:[%s14814_s1 + $0x1c4] ss:$16 sps:$4 sm:$0xff]  }
 0x110   : > { %3714 = vmatpush1.bf16.msra.mxu1 %v10204_v27  ;;  %3674 = vmatprep.subr.bf16.mxu0 %v10209_v28  ;;  %v10278_v27 = vld [vmem:[%s14814_s1 + $0x3c4] ss:$16 sps:$4 sm:$0xff]   ;;  %v10273_v28 = vld [vmem:[%s14814_s1 + $0x1c0] ss:$16 sps:$4 sm:$0xff]  }
 0x111   : > { %3715 = vmatprep.subr.bf16.mxu1 %v10212_v29  ;;  %v10276_v29 = vld [vmem:[%s14814_s1 + $0x3c0] ss:$16 sps:$4 sm:$0xff]  }
 0x113   : > { %3675 = vmatpush1.bf16.msra.mxu0 %v10207_v30  ;;  %v10281_v30 = vld [vmem:[%s14814_s1 + $0x1e4] ss:$16 sps:$4 sm:$0xff]  }
 0x114   : > { %3716 = vmatpush1.bf16.msra.mxu1 %v10210_v31  ;;  %3676 = vmatprep.subr.bf16.mxu0 %v10215_v32  ;;  %v10284_v31 = vld [vmem:[%s14814_s1 + $0x3e4] ss:$16 sps:$4 sm:$0xff]   ;;  %v10279_v32 = vld [vmem:[%s14814_s1 + $0x1e0] ss:$16 sps:$4 sm:$0xff]  }
 0x115   : > { %3717 = vmatprep.subr.bf16.mxu1 %v10218_v33  ;;  %v10282_v33 = vld [vmem:[%s14814_s1 + $0x3e0] ss:$16 sps:$4 sm:$0xff]  }
 0x117   : > { %3677 = vmatpush1.bf16.msra.mxu0 %v10213_v36  ;;  %v10287_v36 = vld [vmem:[%s14814_s1 + $0x404] ss:$16 sps:$4 sm:$0xff]  }
 0x118   : > { %3718 = vmatpush1.bf16.msra.mxu1 %v10216_v37  ;;  %3678 = vmatprep.subr.bf16.mxu0 %v10221_v38  ;;  %v10290_v37 = vld [vmem:[%s14814_s1 + $0x604] ss:$16 sps:$4 sm:$0xff]   ;;  %v10285_v38 = vld [vmem:[%s14814_s1 + $0x400] ss:$16 sps:$4 sm:$0xff]  }
 0x119   : > { %3719 = vmatprep.subr.bf16.mxu1 %v10224_v39  ;;  %v2086_v44 = vpop.f32.mrb[0].mxu0  ;;  %v10288_v39 = vld [vmem:[%s14814_s1 + $0x600] ss:$16 sps:$4 sm:$0xff]  }
 0x11a   : > { %v2127_v45 = vpop.f32.mrb[0].mxu1  ;;  %v2088_v50 = vpop.f32.mrb[1].mxu0 }
 0x11b   : > { %v12331_v49 = vadd.f32 %v2127_v45, %v2086_v44  ;;  %v2129_v51 = vpop.f32.mrb[1].mxu1  ;;  %v2090_v58 = vpop.f32.mrb[2].mxu0  ;;  %3679 = vmatpush1.bf16.msra.mxu0 %v10219_v40  ;;  %v10293_v40 = vld [vmem:[%s14814_s1 + $0x424] ss:$16 sps:$4 sm:$0xff]  }
 0x11c   : > { %v12333_v53 = vadd.f32 %v2129_v51, %v2088_v50  ;;  %v2131_v59 = vpop.f32.mrb[2].mxu1  ;;  %3720 = vmatpush1.bf16.msra.mxu1 %v10222_v41  ;;  %v2091_v60 = vpop.f32.mrb[3].mxu0  ;;  %3680 = vmatprep.subr.bf16.mxu0 %v10227_v42  ;;  %v10296_v41 = vld [vmem:[%s14814_s1 + $0x624] ss:$16 sps:$4 sm:$0xff]   ;;  %v10291_v42 = vld [vmem:[%s14814_s1 + $0x420] ss:$16 sps:$4 sm:$0xff]  }
 0x11d   : > { %v2132_v61 = vpop.f32.mrb[3].mxu1  ;;  %3721 = vmatprep.subr.bf16.mxu1 %v10230_v43  ;;  %v10294_v43 = vld [vmem:[%s14814_s1 + $0x620] ss:$16 sps:$4 sm:$0xff]   ;;  %v10299_v44 = vld [vmem:[%s14814_s1 + $0x444] ss:$16 sps:$4 sm:$0xff]  }
 0x11e   : > { %v10302_v45 = vld [vmem:[%s14814_s1 + $0x644] ss:$16 sps:$4 sm:$0xff]   ;;  %v10303_v58 = vld [vmem:[%s14814_s1 + $0x460] ss:$16 sps:$4 sm:$0xff]  }
 0x11f   : > { %3681 = vmatpush1.bf16.msra.mxu0 %v10225_v46  ;;  %v10297_v46 = vld [vmem:[%s14814_s1 + $0x440] ss:$16 sps:$4 sm:$0xff]   ;;  %v10305_v50 = vld [vmem:[%s14814_s1 + $0x464] ss:$16 sps:$4 sm:$0xff]  }
 0x120   : > { %3722 = vmatpush1.bf16.msra.mxu1 %v10228_v47  ;;  %3682 = vmatprep.subr.bf16.mxu0 %v10233_v62  ;;  %v10300_v47 = vld [vmem:[%s14814_s1 + $0x640] ss:$16 sps:$4 sm:$0xff]   ;;  %v10308_v51 = vld [vmem:[%s14814_s1 + $0x664] ss:$16 sps:$4 sm:$0xff]  }
 0x121   : > { %3723 = vmatprep.subr.bf16.mxu1 %v10236_v63  ;;  %v10306_v59 = vld [vmem:[%s14814_s1 + $0x660] ss:$16 sps:$4 sm:$0xff]   ;;  %v10311_v60 = vld [vmem:[%s14814_s1 + $0x484] ss:$16 sps:$4 sm:$0xff]  }
 0x122   : > { %v10314_v61 = vld [vmem:[%s14814_s1 + $0x684] ss:$16 sps:$4 sm:$0xff]   ;;  %v10309_v62 = vld [vmem:[%s14814_s1 + $0x480] ss:$16 sps:$4 sm:$0xff]  }
 0x123   : > { %3683 = vmatpush1.bf16.msra.mxu0 %v10231_v4  ;;  %v10312_v63 = vld [vmem:[%s14814_s1 + $0x680] ss:$16 sps:$4 sm:$0xff]   ;;  %v10317_v4 = vld [vmem:[%s14814_s1 + $0x4a4] ss:$16 sps:$4 sm:$0xff]  }
 0x124   : > { %3724 = vmatpush1.bf16.msra.mxu1 %v10234_v5  ;;  %3684 = vmatprep.subr.bf16.mxu0 %v10239_v6  ;;  %v10320_v5 = vld [vmem:[%s14814_s1 + $0x6a4] ss:$16 sps:$4 sm:$0xff]   ;;  %v10315_v6 = vld [vmem:[%s14814_s1 + $0x4a0] ss:$16 sps:$4 sm:$0xff]  }
 0x125   : > { %3725 = vmatprep.subr.bf16.mxu1 %v10242_v7  ;;  %v10318_v7 = vld [vmem:[%s14814_s1 + $0x6a0] ss:$16 sps:$4 sm:$0xff]  }
 0x127   : > { %3685 = vmatpush1.bf16.msra.mxu0 %v10237_v9  ;;  %v10323_v9 = vld [vmem:[%s14814_s1 + $0x4c4] ss:$16 sps:$4 sm:$0xff]  }
 0x128   : > { %3726 = vmatpush1.bf16.msra.mxu1 %v10240_v0  ;;  %3686 = vmatprep.subr.bf16.mxu0 %v10245_v1  ;;  %v10326_v0 = vld [vmem:[%s14814_s1 + $0x6c4] ss:$16 sps:$4 sm:$0xff]  }
 0x129   : > { %3727 = vmatprep.subr.bf16.mxu1 %v10248_v10 }
 0x12b   : > { %3687 = vmatpush1.bf16.msra.mxu0 %v10243_v12  ;;  %v10321_v12 = vld [vmem:[%s14814_s1 + $0x4c0] ss:$16 sps:$4 sm:$0xff]  }
 0x12c   : > { %3728 = vmatpush1.bf16.msra.mxu1 %v10246_v13  ;;  %3688 = vmatprep.subr.bf16.mxu0 %v10251_v14  ;;  %v10324_v13 = vld [vmem:[%s14814_s1 + $0x6c0] ss:$16 sps:$4 sm:$0xff]  }
 0x12d   : > { %3729 = vmatprep.subr.bf16.mxu1 %v10254_v15 }
 0x12f   : > { %3689 = vmatpush1.bf16.msra.mxu0 %v10249_v16 }
 0x130   : > { %3730 = vmatpush1.bf16.msra.mxu1 %v10252_v17  ;;  %3690 = vmatprep.subr.bf16.mxu0 %v10257_v18 }
 0x131   : > { %3731 = vmatprep.subr.bf16.mxu1 %v10260_v22 }
 0x133   : > { %3691 = vmatpush1.bf16.msra.mxu0 %v10255_v23 }
 0x134   : > { %3732 = vmatpush1.bf16.msra.mxu1 %v10258_v19  ;;  %3692 = vmatprep.subr.bf16.mxu0 %v10263_v20 }
 0x135   : > { %3733 = vmatprep.subr.bf16.mxu1 %v10266_v8  ;;  %v10329_v8 = vld [vmem:[%s14814_s1 + $0x4e4] ss:$16 sps:$4 sm:$0xff]  }
 0x137   : > { %3693 = vmatpush1.bf16.msra.mxu0 %v10261_v11 }
 0x138   : > { %3734 = vmatpush1.bf16.msra.mxu1 %v10264_v21  ;;  %3694 = vmatprep.subr.bf16.mxu0 %v10269_v24  ;;  %v10330_v21 = vld [vmem:[%s14814_s1 + $0x6e0] ss:$16 sps:$4 sm:$0xff]   ;;  %v10335_v24 = vld [vmem:[%s14814_s1 + $0x504] ss:$16 sps:$4 sm:$0xff]  }
 0x139   : > { %3735 = vmatprep.subr.bf16.mxu1 %v10272_v25  ;;  %v10338_v25 = vld [vmem:[%s14814_s1 + $0x704] ss:$16 sps:$4 sm:$0xff]  }
 0x13b   : > { %3695 = vmatpush1.bf16.msra.mxu0 %v10267_v26  ;;  %v10333_v26 = vld [vmem:[%s14814_s1 + $0x500] ss:$16 sps:$4 sm:$0xff]  }
 0x13c   : > { %3736 = vmatpush1.bf16.msra.mxu1 %v10270_v54  ;;  %3696 = vmatprep.subr.bf16.mxu0 %v10275_v56  ;;  %v10336_v54 = vld [vmem:[%s14814_s1 + $0x700] ss:$16 sps:$4 sm:$0xff]   ;;  %v10341_v56 = vld [vmem:[%s14814_s1 + $0x524] ss:$16 sps:$4 sm:$0xff]  }
 0x13d   : > { %3737 = vmatprep.subr.bf16.mxu1 %v10278_v27  ;;  %v10344_v27 = vld [vmem:[%s14814_s1 + $0x724] ss:$16 sps:$4 sm:$0xff]  }
 0x13f   : > { %3697 = vmatpush1.bf16.msra.mxu0 %v10273_v28  ;;  %v10339_v28 = vld [vmem:[%s14814_s1 + $0x520] ss:$16 sps:$4 sm:$0xff]  }
 0x140   : > { %3738 = vmatpush1.bf16.msra.mxu1 %v10276_v29  ;;  %3698 = vmatprep.subr.bf16.mxu0 %v10281_v30  ;;  %v10342_v29 = vld [vmem:[%s14814_s1 + $0x720] ss:$16 sps:$4 sm:$0xff]   ;;  %v10347_v30 = vld [vmem:[%s14814_s1 + $0x544] ss:$16 sps:$4 sm:$0xff]  }
 0x141   : > { %3739 = vmatprep.subr.bf16.mxu1 %v10284_v31  ;;  %v10350_v31 = vld [vmem:[%s14814_s1 + $0x744] ss:$16 sps:$4 sm:$0xff]  }
 0x143   : > { %3699 = vmatpush1.bf16.msra.mxu0 %v10279_v32  ;;  %v10345_v32 = vld [vmem:[%s14814_s1 + $0x540] ss:$16 sps:$4 sm:$0xff]  }
 0x144   : > { %3740 = vmatpush1.bf16.msra.mxu1 %v10282_v33  ;;  %3750 = vmatprep.subr.bf16.mxu0 %v10287_v36  ;;  %v10348_v33 = vld [vmem:[%s14814_s1 + $0x740] ss:$16 sps:$4 sm:$0xff]   ;;  %v10353_v36 = vld [vmem:[%s14814_s1 + $0x564] ss:$16 sps:$4 sm:$0xff]  }
 0x145   : > { %3791 = vmatprep.subr.bf16.mxu1 %v10290_v37  ;;  %v10356_v37 = vld [vmem:[%s14814_s1 + $0x764] ss:$16 sps:$4 sm:$0xff]  }
 0x146   : > { %3701 = vmatmul.mubr.bf16.vlgmr.msra.gmra.mrb[16].mxu0 %v11573_v2 }
 0x147   : > { %3742 = vmatmul.mubr.bf16.vlgmr.msra.gmra.mrb[16].mxu1 %v11576_v3  ;;  %3751 = vmatpush1.bf16.msra.mxu0 %v10285_v38  ;;  %v10351_v38 = vld [vmem:[%s14814_s1 + $0x560] ss:$16 sps:$4 sm:$0xff]  }
 0x148   : > { %3792 = vmatpush1.bf16.msra.mxu1 %v10288_v39  ;;  %3752 = vmatprep.subr.bf16.mxu0 %v10293_v40  ;;  %v10354_v39 = vld [vmem:[%s14814_s1 + $0x760] ss:$16 sps:$4 sm:$0xff]   ;;  %v10359_v40 = vld [vmem:[%s14814_s1 + $0x584] ss:$16 sps:$4 sm:$0xff]  }
 0x149   : > { %3793 = vmatprep.subr.bf16.mxu1 %v10296_v41  ;;  %3782 = vmatprep.mubr.bf16.mxu0 %v11714_v55  ;;  %v10362_v41 = vld [vmem:[%s14814_s1 + $0x784] ss:$16 sps:$4 sm:$0xff]  }
 0x14a   : > { %3823 = vmatprep.mubr.bf16.mxu1 %v11721_v57 }
 0x14b   : > { %3753 = vmatpush1.bf16.msra.mxu0 %v10291_v42  ;;  %v10357_v42 = vld [vmem:[%s14814_s1 + $0x580] ss:$16 sps:$4 sm:$0xff]  }
 0x14c   : > { %3794 = vmatpush1.bf16.msra.mxu1 %v10294_v43  ;;  %3754 = vmatprep.subr.bf16.mxu0 %v10299_v44  ;;  %v10360_v43 = vld [vmem:[%s14814_s1 + $0x780] ss:$16 sps:$4 sm:$0xff]   ;;  %v10365_v44 = vld [vmem:[%s14814_s1 + $0x5a4] ss:$16 sps:$4 sm:$0xff]  }
 0x14d   : > { %3795 = vmatprep.subr.bf16.mxu1 %v10302_v45  ;;  %v10368_v45 = vld [vmem:[%s14814_s1 + $0x7a4] ss:$16 sps:$4 sm:$0xff]  }
 0x14f   : > { %3755 = vmatpush1.bf16.msra.mxu0 %v10297_v46  ;;  %v10363_v46 = vld [vmem:[%s14814_s1 + $0x5a0] ss:$16 sps:$4 sm:$0xff]  }
 0x150   : > { %3796 = vmatpush1.bf16.msra.mxu1 %v10300_v47  ;;  %3756 = vmatprep.subr.bf16.mxu0 %v10305_v50  ;;  %v10366_v47 = vld [vmem:[%s14814_s1 + $0x7a0] ss:$16 sps:$4 sm:$0xff]   ;;  %v10371_v50 = vld [vmem:[%s14814_s1 + $0x5c4] ss:$16 sps:$4 sm:$0xff]  }
 0x151   : > { %3797 = vmatprep.subr.bf16.mxu1 %v10308_v51  ;;  %v10374_v51 = vld [vmem:[%s14814_s1 + $0x7c4] ss:$16 sps:$4 sm:$0xff]  }
 0x153   : > { %3757 = vmatpush1.bf16.msra.mxu0 %v10303_v58  ;;  %v10369_v58 = vld [vmem:[%s14814_s1 + $0x5c0] ss:$16 sps:$4 sm:$0xff]  }
 0x154   : > { %3798 = vmatpush1.bf16.msra.mxu1 %v10306_v59  ;;  %3758 = vmatprep.subr.bf16.mxu0 %v10311_v60  ;;  %v10372_v59 = vld [vmem:[%s14814_s1 + $0x7c0] ss:$16 sps:$4 sm:$0xff]   ;;  %v10377_v60 = vld [vmem:[%s14814_s1 + $0x5e4] ss:$16 sps:$4 sm:$0xff]  }
 0x155   : > { %3799 = vmatprep.subr.bf16.mxu1 %v10314_v61  ;;  %v10380_v61 = vld [vmem:[%s14814_s1 + $0x7e4] ss:$16 sps:$4 sm:$0xff]  }
 0x157   : > { %3759 = vmatpush1.bf16.msra.mxu0 %v10309_v62  ;;  %v10375_v62 = vld [vmem:[%s14814_s1 + $0x5e0] ss:$16 sps:$4 sm:$0xff]  }
 0x158   : > { %3800 = vmatpush1.bf16.msra.mxu1 %v10312_v63  ;;  %3760 = vmatprep.subr.bf16.mxu0 %v10317_v4  ;;  %v10378_v63 = vld [vmem:[%s14814_s1 + $0x7e0] ss:$16 sps:$4 sm:$0xff]   ;;  %v10383_v4 = vld [vmem:[%s14814_s1 + $0xc] ss:$16 sps:$4 sm:$0xff]  }
 0x159   : > { %3801 = vmatprep.subr.bf16.mxu1 %v10320_v5  ;;  %v2168_v1 = vpop.f32.mrb[4].mxu0  ;;  %v10386_v5 = vld [vmem:[%s14814_s1 + $0x20c] ss:$16 sps:$4 sm:$0xff]  }
 0x15a   : > { %v2209_v10 = vpop.f32.mrb[4].mxu1  ;;  %v2169_v14 = vadd.f32 %v2168_v1, %v12331_v49  ;;  %v2170_v15 = vpop.f32.mrb[5].mxu0  ;;  %v10332_v49 = vld [vmem:[%s14814_s1 + $0x6e4] ss:$16 sps:$4 sm:$0xff]   ;;  %v10387_v1 = vld [vmem:[%s14814_s1 + $0x28] ss:$16 sps:$4 sm:$0xff]  }
 0x15b   : > { %v2211_v16 = vpop.f32.mrb[5].mxu1  ;;  %v2171_v17 = vadd.f32 %v2170_v15, %v12333_v53  ;;  %v2172_v18 = vpop.f32.mrb[6].mxu0  ;;  %3761 = vmatpush1.bf16.msra.mxu0 %v10315_v6  ;;  %v10327_v53 = vld [vmem:[%s14814_s1 + $0x4e0] ss:$16 sps:$4 sm:$0xff]   ;;  %v10381_v6 = vld [vmem:[%s14814_s1 + $0x8] ss:$16 sps:$4 sm:$0xff]  }
 0x15c   : > { %v2213_v22 = vpop.f32.mrb[6].mxu1  ;;  %3802 = vmatpush1.bf16.msra.mxu1 %v10318_v7  ;;  %v12533_v23 = vadd.f32 %v2209_v10, %v2169_v14  ;;  %v2173_v19 = vpop.f32.mrb[7].mxu0  ;;  %3762 = vmatprep.subr.bf16.mxu0 %v10323_v9  ;;  %v10384_v7 = vld [vmem:[%s14814_s1 + $0x208] ss:$16 sps:$4 sm:$0xff]   ;;  %v10389_v9 = vld [vmem:[%s14814_s1 + $0x2c] ss:$16 sps:$4 sm:$0xff]  }
 0x15d   : > { %v2214_v20 = vpop.f32.mrb[7].mxu1  ;;  %3803 = vmatprep.subr.bf16.mxu1 %v10326_v0  ;;  %v12541_v11 = vadd.f32 %v2211_v16, %v2171_v17  ;;  %v10392_v0 = vld [vmem:[%s14814_s1 + $0x22c] ss:$16 sps:$4 sm:$0xff]   ;;  %v10390_v10 = vld [vmem:[%s14814_s1 + $0x228] ss:$16 sps:$4 sm:$0xff]  }
 0x15e   : > { %v10393_v14 = vld [vmem:[%s14814_s1 + $0x48] ss:$16 sps:$4 sm:$0xff]   ;;  %v10401_v16 = vld [vmem:[%s14814_s1 + $0x6c] ss:$16 sps:$4 sm:$0xff]  }
 0x15f   : > { %3763 = vmatpush1.bf16.msra.mxu0 %v10321_v12  ;;  %v10395_v12 = vld [vmem:[%s14814_s1 + $0x4c] ss:$16 sps:$4 sm:$0xff]   ;;  %v10396_v15 = vld [vmem:[%s14814_s1 + $0x248] ss:$16 sps:$4 sm:$0xff]  }
 0x160   : > { %3804 = vmatpush1.bf16.msra.mxu1 %v10324_v13  ;;  %3764 = vmatprep.subr.bf16.mxu0 %v10329_v8  ;;  %v10398_v13 = vld [vmem:[%s14814_s1 + $0x24c] ss:$16 sps:$4 sm:$0xff]   ;;  %v10402_v17 = vld [vmem:[%s14814_s1 + $0x268] ss:$16 sps:$4 sm:$0xff]  }
 0x161   : > { %3805 = vmatprep.subr.bf16.mxu1 %v10332_v49  ;;  %v10407_v18 = vld [vmem:[%s14814_s1 + $0x8c] ss:$16 sps:$4 sm:$0xff]   ;;  %v10405_v19 = vld [vmem:[%s14814_s1 + $0x88] ss:$16 sps:$4 sm:$0xff]  }
 0x162   : > { %v10410_v22 = vld [vmem:[%s14814_s1 + $0x28c] ss:$16 sps:$4 sm:$0xff]   ;;  %v10408_v20 = vld [vmem:[%s14814_s1 + $0x288] ss:$16 sps:$4 sm:$0xff]  }
 0x163   : > { %3765 = vmatpush1.bf16.msra.mxu0 %v10327_v53  ;;  %v10413_v8 = vld [vmem:[%s14814_s1 + $0xac] ss:$16 sps:$4 sm:$0xff]   ;;  %v10411_v53 = vld [vmem:[%s14814_s1 + $0xa8] ss:$16 sps:$4 sm:$0xff]  }
 0x164   : > { %3806 = vmatpush1.bf16.msra.mxu1 %v10330_v21  ;;  %3766 = vmatprep.subr.bf16.mxu0 %v10335_v24  ;;  %v10416_v49 = vld [vmem:[%s14814_s1 + $0x2ac] ss:$16 sps:$4 sm:$0xff]   ;;  %v10414_v21 = vld [vmem:[%s14814_s1 + $0x2a8] ss:$16 sps:$4 sm:$0xff]  }
 0x165   : > { %3807 = vmatprep.subr.bf16.mxu1 %v10338_v25  ;;  %v10419_v24 = vld [vmem:[%s14814_s1 + $0xcc] ss:$16 sps:$4 sm:$0xff]  }
 0x166   : > { %v10422_v25 = vld [vmem:[%s14814_s1 + $0x2cc] ss:$16 sps:$4 sm:$0xff]  }
 0x167   : > { %3767 = vmatpush1.bf16.msra.mxu0 %v10333_v26 }
 0x168   : > { %3808 = vmatpush1.bf16.msra.mxu1 %v10336_v54  ;;  %3768 = vmatprep.subr.bf16.mxu0 %v10341_v56  ;;  %v10417_v56 = vld [vmem:[%s14814_s1 + $0xc8] ss:$16 sps:$4 sm:$0xff]  }
 0x169   : > { %3809 = vmatprep.subr.bf16.mxu1 %v10344_v27  ;;  %v10420_v27 = vld [vmem:[%s14814_s1 + $0x2c8] ss:$16 sps:$4 sm:$0xff]  }
 0x16b   : > { %3769 = vmatpush1.bf16.msra.mxu0 %v10339_v28 }
 0x16c   : > { %3810 = vmatpush1.bf16.msra.mxu1 %v10342_v29  ;;  %3770 = vmatprep.subr.bf16.mxu0 %v10347_v30 }
 0x16d   : > { %3811 = vmatprep.subr.bf16.mxu1 %v10350_v31 }
 0x16f   : > { %3771 = vmatpush1.bf16.msra.mxu0 %v10345_v32 }
 0x170   : > { %3812 = vmatpush1.bf16.msra.mxu1 %v10348_v33  ;;  %3772 = vmatprep.subr.bf16.mxu0 %v10353_v36 }
 0x171   : > { %3813 = vmatprep.subr.bf16.mxu1 %v10356_v37 }
 0x173   : > { %3773 = vmatpush1.bf16.msra.mxu0 %v10351_v38  ;;  %v10425_v38 = vld [vmem:[%s14814_s1 + $0xec] ss:$16 sps:$4 sm:$0xff]  }
 0x174   : > { %3814 = vmatpush1.bf16.msra.mxu1 %v10354_v39  ;;  %3774 = vmatprep.subr.bf16.mxu0 %v10359_v40  ;;  %v10428_v39 = vld [vmem:[%s14814_s1 + $0x2ec] ss:$16 sps:$4 sm:$0xff]   ;;  %v10423_v40 = vld [vmem:[%s14814_s1 + $0xe8] ss:$16 sps:$4 sm:$0xff]  }
 0x175   : > { %3815 = vmatprep.subr.bf16.mxu1 %v10362_v41  ;;  %v10426_v41 = vld [vmem:[%s14814_s1 + $0x2e8] ss:$16 sps:$4 sm:$0xff]  }
 0x177   : > { %3775 = vmatpush1.bf16.msra.mxu0 %v10357_v42  ;;  %v10431_v42 = vld [vmem:[%s14814_s1 + $0x10c] ss:$16 sps:$4 sm:$0xff]  }
 0x178   : > { %3816 = vmatpush1.bf16.msra.mxu1 %v10360_v43  ;;  %3776 = vmatprep.subr.bf16.mxu0 %v10365_v44  ;;  %v10434_v43 = vld [vmem:[%s14814_s1 + $0x30c] ss:$16 sps:$4 sm:$0xff]   ;;  %v10429_v44 = vld [vmem:[%s14814_s1 + $0x108] ss:$16 sps:$4 sm:$0xff]  }
 0x179   : > { %3817 = vmatprep.subr.bf16.mxu1 %v10368_v45  ;;  %v10432_v45 = vld [vmem:[%s14814_s1 + $0x308] ss:$16 sps:$4 sm:$0xff]  }
 0x17b   : > { %3777 = vmatpush1.bf16.msra.mxu0 %v10363_v46  ;;  %v10437_v46 = vld [vmem:[%s14814_s1 + $0x12c] ss:$16 sps:$4 sm:$0xff]  }
 0x17c   : > { %3818 = vmatpush1.bf16.msra.mxu1 %v10366_v47  ;;  %3778 = vmatprep.subr.bf16.mxu0 %v10371_v50  ;;  %v10440_v47 = vld [vmem:[%s14814_s1 + $0x32c] ss:$16 sps:$4 sm:$0xff]   ;;  %v10435_v50 = vld [vmem:[%s14814_s1 + $0x128] ss:$16 sps:$4 sm:$0xff]  }
 0x17d   : > { %3819 = vmatprep.subr.bf16.mxu1 %v10374_v51  ;;  %v10438_v51 = vld [vmem:[%s14814_s1 + $0x328] ss:$16 sps:$4 sm:$0xff]  }
 0x17f   : > { %3779 = vmatpush1.bf16.msra.mxu0 %v10369_v58  ;;  %v10443_v58 = vld [vmem:[%s14814_s1 + $0x14c] ss:$16 sps:$4 sm:$0xff]  }
 0x180   : > { %3820 = vmatpush1.bf16.msra.mxu1 %v10372_v59  ;;  %3780 = vmatprep.subr.bf16.mxu0 %v10377_v60  ;;  %v10446_v59 = vld [vmem:[%s14814_s1 + $0x34c] ss:$16 sps:$4 sm:$0xff]   ;;  %v10441_v60 = vld [vmem:[%s14814_s1 + $0x148] ss:$16 sps:$4 sm:$0xff]  }
 0x181   : > { %3821 = vmatprep.subr.bf16.mxu1 %v10380_v61  ;;  %v10444_v61 = vld [vmem:[%s14814_s1 + $0x348] ss:$16 sps:$4 sm:$0xff]  }
 0x183   : > { %3781 = vmatpush1.bf16.msra.mxu0 %v10375_v62  ;;  %v10449_v62 = vld [vmem:[%s14814_s1 + $0x16c] ss:$16 sps:$4 sm:$0xff]  }
 0x184   : > { %3822 = vmatpush1.bf16.msra.mxu1 %v10378_v63  ;;  %3832 = vmatprep.subr.bf16.mxu0 %v10383_v4  ;;  %v10452_v63 = vld [vmem:[%s14814_s1 + $0x36c] ss:$16 sps:$4 sm:$0xff]   ;;  %v10447_v4 = vld [vmem:[%s14814_s1 + $0x168] ss:$16 sps:$4 sm:$0xff]  }
 0x185   : > { %3873 = vmatprep.subr.bf16.mxu1 %v10386_v5  ;;  %v10450_v5 = vld [vmem:[%s14814_s1 + $0x368] ss:$16 sps:$4 sm:$0xff]  }
 0x186   : > { %3783 = vmatmul.mubr.bf16.vlgmr.msra.gmra.mrb[20].mxu0 %v11813_v34 }
 0x187   : > { %3824 = vmatmul.mubr.bf16.vlgmr.msra.gmra.mrb[20].mxu1 %v11817_v35  ;;  %3833 = vmatpush1.bf16.msra.mxu0 %v10381_v6  ;;  %v10455_v6 = vld [vmem:[%s14814_s1 + $0x18c] ss:$16 sps:$4 sm:$0xff]  }
 0x188   : > { %3874 = vmatpush1.bf16.msra.mxu1 %v10384_v7  ;;  %3834 = vmatprep.subr.bf16.mxu0 %v10389_v9  ;;  %v10458_v7 = vld [vmem:[%s14814_s1 + $0x38c] ss:$16 sps:$4 sm:$0xff]   ;;  %v10453_v9 = vld [vmem:[%s14814_s1 + $0x188] ss:$16 sps:$4 sm:$0xff]  }
 0x189   : > { %3875 = vmatprep.subr.bf16.mxu1 %v10392_v0  ;;  %3864 = vmatprep.mubr.bf16.mxu0 %v11539_v48  ;;  %v10404_v48 = vld [vmem:[%s14814_s1 + $0x26c] ss:$16 sps:$4 sm:$0xff]   ;;  %v10456_v0 = vld [vmem:[%s14814_s1 + $0x388] ss:$16 sps:$4 sm:$0xff]  }
 0x18a   : > { %3905 = vmatprep.mubr.bf16.mxu1 %v11548_v52  ;;  %v10399_v52 = vld [vmem:[%s14814_s1 + $0x68] ss:$16 sps:$4 sm:$0xff]  }
 0x18b   : > { %3835 = vmatpush1.bf16.msra.mxu0 %v10387_v1  ;;  %v10461_v1 = vld [vmem:[%s14814_s1 + $0x1ac] ss:$16 sps:$4 sm:$0xff]  }
 0x18c   : > { %3876 = vmatpush1.bf16.msra.mxu1 %v10390_v10  ;;  %3836 = vmatprep.subr.bf16.mxu0 %v10395_v12  ;;  %v10464_v10 = vld [vmem:[%s14814_s1 + $0x3ac] ss:$16 sps:$4 sm:$0xff]   ;;  %v10459_v12 = vld [vmem:[%s14814_s1 + $0x1a8] ss:$16 sps:$4 sm:$0xff]  }
 0x18d   : > { %3877 = vmatprep.subr.bf16.mxu1 %v10398_v13  ;;  %v10462_v13 = vld [vmem:[%s14814_s1 + $0x3a8] ss:$16 sps:$4 sm:$0xff]  }
 0x18f   : > { %3837 = vmatpush1.bf16.msra.mxu0 %v10393_v14  ;;  %v10467_v14 = vld [vmem:[%s14814_s1 + $0x1cc] ss:$16 sps:$4 sm:$0xff]  }
 0x190   : > { %3878 = vmatpush1.bf16.msra.mxu1 %v10396_v15  ;;  %3838 = vmatprep.subr.bf16.mxu0 %v10401_v16  ;;  %v10470_v15 = vld [vmem:[%s14814_s1 + $0x3cc] ss:$16 sps:$4 sm:$0xff]   ;;  %v10465_v16 = vld [vmem:[%s14814_s1 + $0x1c8] ss:$16 sps:$4 sm:$0xff]  }
 0x191   : > { %3879 = vmatprep.subr.bf16.mxu1 %v10404_v48  ;;  %v10468_v48 = vld [vmem:[%s14814_s1 + $0x3c8] ss:$16 sps:$4 sm:$0xff]  }
 0x193   : > { %3839 = vmatpush1.bf16.msra.mxu0 %v10399_v52  ;;  %v10473_v52 = vld [vmem:[%s14814_s1 + $0x1ec] ss:$16 sps:$4 sm:$0xff]  }
 0x194   : > { %3880 = vmatpush1.bf16.msra.mxu1 %v10402_v17  ;;  %3840 = vmatprep.subr.bf16.mxu0 %v10407_v18  ;;  %v10476_v17 = vld [vmem:[%s14814_s1 + $0x3ec] ss:$16 sps:$4 sm:$0xff]   ;;  %v10471_v18 = vld [vmem:[%s14814_s1 + $0x1e8] ss:$16 sps:$4 sm:$0xff]  }
 0x195   : > { %3881 = vmatprep.subr.bf16.mxu1 %v10410_v22  ;;  %v10474_v22 = vld [vmem:[%s14814_s1 + $0x3e8] ss:$16 sps:$4 sm:$0xff]  }
 0x197   : > { %3841 = vmatpush1.bf16.msra.mxu0 %v10405_v19  ;;  %v10479_v19 = vld [vmem:[%s14814_s1 + $0x40c] ss:$16 sps:$4 sm:$0xff]  }
 0x198   : > { %3882 = vmatpush1.bf16.msra.mxu1 %v10408_v20  ;;  %3842 = vmatprep.subr.bf16.mxu0 %v10413_v8  ;;  %v10482_v20 = vld [vmem:[%s14814_s1 + $0x60c] ss:$16 sps:$4 sm:$0xff]   ;;  %v10477_v8 = vld [vmem:[%s14814_s1 + $0x408] ss:$16 sps:$4 sm:$0xff]  }
 0x199   : > { %3883 = vmatprep.subr.bf16.mxu1 %v10416_v49  ;;  %v2250_v26 = vpop.f32.mrb[8].mxu0  ;;  %v10480_v49 = vld [vmem:[%s14814_s1 + $0x608] ss:$16 sps:$4 sm:$0xff]  }
 0x19a   : > { %v2291_v54 = vpop.f32.mrb[8].mxu1  ;;  %v2252_v29 = vpop.f32.mrb[9].mxu0 }
 0x19b   : > { %v12733_v28 = vadd.f32 %v2291_v54, %v2250_v26  ;;  %v2293_v30 = vpop.f32.mrb[9].mxu1  ;;  %v2254_v32 = vpop.f32.mrb[10].mxu0  ;;  %3843 = vmatpush1.bf16.msra.mxu0 %v10411_v53  ;;  %v10485_v53 = vld [vmem:[%s14814_s1 + $0x42c] ss:$16 sps:$4 sm:$0xff]   ;;  %v10492_v54 = vld [vmem:[%s14814_s1 + $0x648] ss:$16 sps:$4 sm:$0xff]  }
 0x19c   : > { %v12735_v31 = vadd.f32 %v2293_v30, %v2252_v29  ;;  %v2295_v33 = vpop.f32.mrb[10].mxu1  ;;  %3884 = vmatpush1.bf16.msra.mxu1 %v10414_v21  ;;  %v2255_v36 = vpop.f32.mrb[11].mxu0  ;;  %3844 = vmatprep.subr.bf16.mxu0 %v10419_v24  ;;  %v10488_v21 = vld [vmem:[%s14814_s1 + $0x62c] ss:$16 sps:$4 sm:$0xff]   ;;  %v10483_v24 = vld [vmem:[%s14814_s1 + $0x428] ss:$16 sps:$4 sm:$0xff]  }
 0x19d   : > { %v2296_v37 = vpop.f32.mrb[11].mxu1  ;;  %3885 = vmatprep.subr.bf16.mxu1 %v10422_v25  ;;  %v10486_v25 = vld [vmem:[%s14814_s1 + $0x628] ss:$16 sps:$4 sm:$0xff]   ;;  %v10491_v26 = vld [vmem:[%s14814_s1 + $0x44c] ss:$16 sps:$4 sm:$0xff]  }
 0x19e   : > { %v10503_v29 = vld [vmem:[%s14814_s1 + $0x48c] ss:$16 sps:$4 sm:$0xff]   ;;  %v10501_v32 = vld [vmem:[%s14814_s1 + $0x488] ss:$16 sps:$4 sm:$0xff]  }
 0x19f   : > { %3845 = vmatpush1.bf16.msra.mxu0 %v10417_v56  ;;  %v10497_v56 = vld [vmem:[%s14814_s1 + $0x46c] ss:$16 sps:$4 sm:$0xff]   ;;  %v10504_v33 = vld [vmem:[%s14814_s1 + $0x688] ss:$16 sps:$4 sm:$0xff]  }
 0x1a0   : > { %3886 = vmatpush1.bf16.msra.mxu1 %v10420_v27  ;;  %3846 = vmatprep.subr.bf16.mxu0 %v10425_v38  ;;  %v10498_v27 = vld [vmem:[%s14814_s1 + $0x668] ss:$16 sps:$4 sm:$0xff]   ;;  %v10506_v30 = vld [vmem:[%s14814_s1 + $0x68c] ss:$16 sps:$4 sm:$0xff]  }
 0x1a1   : > { %3887 = vmatprep.subr.bf16.mxu1 %v10428_v39  ;;  %v10509_v36 = vld [vmem:[%s14814_s1 + $0x4ac] ss:$16 sps:$4 sm:$0xff]   ;;  %v10507_v38 = vld [vmem:[%s14814_s1 + $0x4a8] ss:$16 sps:$4 sm:$0xff]  }
 0x1a2   : > { %v10512_v37 = vld [vmem:[%s14814_s1 + $0x6ac] ss:$16 sps:$4 sm:$0xff]   ;;  %v10510_v39 = vld [vmem:[%s14814_s1 + $0x6a8] ss:$16 sps:$4 sm:$0xff]  }
 0x1a3   : > { %3847 = vmatpush1.bf16.msra.mxu0 %v10423_v40  ;;  %v10515_v40 = vld [vmem:[%s14814_s1 + $0x4cc] ss:$16 sps:$4 sm:$0xff]  }
 0x1a4   : > { %3888 = vmatpush1.bf16.msra.mxu1 %v10426_v41  ;;  %3848 = vmatprep.subr.bf16.mxu0 %v10431_v42  ;;  %v10518_v41 = vld [vmem:[%s14814_s1 + $0x6cc] ss:$16 sps:$4 sm:$0xff]  }
 0x1a5   : > { %3889 = vmatprep.subr.bf16.mxu1 %v10434_v43 }
 0x1a7   : > { %3849 = vmatpush1.bf16.msra.mxu0 %v10429_v44  ;;  %v10513_v44 = vld [vmem:[%s14814_s1 + $0x4c8] ss:$16 sps:$4 sm:$0xff]  }
 0x1a8   : > { %3890 = vmatpush1.bf16.msra.mxu1 %v10432_v45  ;;  %3850 = vmatprep.subr.bf16.mxu0 %v10437_v46  ;;  %v10516_v45 = vld [vmem:[%s14814_s1 + $0x6c8] ss:$16 sps:$4 sm:$0xff]  }
 0x1a9   : > { %3891 = vmatprep.subr.bf16.mxu1 %v10440_v47 }
 0x1ab   : > { %3851 = vmatpush1.bf16.msra.mxu0 %v10435_v50 }
 0x1ac   : > { %3892 = vmatpush1.bf16.msra.mxu1 %v10438_v51  ;;  %3852 = vmatprep.subr.bf16.mxu0 %v10443_v58 }
 0x1ad   : > { %3893 = vmatprep.subr.bf16.mxu1 %v10446_v59 }
 0x1af   : > { %3853 = vmatpush1.bf16.msra.mxu0 %v10441_v60 }
 0x1b0   : > { %3894 = vmatpush1.bf16.msra.mxu1 %v10444_v61  ;;  %3854 = vmatprep.subr.bf16.mxu0 %v10449_v62 }
 0x1b1   : > { %3895 = vmatprep.subr.bf16.mxu1 %v10452_v63  ;;  %v10521_v63 = vld [vmem:[%s14814_s1 + $0x4ec] ss:$16 sps:$4 sm:$0xff]  }
 0x1b3   : > { %3855 = vmatpush1.bf16.msra.mxu0 %v10447_v4 }
 0x1b4   : > { %3896 = vmatpush1.bf16.msra.mxu1 %v10450_v5  ;;  %3856 = vmatprep.subr.bf16.mxu0 %v10455_v6  ;;  %v10522_v5 = vld [vmem:[%s14814_s1 + $0x6e8] ss:$16 sps:$4 sm:$0xff]   ;;  %v10527_v6 = vld [vmem:[%s14814_s1 + $0x50c] ss:$16 sps:$4 sm:$0xff]  }
 0x1b5   : > { %3897 = vmatprep.subr.bf16.mxu1 %v10458_v7  ;;  %v10530_v7 = vld [vmem:[%s14814_s1 + $0x70c] ss:$16 sps:$4 sm:$0xff]  }
 0x1b7   : > { %3857 = vmatpush1.bf16.msra.mxu0 %v10453_v9  ;;  %v10525_v9 = vld [vmem:[%s14814_s1 + $0x508] ss:$16 sps:$4 sm:$0xff]  }
 0x1b8   : > { %3898 = vmatpush1.bf16.msra.mxu1 %v10456_v0  ;;  %3858 = vmatprep.subr.bf16.mxu0 %v10461_v1  ;;  %v10528_v0 = vld [vmem:[%s14814_s1 + $0x708] ss:$16 sps:$4 sm:$0xff]   ;;  %v10533_v1 = vld [vmem:[%s14814_s1 + $0x52c] ss:$16 sps:$4 sm:$0xff]  }
 0x1b9   : > { %3899 = vmatprep.subr.bf16.mxu1 %v10464_v10  ;;  %v10536_v10 = vld [vmem:[%s14814_s1 + $0x72c] ss:$16 sps:$4 sm:$0xff]  }
 0x1bb   : > { %3859 = vmatpush1.bf16.msra.mxu0 %v10459_v12  ;;  %v10531_v12 = vld [vmem:[%s14814_s1 + $0x528] ss:$16 sps:$4 sm:$0xff]  }
 0x1bc   : > { %3900 = vmatpush1.bf16.msra.mxu1 %v10462_v13  ;;  %3860 = vmatprep.subr.bf16.mxu0 %v10467_v14  ;;  %v10534_v13 = vld [vmem:[%s14814_s1 + $0x728] ss:$16 sps:$4 sm:$0xff]   ;;  %v10539_v14 = vld [vmem:[%s14814_s1 + $0x54c] ss:$16 sps:$4 sm:$0xff]  }
 0x1bd   : > { %3901 = vmatprep.subr.bf16.mxu1 %v10470_v15  ;;  %v10542_v15 = vld [vmem:[%s14814_s1 + $0x74c] ss:$16 sps:$4 sm:$0xff]  }
 0x1bf   : > { %3861 = vmatpush1.bf16.msra.mxu0 %v10465_v16  ;;  %v10537_v16 = vld [vmem:[%s14814_s1 + $0x548] ss:$16 sps:$4 sm:$0xff]  }
 0x1c0   : > { %3902 = vmatpush1.bf16.msra.mxu1 %v10468_v48  ;;  %3862 = vmatprep.subr.bf16.mxu0 %v10473_v52  ;;  %v10540_v48 = vld [vmem:[%s14814_s1 + $0x748] ss:$16 sps:$4 sm:$0xff]   ;;  %v10545_v52 = vld [vmem:[%s14814_s1 + $0x56c] ss:$16 sps:$4 sm:$0xff]  }
 0x1c1   : > { %3903 = vmatprep.subr.bf16.mxu1 %v10476_v17  ;;  %v10548_v17 = vld [vmem:[%s14814_s1 + $0x76c] ss:$16 sps:$4 sm:$0xff]  }
 0x1c3   : > { %3863 = vmatpush1.bf16.msra.mxu0 %v10471_v18  ;;  %v10543_v18 = vld [vmem:[%s14814_s1 + $0x568] ss:$16 sps:$4 sm:$0xff]  }
 0x1c4   : > { %3904 = vmatpush1.bf16.msra.mxu1 %v10474_v22  ;;  %3914 = vmatprep.subr.bf16.mxu0 %v10479_v19  ;;  %v10546_v22 = vld [vmem:[%s14814_s1 + $0x768] ss:$16 sps:$4 sm:$0xff]   ;;  %v10551_v19 = vld [vmem:[%s14814_s1 + $0x58c] ss:$16 sps:$4 sm:$0xff]  }
 0x1c5   : > { %3955 = vmatprep.subr.bf16.mxu1 %v10482_v20  ;;  %v10554_v20 = vld [vmem:[%s14814_s1 + $0x78c] ss:$16 sps:$4 sm:$0xff]  }
 0x1c6   : > { %3865 = vmatmul.mubr.bf16.vlgmr.msra.gmra.mrb[24].mxu0 %v11573_v2  ;;  %v10494_v2 = vld [vmem:[%s14814_s1 + $0x64c] ss:$16 sps:$4 sm:$0xff]  }
 0x1c7   : > { %3906 = vmatmul.mubr.bf16.vlgmr.msra.gmra.mrb[24].mxu1 %v11576_v3  ;;  %3915 = vmatpush1.bf16.msra.mxu0 %v10477_v8  ;;  %v10489_v3 = vld [vmem:[%s14814_s1 + $0x448] ss:$16 sps:$4 sm:$0xff]  }
 0x1c8   : > { %3956 = vmatpush1.bf16.msra.mxu1 %v10480_v49  ;;  %3916 = vmatprep.subr.bf16.mxu0 %v10485_v53  ;;  %v10549_v8 = vld [vmem:[%s14814_s1 + $0x588] ss:$16 sps:$4 sm:$0xff]   ;;  %v10557_v53 = vld [vmem:[%s14814_s1 + $0x5ac] ss:$16 sps:$4 sm:$0xff]  }
 0x1c9   : > { %3957 = vmatprep.subr.bf16.mxu1 %v10488_v21  ;;  %3946 = vmatprep.mubr.bf16.mxu0 %v11714_v55  ;;  %v10500_v55 = vld [vmem:[%s14814_s1 + $0x66c] ss:$16 sps:$4 sm:$0xff]   ;;  %v10552_v49 = vld [vmem:[%s14814_s1 + $0x788] ss:$16 sps:$4 sm:$0xff]  }
 0x1ca   : > { %3987 = vmatprep.mubr.bf16.mxu1 %v11721_v57  ;;  %v10495_v57 = vld [vmem:[%s14814_s1 + $0x468] ss:$16 sps:$4 sm:$0xff]   ;;  %v10560_v21 = vld [vmem:[%s14814_s1 + $0x7ac] ss:$16 sps:$4 sm:$0xff]  }
 0x1cb   : > { %3917 = vmatpush1.bf16.msra.mxu0 %v10483_v24  ;;  %v10555_v24 = vld [vmem:[%s14814_s1 + $0x5a8] ss:$16 sps:$4 sm:$0xff]  }
 0x1cc   : > { %3958 = vmatpush1.bf16.msra.mxu1 %v10486_v25  ;;  %3918 = vmatprep.subr.bf16.mxu0 %v10491_v26  ;;  %v10558_v25 = vld [vmem:[%s14814_s1 + $0x7a8] ss:$16 sps:$4 sm:$0xff]   ;;  %v10563_v26 = vld [vmem:[%s14814_s1 + $0x5cc] ss:$16 sps:$4 sm:$0xff]  }
 0x1cd   : > { %3959 = vmatprep.subr.bf16.mxu1 %v10494_v2  ;;  %v10566_v2 = vld [vmem:[%s14814_s1 + $0x7cc] ss:$16 sps:$4 sm:$0xff]  }
 0x1cf   : > { %3919 = vmatpush1.bf16.msra.mxu0 %v10489_v3  ;;  %v10561_v3 = vld [vmem:[%s14814_s1 + $0x5c8] ss:$16 sps:$4 sm:$0xff]  }
 0x1d0   : > { %3960 = vmatpush1.bf16.msra.mxu1 %v10492_v54  ;;  %3920 = vmatprep.subr.bf16.mxu0 %v10497_v56  ;;  %v10564_v54 = vld [vmem:[%s14814_s1 + $0x7c8] ss:$16 sps:$4 sm:$0xff]   ;;  %v10569_v56 = vld [vmem:[%s14814_s1 + $0x5ec] ss:$16 sps:$4 sm:$0xff]  }
 0x1d1   : > { %3961 = vmatprep.subr.bf16.mxu1 %v10500_v55  ;;  %v10572_v55 = vld [vmem:[%s14814_s1 + $0x7ec] ss:$16 sps:$4 sm:$0xff]  }
 0x1d3   : > { %3921 = vmatpush1.bf16.msra.mxu0 %v10495_v57  ;;  %v13042_v57 = vld [vmem:[%s11527_s30] sm:$0xee] }
 0x1d4   : > { %3962 = vmatpush1.bf16.msra.mxu1 %v10498_v27  ;;  %3922 = vmatprep.subr.bf16.mxu0 %v10503_v29  ;;  %v13045_v27 = vld [vmem:[%s11527_s30 + $0x8] sm:$0xee] }
 0x1d5   : > { %3963 = vmatprep.subr.bf16.mxu1 %v10506_v30  ;;  %v10567_v29 = vld [vmem:[%s14814_s1 + $0x5e8] ss:$16 sps:$4 sm:$0xff]  }
 0x1d6   : > { %v10570_v30 = vld [vmem:[%s14814_s1 + $0x7e8] ss:$16 sps:$4 sm:$0xff]  }
 0x1d7   : > { %3923 = vmatpush1.bf16.msra.mxu0 %v10501_v32  ;;  %v10575_v32 = vld [vmem:[%s14814_s1 + $0x1004] ss:$16 sps:$4 sm:$0xff]  }
 0x1d8   : > { %3964 = vmatpush1.bf16.msra.mxu1 %v10504_v33  ;;  %3924 = vmatprep.subr.bf16.mxu0 %v10509_v36  ;;  %v10578_v33 = vld [vmem:[%s14814_s1 + $0x1204] ss:$16 sps:$4 sm:$0xff]   ;;  %v10573_v36 = vld [vmem:[%s14814_s1 + $0x1000] ss:$16 sps:$4 sm:$0xff]  }
 0x1d9   : > { %3965 = vmatprep.subr.bf16.mxu1 %v10512_v37  ;;  %v2332_v42 = vpop.f32.mrb[12].mxu0  ;;  %v10576_v37 = vld [vmem:[%s14814_s1 + $0x1200] ss:$16 sps:$4 sm:$0xff]  }
 0x1da   : > { %v2373_v43 = vpop.f32.mrb[12].mxu1  ;;  %v2333_v46 = vadd.f32 %v2332_v42, %v12733_v28  ;;  %v2334_v47 = vpop.f32.mrb[13].mxu0  ;;  %v10524_v28 = vld [vmem:[%s14814_s1 + $0x6ec] ss:$16 sps:$4 sm:$0xff]  }
 0x1db   : > { %v2375_v50 = vpop.f32.mrb[13].mxu1  ;;  %v2335_v51 = vadd.f32 %v2334_v47, %v12735_v31  ;;  %v2336_v58 = vpop.f32.mrb[14].mxu0  ;;  %3925 = vmatpush1.bf16.msra.mxu0 %v10507_v38  ;;  %v10519_v31 = vld [vmem:[%s14814_s1 + $0x4e8] ss:$16 sps:$4 sm:$0xff]   ;;  %v13067_v38 = vcombine.high %v13042_v57, %v13042_v57  ;;  %v10588_v47 = vld [vmem:[%s14814_s1 + $0x1240] ss:$16 sps:$4 sm:$0xff]  }
 0x1dc   : > { %v2377_v59 = vpop.f32.mrb[14].mxu1  ;;  %3966 = vmatpush1.bf16.msra.mxu1 %v10510_v39  ;;  %v12935_v60 = vadd.f32 %v2373_v43, %v2333_v46  ;;  %v2337_v61 = vpop.f32.mrb[15].mxu0  ;;  %3926 = vmatprep.subr.bf16.mxu0 %v10515_v40  ;;  %v13071_v39 = vcombine.high %v13045_v27, %v13045_v27  ;;  %v10581_v40 = vld [vmem:[%s14814_s1 + $0x1024] ss:$16 sps:$4 sm:$0xff]   ;;  %v10591_v58 = vld [vmem:[%s14814_s1 + $0x1060] ss:$16 sps:$4 sm:$0xff]  }
 0x1dd   : > { %v2378_v62 = vpop.f32.mrb[15].mxu1  ;;  %3967 = vmatprep.subr.bf16.mxu1 %v10518_v41  ;;  %v12943_v4 = vadd.f32 %v2375_v50, %v2335_v51  ;;  %v10584_v41 = vld [vmem:[%s14814_s1 + $0x1224] ss:$16 sps:$4 sm:$0xff]   ;;  %v4278_v42 = vrot.slane %v13067_v38, 1  ;;  %v10594_v59 = vld [vmem:[%s14814_s1 + $0x1260] ss:$16 sps:$4 sm:$0xff]  }
 0x1de   : > { %v4280_v43 = vrot.slane %v13071_v39, 1  ;;  %v10587_v46 = vld [vmem:[%s14814_s1 + $0x1044] ss:$16 sps:$4 sm:$0xff]  }
 0x1df   : > { %3927 = vmatpush1.bf16.msra.mxu0 %v10513_v44  ;;  %v10579_v44 = vld [vmem:[%s14814_s1 + $0x1020] ss:$16 sps:$4 sm:$0xff]   ;;  %v10593_v50 = vld [vmem:[%s14814_s1 + $0x1064] ss:$16 sps:$4 sm:$0xff]  }
 0x1e0   : > { %3968 = vmatpush1.bf16.msra.mxu1 %v10516_v45  ;;  %3928 = vmatprep.subr.bf16.mxu0 %v10521_v63  ;;  %v10582_v45 = vld [vmem:[%s14814_s1 + $0x1220] ss:$16 sps:$4 sm:$0xff]   ;;  %v10596_v51 = vld [vmem:[%s14814_s1 + $0x1264] ss:$16 sps:$4 sm:$0xff]  }
 0x1e1   : > { %3969 = vmatprep.subr.bf16.mxu1 %v10524_v28  ;;  %v10599_v61 = vld [vmem:[%s14814_s1 + $0x1084] ss:$16 sps:$4 sm:$0xff]   ;;  %v10597_v63 = vld [vmem:[%s14814_s1 + $0x1080] ss:$16 sps:$4 sm:$0xff]  }
 0x1e2   : > { %v10602_v62 = vld [vmem:[%s14814_s1 + $0x1284] ss:$16 sps:$4 sm:$0xff]   ;;  %v10600_v28 = vld [vmem:[%s14814_s1 + $0x1280] ss:$16 sps:$4 sm:$0xff]  }
 0x1e3   : > { %3929 = vmatpush1.bf16.msra.mxu0 %v10519_v31  ;;  %v10605_v31 = vld [vmem:[%s14814_s1 + $0x10a4] ss:$16 sps:$4 sm:$0xff]  }
 0x1e4   : > { %3970 = vmatpush1.bf16.msra.mxu1 %v10522_v5  ;;  %3930 = vmatprep.subr.bf16.mxu0 %v10527_v6  ;;  %v10608_v5 = vld [vmem:[%s14814_s1 + $0x12a4] ss:$16 sps:$4 sm:$0xff]   ;;  %v10603_v6 = vld [vmem:[%s14814_s1 + $0x10a0] ss:$16 sps:$4 sm:$0xff]  }
 0x1e5   : > { %3971 = vmatprep.subr.bf16.mxu1 %v10530_v7  ;;  %v10606_v7 = vld [vmem:[%s14814_s1 + $0x12a0] ss:$16 sps:$4 sm:$0xff]  }
 0x1e7   : > { %3931 = vmatpush1.bf16.msra.mxu0 %v10525_v9  ;;  %v10611_v9 = vld [vmem:[%s14814_s1 + $0x10c4] ss:$16 sps:$4 sm:$0xff]  }
 0x1e8   : > { %3972 = vmatpush1.bf16.msra.mxu1 %v10528_v0  ;;  %3932 = vmatprep.subr.bf16.mxu0 %v10533_v1  ;;  %v10614_v0 = vld [vmem:[%s14814_s1 + $0x12c4] ss:$16 sps:$4 sm:$0xff]  }
 0x1e9   : > { %3973 = vmatprep.subr.bf16.mxu1 %v10536_v10 }
 0x1eb   : > { %3933 = vmatpush1.bf16.msra.mxu0 %v10531_v12  ;;  %v10609_v12 = vld [vmem:[%s14814_s1 + $0x10c0] ss:$16 sps:$4 sm:$0xff]  }
 0x1ec   : > { %3974 = vmatpush1.bf16.msra.mxu1 %v10534_v13  ;;  %3934 = vmatprep.subr.bf16.mxu0 %v10539_v14  ;;  %v10612_v13 = vld [vmem:[%s14814_s1 + $0x12c0] ss:$16 sps:$4 sm:$0xff]  }
 0x1ed   : > { %3975 = vmatprep.subr.bf16.mxu1 %v10542_v15 }
 0x1ef   : > { %3935 = vmatpush1.bf16.msra.mxu0 %v10537_v16 }
 0x1f0   : > { %3976 = vmatpush1.bf16.msra.mxu1 %v10540_v48  ;;  %3936 = vmatprep.subr.bf16.mxu0 %v10545_v52 }
 0x1f1   : > { %3977 = vmatprep.subr.bf16.mxu1 %v10548_v17 }
 0x1f3   : > { %3937 = vmatpush1.bf16.msra.mxu0 %v10543_v18 }
 0x1f4   : > { %3978 = vmatpush1.bf16.msra.mxu1 %v10546_v22  ;;  %3938 = vmatprep.subr.bf16.mxu0 %v10551_v19 }
 0x1f5   : > { %3979 = vmatprep.subr.bf16.mxu1 %v10554_v20  ;;  %v10617_v20 = vld [vmem:[%s14814_s1 + $0x10e4] ss:$16 sps:$4 sm:$0xff]  }
 0x1f7   : > { %3939 = vmatpush1.bf16.msra.mxu0 %v10549_v8 }
 0x1f8   : > { %3980 = vmatpush1.bf16.msra.mxu1 %v10552_v49  ;;  %3940 = vmatprep.subr.bf16.mxu0 %v10557_v53  ;;  %v10618_v49 = vld [vmem:[%s14814_s1 + $0x12e0] ss:$16 sps:$4 sm:$0xff]   ;;  %v10623_v53 = vld [vmem:[%s14814_s1 + $0x1104] ss:$16 sps:$4 sm:$0xff]  }
 0x1f9   : > { %3981 = vmatprep.subr.bf16.mxu1 %v10560_v21  ;;  %v10626_v21 = vld [vmem:[%s14814_s1 + $0x1304] ss:$16 sps:$4 sm:$0xff]  }
 0x1fb   : > { %3941 = vmatpush1.bf16.msra.mxu0 %v10555_v24  ;;  %v10621_v24 = vld [vmem:[%s14814_s1 + $0x1100] ss:$16 sps:$4 sm:$0xff]  }
 0x1fc   : > { %3982 = vmatpush1.bf16.msra.mxu1 %v10558_v25  ;;  %3942 = vmatprep.subr.bf16.mxu0 %v10563_v26  ;;  %v10624_v25 = vld [vmem:[%s14814_s1 + $0x1300] ss:$16 sps:$4 sm:$0xff]   ;;  %v10629_v26 = vld [vmem:[%s14814_s1 + $0x1124] ss:$16 sps:$4 sm:$0xff]  }
 0x1fd   : > { %3983 = vmatprep.subr.bf16.mxu1 %v10566_v2  ;;  %v10632_v2 = vld [vmem:[%s14814_s1 + $0x1324] ss:$16 sps:$4 sm:$0xff]  }
 0x1ff   : > { %3943 = vmatpush1.bf16.msra.mxu0 %v10561_v3  ;;  %v10627_v3 = vld [vmem:[%s14814_s1 + $0x1120] ss:$16 sps:$4 sm:$0xff]  }
 0x200   : > { %3984 = vmatpush1.bf16.msra.mxu1 %v10564_v54  ;;  %3944 = vmatprep.subr.bf16.mxu0 %v10569_v56  ;;  %v10630_v54 = vld [vmem:[%s14814_s1 + $0x1320] ss:$16 sps:$4 sm:$0xff]   ;;  %v10635_v56 = vld [vmem:[%s14814_s1 + $0x1144] ss:$16 sps:$4 sm:$0xff]  }
 0x201   : > { %3985 = vmatprep.subr.bf16.mxu1 %v10572_v55  ;;  %v10638_v55 = vld [vmem:[%s14814_s1 + $0x1344] ss:$16 sps:$4 sm:$0xff]  }
 0x203   : > { %3945 = vmatpush1.bf16.msra.mxu0 %v10567_v29  ;;  %v10633_v29 = vld [vmem:[%s14814_s1 + $0x1140] ss:$16 sps:$4 sm:$0xff]  }
 0x204   : > { %3986 = vmatpush1.bf16.msra.mxu1 %v10570_v30  ;;  %5573 = vmatprep.subr.bf16.mxu0 %v10575_v32  ;;  %v10636_v30 = vld [vmem:[%s14814_s1 + $0x1340] ss:$16 sps:$4 sm:$0xff]   ;;  %v10641_v32 = vld [vmem:[%s14814_s1 + $0x1164] ss:$16 sps:$4 sm:$0xff]  }
 0x205   : > { %5614 = vmatprep.subr.bf16.mxu1 %v10578_v33  ;;  %v10644_v33 = vld [vmem:[%s14814_s1 + $0x1364] ss:$16 sps:$4 sm:$0xff]  }
 0x206   : > { %3947 = vmatmul.mubr.bf16.vlgmr.msra.gmra.mrb[28].mxu0 %v11813_v34  ;;  %v10590_v34 = vld [vmem:[%s14814_s1 + $0x1244] ss:$16 sps:$4 sm:$0xff]  }
 0x207   : > { %3988 = vmatmul.mubr.bf16.vlgmr.msra.gmra.mrb[28].mxu1 %v11817_v35  ;;  %5574 = vmatpush1.bf16.msra.mxu0 %v10573_v36  ;;  %v10585_v35 = vld [vmem:[%s14814_s1 + $0x1040] ss:$16 sps:$4 sm:$0xff]  }
 0x208   : > { %5615 = vmatpush1.bf16.msra.mxu1 %v10576_v37  ;;  %5575 = vmatprep.subr.bf16.mxu0 %v10581_v40  ;;  %v10639_v36 = vld [vmem:[%s14814_s1 + $0x1160] ss:$16 sps:$4 sm:$0xff]   ;;  %v10647_v40 = vld [vmem:[%s14814_s1 + $0x1184] ss:$16 sps:$4 sm:$0xff]  }
 0x209   : > { %5616 = vmatprep.subr.bf16.mxu1 %v10584_v41  ;;  %5605 = vmatprep.mubr.bf16.mxu0 %v4278_v42  ;;  %v10642_v37 = vld [vmem:[%s14814_s1 + $0x1360] ss:$16 sps:$4 sm:$0xff]   ;;  %v10650_v41 = vld [vmem:[%s14814_s1 + $0x1384] ss:$16 sps:$4 sm:$0xff]  }
 0x20a   : > { %5646 = vmatprep.mubr.bf16.mxu1 %v4280_v43 }
 0x20b   : > { %5576 = vmatpush1.bf16.msra.mxu0 %v10579_v44  ;;  %v10645_v44 = vld [vmem:[%s14814_s1 + $0x1180] ss:$16 sps:$4 sm:$0xff]  }
 0x20c   : > { %5617 = vmatpush1.bf16.msra.mxu1 %v10582_v45  ;;  %5577 = vmatprep.subr.bf16.mxu0 %v10587_v46  ;;  %v10648_v45 = vld [vmem:[%s14814_s1 + $0x1380] ss:$16 sps:$4 sm:$0xff]   ;;  %v10653_v46 = vld [vmem:[%s14814_s1 + $0x11a4] ss:$16 sps:$4 sm:$0xff]  }
 0x20d   : > { %5618 = vmatprep.subr.bf16.mxu1 %v10590_v34  ;;  %v10656_v34 = vld [vmem:[%s14814_s1 + $0x13a4] ss:$16 sps:$4 sm:$0xff]  }
 0x20f   : > { %5578 = vmatpush1.bf16.msra.mxu0 %v10585_v35  ;;  %v10651_v35 = vld [vmem:[%s14814_s1 + $0x11a0] ss:$16 sps:$4 sm:$0xff]  }
 0x210   : > { %5619 = vmatpush1.bf16.msra.mxu1 %v10588_v47  ;;  %5579 = vmatprep.subr.bf16.mxu0 %v10593_v50  ;;  %v10654_v47 = vld [vmem:[%s14814_s1 + $0x13a0] ss:$16 sps:$4 sm:$0xff]   ;;  %v10659_v50 = vld [vmem:[%s14814_s1 + $0x11c4] ss:$16 sps:$4 sm:$0xff]  }
 0x211   : > { %5620 = vmatprep.subr.bf16.mxu1 %v10596_v51  ;;  %v10662_v51 = vld [vmem:[%s14814_s1 + $0x13c4] ss:$16 sps:$4 sm:$0xff]  }
 0x213   : > { %5580 = vmatpush1.bf16.msra.mxu0 %v10591_v58  ;;  %v10657_v58 = vld [vmem:[%s14814_s1 + $0x11c0] ss:$16 sps:$4 sm:$0xff]  }
 0x214   : > { %5621 = vmatpush1.bf16.msra.mxu1 %v10594_v59  ;;  %5581 = vmatprep.subr.bf16.mxu0 %v10599_v61  ;;  %v10660_v59 = vld [vmem:[%s14814_s1 + $0x13c0] ss:$16 sps:$4 sm:$0xff]   ;;  %v10665_v61 = vld [vmem:[%s14814_s1 + $0x11e4] ss:$16 sps:$4 sm:$0xff]  }
 0x215   : > { %5622 = vmatprep.subr.bf16.mxu1 %v10602_v62  ;;  %v10668_v62 = vld [vmem:[%s14814_s1 + $0x13e4] ss:$16 sps:$4 sm:$0xff]  }
 0x217   : > { %5582 = vmatpush1.bf16.msra.mxu0 %v10597_v63  ;;  %v13262_v63 = vld [vmem:[%s11527_s30 + $0x10] sm:$0xee] }
 0x218   : > { %5623 = vmatpush1.bf16.msra.mxu1 %v10600_v28  ;;  %5583 = vmatprep.subr.bf16.mxu0 %v10605_v31  ;;  %v13265_v28 = vld [vmem:[%s11527_s30 + $0x18] sm:$0xee]  ;;  %v13269_v31 = vcombine.low %v13042_v57, %v13042_v57  ;;  %v10675_v57 = vld [vmem:[%s14814_s1 + $0x1404] ss:$16 sps:$4 sm:$0xff]  }
 0x219   : > { %5624 = vmatprep.subr.bf16.mxu1 %v10608_v5  ;;  %v3702_v1 = vpop.f32.mrb[16].mxu0  ;;  %v13273_v5 = vcombine.low %v13045_v27, %v13045_v27  ;;  %v10678_v27 = vld [vmem:[%s14814_s1 + $0x1604] ss:$16 sps:$4 sm:$0xff]  }
 0x21a   : > { %v3743_v10 = vpop.f32.mrb[16].mxu1  ;;  %v3703_v14 = vadd.f32 %v3702_v1, %v12533_v23  ;;  %v3704_v15 = vpop.f32.mrb[17].mxu0  ;;  %v10620_v23 = vld [vmem:[%s14814_s1 + $0x12e4] ss:$16 sps:$4 sm:$0xff]   ;;  %v13295_v1 = vcombine.high %v13262_v63, %v13262_v63 }
 0x21b   : > { %v3745_v16 = vpop.f32.mrb[17].mxu1  ;;  %v3705_v48 = vadd.f32 %v3704_v15, %v12541_v11  ;;  %v3706_v52 = vpop.f32.mrb[18].mxu0  ;;  %5584 = vmatpush1.bf16.msra.mxu0 %v10603_v6  ;;  %v10615_v11 = vld [vmem:[%s14814_s1 + $0x10e0] ss:$16 sps:$4 sm:$0xff]   ;;  %v10684_v15 = vld [vmem:[%s14814_s1 + $0x1624] ss:$16 sps:$4 sm:$0xff]  }
 0x21c   : > { %v3747_v17 = vpop.f32.mrb[18].mxu1  ;;  %5625 = vmatpush1.bf16.msra.mxu1 %v10606_v7  ;;  %v13155_v18 = vadd.f32 %v3743_v10, %v3703_v14  ;;  %v3707_v22 = vpop.f32.mrb[19].mxu0  ;;  %5585 = vmatprep.subr.bf16.mxu0 %v10611_v9  ;;  %v10663_v6 = vld [vmem:[%s14814_s1 + $0x11e0] ss:$16 sps:$4 sm:$0xff]   ;;  %v13299_v10 = vcombine.high %v13265_v28, %v13265_v28  ;;  %v10681_v14 = vld [vmem:[%s14814_s1 + $0x1424] ss:$16 sps:$4 sm:$0xff]  }
 0x21d   : > { %v3748_v19 = vpop.f32.mrb[19].mxu1  ;;  %5626 = vmatprep.subr.bf16.mxu1 %v10614_v0  ;;  %v13163_v8 = vadd.f32 %v3745_v16, %v3705_v48  ;;  %v10666_v7 = vld [vmem:[%s14814_s1 + $0x13e0] ss:$16 sps:$4 sm:$0xff]   ;;  %v4282_v16 = vrot.slane %v13295_v1, 1  ;;  %v10687_v22 = vld [vmem:[%s14814_s1 + $0x1444] ss:$16 sps:$4 sm:$0xff]  }
 0x21e   : > { %v10673_v9 = vld [vmem:[%s14814_s1 + $0x1400] ss:$16 sps:$4 sm:$0xff]   ;;  %v4284_v48 = vrot.slane %v13299_v10, 1  ;;  %v10690_v19 = vld [vmem:[%s14814_s1 + $0x1644] ss:$16 sps:$4 sm:$0xff]  }
 0x21f   : > { %5586 = vmatpush1.bf16.msra.mxu0 %v10609_v12  ;;  %v10676_v0 = vld [vmem:[%s14814_s1 + $0x1600] ss:$16 sps:$4 sm:$0xff]   ;;  %v4277_v12 = vrot.slane %v13269_v31, 1 }
 0x220   : > { %5627 = vmatpush1.bf16.msra.mxu1 %v10612_v13  ;;  %5587 = vmatprep.subr.bf16.mxu0 %v10617_v20  ;;  %v4279_v13 = vrot.slane %v13273_v5, 1  ;;  %v10679_v52 = vld [vmem:[%s14814_s1 + $0x1420] ss:$16 sps:$4 sm:$0xff]  }
 0x221   : > { %5628 = vmatprep.subr.bf16.mxu1 %v10620_v23  ;;  %v10682_v17 = vld [vmem:[%s14814_s1 + $0x1620] ss:$16 sps:$4 sm:$0xff]  }
 0x222   : > { %v10685_v20 = vld [vmem:[%s14814_s1 + $0x1440] ss:$16 sps:$4 sm:$0xff]  }
 0x223   : > { %5588 = vmatpush1.bf16.msra.mxu0 %v10615_v11  ;;  %v10688_v23 = vld [vmem:[%s14814_s1 + $0x1640] ss:$16 sps:$4 sm:$0xff]   ;;  %v10693_v11 = vld [vmem:[%s14814_s1 + $0x1464] ss:$16 sps:$4 sm:$0xff]  }
 0x224   : > { %5629 = vmatpush1.bf16.msra.mxu1 %v10618_v49  ;;  %5589 = vmatprep.subr.bf16.mxu0 %v10623_v53  ;;  %v10696_v49 = vld [vmem:[%s14814_s1 + $0x1664] ss:$16 sps:$4 sm:$0xff]   ;;  %v10691_v53 = vld [vmem:[%s14814_s1 + $0x1460] ss:$16 sps:$4 sm:$0xff]  }
 0x225   : > { %5630 = vmatprep.subr.bf16.mxu1 %v10626_v21  ;;  %v10694_v21 = vld [vmem:[%s14814_s1 + $0x1660] ss:$16 sps:$4 sm:$0xff]  }
 0x227   : > { %5590 = vmatpush1.bf16.msra.mxu0 %v10621_v24  ;;  %v10699_v24 = vld [vmem:[%s14814_s1 + $0x1484] ss:$16 sps:$4 sm:$0xff]  }
 0x228   : > { %5631 = vmatpush1.bf16.msra.mxu1 %v10624_v25  ;;  %5591 = vmatprep.subr.bf16.mxu0 %v10629_v26  ;;  %v10702_v25 = vld [vmem:[%s14814_s1 + $0x1684] ss:$16 sps:$4 sm:$0xff]   ;;  %v10697_v26 = vld [vmem:[%s14814_s1 + $0x1480] ss:$16 sps:$4 sm:$0xff]  }
 0x229   : > { %5632 = vmatprep.subr.bf16.mxu1 %v10632_v2  ;;  %v10700_v2 = vld [vmem:[%s14814_s1 + $0x1680] ss:$16 sps:$4 sm:$0xff]  }
 0x22b   : > { %5592 = vmatpush1.bf16.msra.mxu0 %v10627_v3  ;;  %v10705_v3 = vld [vmem:[%s14814_s1 + $0x14a4] ss:$16 sps:$4 sm:$0xff]  }
 0x22c   : > { %5633 = vmatpush1.bf16.msra.mxu1 %v10630_v54  ;;  %5593 = vmatprep.subr.bf16.mxu0 %v10635_v56  ;;  %v10708_v54 = vld [vmem:[%s14814_s1 + $0x16a4] ss:$16 sps:$4 sm:$0xff]   ;;  %v10703_v56 = vld [vmem:[%s14814_s1 + $0x14a0] ss:$16 sps:$4 sm:$0xff]  }
 0x22d   : > { %5634 = vmatprep.subr.bf16.mxu1 %v10638_v55  ;;  %v10706_v55 = vld [vmem:[%s14814_s1 + $0x16a0] ss:$16 sps:$4 sm:$0xff]  }
 0x22f   : > { %5594 = vmatpush1.bf16.msra.mxu0 %v10633_v29  ;;  %v10711_v29 = vld [vmem:[%s14814_s1 + $0x14c4] ss:$16 sps:$4 sm:$0xff]  }
 0x230   : > { %5635 = vmatpush1.bf16.msra.mxu1 %v10636_v30  ;;  %5595 = vmatprep.subr.bf16.mxu0 %v10641_v32  ;;  %v10714_v30 = vld [vmem:[%s14814_s1 + $0x16c4] ss:$16 sps:$4 sm:$0xff]  }
 0x231   : > { %5636 = vmatprep.subr.bf16.mxu1 %v10644_v33 }
 0x233   : > { %5596 = vmatpush1.bf16.msra.mxu0 %v10639_v36 }
 0x234   : > { %5637 = vmatpush1.bf16.msra.mxu1 %v10642_v37  ;;  %5597 = vmatprep.subr.bf16.mxu0 %v10647_v40 }
 0x235   : > { %5638 = vmatprep.subr.bf16.mxu1 %v10650_v41 }
 0x237   : > { %5598 = vmatpush1.bf16.msra.mxu0 %v10645_v44 }
 0x238   : > { %5639 = vmatpush1.bf16.msra.mxu1 %v10648_v45  ;;  %5599 = vmatprep.subr.bf16.mxu0 %v10653_v46  ;;  %v10709_v46 = vld [vmem:[%s14814_s1 + $0x14c0] ss:$16 sps:$4 sm:$0xff]  }
 0x239   : > { %5640 = vmatprep.subr.bf16.mxu1 %v10656_v34  ;;  %v10712_v34 = vld [vmem:[%s14814_s1 + $0x16c0] ss:$16 sps:$4 sm:$0xff]  }
 0x23b   : > { %5600 = vmatpush1.bf16.msra.mxu0 %v10651_v35 }
 0x23c   : > { %5641 = vmatpush1.bf16.msra.mxu1 %v10654_v47  ;;  %5601 = vmatprep.subr.bf16.mxu0 %v10659_v50  ;;  %v10720_v50 = vld [vmem:[%s14814_s1 + $0x16e4] ss:$16 sps:$4 sm:$0xff]  }
 0x23d   : > { %5642 = vmatprep.subr.bf16.mxu1 %v10662_v51 }
 0x23f   : > { %5602 = vmatpush1.bf16.msra.mxu0 %v10657_v58  ;;  %v10715_v58 = vld [vmem:[%s14814_s1 + $0x14e0] ss:$16 sps:$4 sm:$0xff]  }
 0x240   : > { %5643 = vmatpush1.bf16.msra.mxu1 %v10660_v59  ;;  %5603 = vmatprep.subr.bf16.mxu0 %v10665_v61  ;;  %v10718_v59 = vld [vmem:[%s14814_s1 + $0x16e0] ss:$16 sps:$4 sm:$0xff]   ;;  %v10723_v61 = vld [vmem:[%s14814_s1 + $0x1504] ss:$16 sps:$4 sm:$0xff]  }
 0x241   : > { %5644 = vmatprep.subr.bf16.mxu1 %v10668_v62  ;;  %v10726_v62 = vld [vmem:[%s14814_s1 + $0x1704] ss:$16 sps:$4 sm:$0xff]  }
 0x243   : > { %5604 = vmatpush1.bf16.msra.mxu0 %v10663_v6  ;;  %v10721_v6 = vld [vmem:[%s14814_s1 + $0x1500] ss:$16 sps:$4 sm:$0xff]  }
 0x244   : > { %5645 = vmatpush1.bf16.msra.mxu1 %v10666_v7  ;;  %5655 = vmatprep.subr.bf16.mxu0 %v10675_v57  ;;  %v10724_v7 = vld [vmem:[%s14814_s1 + $0x1700] ss:$16 sps:$4 sm:$0xff]   ;;  %v10729_v57 = vld [vmem:[%s14814_s1 + $0x1524] ss:$16 sps:$4 sm:$0xff]  }
 0x245   : > { %5696 = vmatprep.subr.bf16.mxu1 %v10678_v27  ;;  %v10732_v27 = vld [vmem:[%s14814_s1 + $0x1724] ss:$16 sps:$4 sm:$0xff]  }
 0x246   : > { %5606 = vmatmul.mubr.bf16.vlgmr.msra.gmra.mrb[32].mxu0 %v4277_v12 }
 0x247   : > { %5647 = vmatmul.mubr.bf16.vlgmr.msra.gmra.mrb[32].mxu1 %v4279_v13  ;;  %5656 = vmatpush1.bf16.msra.mxu0 %v10673_v9  ;;  %v10727_v9 = vld [vmem:[%s14814_s1 + $0x1520] ss:$16 sps:$4 sm:$0xff]  }
 0x248   : > { %5697 = vmatpush1.bf16.msra.mxu1 %v10676_v0  ;;  %5657 = vmatprep.subr.bf16.mxu0 %v10681_v14  ;;  %v10730_v0 = vld [vmem:[%s14814_s1 + $0x1720] ss:$16 sps:$4 sm:$0xff]   ;;  %v10735_v14 = vld [vmem:[%s14814_s1 + $0x1544] ss:$16 sps:$4 sm:$0xff]  }
 0x249   : > { %5698 = vmatprep.subr.bf16.mxu1 %v10684_v15  ;;  %5687 = vmatprep.mubr.bf16.mxu0 %v4282_v16  ;;  %v10738_v15 = vld [vmem:[%s14814_s1 + $0x1744] ss:$16 sps:$4 sm:$0xff]  }
 0x24a   : > { %5728 = vmatprep.mubr.bf16.mxu1 %v4284_v48 }
 0x24b   : > { %5658 = vmatpush1.bf16.msra.mxu0 %v10679_v52  ;;  %v10733_v52 = vld [vmem:[%s14814_s1 + $0x1540] ss:$16 sps:$4 sm:$0xff]  }
 0x24c   : > { %5699 = vmatpush1.bf16.msra.mxu1 %v10682_v17  ;;  %5659 = vmatprep.subr.bf16.mxu0 %v10687_v22  ;;  %v10736_v17 = vld [vmem:[%s14814_s1 + $0x1740] ss:$16 sps:$4 sm:$0xff]   ;;  %v10741_v22 = vld [vmem:[%s14814_s1 + $0x1564] ss:$16 sps:$4 sm:$0xff]  }
 0x24d   : > { %5700 = vmatprep.subr.bf16.mxu1 %v10690_v19  ;;  %v10744_v19 = vld [vmem:[%s14814_s1 + $0x1764] ss:$16 sps:$4 sm:$0xff]  }
 0x24f   : > { %5660 = vmatpush1.bf16.msra.mxu0 %v10685_v20  ;;  %v10739_v20 = vld [vmem:[%s14814_s1 + $0x1560] ss:$16 sps:$4 sm:$0xff]  }
 0x250   : > { %5701 = vmatpush1.bf16.msra.mxu1 %v10688_v23  ;;  %5661 = vmatprep.subr.bf16.mxu0 %v10693_v11  ;;  %v10742_v23 = vld [vmem:[%s14814_s1 + $0x1760] ss:$16 sps:$4 sm:$0xff]   ;;  %v10747_v11 = vld [vmem:[%s14814_s1 + $0x1584] ss:$16 sps:$4 sm:$0xff]  }
 0x251   : > { %5702 = vmatprep.subr.bf16.mxu1 %v10696_v49  ;;  %v10750_v49 = vld [vmem:[%s14814_s1 + $0x1784] ss:$16 sps:$4 sm:$0xff]  }
 0x253   : > { %5662 = vmatpush1.bf16.msra.mxu0 %v10691_v53  ;;  %v10745_v53 = vld [vmem:[%s14814_s1 + $0x1580] ss:$16 sps:$4 sm:$0xff]  }
 0x254   : > { %5703 = vmatpush1.bf16.msra.mxu1 %v10694_v21  ;;  %5663 = vmatprep.subr.bf16.mxu0 %v10699_v24  ;;  %v10748_v21 = vld [vmem:[%s14814_s1 + $0x1780] ss:$16 sps:$4 sm:$0xff]   ;;  %v10753_v24 = vld [vmem:[%s14814_s1 + $0x15a4] ss:$16 sps:$4 sm:$0xff]  }
 0x255   : > { %5704 = vmatprep.subr.bf16.mxu1 %v10702_v25  ;;  %v10756_v25 = vld [vmem:[%s14814_s1 + $0x17a4] ss:$16 sps:$4 sm:$0xff]  }
 0x257   : > { %5664 = vmatpush1.bf16.msra.mxu0 %v10697_v26  ;;  %v10751_v26 = vld [vmem:[%s14814_s1 + $0x15a0] ss:$16 sps:$4 sm:$0xff]  }
 0x258   : > { %5705 = vmatpush1.bf16.msra.mxu1 %v10700_v2  ;;  %5665 = vmatprep.subr.bf16.mxu0 %v10705_v3  ;;  %v10754_v2 = vld [vmem:[%s14814_s1 + $0x17a0] ss:$16 sps:$4 sm:$0xff]   ;;  %v10759_v3 = vld [vmem:[%s14814_s1 + $0x15c4] ss:$16 sps:$4 sm:$0xff]  }
 0x259   : > { %5706 = vmatprep.subr.bf16.mxu1 %v10708_v54  ;;  %v3784_v32 = vpop.f32.mrb[20].mxu0  ;;  %v10762_v54 = vld [vmem:[%s14814_s1 + $0x17c4] ss:$16 sps:$4 sm:$0xff]  }
 0x25a   : > { %v3825_v33 = vpop.f32.mrb[20].mxu1  ;;  %v3785_v36 = vadd.f32 %v3784_v32, %v13155_v18  ;;  %v3786_v37 = vpop.f32.mrb[21].mxu0  ;;  %v13495_v32 = vcombine.low %v13262_v63, %v13262_v63  ;;  %v10775_v63 = vld [vmem:[%s14814_s1 + $0x100c] ss:$16 sps:$4 sm:$0xff]  }
 0x25b   : > { %v3827_v40 = vpop.f32.mrb[21].mxu1  ;;  %v3787_v41 = vadd.f32 %v3786_v37, %v13163_v8  ;;  %v3788_v44 = vpop.f32.mrb[22].mxu0  ;;  %5666 = vmatpush1.bf16.msra.mxu0 %v10703_v56  ;;  %v10717_v8 = vld [vmem:[%s14814_s1 + $0x14e4] ss:$16 sps:$4 sm:$0xff]   ;;  %v10757_v56 = vld [vmem:[%s14814_s1 + $0x15c0] ss:$16 sps:$4 sm:$0xff]  }
 0x25c   : > { %v3829_v45 = vpop.f32.mrb[22].mxu1  ;;  %5707 = vmatpush1.bf16.msra.mxu1 %v10706_v55  ;;  %v13387_v35 = vadd.f32 %v3825_v33, %v3785_v36  ;;  %v3789_v47 = vpop.f32.mrb[23].mxu0  ;;  %5667 = vmatprep.subr.bf16.mxu0 %v10711_v29  ;;  %v10760_v55 = vld [vmem:[%s14814_s1 + $0x17c0] ss:$16 sps:$4 sm:$0xff]   ;;  %v10765_v29 = vld [vmem:[%s14814_s1 + $0x15e4] ss:$16 sps:$4 sm:$0xff]   ;;  %v13499_v33 = vcombine.low %v13265_v28, %v13265_v28 }
 0x25d   : > { %v3830_v18 = vpop.f32.mrb[23].mxu1  ;;  %5708 = vmatprep.subr.bf16.mxu1 %v10714_v30  ;;  %v13395_v51 = vadd.f32 %v3827_v40, %v3787_v41  ;;  %v10768_v30 = vld [vmem:[%s14814_s1 + $0x17e4] ss:$16 sps:$4 sm:$0xff]   ;;  %v10763_v36 = vld [vmem:[%s14814_s1 + $0x15e0] ss:$16 sps:$4 sm:$0xff]   ;;  %v4281_v40 = vrot.slane %v13495_v32, 1 }
 0x25e   : > { %v10766_v37 = vld [vmem:[%s14814_s1 + $0x17e0] ss:$16 sps:$4 sm:$0xff]   ;;  %v10778_v28 = vld [vmem:[%s14814_s1 + $0x120c] ss:$16 sps:$4 sm:$0xff]   ;;  %v4283_v41 = vrot.slane %v13499_v33, 1 }
 0x25f   : > { %5668 = vmatpush1.bf16.msra.mxu0 %v10709_v46  ;;  %v10773_v44 = vld [vmem:[%s14814_s1 + $0x1008] ss:$16 sps:$4 sm:$0xff]   ;;  %v10781_v46 = vld [vmem:[%s14814_s1 + $0x102c] ss:$16 sps:$4 sm:$0xff]  }
 0x260   : > { %5709 = vmatpush1.bf16.msra.mxu1 %v10712_v34  ;;  %5669 = vmatprep.subr.bf16.mxu0 %v10717_v8  ;;  %v10776_v45 = vld [vmem:[%s14814_s1 + $0x1208] ss:$16 sps:$4 sm:$0xff]   ;;  %v10784_v34 = vld [vmem:[%s14814_s1 + $0x122c] ss:$16 sps:$4 sm:$0xff]  }
 0x261   : > { %5710 = vmatprep.subr.bf16.mxu1 %v10720_v50  ;;  %v10779_v47 = vld [vmem:[%s14814_s1 + $0x1028] ss:$16 sps:$4 sm:$0xff]   ;;  %v10787_v8 = vld [vmem:[%s14814_s1 + $0x104c] ss:$16 sps:$4 sm:$0xff]  }
 0x262   : > { %v10782_v18 = vld [vmem:[%s14814_s1 + $0x1228] ss:$16 sps:$4 sm:$0xff]   ;;  %v10790_v50 = vld [vmem:[%s14814_s1 + $0x124c] ss:$16 sps:$4 sm:$0xff]  }
 0x263   : > { %5670 = vmatpush1.bf16.msra.mxu0 %v10715_v58  ;;  %v10785_v58 = vld [vmem:[%s14814_s1 + $0x1048] ss:$16 sps:$4 sm:$0xff]  }
 0x264   : > { %5711 = vmatpush1.bf16.msra.mxu1 %v10718_v59  ;;  %5671 = vmatprep.subr.bf16.mxu0 %v10723_v61  ;;  %v10788_v59 = vld [vmem:[%s14814_s1 + $0x1248] ss:$16 sps:$4 sm:$0xff]   ;;  %v10793_v61 = vld [vmem:[%s14814_s1 + $0x106c] ss:$16 sps:$4 sm:$0xff]  }
 0x265   : > { %5712 = vmatprep.subr.bf16.mxu1 %v10726_v62  ;;  %v10794_v62 = vld [vmem:[%s14814_s1 + $0x1268] ss:$16 sps:$4 sm:$0xff]  }
 0x267   : > { %5672 = vmatpush1.bf16.msra.mxu0 %v10721_v6  ;;  %v10799_v6 = vld [vmem:[%s14814_s1 + $0x108c] ss:$16 sps:$4 sm:$0xff]  }
 0x268   : > { %5713 = vmatpush1.bf16.msra.mxu1 %v10724_v7  ;;  %5673 = vmatprep.subr.bf16.mxu0 %v10729_v57  ;;  %v10802_v7 = vld [vmem:[%s14814_s1 + $0x128c] ss:$16 sps:$4 sm:$0xff]   ;;  %v10797_v57 = vld [vmem:[%s14814_s1 + $0x1088] ss:$16 sps:$4 sm:$0xff]  }
 0x269   : > { %5714 = vmatprep.subr.bf16.mxu1 %v10732_v27  ;;  %v10800_v27 = vld [vmem:[%s14814_s1 + $0x1288] ss:$16 sps:$4 sm:$0xff]  }
 0x26b   : > { %5674 = vmatpush1.bf16.msra.mxu0 %v10727_v9  ;;  %v10805_v9 = vld [vmem:[%s14814_s1 + $0x10ac] ss:$16 sps:$4 sm:$0xff]  }
 0x26c   : > { %5715 = vmatpush1.bf16.msra.mxu1 %v10730_v0  ;;  %5675 = vmatprep.subr.bf16.mxu0 %v10735_v14  ;;  %v10808_v0 = vld [vmem:[%s14814_s1 + $0x12ac] ss:$16 sps:$4 sm:$0xff]   ;;  %v10803_v14 = vld [vmem:[%s14814_s1 + $0x10a8] ss:$16 sps:$4 sm:$0xff]  }
 0x26d   : > { %5716 = vmatprep.subr.bf16.mxu1 %v10738_v15  ;;  %v10806_v15 = vld [vmem:[%s14814_s1 + $0x12a8] ss:$16 sps:$4 sm:$0xff]  }
 0x26f   : > { %5676 = vmatpush1.bf16.msra.mxu0 %v10733_v52  ;;  %v10811_v52 = vld [vmem:[%s14814_s1 + $0x10cc] ss:$16 sps:$4 sm:$0xff]  }
 0x270   : > { %5717 = vmatpush1.bf16.msra.mxu1 %v10736_v17  ;;  %5677 = vmatprep.subr.bf16.mxu0 %v10741_v22  ;;  %v10814_v17 = vld [vmem:[%s14814_s1 + $0x12cc] ss:$16 sps:$4 sm:$0xff]  }
 0x271   : > { %5718 = vmatprep.subr.bf16.mxu1 %v10744_v19 }
 0x273   : > { %5678 = vmatpush1.bf16.msra.mxu0 %v10739_v20 }
 0x274   : > { %5719 = vmatpush1.bf16.msra.mxu1 %v10742_v23  ;;  %5679 = vmatprep.subr.bf16.mxu0 %v10747_v11 }
 0x275   : > { %5720 = vmatprep.subr.bf16.mxu1 %v10750_v49 }
 0x277   : > { %5680 = vmatpush1.bf16.msra.mxu0 %v10745_v53 }
 0x278   : > { %5721 = vmatpush1.bf16.msra.mxu1 %v10748_v21  ;;  %5681 = vmatprep.subr.bf16.mxu0 %v10753_v24  ;;  %v10809_v24 = vld [vmem:[%s14814_s1 + $0x10c8] ss:$16 sps:$4 sm:$0xff]  }
 0x279   : > { %5722 = vmatprep.subr.bf16.mxu1 %v10756_v25  ;;  %v10812_v25 = vld [vmem:[%s14814_s1 + $0x12c8] ss:$16 sps:$4 sm:$0xff]  }
 0x27b   : > { %5682 = vmatpush1.bf16.msra.mxu0 %v10751_v26 }
 0x27c   : > { %5723 = vmatpush1.bf16.msra.mxu1 %v10754_v2  ;;  %5683 = vmatprep.subr.bf16.mxu0 %v10759_v3  ;;  %v10820_v3 = vld [vmem:[%s14814_s1 + $0x12ec] ss:$16 sps:$4 sm:$0xff]  }
 0x27d   : > { %5724 = vmatprep.subr.bf16.mxu1 %v10762_v54 }
 0x27f   : > { %5684 = vmatpush1.bf16.msra.mxu0 %v10757_v56  ;;  %v10815_v56 = vld [vmem:[%s14814_s1 + $0x10e8] ss:$16 sps:$4 sm:$0xff]  }
 0x280   : > { %5725 = vmatpush1.bf16.msra.mxu1 %v10760_v55  ;;  %5685 = vmatprep.subr.bf16.mxu0 %v10765_v29  ;;  %v10818_v55 = vld [vmem:[%s14814_s1 + $0x12e8] ss:$16 sps:$4 sm:$0xff]   ;;  %v10823_v29 = vld [vmem:[%s14814_s1 + $0x110c] ss:$16 sps:$4 sm:$0xff]  }
 0x281   : > { %5726 = vmatprep.subr.bf16.mxu1 %v10768_v30  ;;  %v10826_v30 = vld [vmem:[%s14814_s1 + $0x130c] ss:$16 sps:$4 sm:$0xff]  }
 0x283   : > { %5686 = vmatpush1.bf16.msra.mxu0 %v10763_v36  ;;  %v10821_v36 = vld [vmem:[%s14814_s1 + $0x1108] ss:$16 sps:$4 sm:$0xff]  }
 0x284   : > { %5727 = vmatpush1.bf16.msra.mxu1 %v10766_v37  ;;  %5737 = vmatprep.subr.bf16.mxu0 %v10775_v63  ;;  %v10824_v37 = vld [vmem:[%s14814_s1 + $0x1308] ss:$16 sps:$4 sm:$0xff]   ;;  %v10829_v63 = vld [vmem:[%s14814_s1 + $0x112c] ss:$16 sps:$4 sm:$0xff]  }
 0x285   : > { %5778 = vmatprep.subr.bf16.mxu1 %v10778_v28  ;;  %v10832_v28 = vld [vmem:[%s14814_s1 + $0x132c] ss:$16 sps:$4 sm:$0xff]  }
 0x286   : > { %5688 = vmatmul.mubr.bf16.vlgmr.msra.gmra.mrb[36].mxu0 %v4281_v40 }
 0x287   : > { %5729 = vmatmul.mubr.bf16.vlgmr.msra.gmra.mrb[36].mxu1 %v4283_v41  ;;  %5738 = vmatpush1.bf16.msra.mxu0 %v10773_v44  ;;  %v10827_v44 = vld [vmem:[%s14814_s1 + $0x1128] ss:$16 sps:$4 sm:$0xff]  }
 0x288   : > { %5779 = vmatpush1.bf16.msra.mxu1 %v10776_v45  ;;  %5739 = vmatprep.subr.bf16.mxu0 %v10781_v46  ;;  %v10830_v45 = vld [vmem:[%s14814_s1 + $0x1328] ss:$16 sps:$4 sm:$0xff]   ;;  %v10835_v46 = vld [vmem:[%s14814_s1 + $0x114c] ss:$16 sps:$4 sm:$0xff]  }
 0x289   : > { %5780 = vmatprep.subr.bf16.mxu1 %v10784_v34  ;;  %5769 = vmatprep.mubr.bf16.mxu0 %v4278_v42  ;;  %v10796_v42 = vld [vmem:[%s14814_s1 + $0x126c] ss:$16 sps:$4 sm:$0xff]  }
 0x28a   : > { %5810 = vmatprep.mubr.bf16.mxu1 %v4280_v43  ;;  %v10791_v43 = vld [vmem:[%s14814_s1 + $0x1068] ss:$16 sps:$4 sm:$0xff]   ;;  %v10838_v34 = vld [vmem:[%s14814_s1 + $0x134c] ss:$16 sps:$4 sm:$0xff]  }
 0x28b   : > { %5740 = vmatpush1.bf16.msra.mxu0 %v10779_v47  ;;  %v10833_v47 = vld [vmem:[%s14814_s1 + $0x1148] ss:$16 sps:$4 sm:$0xff]  }
 0x28c   : > { %5781 = vmatpush1.bf16.msra.mxu1 %v10782_v18  ;;  %5741 = vmatprep.subr.bf16.mxu0 %v10787_v8  ;;  %v10836_v18 = vld [vmem:[%s14814_s1 + $0x1348] ss:$16 sps:$4 sm:$0xff]   ;;  %v10841_v8 = vld [vmem:[%s14814_s1 + $0x116c] ss:$16 sps:$4 sm:$0xff]  }
 0x28d   : > { %5782 = vmatprep.subr.bf16.mxu1 %v10790_v50  ;;  %v10844_v50 = vld [vmem:[%s14814_s1 + $0x136c] ss:$16 sps:$4 sm:$0xff]  }
 0x28f   : > { %5742 = vmatpush1.bf16.msra.mxu0 %v10785_v58  ;;  %v10839_v58 = vld [vmem:[%s14814_s1 + $0x1168] ss:$16 sps:$4 sm:$0xff]  }
 0x290   : > { %5783 = vmatpush1.bf16.msra.mxu1 %v10788_v59  ;;  %5743 = vmatprep.subr.bf16.mxu0 %v10793_v61  ;;  %v10842_v59 = vld [vmem:[%s14814_s1 + $0x1368] ss:$16 sps:$4 sm:$0xff]   ;;  %v10847_v61 = vld [vmem:[%s14814_s1 + $0x118c] ss:$16 sps:$4 sm:$0xff]  }
 0x291   : > { %5784 = vmatprep.subr.bf16.mxu1 %v10796_v42  ;;  %v10850_v42 = vld [vmem:[%s14814_s1 + $0x138c] ss:$16 sps:$4 sm:$0xff]  }
 0x293   : > { %5744 = vmatpush1.bf16.msra.mxu0 %v10791_v43  ;;  %v10845_v43 = vld [vmem:[%s14814_s1 + $0x1188] ss:$16 sps:$4 sm:$0xff]  }
 0x294   : > { %5785 = vmatpush1.bf16.msra.mxu1 %v10794_v62  ;;  %5745 = vmatprep.subr.bf16.mxu0 %v10799_v6  ;;  %v10848_v62 = vld [vmem:[%s14814_s1 + $0x1388] ss:$16 sps:$4 sm:$0xff]   ;;  %v10853_v6 = vld [vmem:[%s14814_s1 + $0x11ac] ss:$16 sps:$4 sm:$0xff]  }
 0x295   : > { %5786 = vmatprep.subr.bf16.mxu1 %v10802_v7  ;;  %v10856_v7 = vld [vmem:[%s14814_s1 + $0x13ac] ss:$16 sps:$4 sm:$0xff]  }
 0x297   : > { %5746 = vmatpush1.bf16.msra.mxu0 %v10797_v57  ;;  %v10851_v57 = vld [vmem:[%s14814_s1 + $0x11a8] ss:$16 sps:$4 sm:$0xff]  }
 0x298   : > { %5787 = vmatpush1.bf16.msra.mxu1 %v10800_v27  ;;  %5747 = vmatprep.subr.bf16.mxu0 %v10805_v9  ;;  %v10854_v27 = vld [vmem:[%s14814_s1 + $0x13a8] ss:$16 sps:$4 sm:$0xff]   ;;  %v10859_v9 = vld [vmem:[%s14814_s1 + $0x11cc] ss:$16 sps:$4 sm:$0xff]  }
 0x299   : > { %5788 = vmatprep.subr.bf16.mxu1 %v10808_v0  ;;  %v3866_v22 = vpop.f32.mrb[24].mxu0  ;;  %v10862_v0 = vld [vmem:[%s14814_s1 + $0x13cc] ss:$16 sps:$4 sm:$0xff]  }
 0x29a   : > { %v3907_v19 = vpop.f32.mrb[24].mxu1  ;;  %v3867_v20 = vadd.f32 %v3866_v22, %v12935_v60  ;;  %v3868_v23 = vpop.f32.mrb[25].mxu0  ;;  %v10863_v22 = vld [vmem:[%s14814_s1 + $0x11e8] ss:$16 sps:$4 sm:$0xff]  }
 0x29b   : > { %v3909_v11 = vpop.f32.mrb[25].mxu1  ;;  %v3869_v49 = vadd.f32 %v3868_v23, %v12943_v4  ;;  %v3870_v53 = vpop.f32.mrb[26].mxu0  ;;  %5748 = vmatpush1.bf16.msra.mxu0 %v10803_v14  ;;  %v10817_v4 = vld [vmem:[%s14814_s1 + $0x10ec] ss:$16 sps:$4 sm:$0xff]   ;;  %v10857_v14 = vld [vmem:[%s14814_s1 + $0x11c8] ss:$16 sps:$4 sm:$0xff]  }
 0x29c   : > { %v3911_v21 = vpop.f32.mrb[26].mxu1  ;;  %5789 = vmatpush1.bf16.msra.mxu1 %v10806_v15  ;;  %v13603_v26 = vadd.f32 %v3907_v19, %v3867_v20  ;;  %v3871_v2 = vpop.f32.mrb[27].mxu0  ;;  %5749 = vmatprep.subr.bf16.mxu0 %v10811_v52  ;;  %v10860_v15 = vld [vmem:[%s14814_s1 + $0x13c8] ss:$16 sps:$4 sm:$0xff]   ;;  %v10865_v52 = vld [vmem:[%s14814_s1 + $0x11ec] ss:$16 sps:$4 sm:$0xff]  }
 0x29d   : > { %v3912_v60 = vpop.f32.mrb[27].mxu1  ;;  %5790 = vmatprep.subr.bf16.mxu1 %v10814_v17  ;;  %v13611_v54 = vadd.f32 %v3909_v11, %v3869_v49  ;;  %v10868_v17 = vld [vmem:[%s14814_s1 + $0x13ec] ss:$16 sps:$4 sm:$0xff]   ;;  %v10866_v19 = vld [vmem:[%s14814_s1 + $0x13e8] ss:$16 sps:$4 sm:$0xff]  }
 0x29e   : > { %v10871_v20 = vld [vmem:[%s14814_s1 + $0x140c] ss:$16 sps:$4 sm:$0xff]   ;;  %v10869_v11 = vld [vmem:[%s14814_s1 + $0x1408] ss:$16 sps:$4 sm:$0xff]  }
 0x29f   : > { %5750 = vmatpush1.bf16.msra.mxu0 %v10809_v24  ;;  %v10874_v23 = vld [vmem:[%s14814_s1 + $0x160c] ss:$16 sps:$4 sm:$0xff]   ;;  %v10872_v49 = vld [vmem:[%s14814_s1 + $0x1608] ss:$16 sps:$4 sm:$0xff]  }
 0x2a0   : > { %5791 = vmatpush1.bf16.msra.mxu1 %v10812_v25  ;;  %5751 = vmatprep.subr.bf16.mxu0 %v10817_v4  ;;  %v10877_v53 = vld [vmem:[%s14814_s1 + $0x142c] ss:$16 sps:$4 sm:$0xff]   ;;  %v10875_v24 = vld [vmem:[%s14814_s1 + $0x1428] ss:$16 sps:$4 sm:$0xff]  }
 0x2a1   : > { %5792 = vmatprep.subr.bf16.mxu1 %v10820_v3  ;;  %v10880_v21 = vld [vmem:[%s14814_s1 + $0x162c] ss:$16 sps:$4 sm:$0xff]   ;;  %v10878_v25 = vld [vmem:[%s14814_s1 + $0x1628] ss:$16 sps:$4 sm:$0xff]  }
 0x2a2   : > { %v10883_v2 = vld [vmem:[%s14814_s1 + $0x144c] ss:$16 sps:$4 sm:$0xff]   ;;  %v10884_v60 = vld [vmem:[%s14814_s1 + $0x1648] ss:$16 sps:$4 sm:$0xff]  }
 0x2a3   : > { %5752 = vmatpush1.bf16.msra.mxu0 %v10815_v56  ;;  %v10889_v4 = vld [vmem:[%s14814_s1 + $0x146c] ss:$16 sps:$4 sm:$0xff]   ;;  %v10890_v3 = vld [vmem:[%s14814_s1 + $0x1668] ss:$16 sps:$4 sm:$0xff]  }
 0x2a4   : > { %5793 = vmatpush1.bf16.msra.mxu1 %v10818_v55  ;;  %5753 = vmatprep.subr.bf16.mxu0 %v10823_v29  ;;  %v10895_v56 = vld [vmem:[%s14814_s1 + $0x148c] ss:$16 sps:$4 sm:$0xff]   ;;  %v10893_v29 = vld [vmem:[%s14814_s1 + $0x1488] ss:$16 sps:$4 sm:$0xff]  }
 0x2a5   : > { %5794 = vmatprep.subr.bf16.mxu1 %v10826_v30  ;;  %v10898_v55 = vld [vmem:[%s14814_s1 + $0x168c] ss:$16 sps:$4 sm:$0xff]   ;;  %v10896_v30 = vld [vmem:[%s14814_s1 + $0x1688] ss:$16 sps:$4 sm:$0xff]  }
 0x2a7   : > { %5754 = vmatpush1.bf16.msra.mxu0 %v10821_v36  ;;  %v10901_v36 = vld [vmem:[%s14814_s1 + $0x14ac] ss:$16 sps:$4 sm:$0xff]  }
 0x2a8   : > { %5795 = vmatpush1.bf16.msra.mxu1 %v10824_v37  ;;  %5755 = vmatprep.subr.bf16.mxu0 %v10829_v63  ;;  %v10904_v37 = vld [vmem:[%s14814_s1 + $0x16ac] ss:$16 sps:$4 sm:$0xff]   ;;  %v10899_v63 = vld [vmem:[%s14814_s1 + $0x14a8] ss:$16 sps:$4 sm:$0xff]  }
 0x2a9   : > { %5796 = vmatprep.subr.bf16.mxu1 %v10832_v28  ;;  %v10902_v28 = vld [vmem:[%s14814_s1 + $0x16a8] ss:$16 sps:$4 sm:$0xff]  }
 0x2ab   : > { %5756 = vmatpush1.bf16.msra.mxu0 %v10827_v44  ;;  %v10907_v44 = vld [vmem:[%s14814_s1 + $0x14cc] ss:$16 sps:$4 sm:$0xff]  }
 0x2ac   : > { %5797 = vmatpush1.bf16.msra.mxu1 %v10830_v45  ;;  %5757 = vmatprep.subr.bf16.mxu0 %v10835_v46  ;;  %v10910_v45 = vld [vmem:[%s14814_s1 + $0x16cc] ss:$16 sps:$4 sm:$0xff]  }
 0x2ad   : > { %5798 = vmatprep.subr.bf16.mxu1 %v10838_v34 }
 0x2af   : > { %5758 = vmatpush1.bf16.msra.mxu0 %v10833_v47 }
 0x2b0   : > { %5799 = vmatpush1.bf16.msra.mxu1 %v10836_v18  ;;  %5759 = vmatprep.subr.bf16.mxu0 %v10841_v8 }
 0x2b1   : > { %5800 = vmatprep.subr.bf16.mxu1 %v10844_v50 }
 0x2b3   : > { %5760 = vmatpush1.bf16.msra.mxu0 %v10839_v58 }
 0x2b4   : > { %5801 = vmatpush1.bf16.msra.mxu1 %v10842_v59  ;;  %5761 = vmatprep.subr.bf16.mxu0 %v10847_v61  ;;  %v10905_v61 = vld [vmem:[%s14814_s1 + $0x14c8] ss:$16 sps:$4 sm:$0xff]  }
 0x2b5   : > { %5802 = vmatprep.subr.bf16.mxu1 %v10850_v42  ;;  %v10908_v42 = vld [vmem:[%s14814_s1 + $0x16c8] ss:$16 sps:$4 sm:$0xff]  }
 0x2b7   : > { %5762 = vmatpush1.bf16.msra.mxu0 %v10845_v43 }
 0x2b8   : > { %5803 = vmatpush1.bf16.msra.mxu1 %v10848_v62  ;;  %5763 = vmatprep.subr.bf16.mxu0 %v10853_v6  ;;  %v10916_v6 = vld [vmem:[%s14814_s1 + $0x16ec] ss:$16 sps:$4 sm:$0xff]  }
 0x2b9   : > { %5804 = vmatprep.subr.bf16.mxu1 %v10856_v7 }
 0x2bb   : > { %5764 = vmatpush1.bf16.msra.mxu0 %v10851_v57  ;;  %v10911_v57 = vld [vmem:[%s14814_s1 + $0x14e8] ss:$16 sps:$4 sm:$0xff]  }
 0x2bc   : > { %5805 = vmatpush1.bf16.msra.mxu1 %v10854_v27  ;;  %5765 = vmatprep.subr.bf16.mxu0 %v10859_v9  ;;  %v10914_v27 = vld [vmem:[%s14814_s1 + $0x16e8] ss:$16 sps:$4 sm:$0xff]   ;;  %v10919_v9 = vld [vmem:[%s14814_s1 + $0x150c] ss:$16 sps:$4 sm:$0xff]  }
 0x2bd   : > { %5806 = vmatprep.subr.bf16.mxu1 %v10862_v0  ;;  %v10922_v0 = vld [vmem:[%s14814_s1 + $0x170c] ss:$16 sps:$4 sm:$0xff]  }
 0x2bf   : > { %5766 = vmatpush1.bf16.msra.mxu0 %v10857_v14  ;;  %v10917_v14 = vld [vmem:[%s14814_s1 + $0x1508] ss:$16 sps:$4 sm:$0xff]  }
 0x2c0   : > { %5807 = vmatpush1.bf16.msra.mxu1 %v10860_v15  ;;  %5767 = vmatprep.subr.bf16.mxu0 %v10865_v52  ;;  %v10920_v15 = vld [vmem:[%s14814_s1 + $0x1708] ss:$16 sps:$4 sm:$0xff]   ;;  %v10925_v52 = vld [vmem:[%s14814_s1 + $0x152c] ss:$16 sps:$4 sm:$0xff]  }
 0x2c1   : > { %5808 = vmatprep.subr.bf16.mxu1 %v10868_v17  ;;  %v10928_v17 = vld [vmem:[%s14814_s1 + $0x172c] ss:$16 sps:$4 sm:$0xff]  }
 0x2c3   : > { %5768 = vmatpush1.bf16.msra.mxu0 %v10863_v22  ;;  %v10923_v22 = vld [vmem:[%s14814_s1 + $0x1528] ss:$16 sps:$4 sm:$0xff]  }
 0x2c4   : > { %5809 = vmatpush1.bf16.msra.mxu1 %v10866_v19  ;;  %5819 = vmatprep.subr.bf16.mxu0 %v10871_v20  ;;  %v10926_v19 = vld [vmem:[%s14814_s1 + $0x1728] ss:$16 sps:$4 sm:$0xff]   ;;  %v10931_v20 = vld [vmem:[%s14814_s1 + $0x154c] ss:$16 sps:$4 sm:$0xff]  }
 0x2c5   : > { %5860 = vmatprep.subr.bf16.mxu1 %v10874_v23  ;;  %v10934_v23 = vld [vmem:[%s14814_s1 + $0x174c] ss:$16 sps:$4 sm:$0xff]  }
 0x2c6   : > { %5770 = vmatmul.mubr.bf16.vlgmr.msra.gmra.mrb[40].mxu0 %v4277_v12  ;;  %v10886_v12 = vld [vmem:[%s14814_s1 + $0x164c] ss:$16 sps:$4 sm:$0xff]  }
 0x2c7   : > { %5811 = vmatmul.mubr.bf16.vlgmr.msra.gmra.mrb[40].mxu1 %v4279_v13  ;;  %5820 = vmatpush1.bf16.msra.mxu0 %v10869_v11  ;;  %v10881_v13 = vld [vmem:[%s14814_s1 + $0x1448] ss:$16 sps:$4 sm:$0xff]  }
 0x2c8   : > { %5861 = vmatpush1.bf16.msra.mxu1 %v10872_v49  ;;  %5821 = vmatprep.subr.bf16.mxu0 %v10877_v53  ;;  %v10929_v11 = vld [vmem:[%s14814_s1 + $0x1548] ss:$16 sps:$4 sm:$0xff]   ;;  %v10937_v53 = vld [vmem:[%s14814_s1 + $0x156c] ss:$16 sps:$4 sm:$0xff]  }
 0x2c9   : > { %5862 = vmatprep.subr.bf16.mxu1 %v10880_v21  ;;  %5851 = vmatprep.mubr.bf16.mxu0 %v4282_v16  ;;  %v10892_v16 = vld [vmem:[%s14814_s1 + $0x166c] ss:$16 sps:$4 sm:$0xff]   ;;  %v10932_v49 = vld [vmem:[%s14814_s1 + $0x1748] ss:$16 sps:$4 sm:$0xff]  }
 0x2ca   : > { %5892 = vmatprep.mubr.bf16.mxu1 %v4284_v48  ;;  %v10887_v48 = vld [vmem:[%s14814_s1 + $0x1468] ss:$16 sps:$4 sm:$0xff]   ;;  %v10940_v21 = vld [vmem:[%s14814_s1 + $0x176c] ss:$16 sps:$4 sm:$0xff]  }
 0x2cb   : > { %5822 = vmatpush1.bf16.msra.mxu0 %v10875_v24  ;;  %v10935_v24 = vld [vmem:[%s14814_s1 + $0x1568] ss:$16 sps:$4 sm:$0xff]  }
 0x2cc   : > { %5863 = vmatpush1.bf16.msra.mxu1 %v10878_v25  ;;  %5823 = vmatprep.subr.bf16.mxu0 %v10883_v2  ;;  %v10938_v25 = vld [vmem:[%s14814_s1 + $0x1768] ss:$16 sps:$4 sm:$0xff]   ;;  %v10943_v2 = vld [vmem:[%s14814_s1 + $0x158c] ss:$16 sps:$4 sm:$0xff]  }
 0x2cd   : > { %5864 = vmatprep.subr.bf16.mxu1 %v10886_v12  ;;  %v10946_v12 = vld [vmem:[%s14814_s1 + $0x178c] ss:$16 sps:$4 sm:$0xff]  }
 0x2cf   : > { %5824 = vmatpush1.bf16.msra.mxu0 %v10881_v13  ;;  %v10941_v13 = vld [vmem:[%s14814_s1 + $0x1588] ss:$16 sps:$4 sm:$0xff]  }
 0x2d0   : > { %5865 = vmatpush1.bf16.msra.mxu1 %v10884_v60  ;;  %5825 = vmatprep.subr.bf16.mxu0 %v10889_v4  ;;  %v10944_v60 = vld [vmem:[%s14814_s1 + $0x1788] ss:$16 sps:$4 sm:$0xff]   ;;  %v10949_v4 = vld [vmem:[%s14814_s1 + $0x15ac] ss:$16 sps:$4 sm:$0xff]  }
 0x2d1   : > { %5866 = vmatprep.subr.bf16.mxu1 %v10892_v16  ;;  %v10952_v16 = vld [vmem:[%s14814_s1 + $0x17ac] ss:$16 sps:$4 sm:$0xff]  }
 0x2d3   : > { %5826 = vmatpush1.bf16.msra.mxu0 %v10887_v48  ;;  %v10947_v48 = vld [vmem:[%s14814_s1 + $0x15a8] ss:$16 sps:$4 sm:$0xff]  }
 0x2d4   : > { %5867 = vmatpush1.bf16.msra.mxu1 %v10890_v3  ;;  %5827 = vmatprep.subr.bf16.mxu0 %v10895_v56  ;;  %v10950_v3 = vld [vmem:[%s14814_s1 + $0x17a8] ss:$16 sps:$4 sm:$0xff]   ;;  %v10955_v56 = vld [vmem:[%s14814_s1 + $0x15cc] ss:$16 sps:$4 sm:$0xff]  }
 0x2d5   : > { %5868 = vmatprep.subr.bf16.mxu1 %v10898_v55  ;;  %v10958_v55 = vld [vmem:[%s14814_s1 + $0x17cc] ss:$16 sps:$4 sm:$0xff]  }
 0x2d7   : > { %5828 = vmatpush1.bf16.msra.mxu0 %v10893_v29  ;;  %v10953_v29 = vld [vmem:[%s14814_s1 + $0x15c8] ss:$16 sps:$4 sm:$0xff]  }
 0x2d8   : > { %5869 = vmatpush1.bf16.msra.mxu1 %v10896_v30  ;;  %5829 = vmatprep.subr.bf16.mxu0 %v10901_v36  ;;  %v10956_v30 = vld [vmem:[%s14814_s1 + $0x17c8] ss:$16 sps:$4 sm:$0xff]   ;;  %v10961_v36 = vld [vmem:[%s14814_s1 + $0x15ec] ss:$16 sps:$4 sm:$0xff]  }
 0x2d9   : > { %5870 = vmatprep.subr.bf16.mxu1 %v10904_v37  ;;  %v3948_v46 = vpop.f32.mrb[28].mxu0  ;;  %v10964_v37 = vld [vmem:[%s14814_s1 + $0x17ec] ss:$16 sps:$4 sm:$0xff]  }
 0x2da   : > { %v3989_v34 = vpop.f32.mrb[28].mxu1  ;;  %v3949_v47 = vadd.f32 %v3948_v46, %v13603_v26  ;;  %v3950_v18 = vpop.f32.mrb[29].mxu0  ;;  %v10959_v46 = vld [vmem:[%s14814_s1 + $0x15e8] ss:$16 sps:$4 sm:$0xff]  }
 0x2db   : > { %v3991_v8 = vpop.f32.mrb[29].mxu1  ;;  %v3951_v50 = vadd.f32 %v3950_v18, %v13611_v54  ;;  %v3952_v58 = vpop.f32.mrb[30].mxu0  ;;  %5830 = vmatpush1.bf16.msra.mxu0 %v10899_v63  ;;  %v10913_v54 = vld [vmem:[%s14814_s1 + $0x14ec] ss:$16 sps:$4 sm:$0xff]   ;;  %v6171_v63 = vshrl.u32 %v13067_v38, 16 }
 0x2dc   : > { %v3993_v59 = vpop.f32.mrb[30].mxu1  ;;  %5871 = vmatpush1.bf16.msra.mxu1 %v10902_v28  ;;  %v13809_v43 = vadd.f32 %v3989_v34, %v3949_v47  ;;  %v3953_v62 = vpop.f32.mrb[31].mxu0  ;;  %5831 = vmatprep.subr.bf16.mxu0 %v10907_v44  ;;  %v6174_v28 = vshll.u32 %v13067_v38, 16  ;;  %v6187_v44 = vshrl.u32 %v13071_v39, 16  ;;  %v10962_v34 = vld [vmem:[%s14814_s1 + $0x17e8] ss:$16 sps:$4 sm:$0xff]  }
 0x2dd   : > { %v3994_v26 = vpop.f32.mrb[31].mxu1  ;;  %5872 = vmatprep.subr.bf16.mxu1 %v10910_v45  ;;  %v13817_v7 = vadd.f32 %v3991_v8, %v3951_v50  ;;  %v6190_v45 = vshll.u32 %v13071_v39, 16  ;;  %v10967_v38 = vld [vmem:[%s14814_s1 + $0x1804] ss:$16 sps:$4 sm:$0xff]   ;;  %v6173_v47 = vrot.slane %v6171_v63, 1 }
 0x2de   : > { %v10970_v39 = vld [vmem:[%s14814_s1 + $0x1a04] ss:$16 sps:$4 sm:$0xff]   ;;  %v6176_v18 = vrot.slane %v6174_v28, 2  ;;  %v6189_v8 = vrot.slane %v6187_v44, 1  ;;  %v10965_v58 = vld [vmem:[%s14814_s1 + $0x1800] ss:$16 sps:$4 sm:$0xff]  }
 0x2df   : > { %5832 = vmatpush1.bf16.msra.mxu0 %v10905_v61  ;;  %v6192_v50 = vrot.slane %v6190_v45, 2  ;;  %v10968_v59 = vld [vmem:[%s14814_s1 + $0x1a00] ss:$16 sps:$4 sm:$0xff]   ;;  %v10973_v61 = vld [vmem:[%s14814_s1 + $0x1824] ss:$16 sps:$4 sm:$0xff]  }
 0x2e0   : > { %5873 = vmatpush1.bf16.msra.mxu1 %v10908_v42  ;;  %5833 = vmatprep.subr.bf16.mxu0 %v10913_v54  ;;  %v10976_v42 = vld [vmem:[%s14814_s1 + $0x1a24] ss:$16 sps:$4 sm:$0xff]   ;;  %v13943_v62 = vor.u32 %v6176_v18, %v6173_v47  ;;  %v10971_v54 = vld [vmem:[%s14814_s1 + $0x1820] ss:$16 sps:$4 sm:$0xff]  }
 0x2e1   : > { %5874 = vmatprep.subr.bf16.mxu1 %v10916_v6  ;;  %v13945_v26 = vor.u32 %v6192_v50, %v6189_v8  ;;  %v10974_v6 = vld [vmem:[%s14814_s1 + $0x1a20] ss:$16 sps:$4 sm:$0xff]   ;;  %v11015_v63 = vld [vmem:[%s14814_s1 + $0x1904] ss:$16 sps:$4 sm:$0xff]  }
 0x2e2   : > { %v11018_v28 = vld [vmem:[%s14814_s1 + $0x1b04] ss:$16 sps:$4 sm:$0xff]   ;;  %v11013_v44 = vld [vmem:[%s14814_s1 + $0x1900] ss:$16 sps:$4 sm:$0xff]  }
 0x2e3   : > { %5834 = vmatpush1.bf16.msra.mxu0 %v10911_v57  ;;  %v10979_v57 = vld [vmem:[%s14814_s1 + $0x1844] ss:$16 sps:$4 sm:$0xff]   ;;  %v11016_v45 = vld [vmem:[%s14814_s1 + $0x1b00] ss:$16 sps:$4 sm:$0xff]  }
 0x2e4   : > { %5875 = vmatpush1.bf16.msra.mxu1 %v10914_v27  ;;  %5835 = vmatprep.subr.bf16.mxu0 %v10919_v9  ;;  %v10980_v27 = vld [vmem:[%s14814_s1 + $0x1a40] ss:$16 sps:$4 sm:$0xff]   ;;  %v10985_v9 = vld [vmem:[%s14814_s1 + $0x1864] ss:$16 sps:$4 sm:$0xff]  }
 0x2e5   : > { %5876 = vmatprep.subr.bf16.mxu1 %v10922_v0  ;;  %v10988_v0 = vld [vmem:[%s14814_s1 + $0x1a64] ss:$16 sps:$4 sm:$0xff]   ;;  %v11025_v8 = vld [vmem:[%s14814_s1 + $0x1940] ss:$16 sps:$4 sm:$0xff]  }
 0x2e6   : > { %v11027_v47 = vld [vmem:[%s14814_s1 + $0x1944] ss:$16 sps:$4 sm:$0xff]   ;;  %v11028_v50 = vld [vmem:[%s14814_s1 + $0x1b40] ss:$16 sps:$4 sm:$0xff]  }
 0x2e7   : > { %5836 = vmatpush1.bf16.msra.mxu0 %v10917_v14  ;;  %v10983_v14 = vld [vmem:[%s14814_s1 + $0x1860] ss:$16 sps:$4 sm:$0xff]   ;;  %v11030_v18 = vld [vmem:[%s14814_s1 + $0x1b44] ss:$16 sps:$4 sm:$0xff]  }
 0x2e8   : > { %5877 = vmatpush1.bf16.msra.mxu1 %v10920_v15  ;;  %5837 = vmatprep.subr.bf16.mxu0 %v10925_v52  ;;  %v10986_v15 = vld [vmem:[%s14814_s1 + $0x1a60] ss:$16 sps:$4 sm:$0xff]   ;;  %v10991_v52 = vld [vmem:[%s14814_s1 + $0x1884] ss:$16 sps:$4 sm:$0xff]  }
 0x2e9   : > { %5878 = vmatprep.subr.bf16.mxu1 %v10928_v17  ;;  %v10994_v17 = vld [vmem:[%s14814_s1 + $0x1a84] ss:$16 sps:$4 sm:$0xff]  }
 0x2eb   : > { %5838 = vmatpush1.bf16.msra.mxu0 %v10923_v22  ;;  %v10989_v22 = vld [vmem:[%s14814_s1 + $0x1880] ss:$16 sps:$4 sm:$0xff]  }
 0x2ec   : > { %5879 = vmatpush1.bf16.msra.mxu1 %v10926_v19  ;;  %5839 = vmatprep.subr.bf16.mxu0 %v10931_v20  ;;  %v10992_v19 = vld [vmem:[%s14814_s1 + $0x1a80] ss:$16 sps:$4 sm:$0xff]   ;;  %v10997_v20 = vld [vmem:[%s14814_s1 + $0x18a4] ss:$16 sps:$4 sm:$0xff]  }
 0x2ed   : > { %5880 = vmatprep.subr.bf16.mxu1 %v10934_v23  ;;  %v11000_v23 = vld [vmem:[%s14814_s1 + $0x1aa4] ss:$16 sps:$4 sm:$0xff]  }
 0x2ef   : > { %5840 = vmatpush1.bf16.msra.mxu0 %v10929_v11  ;;  %v10995_v11 = vld [vmem:[%s14814_s1 + $0x18a0] ss:$16 sps:$4 sm:$0xff]  }
 0x2f0   : > { %5881 = vmatpush1.bf16.msra.mxu1 %v10932_v49  ;;  %5841 = vmatprep.subr.bf16.mxu0 %v10937_v53  ;;  %v10998_v49 = vld [vmem:[%s14814_s1 + $0x1aa0] ss:$16 sps:$4 sm:$0xff]   ;;  %v11003_v53 = vld [vmem:[%s14814_s1 + $0x18c4] ss:$16 sps:$4 sm:$0xff]  }
 0x2f1   : > { %5882 = vmatprep.subr.bf16.mxu1 %v10940_v21  ;;  %v11006_v21 = vld [vmem:[%s14814_s1 + $0x1ac4] ss:$16 sps:$4 sm:$0xff]  }
 0x2f3   : > { %5842 = vmatpush1.bf16.msra.mxu0 %v10935_v24 }
 0x2f4   : > { %5883 = vmatpush1.bf16.msra.mxu1 %v10938_v25  ;;  %5843 = vmatprep.subr.bf16.mxu0 %v10943_v2 }
 0x2f5   : > { %5884 = vmatprep.subr.bf16.mxu1 %v10946_v12 }
 0x2f7   : > { %5844 = vmatpush1.bf16.msra.mxu0 %v10941_v13 }
 0x2f8   : > { %5885 = vmatpush1.bf16.msra.mxu1 %v10944_v60  ;;  %5845 = vmatprep.subr.bf16.mxu0 %v10949_v4 }
 0x2f9   : > { %5886 = vmatprep.subr.bf16.mxu1 %v10952_v16 }
 0x2fb   : > { %5846 = vmatpush1.bf16.msra.mxu0 %v10947_v48  ;;  %v11001_v48 = vld [vmem:[%s14814_s1 + $0x18c0] ss:$16 sps:$4 sm:$0xff]  }
 0x2fc   : > { %5887 = vmatpush1.bf16.msra.mxu1 %v10950_v3  ;;  %5847 = vmatprep.subr.bf16.mxu0 %v10955_v56  ;;  %v11004_v3 = vld [vmem:[%s14814_s1 + $0x1ac0] ss:$16 sps:$4 sm:$0xff]  }
 0x2fd   : > { %5888 = vmatprep.subr.bf16.mxu1 %v10958_v55 }
 0x2ff   : > { %5848 = vmatpush1.bf16.msra.mxu0 %v10953_v29  ;;  %v11009_v29 = vld [vmem:[%s14814_s1 + $0x18e4] ss:$16 sps:$4 sm:$0xff]  }
 0x300   : > { %5889 = vmatpush1.bf16.msra.mxu1 %v10956_v30  ;;  %5849 = vmatprep.subr.bf16.mxu0 %v10961_v36  ;;  %v11012_v30 = vld [vmem:[%s14814_s1 + $0x1ae4] ss:$16 sps:$4 sm:$0xff]   ;;  %v11007_v36 = vld [vmem:[%s14814_s1 + $0x18e0] ss:$16 sps:$4 sm:$0xff]  }
 0x301   : > { %5890 = vmatprep.subr.bf16.mxu1 %v10964_v37  ;;  %v11010_v37 = vld [vmem:[%s14814_s1 + $0x1ae0] ss:$16 sps:$4 sm:$0xff]  }
 0x303   : > { %5850 = vmatpush1.bf16.msra.mxu0 %v10959_v46  ;;  %v11021_v46 = vld [vmem:[%s14814_s1 + $0x1924] ss:$16 sps:$4 sm:$0xff]  }
 0x304   : > { %5891 = vmatpush1.bf16.msra.mxu1 %v10962_v34  ;;  %7514 = vmatprep.subr.bf16.mxu0 %v10967_v38  ;;  %v11024_v34 = vld [vmem:[%s14814_s1 + $0x1b24] ss:$16 sps:$4 sm:$0xff]   ;;  %v11019_v38 = vld [vmem:[%s14814_s1 + $0x1920] ss:$16 sps:$4 sm:$0xff]  }
 0x305   : > { %7555 = vmatprep.subr.bf16.mxu1 %v10970_v39  ;;  %v11022_v39 = vld [vmem:[%s14814_s1 + $0x1b20] ss:$16 sps:$4 sm:$0xff]  }
 0x306   : > { %5852 = vmatmul.mubr.bf16.vlgmr.msra.gmra.mrb[44].mxu0 %v4281_v40  ;;  %v10982_v40 = vld [vmem:[%s14814_s1 + $0x1a44] ss:$16 sps:$4 sm:$0xff]  }
 0x307   : > { %5893 = vmatmul.mubr.bf16.vlgmr.msra.gmra.mrb[44].mxu1 %v4283_v41  ;;  %7515 = vmatpush1.bf16.msra.mxu0 %v10965_v58  ;;  %v10977_v41 = vld [vmem:[%s14814_s1 + $0x1840] ss:$16 sps:$4 sm:$0xff]   ;;  %v11033_v58 = vld [vmem:[%s14814_s1 + $0x1964] ss:$16 sps:$4 sm:$0xff]  }
 0x308   : > { %7556 = vmatpush1.bf16.msra.mxu1 %v10968_v59  ;;  %7516 = vmatprep.subr.bf16.mxu0 %v10973_v61  ;;  %v11036_v59 = vld [vmem:[%s14814_s1 + $0x1b64] ss:$16 sps:$4 sm:$0xff]   ;;  %v11031_v61 = vld [vmem:[%s14814_s1 + $0x1960] ss:$16 sps:$4 sm:$0xff]  }
 0x309   : > { %7557 = vmatprep.subr.bf16.mxu1 %v10976_v42  ;;  %7546 = vmatprep.mubr.bf16.mxu0 %v13943_v62  ;;  %v11034_v42 = vld [vmem:[%s14814_s1 + $0x1b60] ss:$16 sps:$4 sm:$0xff]  }
 0x30a   : > { %7587 = vmatprep.mubr.bf16.mxu1 %v13945_v26 }
 0x30b   : > { %7517 = vmatpush1.bf16.msra.mxu0 %v10971_v54  ;;  %v11039_v54 = vld [vmem:[%s14814_s1 + $0x1984] ss:$16 sps:$4 sm:$0xff]  }
 0x30c   : > { %7558 = vmatpush1.bf16.msra.mxu1 %v10974_v6  ;;  %7518 = vmatprep.subr.bf16.mxu0 %v10979_v57  ;;  %v11042_v6 = vld [vmem:[%s14814_s1 + $0x1b84] ss:$16 sps:$4 sm:$0xff]   ;;  %v11037_v57 = vld [vmem:[%s14814_s1 + $0x1980] ss:$16 sps:$4 sm:$0xff]  }
 0x30d   : > { %7559 = vmatprep.subr.bf16.mxu1 %v10982_v40  ;;  %v11040_v40 = vld [vmem:[%s14814_s1 + $0x1b80] ss:$16 sps:$4 sm:$0xff]  }
 0x30f   : > { %7519 = vmatpush1.bf16.msra.mxu0 %v10977_v41  ;;  %v11045_v41 = vld [vmem:[%s14814_s1 + $0x19a4] ss:$16 sps:$4 sm:$0xff]  }
 0x310   : > { %7560 = vmatpush1.bf16.msra.mxu1 %v10980_v27  ;;  %7520 = vmatprep.subr.bf16.mxu0 %v10985_v9  ;;  %v11048_v27 = vld [vmem:[%s14814_s1 + $0x1ba4] ss:$16 sps:$4 sm:$0xff]   ;;  %v11043_v9 = vld [vmem:[%s14814_s1 + $0x19a0] ss:$16 sps:$4 sm:$0xff]  }
 0x311   : > { %7561 = vmatprep.subr.bf16.mxu1 %v10988_v0  ;;  %v11046_v0 = vld [vmem:[%s14814_s1 + $0x1ba0] ss:$16 sps:$4 sm:$0xff]  }
 0x313   : > { %7521 = vmatpush1.bf16.msra.mxu0 %v10983_v14  ;;  %v11051_v14 = vld [vmem:[%s14814_s1 + $0x19c4] ss:$16 sps:$4 sm:$0xff]  }
 0x314   : > { %7562 = vmatpush1.bf16.msra.mxu1 %v10986_v15  ;;  %7522 = vmatprep.subr.bf16.mxu0 %v10991_v52  ;;  %v11054_v15 = vld [vmem:[%s14814_s1 + $0x1bc4] ss:$16 sps:$4 sm:$0xff]   ;;  %v6163_v52 = vshrl.u32 %v13269_v31, 16 }
 0x315   : > { %7563 = vmatprep.subr.bf16.mxu1 %v10994_v17  ;;  %v6166_v17 = vshll.u32 %v13269_v31, 16  ;;  %v11057_v31 = vld [vmem:[%s14814_s1 + $0x19e4] ss:$16 sps:$4 sm:$0xff]  }
 0x317   : > { %7523 = vmatpush1.bf16.msra.mxu0 %v10989_v22  ;;  %v6179_v22 = vshrl.u32 %v13273_v5, 16 }
 0x318   : > { %7564 = vmatpush1.bf16.msra.mxu1 %v10992_v19  ;;  %7524 = vmatprep.subr.bf16.mxu0 %v10997_v20  ;;  %v6182_v19 = vshll.u32 %v13273_v5, 16  ;;  %v11049_v20 = vld [vmem:[%s14814_s1 + $0x19c0] ss:$16 sps:$4 sm:$0xff]   ;;  %v11060_v5 = vld [vmem:[%s14814_s1 + $0x1be4] ss:$16 sps:$4 sm:$0xff]  }
 0x319   : > { %7565 = vmatprep.subr.bf16.mxu1 %v11000_v23  ;;  %v5607_v24 = vpop.f32.mrb[32].mxu0  ;;  %v11052_v23 = vld [vmem:[%s14814_s1 + $0x1bc0] ss:$16 sps:$4 sm:$0xff]  }
 0x31a   : > { %v5648_v25 = vpop.f32.mrb[32].mxu1  ;;  %v5609_v12 = vpop.f32.mrb[33].mxu0 }
 0x31b   : > { %v14013_v2 = vadd.f32 %v5648_v25, %v5607_v24  ;;  %v5650_v13 = vpop.f32.mrb[33].mxu1  ;;  %v5611_v4 = vpop.f32.mrb[34].mxu0  ;;  %7525 = vmatpush1.bf16.msra.mxu0 %v10995_v11  ;;  %v6203_v11 = vshrl.u32 %v13295_v1, 16  ;;  %v6165_v24 = vrot.slane %v6163_v52, 1  ;;  %v6168_v25 = vrot.slane %v6166_v17, 2 }
 0x31c   : > { %v14015_v60 = vadd.f32 %v5650_v13, %v5609_v12  ;;  %v5652_v16 = vpop.f32.mrb[34].mxu1  ;;  %7566 = vmatpush1.bf16.msra.mxu1 %v10998_v49  ;;  %v5612_v56 = vpop.f32.mrb[35].mxu0  ;;  %7526 = vmatprep.subr.bf16.mxu0 %v11003_v53  ;;  %v6206_v49 = vshll.u32 %v13295_v1, 16  ;;  %v6219_v53 = vshrl.u32 %v13299_v10, 16  ;;  %v6181_v12 = vrot.slane %v6179_v22, 1 }
 0x31d   : > { %v5653_v55 = vpop.f32.mrb[35].mxu1  ;;  %7567 = vmatprep.subr.bf16.mxu1 %v11006_v21  ;;  %v6222_v21 = vshll.u32 %v13299_v10, 16  ;;  %v6184_v13 = vrot.slane %v6182_v19, 2  ;;  %v11055_v4 = vld [vmem:[%s14814_s1 + $0x19e0] ss:$16 sps:$4 sm:$0xff]  }
 0x31e   : > { %v11058_v16 = vld [vmem:[%s14814_s1 + $0x1be0] ss:$16 sps:$4 sm:$0xff]   ;;  %v11063_v1 = vld [vmem:[%s14814_s1 + $0x1c04] ss:$16 sps:$4 sm:$0xff]   ;;  %v6221_v56 = vrot.slane %v6219_v53, 1 }
 0x31f   : > { %7527 = vmatpush1.bf16.msra.mxu0 %v11001_v48  ;;  %v11066_v10 = vld [vmem:[%s14814_s1 + $0x1e04] ss:$16 sps:$4 sm:$0xff]   ;;  %v6205_v48 = vrot.slane %v6203_v11, 1  ;;  %v6224_v55 = vrot.slane %v6222_v21, 2 }
 0x320   : > { %7568 = vmatpush1.bf16.msra.mxu1 %v11004_v3  ;;  %7528 = vmatprep.subr.bf16.mxu0 %v11009_v29  ;;  %v6208_v3 = vrot.slane %v6206_v49, 2  ;;  %v14145_v29 = vor.u32 %v6168_v25, %v6165_v24 }
 0x321   : > { %7569 = vmatprep.subr.bf16.mxu1 %v11012_v30  ;;  %v14147_v30 = vor.u32 %v6184_v13, %v6181_v12  ;;  %v11103_v12 = vld [vmem:[%s14814_s1 + $0x1ce0] ss:$16 sps:$4 sm:$0xff]  }
 0x322   : > { %v11106_v13 = vld [vmem:[%s14814_s1 + $0x1ee0] ss:$16 sps:$4 sm:$0xff]  }
 0x323   : > { %7529 = vmatpush1.bf16.msra.mxu0 %v11007_v36  ;;  %v11061_v36 = vld [vmem:[%s14814_s1 + $0x1c00] ss:$16 sps:$4 sm:$0xff]  }
 0x324   : > { %7570 = vmatpush1.bf16.msra.mxu1 %v11010_v37  ;;  %7530 = vmatprep.subr.bf16.mxu0 %v11015_v63  ;;  %v11064_v37 = vld [vmem:[%s14814_s1 + $0x1e00] ss:$16 sps:$4 sm:$0xff]   ;;  %v11069_v63 = vld [vmem:[%s14814_s1 + $0x1c24] ss:$16 sps:$4 sm:$0xff]  }
 0x325   : > { %7571 = vmatprep.subr.bf16.mxu1 %v11018_v28  ;;  %v11072_v28 = vld [vmem:[%s14814_s1 + $0x1e24] ss:$16 sps:$4 sm:$0xff]  }
 0x327   : > { %7531 = vmatpush1.bf16.msra.mxu0 %v11013_v44  ;;  %v14161_v44 = vor.u32 %v6208_v3, %v6205_v48  ;;  %v11115_v48 = vld [vmem:[%s14814_s1 + $0x1d20] ss:$16 sps:$4 sm:$0xff]  }
 0x328   : > { %7572 = vmatpush1.bf16.msra.mxu1 %v11016_v45  ;;  %7532 = vmatprep.subr.bf16.mxu0 %v11021_v46  ;;  %v14163_v45 = vor.u32 %v6224_v55, %v6221_v56  ;;  %v11067_v46 = vld [vmem:[%s14814_s1 + $0x1c20] ss:$16 sps:$4 sm:$0xff]   ;;  %v11123_v56 = vld [vmem:[%s14814_s1 + $0x1d44] ss:$16 sps:$4 sm:$0xff]  }
 0x329   : > { %7573 = vmatprep.subr.bf16.mxu1 %v11024_v34  ;;  %v11070_v34 = vld [vmem:[%s14814_s1 + $0x1e20] ss:$16 sps:$4 sm:$0xff]   ;;  %v11126_v55 = vld [vmem:[%s14814_s1 + $0x1f44] ss:$16 sps:$4 sm:$0xff]  }
 0x32a   : > { %v11118_v3 = vld [vmem:[%s14814_s1 + $0x1f20] ss:$16 sps:$4 sm:$0xff]  }
 0x32b   : > { %7533 = vmatpush1.bf16.msra.mxu0 %v11019_v38  ;;  %v11075_v38 = vld [vmem:[%s14814_s1 + $0x1c44] ss:$16 sps:$4 sm:$0xff]  }
 0x32c   : > { %7574 = vmatpush1.bf16.msra.mxu1 %v11022_v39  ;;  %7534 = vmatprep.subr.bf16.mxu0 %v11027_v47  ;;  %v11078_v39 = vld [vmem:[%s14814_s1 + $0x1e44] ss:$16 sps:$4 sm:$0xff]   ;;  %v11073_v47 = vld [vmem:[%s14814_s1 + $0x1c40] ss:$16 sps:$4 sm:$0xff]  }
 0x32d   : > { %7575 = vmatprep.subr.bf16.mxu1 %v11030_v18  ;;  %v11076_v18 = vld [vmem:[%s14814_s1 + $0x1e40] ss:$16 sps:$4 sm:$0xff]  }
 0x32f   : > { %7535 = vmatpush1.bf16.msra.mxu0 %v11025_v8  ;;  %v11081_v8 = vld [vmem:[%s14814_s1 + $0x1c64] ss:$16 sps:$4 sm:$0xff]  }
 0x330   : > { %7576 = vmatpush1.bf16.msra.mxu1 %v11028_v50  ;;  %7536 = vmatprep.subr.bf16.mxu0 %v11033_v58  ;;  %v11084_v50 = vld [vmem:[%s14814_s1 + $0x1e64] ss:$16 sps:$4 sm:$0xff]   ;;  %v11079_v58 = vld [vmem:[%s14814_s1 + $0x1c60] ss:$16 sps:$4 sm:$0xff]  }
 0x331   : > { %7577 = vmatprep.subr.bf16.mxu1 %v11036_v59  ;;  %v11082_v59 = vld [vmem:[%s14814_s1 + $0x1e60] ss:$16 sps:$4 sm:$0xff]  }
 0x333   : > { %7537 = vmatpush1.bf16.msra.mxu0 %v11031_v61  ;;  %v11087_v61 = vld [vmem:[%s14814_s1 + $0x1c84] ss:$16 sps:$4 sm:$0xff]  }
 0x334   : > { %7578 = vmatpush1.bf16.msra.mxu1 %v11034_v42  ;;  %7538 = vmatprep.subr.bf16.mxu0 %v11039_v54  ;;  %v11090_v42 = vld [vmem:[%s14814_s1 + $0x1e84] ss:$16 sps:$4 sm:$0xff]   ;;  %v11085_v54 = vld [vmem:[%s14814_s1 + $0x1c80] ss:$16 sps:$4 sm:$0xff]  }
 0x335   : > { %7579 = vmatprep.subr.bf16.mxu1 %v11042_v6  ;;  %v11088_v6 = vld [vmem:[%s14814_s1 + $0x1e80] ss:$16 sps:$4 sm:$0xff]  }
 0x337   : > { %7539 = vmatpush1.bf16.msra.mxu0 %v11037_v57  ;;  %v11093_v57 = vld [vmem:[%s14814_s1 + $0x1ca4] ss:$16 sps:$4 sm:$0xff]  }
 0x338   : > { %7580 = vmatpush1.bf16.msra.mxu1 %v11040_v40  ;;  %7540 = vmatprep.subr.bf16.mxu0 %v11045_v41  ;;  %v11096_v40 = vld [vmem:[%s14814_s1 + $0x1ea4] ss:$16 sps:$4 sm:$0xff]   ;;  %v11091_v41 = vld [vmem:[%s14814_s1 + $0x1ca0] ss:$16 sps:$4 sm:$0xff]  }
 0x339   : > { %7581 = vmatprep.subr.bf16.mxu1 %v11048_v27  ;;  %v11094_v27 = vld [vmem:[%s14814_s1 + $0x1ea0] ss:$16 sps:$4 sm:$0xff]  }
 0x33b   : > { %7541 = vmatpush1.bf16.msra.mxu0 %v11043_v9  ;;  %v11099_v9 = vld [vmem:[%s14814_s1 + $0x1cc4] ss:$16 sps:$4 sm:$0xff]  }
 0x33c   : > { %7582 = vmatpush1.bf16.msra.mxu1 %v11046_v0  ;;  %7542 = vmatprep.subr.bf16.mxu0 %v11051_v14  ;;  %v11102_v0 = vld [vmem:[%s14814_s1 + $0x1ec4] ss:$16 sps:$4 sm:$0xff]  }
 0x33d   : > { %7583 = vmatprep.subr.bf16.mxu1 %v11054_v15 }
 0x33f   : > { %7543 = vmatpush1.bf16.msra.mxu0 %v11049_v20 }
 0x340   : > { %7584 = vmatpush1.bf16.msra.mxu1 %v11052_v23  ;;  %7544 = vmatprep.subr.bf16.mxu0 %v11057_v31  ;;  %v11097_v31 = vld [vmem:[%s14814_s1 + $0x1cc0] ss:$16 sps:$4 sm:$0xff]  }
 0x341   : > { %7585 = vmatprep.subr.bf16.mxu1 %v11060_v5  ;;  %v11100_v5 = vld [vmem:[%s14814_s1 + $0x1ec0] ss:$16 sps:$4 sm:$0xff]  }
 0x343   : > { %7545 = vmatpush1.bf16.msra.mxu0 %v11055_v4  ;;  %v11109_v4 = vld [vmem:[%s14814_s1 + $0x1d00] ss:$16 sps:$4 sm:$0xff]  }
 0x344   : > { %7586 = vmatpush1.bf16.msra.mxu1 %v11058_v16  ;;  %7596 = vmatprep.subr.bf16.mxu0 %v11063_v1  ;;  %v11112_v16 = vld [vmem:[%s14814_s1 + $0x1f00] ss:$16 sps:$4 sm:$0xff]   ;;  %v11117_v1 = vld [vmem:[%s14814_s1 + $0x1d24] ss:$16 sps:$4 sm:$0xff]  }
 0x345   : > { %7637 = vmatprep.subr.bf16.mxu1 %v11066_v10  ;;  %v11120_v10 = vld [vmem:[%s14814_s1 + $0x1f24] ss:$16 sps:$4 sm:$0xff]  }
 0x346   : > { %7547 = vmatmul.mubr.bf16.vlgmr.msra.gmra.mrb[48].mxu0 %v14145_v29 }
 0x347   : > { %7588 = vmatmul.mubr.bf16.vlgmr.msra.gmra.mrb[48].mxu1 %v14147_v30  ;;  %7597 = vmatpush1.bf16.msra.mxu0 %v11061_v36  ;;  %v11121_v36 = vld [vmem:[%s14814_s1 + $0x1d40] ss:$16 sps:$4 sm:$0xff]  }
 0x348   : > { %7638 = vmatpush1.bf16.msra.mxu1 %v11064_v37  ;;  %7598 = vmatprep.subr.bf16.mxu0 %v11069_v63  ;;  %v11124_v37 = vld [vmem:[%s14814_s1 + $0x1f40] ss:$16 sps:$4 sm:$0xff]   ;;  %v11129_v63 = vld [vmem:[%s14814_s1 + $0x1d64] ss:$16 sps:$4 sm:$0xff]  }
 0x349   : > { %7639 = vmatprep.subr.bf16.mxu1 %v11072_v28  ;;  %7628 = vmatprep.mubr.bf16.mxu0 %v14161_v44  ;;  %v11132_v28 = vld [vmem:[%s14814_s1 + $0x1f64] ss:$16 sps:$4 sm:$0xff]  }
 0x34a   : > { %7669 = vmatprep.mubr.bf16.mxu1 %v14163_v45 }
 0x34b   : > { %7599 = vmatpush1.bf16.msra.mxu0 %v11067_v46  ;;  %v11127_v46 = vld [vmem:[%s14814_s1 + $0x1d60] ss:$16 sps:$4 sm:$0xff]  }
 0x34c   : > { %7640 = vmatpush1.bf16.msra.mxu1 %v11070_v34  ;;  %7600 = vmatprep.subr.bf16.mxu0 %v11075_v38  ;;  %v11130_v34 = vld [vmem:[%s14814_s1 + $0x1f60] ss:$16 sps:$4 sm:$0xff]   ;;  %v11135_v38 = vld [vmem:[%s14814_s1 + $0x1d84] ss:$16 sps:$4 sm:$0xff]  }
 0x34d   : > { %7641 = vmatprep.subr.bf16.mxu1 %v11078_v39  ;;  %v11138_v39 = vld [vmem:[%s14814_s1 + $0x1f84] ss:$16 sps:$4 sm:$0xff]  }
 0x34f   : > { %7601 = vmatpush1.bf16.msra.mxu0 %v11073_v47  ;;  %v11133_v47 = vld [vmem:[%s14814_s1 + $0x1d80] ss:$16 sps:$4 sm:$0xff]  }
 0x350   : > { %7642 = vmatpush1.bf16.msra.mxu1 %v11076_v18  ;;  %7602 = vmatprep.subr.bf16.mxu0 %v11081_v8  ;;  %v11136_v18 = vld [vmem:[%s14814_s1 + $0x1f80] ss:$16 sps:$4 sm:$0xff]   ;;  %v11141_v8 = vld [vmem:[%s14814_s1 + $0x1da4] ss:$16 sps:$4 sm:$0xff]  }
 0x351   : > { %7643 = vmatprep.subr.bf16.mxu1 %v11084_v50  ;;  %v11144_v50 = vld [vmem:[%s14814_s1 + $0x1fa4] ss:$16 sps:$4 sm:$0xff]  }
 0x353   : > { %7603 = vmatpush1.bf16.msra.mxu0 %v11079_v58  ;;  %v11139_v58 = vld [vmem:[%s14814_s1 + $0x1da0] ss:$16 sps:$4 sm:$0xff]  }
 0x354   : > { %7644 = vmatpush1.bf16.msra.mxu1 %v11082_v59  ;;  %7604 = vmatprep.subr.bf16.mxu0 %v11087_v61  ;;  %v11142_v59 = vld [vmem:[%s14814_s1 + $0x1fa0] ss:$16 sps:$4 sm:$0xff]   ;;  %v11147_v61 = vld [vmem:[%s14814_s1 + $0x1dc4] ss:$16 sps:$4 sm:$0xff]  }
 0x355   : > { %7645 = vmatprep.subr.bf16.mxu1 %v11090_v42  ;;  %v11150_v42 = vld [vmem:[%s14814_s1 + $0x1fc4] ss:$16 sps:$4 sm:$0xff]  }
 0x357   : > { %7605 = vmatpush1.bf16.msra.mxu0 %v11085_v54  ;;  %v6195_v54 = vshrl.u32 %v13495_v32, 16 }
 0x358   : > { %7646 = vmatpush1.bf16.msra.mxu1 %v11088_v6  ;;  %7606 = vmatprep.subr.bf16.mxu0 %v11093_v57  ;;  %v6198_v6 = vshll.u32 %v13495_v32, 16  ;;  %v6211_v57 = vshrl.u32 %v13499_v33, 16  ;;  %v11153_v32 = vld [vmem:[%s14814_s1 + $0x1de4] ss:$16 sps:$4 sm:$0xff]  }
 0x359   : > { %7647 = vmatprep.subr.bf16.mxu1 %v11096_v40  ;;  %v5689_v14 = vpop.f32.mrb[36].mxu0  ;;  %v6214_v40 = vshll.u32 %v13499_v33, 16  ;;  %v11156_v33 = vld [vmem:[%s14814_s1 + $0x1fe4] ss:$16 sps:$4 sm:$0xff]  }
 0x35a   : > { %v5730_v15 = vpop.f32.mrb[36].mxu1  ;;  %v5690_v52 = vadd.f32 %v5689_v14, %v14013_v2  ;;  %v5691_v17 = vpop.f32.mrb[37].mxu0  ;;  %v11105_v2 = vld [vmem:[%s14814_s1 + $0x1ce4] ss:$16 sps:$4 sm:$0xff]   ;;  %v6213_v14 = vrot.slane %v6211_v57, 1 }
 0x35b   : > { %v5732_v22 = vpop.f32.mrb[37].mxu1  ;;  %v5692_v19 = vadd.f32 %v5691_v17, %v14015_v60  ;;  %v5693_v20 = vpop.f32.mrb[38].mxu0  ;;  %7607 = vmatpush1.bf16.msra.mxu0 %v11091_v41  ;;  %v11108_v60 = vld [vmem:[%s14814_s1 + $0x1ee4] ss:$16 sps:$4 sm:$0xff]   ;;  %v11145_v41 = vld [vmem:[%s14814_s1 + $0x1dc0] ss:$16 sps:$4 sm:$0xff]  }
 0x35c   : > { %v5734_v23 = vpop.f32.mrb[38].mxu1  ;;  %7648 = vmatpush1.bf16.msra.mxu1 %v11094_v27  ;;  %v5731_v11 = vadd.f32 %v5730_v15, %v5690_v52  ;;  %v5694_v49 = vpop.f32.mrb[39].mxu0  ;;  %7608 = vmatprep.subr.bf16.mxu0 %v11099_v9  ;;  %v11148_v27 = vld [vmem:[%s14814_s1 + $0x1fc0] ss:$16 sps:$4 sm:$0xff]   ;;  %v6197_v9 = vrot.slane %v6195_v54, 1  ;;  %v6216_v15 = vrot.slane %v6214_v40, 2 }
 0x35d   : > { %v5735_v53 = vpop.f32.mrb[39].mxu1  ;;  %7649 = vmatprep.subr.bf16.mxu1 %v11102_v0  ;;  %v5733_v21 = vadd.f32 %v5732_v22, %v5692_v19  ;;  %v6200_v0 = vrot.slane %v6198_v6, 2  ;;  %v11151_v52 = vld [vmem:[%s14814_s1 + $0x1de0] ss:$16 sps:$4 sm:$0xff]   ;;  %v11159_v22 = vld [vmem:[%s14814_s1 + $0x180c] ss:$16 sps:$4 sm:$0xff]  }
 0x35e   : > { %v14244_v24 = vadd.f32 %v5731_v11, %v13387_v35  ;;  %v11111_v35 = vld [vmem:[%s14814_s1 + $0x1d04] ss:$16 sps:$4 sm:$0xff]   ;;  %v11154_v17 = vld [vmem:[%s14814_s1 + $0x1fe0] ss:$16 sps:$4 sm:$0xff]   ;;  %v11162_v19 = vld [vmem:[%s14814_s1 + $0x1a0c] ss:$16 sps:$4 sm:$0xff]   ;;  %v14363_v23 = vor.u32 %v6216_v15, %v6213_v14 }
 0x35f   : > { %v14247_v25 = vadd.f32 %v5733_v21, %v13395_v51  ;;  %7609 = vmatpush1.bf16.msra.mxu0 %v11097_v31  ;;  %v11114_v51 = vld [vmem:[%s14814_s1 + $0x1f04] ss:$16 sps:$4 sm:$0xff]   ;;  %v14361_v20 = vor.u32 %v6200_v0, %v6197_v9  ;;  %v11157_v31 = vld [vmem:[%s14814_s1 + $0x1808] ss:$16 sps:$4 sm:$0xff]   ;;  %v11165_v11 = vld [vmem:[%s14814_s1 + $0x182c] ss:$16 sps:$4 sm:$0xff]  }
 0x360   : > { %7650 = vmatpush1.bf16.msra.mxu1 %v11100_v5  ;;  %7610 = vmatprep.subr.bf16.mxu0 %v11105_v2  ;;  %v11160_v5 = vld [vmem:[%s14814_s1 + $0x1a08] ss:$16 sps:$4 sm:$0xff]   ;;  %v11168_v49 = vld [vmem:[%s14814_s1 + $0x1a2c] ss:$16 sps:$4 sm:$0xff]  }
 0x361   : > { %7651 = vmatprep.subr.bf16.mxu1 %v11108_v60  ;;  %v11163_v53 = vld [vmem:[%s14814_s1 + $0x1828] ss:$16 sps:$4 sm:$0xff]   ;;  %v11171_v60 = vld [vmem:[%s14814_s1 + $0x184c] ss:$16 sps:$4 sm:$0xff]  }
 0x362   : > { %v11166_v2 = vld [vmem:[%s14814_s1 + $0x1a28] ss:$16 sps:$4 sm:$0xff]   ;;  %v11174_v21 = vld [vmem:[%s14814_s1 + $0x1a4c] ss:$16 sps:$4 sm:$0xff]  }
 0x363   : > { %7611 = vmatpush1.bf16.msra.mxu0 %v11103_v12  ;;  %v11169_v12 = vld [vmem:[%s14814_s1 + $0x1848] ss:$16 sps:$4 sm:$0xff]   ;;  %v11207_v57 = vld [vmem:[%s14814_s1 + $0x190c] ss:$16 sps:$4 sm:$0xff]  }
 0x364   : > { %7652 = vmatpush1.bf16.msra.mxu1 %v11106_v13  ;;  %7612 = vmatprep.subr.bf16.mxu0 %v11111_v35  ;;  %v11172_v13 = vld [vmem:[%s14814_s1 + $0x1a48] ss:$16 sps:$4 sm:$0xff]   ;;  %v11177_v35 = vld [vmem:[%s14814_s1 + $0x186c] ss:$16 sps:$4 sm:$0xff]  }
 0x365   : > { %7653 = vmatprep.subr.bf16.mxu1 %v11114_v51  ;;  %v11178_v51 = vld [vmem:[%s14814_s1 + $0x1a68] ss:$16 sps:$4 sm:$0xff]   ;;  %v11210_v40 = vld [vmem:[%s14814_s1 + $0x1b0c] ss:$16 sps:$4 sm:$0xff]  }
 0x366   : > { %v11199_v54 = vld [vmem:[%s14814_s1 + $0x18e8] ss:$16 sps:$4 sm:$0xff]   ;;  %v11219_v14 = vld [vmem:[%s14814_s1 + $0x194c] ss:$16 sps:$4 sm:$0xff]  }
 0x367   : > { %7613 = vmatpush1.bf16.msra.mxu0 %v11109_v4  ;;  %v11183_v4 = vld [vmem:[%s14814_s1 + $0x188c] ss:$16 sps:$4 sm:$0xff]   ;;  %v11202_v6 = vld [vmem:[%s14814_s1 + $0x1ae8] ss:$16 sps:$4 sm:$0xff]  }
 0x368   : > { %7654 = vmatpush1.bf16.msra.mxu1 %v11112_v16  ;;  %7614 = vmatprep.subr.bf16.mxu0 %v11117_v1  ;;  %v11186_v16 = vld [vmem:[%s14814_s1 + $0x1a8c] ss:$16 sps:$4 sm:$0xff]   ;;  %v11181_v1 = vld [vmem:[%s14814_s1 + $0x1888] ss:$16 sps:$4 sm:$0xff]  }
 0x369   : > { %7655 = vmatprep.subr.bf16.mxu1 %v11120_v10  ;;  %v11184_v10 = vld [vmem:[%s14814_s1 + $0x1a88] ss:$16 sps:$4 sm:$0xff]   ;;  %v11222_v15 = vld [vmem:[%s14814_s1 + $0x1b4c] ss:$16 sps:$4 sm:$0xff]  }
 0x36a   : > { %v11211_v9 = vld [vmem:[%s14814_s1 + $0x1928] ss:$16 sps:$4 sm:$0xff]  }
 0x36b   : > { %7615 = vmatpush1.bf16.msra.mxu0 %v11115_v48  ;;  %v11189_v48 = vld [vmem:[%s14814_s1 + $0x18ac] ss:$16 sps:$4 sm:$0xff]   ;;  %v11214_v0 = vld [vmem:[%s14814_s1 + $0x1b28] ss:$16 sps:$4 sm:$0xff]  }
 0x36c   : > { %7656 = vmatpush1.bf16.msra.mxu1 %v11118_v3  ;;  %7616 = vmatprep.subr.bf16.mxu0 %v11123_v56  ;;  %v11192_v3 = vld [vmem:[%s14814_s1 + $0x1aac] ss:$16 sps:$4 sm:$0xff]   ;;  %v11187_v56 = vld [vmem:[%s14814_s1 + $0x18a8] ss:$16 sps:$4 sm:$0xff]  }
 0x36d   : > { %7657 = vmatprep.subr.bf16.mxu1 %v11126_v55  ;;  %v11190_v55 = vld [vmem:[%s14814_s1 + $0x1aa8] ss:$16 sps:$4 sm:$0xff]  }
 0x36f   : > { %7617 = vmatpush1.bf16.msra.mxu0 %v11121_v36  ;;  %v11195_v36 = vld [vmem:[%s14814_s1 + $0x18cc] ss:$16 sps:$4 sm:$0xff]  }
 0x370   : > { %7658 = vmatpush1.bf16.msra.mxu1 %v11124_v37  ;;  %7618 = vmatprep.subr.bf16.mxu0 %v11129_v63  ;;  %v11198_v37 = vld [vmem:[%s14814_s1 + $0x1acc] ss:$16 sps:$4 sm:$0xff]  }
 0x371   : > { %7659 = vmatprep.subr.bf16.mxu1 %v11132_v28 }
 0x373   : > { %7619 = vmatpush1.bf16.msra.mxu0 %v11127_v46 }
 0x374   : > { %7660 = vmatpush1.bf16.msra.mxu1 %v11130_v34  ;;  %7620 = vmatprep.subr.bf16.mxu0 %v11135_v38 }
 0x375   : > { %7661 = vmatprep.subr.bf16.mxu1 %v11138_v39 }
 0x377   : > { %7621 = vmatpush1.bf16.msra.mxu0 %v11133_v47 }
 0x378   : > { %7662 = vmatpush1.bf16.msra.mxu1 %v11136_v18  ;;  %7622 = vmatprep.subr.bf16.mxu0 %v11141_v8  ;;  %v11193_v8 = vld [vmem:[%s14814_s1 + $0x18c8] ss:$16 sps:$4 sm:$0xff]  }
 0x379   : > { %7663 = vmatprep.subr.bf16.mxu1 %v11144_v50  ;;  %v11196_v50 = vld [vmem:[%s14814_s1 + $0x1ac8] ss:$16 sps:$4 sm:$0xff]  }
 0x37b   : > { %7623 = vmatpush1.bf16.msra.mxu0 %v11139_v58 }
 0x37c   : > { %7664 = vmatpush1.bf16.msra.mxu1 %v11142_v59  ;;  %7624 = vmatprep.subr.bf16.mxu0 %v11147_v61  ;;  %v11201_v61 = vld [vmem:[%s14814_s1 + $0x18ec] ss:$16 sps:$4 sm:$0xff]  }
 0x37d   : > { %7665 = vmatprep.subr.bf16.mxu1 %v11150_v42  ;;  %v11204_v42 = vld [vmem:[%s14814_s1 + $0x1aec] ss:$16 sps:$4 sm:$0xff]  }
 0x37f   : > { %7625 = vmatpush1.bf16.msra.mxu0 %v11145_v41  ;;  %v11205_v41 = vld [vmem:[%s14814_s1 + $0x1908] ss:$16 sps:$4 sm:$0xff]  }
 0x380   : > { %7666 = vmatpush1.bf16.msra.mxu1 %v11148_v27  ;;  %7626 = vmatprep.subr.bf16.mxu0 %v11153_v32  ;;  %v11208_v27 = vld [vmem:[%s14814_s1 + $0x1b08] ss:$16 sps:$4 sm:$0xff]   ;;  %v11213_v32 = vld [vmem:[%s14814_s1 + $0x192c] ss:$16 sps:$4 sm:$0xff]  }
 0x381   : > { %7667 = vmatprep.subr.bf16.mxu1 %v11156_v33  ;;  %v11216_v33 = vld [vmem:[%s14814_s1 + $0x1b2c] ss:$16 sps:$4 sm:$0xff]  }
 0x383   : > { %7627 = vmatpush1.bf16.msra.mxu0 %v11151_v52  ;;  %v11217_v52 = vld [vmem:[%s14814_s1 + $0x1948] ss:$16 sps:$4 sm:$0xff]  }
 0x384   : > { %7668 = vmatpush1.bf16.msra.mxu1 %v11154_v17  ;;  %7678 = vmatprep.subr.bf16.mxu0 %v11159_v22  ;;  %v11220_v17 = vld [vmem:[%s14814_s1 + $0x1b48] ss:$16 sps:$4 sm:$0xff]   ;;  %v11225_v22 = vld [vmem:[%s14814_s1 + $0x196c] ss:$16 sps:$4 sm:$0xff]  }
 0x385   : > { %7719 = vmatprep.subr.bf16.mxu1 %v11162_v19  ;;  %v11228_v19 = vld [vmem:[%s14814_s1 + $0x1b6c] ss:$16 sps:$4 sm:$0xff]  }
 0x386   : > { %7629 = vmatmul.mubr.bf16.vlgmr.msra.gmra.mrb[52].mxu0 %v14361_v20 }
 0x387   : > { %7670 = vmatmul.mubr.bf16.vlgmr.msra.gmra.mrb[52].mxu1 %v14363_v23  ;;  %7679 = vmatpush1.bf16.msra.mxu0 %v11157_v31  ;;  %v11223_v31 = vld [vmem:[%s14814_s1 + $0x1968] ss:$16 sps:$4 sm:$0xff]  }
 0x388   : > { %7720 = vmatpush1.bf16.msra.mxu1 %v11160_v5  ;;  %7680 = vmatprep.subr.bf16.mxu0 %v11165_v11  ;;  %v11226_v5 = vld [vmem:[%s14814_s1 + $0x1b68] ss:$16 sps:$4 sm:$0xff]   ;;  %v11231_v11 = vld [vmem:[%s14814_s1 + $0x198c] ss:$16 sps:$4 sm:$0xff]  }
 0x389   : > { %7721 = vmatprep.subr.bf16.mxu1 %v11168_v49  ;;  %7710 = vmatprep.mubr.bf16.mxu0 %v13943_v62  ;;  %v11180_v62 = vld [vmem:[%s14814_s1 + $0x1a6c] ss:$16 sps:$4 sm:$0xff]  }
 0x38a   : > { %7751 = vmatprep.mubr.bf16.mxu1 %v13945_v26  ;;  %v11175_v26 = vld [vmem:[%s14814_s1 + $0x1868] ss:$16 sps:$4 sm:$0xff]   ;;  %v11234_v49 = vld [vmem:[%s14814_s1 + $0x1b8c] ss:$16 sps:$4 sm:$0xff]  }
 0x38b   : > { %7681 = vmatpush1.bf16.msra.mxu0 %v11163_v53  ;;  %v11229_v53 = vld [vmem:[%s14814_s1 + $0x1988] ss:$16 sps:$4 sm:$0xff]  }
 0x38c   : > { %7722 = vmatpush1.bf16.msra.mxu1 %v11166_v2  ;;  %7682 = vmatprep.subr.bf16.mxu0 %v11171_v60  ;;  %v11232_v2 = vld [vmem:[%s14814_s1 + $0x1b88] ss:$16 sps:$4 sm:$0xff]   ;;  %v11237_v60 = vld [vmem:[%s14814_s1 + $0x19ac] ss:$16 sps:$4 sm:$0xff]  }
 0x38d   : > { %7723 = vmatprep.subr.bf16.mxu1 %v11174_v21  ;;  %v11240_v21 = vld [vmem:[%s14814_s1 + $0x1bac] ss:$16 sps:$4 sm:$0xff]  }
 0x38f   : > { %7683 = vmatpush1.bf16.msra.mxu0 %v11169_v12  ;;  %v11235_v12 = vld [vmem:[%s14814_s1 + $0x19a8] ss:$16 sps:$4 sm:$0xff]  }
 0x390   : > { %7724 = vmatpush1.bf16.msra.mxu1 %v11172_v13  ;;  %7684 = vmatprep.subr.bf16.mxu0 %v11177_v35  ;;  %v11238_v13 = vld [vmem:[%s14814_s1 + $0x1ba8] ss:$16 sps:$4 sm:$0xff]   ;;  %v11243_v35 = vld [vmem:[%s14814_s1 + $0x19cc] ss:$16 sps:$4 sm:$0xff]  }
 0x391   : > { %7725 = vmatprep.subr.bf16.mxu1 %v11180_v62  ;;  %v11246_v62 = vld [vmem:[%s14814_s1 + $0x1bcc] ss:$16 sps:$4 sm:$0xff]  }
 0x393   : > { %7685 = vmatpush1.bf16.msra.mxu0 %v11175_v26  ;;  %v11241_v26 = vld [vmem:[%s14814_s1 + $0x19c8] ss:$16 sps:$4 sm:$0xff]  }
 0x394   : > { %7726 = vmatpush1.bf16.msra.mxu1 %v11178_v51  ;;  %7686 = vmatprep.subr.bf16.mxu0 %v11183_v4  ;;  %v11244_v51 = vld [vmem:[%s14814_s1 + $0x1bc8] ss:$16 sps:$4 sm:$0xff]   ;;  %v11249_v4 = vld [vmem:[%s14814_s1 + $0x19ec] ss:$16 sps:$4 sm:$0xff]  }
 0x395   : > { %7727 = vmatprep.subr.bf16.mxu1 %v11186_v16  ;;  %v11252_v16 = vld [vmem:[%s14814_s1 + $0x1bec] ss:$16 sps:$4 sm:$0xff]  }
 0x397   : > { %7687 = vmatpush1.bf16.msra.mxu0 %v11181_v1  ;;  %v11247_v1 = vld [vmem:[%s14814_s1 + $0x19e8] ss:$16 sps:$4 sm:$0xff]  }
 0x398   : > { %7728 = vmatpush1.bf16.msra.mxu1 %v11184_v10  ;;  %7688 = vmatprep.subr.bf16.mxu0 %v11189_v48  ;;  %v11250_v10 = vld [vmem:[%s14814_s1 + $0x1be8] ss:$16 sps:$4 sm:$0xff]   ;;  %v11255_v48 = vld [vmem:[%s14814_s1 + $0x1c0c] ss:$16 sps:$4 sm:$0xff]  }
 0x399   : > { %7729 = vmatprep.subr.bf16.mxu1 %v11192_v3  ;;  %v5771_v63 = vpop.f32.mrb[40].mxu0  ;;  %v11258_v3 = vld [vmem:[%s14814_s1 + $0x1e0c] ss:$16 sps:$4 sm:$0xff]  }
 0x39a   : > { %v5812_v28 = vpop.f32.mrb[40].mxu1  ;;  %v5773_v34 = vpop.f32.mrb[41].mxu0 }
 0x39b   : > { %v14441_v46 = vadd.f32 %v5812_v28, %v5771_v63  ;;  %v5814_v38 = vpop.f32.mrb[41].mxu1  ;;  %v5775_v47 = vpop.f32.mrb[42].mxu0  ;;  %7689 = vmatpush1.bf16.msra.mxu0 %v11187_v56  ;;  %v11253_v56 = vld [vmem:[%s14814_s1 + $0x1c08] ss:$16 sps:$4 sm:$0xff]  }
 0x39c   : > { %v14443_v39 = vadd.f32 %v5814_v38, %v5773_v34  ;;  %v5816_v18 = vpop.f32.mrb[42].mxu1  ;;  %7730 = vmatpush1.bf16.msra.mxu1 %v11190_v55  ;;  %v5776_v58 = vpop.f32.mrb[43].mxu0  ;;  %7690 = vmatprep.subr.bf16.mxu0 %v11195_v36  ;;  %v11256_v55 = vld [vmem:[%s14814_s1 + $0x1e08] ss:$16 sps:$4 sm:$0xff]   ;;  %v11261_v36 = vld [vmem:[%s14814_s1 + $0x1c2c] ss:$16 sps:$4 sm:$0xff]  }
 0x39d   : > { %v5817_v59 = vpop.f32.mrb[43].mxu1  ;;  %7731 = vmatprep.subr.bf16.mxu1 %v11198_v37  ;;  %v11264_v37 = vld [vmem:[%s14814_s1 + $0x1e2c] ss:$16 sps:$4 sm:$0xff]   ;;  %v11259_v63 = vld [vmem:[%s14814_s1 + $0x1c28] ss:$16 sps:$4 sm:$0xff]  }
 0x39e   : > { %v11262_v28 = vld [vmem:[%s14814_s1 + $0x1e28] ss:$16 sps:$4 sm:$0xff]   ;;  %v11267_v34 = vld [vmem:[%s14814_s1 + $0x1c4c] ss:$16 sps:$4 sm:$0xff]  }
 0x39f   : > { %7691 = vmatpush1.bf16.msra.mxu0 %v11193_v8  ;;  %v11268_v38 = vld [vmem:[%s14814_s1 + $0x1e48] ss:$16 sps:$4 sm:$0xff]   ;;  %v11273_v47 = vld [vmem:[%s14814_s1 + $0x1c6c] ss:$16 sps:$4 sm:$0xff]  }
 0x3a0   : > { %7732 = vmatpush1.bf16.msra.mxu1 %v11196_v50  ;;  %7692 = vmatprep.subr.bf16.mxu0 %v11201_v61  ;;  %v11274_v18 = vld [vmem:[%s14814_s1 + $0x1e68] ss:$16 sps:$4 sm:$0xff]   ;;  %v11279_v8 = vld [vmem:[%s14814_s1 + $0x1c8c] ss:$16 sps:$4 sm:$0xff]  }
 0x3a1   : > { %7733 = vmatprep.subr.bf16.mxu1 %v11204_v42  ;;  %v11282_v50 = vld [vmem:[%s14814_s1 + $0x1e8c] ss:$16 sps:$4 sm:$0xff]   ;;  %v11277_v58 = vld [vmem:[%s14814_s1 + $0x1c88] ss:$16 sps:$4 sm:$0xff]  }
 0x3a2   : > { %v11280_v59 = vld [vmem:[%s14814_s1 + $0x1e88] ss:$16 sps:$4 sm:$0xff]   ;;  %v11285_v61 = vld [vmem:[%s14814_s1 + $0x1cac] ss:$16 sps:$4 sm:$0xff]  }
 0x3a3   : > { %7693 = vmatpush1.bf16.msra.mxu0 %v11199_v54  ;;  %v11288_v42 = vld [vmem:[%s14814_s1 + $0x1eac] ss:$16 sps:$4 sm:$0xff]   ;;  %v11283_v54 = vld [vmem:[%s14814_s1 + $0x1ca8] ss:$16 sps:$4 sm:$0xff]  }
 0x3a4   : > { %7734 = vmatpush1.bf16.msra.mxu1 %v11202_v6  ;;  %7694 = vmatprep.subr.bf16.mxu0 %v11207_v57  ;;  %v11286_v6 = vld [vmem:[%s14814_s1 + $0x1ea8] ss:$16 sps:$4 sm:$0xff]   ;;  %v11291_v57 = vld [vmem:[%s14814_s1 + $0x1ccc] ss:$16 sps:$4 sm:$0xff]  }
 0x3a5   : > { %7735 = vmatprep.subr.bf16.mxu1 %v11210_v40  ;;  %v11294_v40 = vld [vmem:[%s14814_s1 + $0x1ecc] ss:$16 sps:$4 sm:$0xff]  }
 0x3a7   : > { %7695 = vmatpush1.bf16.msra.mxu0 %v11205_v41 }
 0x3a8   : > { %7736 = vmatpush1.bf16.msra.mxu1 %v11208_v27  ;;  %7696 = vmatprep.subr.bf16.mxu0 %v11213_v32 }
 0x3a9   : > { %7737 = vmatprep.subr.bf16.mxu1 %v11216_v33 }
 0x3ab   : > { %7697 = vmatpush1.bf16.msra.mxu0 %v11211_v9 }
 0x3ac   : > { %7738 = vmatpush1.bf16.msra.mxu1 %v11214_v0  ;;  %7698 = vmatprep.subr.bf16.mxu0 %v11219_v14 }
 0x3ad   : > { %7739 = vmatprep.subr.bf16.mxu1 %v11222_v15 }
 0x3af   : > { %7699 = vmatpush1.bf16.msra.mxu0 %v11217_v52  ;;  %v11289_v52 = vld [vmem:[%s14814_s1 + $0x1cc8] ss:$16 sps:$4 sm:$0xff]  }
 0x3b0   : > { %7740 = vmatpush1.bf16.msra.mxu1 %v11220_v17  ;;  %7700 = vmatprep.subr.bf16.mxu0 %v11225_v22  ;;  %v11292_v17 = vld [vmem:[%s14814_s1 + $0x1ec8] ss:$16 sps:$4 sm:$0xff]  }
 0x3b1   : > { %7741 = vmatprep.subr.bf16.mxu1 %v11228_v19 }
 0x3b3   : > { %7701 = vmatpush1.bf16.msra.mxu0 %v11223_v31 }
 0x3b4   : > { %7742 = vmatpush1.bf16.msra.mxu1 %v11226_v5  ;;  %7702 = vmatprep.subr.bf16.mxu0 %v11231_v11 }
 0x3b5   : > { %7743 = vmatprep.subr.bf16.mxu1 %v11234_v49 }
 0x3b7   : > { %7703 = vmatpush1.bf16.msra.mxu0 %v11229_v53  ;;  %v11295_v53 = vld [vmem:[%s14814_s1 + $0x1ce8] ss:$16 sps:$4 sm:$0xff]  }
 0x3b8   : > { %7744 = vmatpush1.bf16.msra.mxu1 %v11232_v2  ;;  %7704 = vmatprep.subr.bf16.mxu0 %v11237_v60  ;;  %v11298_v2 = vld [vmem:[%s14814_s1 + $0x1ee8] ss:$16 sps:$4 sm:$0xff]  }
 0x3b9   : > { %7745 = vmatprep.subr.bf16.mxu1 %v11240_v21  ;;  %v11301_v60 = vld [vmem:[%s14814_s1 + $0x1d08] ss:$16 sps:$4 sm:$0xff]  }
 0x3ba   : > { %v11304_v21 = vld [vmem:[%s14814_s1 + $0x1f08] ss:$16 sps:$4 sm:$0xff]  }
 0x3bb   : > { %7705 = vmatpush1.bf16.msra.mxu0 %v11235_v12  ;;  %v11309_v12 = vld [vmem:[%s14814_s1 + $0x1d2c] ss:$16 sps:$4 sm:$0xff]  }
 0x3bc   : > { %7746 = vmatpush1.bf16.msra.mxu1 %v11238_v13  ;;  %7706 = vmatprep.subr.bf16.mxu0 %v11243_v35  ;;  %v11312_v13 = vld [vmem:[%s14814_s1 + $0x1f2c] ss:$16 sps:$4 sm:$0xff]   ;;  %v11307_v35 = vld [vmem:[%s14814_s1 + $0x1d28] ss:$16 sps:$4 sm:$0xff]  }
 0x3bd   : > { %7747 = vmatprep.subr.bf16.mxu1 %v11246_v62  ;;  %v11310_v62 = vld [vmem:[%s14814_s1 + $0x1f28] ss:$16 sps:$4 sm:$0xff]  }
 0x3bf   : > { %7707 = vmatpush1.bf16.msra.mxu0 %v11241_v26  ;;  %v11315_v26 = vld [vmem:[%s14814_s1 + $0x1d4c] ss:$16 sps:$4 sm:$0xff]  }
 0x3c0   : > { %7748 = vmatpush1.bf16.msra.mxu1 %v11244_v51  ;;  %7708 = vmatprep.subr.bf16.mxu0 %v11249_v4  ;;  %v11318_v51 = vld [vmem:[%s14814_s1 + $0x1f4c] ss:$16 sps:$4 sm:$0xff]   ;;  %v11313_v4 = vld [vmem:[%s14814_s1 + $0x1d48] ss:$16 sps:$4 sm:$0xff]  }
 0x3c1   : > { %7749 = vmatprep.subr.bf16.mxu1 %v11252_v16  ;;  %v11316_v16 = vld [vmem:[%s14814_s1 + $0x1f48] ss:$16 sps:$4 sm:$0xff]  }
 0x3c3   : > { %7709 = vmatpush1.bf16.msra.mxu0 %v11247_v1  ;;  %v11321_v1 = vld [vmem:[%s14814_s1 + $0x1d6c] ss:$16 sps:$4 sm:$0xff]  }
 0x3c4   : > { %7750 = vmatpush1.bf16.msra.mxu1 %v11250_v10  ;;  %7760 = vmatprep.subr.bf16.mxu0 %v11255_v48  ;;  %v11324_v10 = vld [vmem:[%s14814_s1 + $0x1f6c] ss:$16 sps:$4 sm:$0xff]   ;;  %v11319_v48 = vld [vmem:[%s14814_s1 + $0x1d68] ss:$16 sps:$4 sm:$0xff]  }
 0x3c5   : > { %7801 = vmatprep.subr.bf16.mxu1 %v11258_v3  ;;  %v11322_v3 = vld [vmem:[%s14814_s1 + $0x1f68] ss:$16 sps:$4 sm:$0xff]  }
 0x3c6   : > { %7711 = vmatmul.mubr.bf16.vlgmr.msra.gmra.mrb[56].mxu0 %v14145_v29  ;;  %v11270_v29 = vld [vmem:[%s14814_s1 + $0x1e4c] ss:$16 sps:$4 sm:$0xff]  }
 0x3c7   : > { %7752 = vmatmul.mubr.bf16.vlgmr.msra.gmra.mrb[56].mxu1 %v14147_v30  ;;  %7761 = vmatpush1.bf16.msra.mxu0 %v11253_v56  ;;  %v11265_v30 = vld [vmem:[%s14814_s1 + $0x1c48] ss:$16 sps:$4 sm:$0xff]   ;;  %v11327_v56 = vld [vmem:[%s14814_s1 + $0x1d8c] ss:$16 sps:$4 sm:$0xff]  }
 0x3c8   : > { %7802 = vmatpush1.bf16.msra.mxu1 %v11256_v55  ;;  %7762 = vmatprep.subr.bf16.mxu0 %v11261_v36  ;;  %v11330_v55 = vld [vmem:[%s14814_s1 + $0x1f8c] ss:$16 sps:$4 sm:$0xff]   ;;  %v11325_v36 = vld [vmem:[%s14814_s1 + $0x1d88] ss:$16 sps:$4 sm:$0xff]  }
 0x3c9   : > { %7803 = vmatprep.subr.bf16.mxu1 %v11264_v37  ;;  %7792 = vmatprep.mubr.bf16.mxu0 %v14161_v44  ;;  %v11276_v44 = vld [vmem:[%s14814_s1 + $0x1e6c] ss:$16 sps:$4 sm:$0xff]   ;;  %v11328_v37 = vld [vmem:[%s14814_s1 + $0x1f88] ss:$16 sps:$4 sm:$0xff]  }
 0x3ca   : > { %7833 = vmatprep.mubr.bf16.mxu1 %v14163_v45  ;;  %v11271_v45 = vld [vmem:[%s14814_s1 + $0x1c68] ss:$16 sps:$4 sm:$0xff]  }
 0x3cb   : > { %7763 = vmatpush1.bf16.msra.mxu0 %v11259_v63  ;;  %v11333_v63 = vld [vmem:[%s14814_s1 + $0x1dac] ss:$16 sps:$4 sm:$0xff]  }
 0x3cc   : > { %7804 = vmatpush1.bf16.msra.mxu1 %v11262_v28  ;;  %7764 = vmatprep.subr.bf16.mxu0 %v11267_v34  ;;  %v11336_v28 = vld [vmem:[%s14814_s1 + $0x1fac] ss:$16 sps:$4 sm:$0xff]   ;;  %v11331_v34 = vld [vmem:[%s14814_s1 + $0x1da8] ss:$16 sps:$4 sm:$0xff]  }
 0x3cd   : > { %7805 = vmatprep.subr.bf16.mxu1 %v11270_v29  ;;  %v11334_v29 = vld [vmem:[%s14814_s1 + $0x1fa8] ss:$16 sps:$4 sm:$0xff]  }
 0x3cf   : > { %7765 = vmatpush1.bf16.msra.mxu0 %v11265_v30  ;;  %v11339_v30 = vld [vmem:[%s14814_s1 + $0x1dcc] ss:$16 sps:$4 sm:$0xff]  }
 0x3d0   : > { %7806 = vmatpush1.bf16.msra.mxu1 %v11268_v38  ;;  %7766 = vmatprep.subr.bf16.mxu0 %v11273_v47  ;;  %v11342_v38 = vld [vmem:[%s14814_s1 + $0x1fcc] ss:$16 sps:$4 sm:$0xff]   ;;  %v11337_v47 = vld [vmem:[%s14814_s1 + $0x1dc8] ss:$16 sps:$4 sm:$0xff]  }
 0x3d1   : > { %7807 = vmatprep.subr.bf16.mxu1 %v11276_v44  ;;  %v11340_v44 = vld [vmem:[%s14814_s1 + $0x1fc8] ss:$16 sps:$4 sm:$0xff]  }
 0x3d3   : > { %7767 = vmatpush1.bf16.msra.mxu0 %v11271_v45  ;;  %v11345_v45 = vld [vmem:[%s14814_s1 + $0x1dec] ss:$16 sps:$4 sm:$0xff]  }
 0x3d4   : > { %7808 = vmatpush1.bf16.msra.mxu1 %v11274_v18  ;;  %7768 = vmatprep.subr.bf16.mxu0 %v11279_v8  ;;  %v11348_v18 = vld [vmem:[%s14814_s1 + $0x1fec] ss:$16 sps:$4 sm:$0xff]   ;;  %v11343_v8 = vld [vmem:[%s14814_s1 + $0x1de8] ss:$16 sps:$4 sm:$0xff]  }
 0x3d5   : > { %7809 = vmatprep.subr.bf16.mxu1 %v11282_v50  ;;  %v11346_v50 = vld [vmem:[%s14814_s1 + $0x1fe8] ss:$16 sps:$4 sm:$0xff]  }
 0x3d7   : > { %7769 = vmatpush1.bf16.msra.mxu0 %v11277_v58 }
 0x3d8   : > { %7810 = vmatpush1.bf16.msra.mxu1 %v11280_v59  ;;  %7770 = vmatprep.subr.bf16.mxu0 %v11285_v61 }
 0x3d9   : > { %7811 = vmatprep.subr.bf16.mxu1 %v11288_v42  ;;  %v5853_v41 = vpop.f32.mrb[44].mxu0 }
 0x3da   : > { %v5894_v27 = vpop.f32.mrb[44].mxu1  ;;  %v5854_v32 = vadd.f32 %v5853_v41, %v14441_v46  ;;  %v5855_v33 = vpop.f32.mrb[45].mxu0  ;;  %v11297_v46 = vld [vmem:[%s14814_s1 + $0x1cec] ss:$16 sps:$4 sm:$0xff]  }
 0x3db   : > { %v5896_v9 = vpop.f32.mrb[45].mxu1  ;;  %v5856_v0 = vadd.f32 %v5855_v33, %v14443_v39  ;;  %v5857_v14 = vpop.f32.mrb[46].mxu0  ;;  %7771 = vmatpush1.bf16.msra.mxu0 %v11283_v54  ;;  %v11300_v39 = vld [vmem:[%s14814_s1 + $0x1eec] ss:$16 sps:$4 sm:$0xff]  }
 0x3dc   : > { %v5898_v15 = vpop.f32.mrb[46].mxu1  ;;  %7812 = vmatpush1.bf16.msra.mxu1 %v11286_v6  ;;  %v5895_v22 = vadd.f32 %v5894_v27, %v5854_v32  ;;  %v5858_v19 = vpop.f32.mrb[47].mxu0  ;;  %7772 = vmatprep.subr.bf16.mxu0 %v11291_v57  ;;  %v7848_v32 = vlaneseq }
 0x3dd   : > { %v5899_v31 = vpop.f32.mrb[47].mxu1  ;;  %7813 = vmatprep.subr.bf16.mxu1 %v11294_v40  ;;  %v5897_v5 = vadd.f32 %v5896_v9, %v5856_v0 }
 0x3de   : > { %v14656_v11 = vadd.f32 %v5895_v22, %v13809_v43  ;;  %v11303_v43 = vld [vmem:[%s14814_s1 + $0x1d0c] ss:$16 sps:$4 sm:$0xff]   ;;  %v14765_v33 = vshrl.u32 %v7848_v32, 7 }
 0x3df   : > { %v14659_v49 = vadd.f32 %v5897_v5, %v13817_v7  ;;  %7773 = vmatpush1.bf16.msra.mxu0 %v11289_v52  ;;  %v11306_v7 = vld [vmem:[%s14814_s1 + $0x1f0c] ss:$16 sps:$4 sm:$0xff]  }
 0x3e0   : > { %7814 = vmatpush1.bf16.msra.mxu1 %v11292_v17  ;;  %7774 = vmatprep.subr.bf16.mxu0 %v11297_v46  ;;  %v7850_v9 = vsub.s32 0, %v14765_v33 }
 0x3e1   : > { %7815 = vmatprep.subr.bf16.mxu1 %v11300_v39 }
 0x3e3   : > { %7775 = vmatpush1.bf16.msra.mxu0 %v11295_v53 }
 0x3e4   : > { %7816 = vmatpush1.bf16.msra.mxu1 %v11298_v2  ;;  %7776 = vmatprep.subr.bf16.mxu0 %v11303_v43 }
 0x3e5   : > { %7817 = vmatprep.subr.bf16.mxu1 %v11306_v7 }
 0x3e7   : > { %7777 = vmatpush1.bf16.msra.mxu0 %v11301_v60 }
 0x3e8   : > { %7818 = vmatpush1.bf16.msra.mxu1 %v11304_v21  ;;  %7778 = vmatprep.subr.bf16.mxu0 %v11309_v12 }
 0x3e9   : > { %7819 = vmatprep.subr.bf16.mxu1 %v11312_v13 }
 0x3eb   : > { %7779 = vmatpush1.bf16.msra.mxu0 %v11307_v35 }
 0x3ec   : > { %7820 = vmatpush1.bf16.msra.mxu1 %v11310_v62  ;;  %7780 = vmatprep.subr.bf16.mxu0 %v11315_v26 }
 0x3ed   : > { %7821 = vmatprep.subr.bf16.mxu1 %v11318_v51  ;;  %v7903_v51 = vld [vmem:[%s14782_s14] sm:$0x77] }
 0x3ef   : > { %7781 = vmatpush1.bf16.msra.mxu0 %v11313_v4 }
 0x3f0   : > { %7822 = vmatpush1.bf16.msra.mxu1 %v11316_v16  ;;  %7782 = vmatprep.subr.bf16.mxu0 %v11321_v1 }
 0x3f1   : > { %7823 = vmatprep.subr.bf16.mxu1 %v11324_v10 }
 0x3f3   : > { %7783 = vmatpush1.bf16.msra.mxu0 %v11319_v48 }
 0x3f4   : > { %7824 = vmatpush1.bf16.msra.mxu1 %v11322_v3  ;;  %7784 = vmatprep.subr.bf16.mxu0 %v11327_v56 }
 0x3f5   : > { %7825 = vmatprep.subr.bf16.mxu1 %v11330_v55 }
 0x3f7   : > { %7785 = vmatpush1.bf16.msra.mxu0 %v11325_v36 }
 0x3f8   : > { %7826 = vmatpush1.bf16.msra.mxu1 %v11328_v37  ;;  %7786 = vmatprep.subr.bf16.mxu0 %v11333_v63 }
 0x3f9   : > { %7827 = vmatprep.subr.bf16.mxu1 %v11336_v28 }
 0x3fb   : > { %7787 = vmatpush1.bf16.msra.mxu0 %v11331_v34  ;;  %v7858_v34 = vsub.s32 2, %v14765_v33 }
 0x3fc   : > { %7828 = vmatpush1.bf16.msra.mxu1 %v11334_v29  ;;  %7788 = vmatprep.subr.bf16.mxu0 %v11339_v30 }
 0x3fd   : > { %7829 = vmatprep.subr.bf16.mxu1 %v11342_v38  ;;  %v7862_v38 = vsub.s32 3, %v14765_v33 }
 0x3ff   : > { %7789 = vmatpush1.bf16.msra.mxu0 %v11337_v47 }
 0x400   : > { %7830 = vmatpush1.bf16.msra.mxu1 %v11340_v44  ;;  %7790 = vmatprep.subr.bf16.mxu0 %v11345_v45 }
 0x401   : > { %7831 = vmatprep.subr.bf16.mxu1 %v11348_v18 }
 0x403   : > { %7791 = vmatpush1.bf16.msra.mxu0 %v11343_v8 }
 0x404   : > { %7832 = vmatpush1.bf16.msra.mxu1 %v11346_v50 }
 0x406   : > { %7793 = vmatmul.mubr.bf16.vlgmr.msra.gmra.mrb[60].mxu0 %v14361_v20  ;;  %v7846_v20 = vld [vmem:[%s14815_s2] sm:$0xf] }
 0x407   : > { %7834 = vmatmul.mubr.bf16.vlgmr.msra.gmra.mrb[60].mxu1 %v14363_v23  ;;  %v7854_v23 = vsub.s32 1, %v14765_v33  ;;  %v7851_v39 = vrot.slane %v7846_v20, %v7850_v9 }
 0x409   : > { %v7855_v43 = vrot.slane %v7846_v20, %v7854_v23 }
 0x419   : > { %v7548_v58 = vpop.f32.mrb[48].mxu0 }
 0x41a   : > { %v7589_v59 = vpop.f32.mrb[48].mxu1  ;;  %v7550_v42 = vpop.f32.mrb[49].mxu0 }
 0x41b   : > { %v7590_v61 = vadd.f32 %v7589_v59, %v7548_v58  ;;  %v7591_v54 = vpop.f32.mrb[49].mxu1  ;;  %v7552_v57 = vpop.f32.mrb[50].mxu0  ;;  %v7859_v59 = vrot.slane %v7846_v20, %v7858_v34 }
 0x41c   : > { %v7592_v6 = vadd.f32 %v7591_v54, %v7550_v42  ;;  %v7593_v40 = vpop.f32.mrb[50].mxu1  ;;  %v7553_v41 = vpop.f32.mrb[51].mxu0 }
 0x41d   : > { %v7594_v27 = vpop.f32.mrb[51].mxu1 }
 0x459   : > { %v7630_v0 = vpop.f32.mrb[52].mxu0 }
 0x45a   : > { %v7671_v14 = vpop.f32.mrb[52].mxu1  ;;  %v7631_v15 = vadd.f32 %v7630_v0, %v7590_v61  ;;  %v7632_v52 = vpop.f32.mrb[53].mxu0 }
 0x45b   : > { %v7673_v17 = vpop.f32.mrb[53].mxu1  ;;  %v7633_v22 = vadd.f32 %v7632_v52, %v7592_v6  ;;  %v7634_v19 = vpop.f32.mrb[54].mxu0  ;;  %v7863_v6 = vrot.slane %v7846_v20, %v7862_v38 }
 0x45c   : > { %v7675_v31 = vpop.f32.mrb[54].mxu1  ;;  %v7672_v46 = vadd.f32 %v7671_v14, %v7631_v15  ;;  %v7635_v5 = vpop.f32.mrb[55].mxu0  ;;  %v7906_v14 = vld [vmem:[%s14782_s14 + $0x8] sm:$0x77] }
 0x45d   : > { %v7676_v53 = vpop.f32.mrb[55].mxu1  ;;  %v7674_v2 = vadd.f32 %v7673_v17, %v7633_v22 }
 0x45e   : > { %v7842_v7 = vadd.f32 %v7672_v46, %v14244_v24 }
 0x45f   : > { %v7843_v60 = vadd.f32 %v7674_v2, %v14247_v25 }
 0x460   : > { %v7868_v21 = vadd.f32 %v7851_v39, %v7842_v7 }
 0x461   : > { %v7869_v12 = vadd.f32 %v7855_v43, %v7843_v60 }
 0x462   : > { %v7872_v13 = vmul.f32 0.2, %v7868_v21 }
 0x463   : > { %v7873_v24 = vmul.f32 0.2, %v7869_v12 }
 0x464   : > { %v7876_v62 = vmax.f32 %v7868_v21, %v7872_v13 }
 0x465   : > { %v7877_v26 = vmax.f32 %v7869_v12, %v7873_v24 }
 0x467   : > { %v9787_v4 = vpack.c.bf16 %v7877_v26, %v7876_v62 }
 0x469   : > { %v7904_v16 = vsel %vm7902_vm6, %v9787_v4, %v7903_v51 }
 0x46a   : > { %7905 = vst [vmem:[%s14782_s14] sm:$0x77] %v7904_v16 }
 0x499   : > { %v7712_v1 = vpop.f32.mrb[56].mxu0 }
 0x49a   : > { %v7753_v10 = vpop.f32.mrb[56].mxu1  ;;  %v7714_v3 = vpop.f32.mrb[57].mxu0 }
 0x49b   : > { %v7754_v48 = vadd.f32 %v7753_v10, %v7712_v1  ;;  %v7755_v56 = vpop.f32.mrb[57].mxu1  ;;  %v7716_v36 = vpop.f32.mrb[58].mxu0 }
 0x49c   : > { %v7756_v55 = vadd.f32 %v7755_v56, %v7714_v3  ;;  %v7757_v37 = vpop.f32.mrb[58].mxu1  ;;  %v7717_v63 = vpop.f32.mrb[59].mxu0 }
 0x49d   : > { %v7758_v28 = vpop.f32.mrb[59].mxu1 }
 0x4d9   : > { %v7794_v29 = vpop.f32.mrb[60].mxu0 }
 0x4da   : > { %v7835_v30 = vpop.f32.mrb[60].mxu1  ;;  %v7795_v47 = vadd.f32 %v7794_v29, %v7754_v48  ;;  %v7796_v44 = vpop.f32.mrb[61].mxu0 }
 0x4db   : > { %v7837_v45 = vpop.f32.mrb[61].mxu1  ;;  %v7797_v18 = vadd.f32 %v7796_v44, %v7756_v55  ;;  %v7798_v8 = vpop.f32.mrb[62].mxu0 }
 0x4dc   : > { %v7839_v50 = vpop.f32.mrb[62].mxu1  ;;  %v7836_v58 = vadd.f32 %v7835_v30, %v7795_v47  ;;  %v7799_v61 = vpop.f32.mrb[63].mxu0 }
 0x4dd   : > { %v7840_v42 = vpop.f32.mrb[63].mxu1  ;;  %v7838_v54 = vadd.f32 %v7837_v45, %v7797_v18 }
 0x4de   : > { %v7844_v57 = vadd.f32 %v7836_v58, %v14656_v11 }
 0x4df   : > { %v7845_v40 = vadd.f32 %v7838_v54, %v14659_v49 }
 0x4e0   : > { %v7870_v41 = vadd.f32 %v7859_v59, %v7844_v57 }
 0x4e1   : > { %v7871_v27 = vadd.f32 %v7863_v6, %v7845_v40 }
 0x4e2   : > { %v7874_v32 = vmul.f32 0.2, %v7870_v41 }
 0x4e3   : > { %v7875_v33 = vmul.f32 0.2, %v7871_v27 }
 0x4e4   : > { %v7878_v9 = vmax.f32 %v7870_v41, %v7874_v32 }
 0x4e5   : > { %v7879_v0 = vmax.f32 %v7871_v27, %v7875_v33 }
 0x4e7   : > { %v9788_v23 = vpack.c.bf16 %v7879_v0, %v7878_v9 }
 0x4e9   : > { %v7907_v15 = vsel %vm7902_vm6, %v9788_v23, %v7906_v14 }
 0x4ea   : > { %7908 = vst [vmem:[%s14782_s14 + $0x8] sm:$0x77] %v7907_v15 }
 0x4eb PF: > { %s13_s12 = sadd.s32 1, %s11355_s12  }
 0x4ec   : > { %p10_p4 = scmp.ge.s32.totalorder %s13_s12, 4  }
 0x4ee   :  { %12 = sbr.rel (!%p10_p4) target bundleno = 1 (0x1), region = 65 }

</bundles_post_ra>
